<compile_context>
chip_gen: v6e
topology: v6e:2x2x1
jax: 0.10.0
libtpu: 0.0.40
codegen_flags: <defaults>
</compile_context>

<pallas_src>
import jax
import jax.numpy as jnp
from jax.experimental import pallas as pl
from jax.experimental.pallas import tpu as pltpu

# ----- model config (mirrors the PyTorch module) -----
N_EMBD = 32 * 6               # 192
CONTEXT = 64                  # context_size
NHEAD = 6
HEAD_SIZE = N_EMBD // NHEAD   # 32
NDEC = 6
HIDDEN = 4 * N_EMBD           # 768
VOCAB = 128                   # vocab_size (not defined in the snippet)
EPS = 1e-5                    # nn.LayerNorm default eps

KBLK = 3072                   # LM-head contraction tile (12288 / 3072 = 4 steps)


def _layernorm(x, g, b):
    mu = jnp.mean(x, axis=-1, keepdims=True)
    var = jnp.mean((x - mu) ** 2, axis=-1, keepdims=True)
    return (x - mu) * jax.lax.rsqrt(var + EPS) * g + b


# --------------------------------------------------------------------------
# Kernel 1: fused decoder stack + final LayerNorm.
# grid=(NDEC,) ("arbitrary"); one grid step = one DecoderLayer over the whole
# (B*T, C) activation, which stays resident in a VMEM scratch across layers.
# Per-layer weights are stacked on a leading NDEC axis and auto-pipelined.
# --------------------------------------------------------------------------
def decoder_stack_kernel(x_ref, mask_ref, ln1g_ref, ln1b_ref, wqkv_ref,
                         ln2g_ref, ln2b_ref, w1_ref, b1_ref, w2_ref, b2_ref,
                         lnfg_ref, lnfb_ref, o_ref, x_sc):
    layer = pl.program_id(0)

    @pl.when(layer == 0)
    def _():
        x_sc[...] = x_ref[...]

    x = x_sc[...]                                      # (N, C) f32, N = B*T

    # ---------------- self-attention branch ----------------
    xn = _layernorm(x, ln1g_ref[0], ln1b_ref[0])       # (N, C) f32

    # Single lane-dense fused QKV projection: (N,192) @ (192,576) -> (N,576).
    # Columns [0:192) = K, [192:384) = Q, [384:576) = V; head h occupies the
    # 32-lane block [h*32:(h+1)*32) inside each 192-wide group.
    qkv = jnp.dot(xn.astype(jnp.bfloat16), wqkv_ref[0],
                  preferred_element_type=jnp.float32)  # (N, 3C) f32
    qkv = qkv.astype(jnp.bfloat16)

    bias = mask_ref[...]                               # (N, N) f32: 0 / -1e30
    scale = float(N_EMBD) ** -0.5                      # reference scales by n_embd

    outs = []
    for h in range(NHEAD):                             # unrolled; 6 heads
        k_h = qkv[:, h * HEAD_SIZE:(h + 1) * HEAD_SIZE]                       # (N, 32)
        q_h = qkv[:, N_EMBD + h * HEAD_SIZE:N_EMBD + (h + 1) * HEAD_SIZE]     # (N, 32)
        v_h = qkv[:, 2 * N_EMBD + h * HEAD_SIZE:2 * N_EMBD + (h + 1) * HEAD_SIZE]

        # wei[i, j] = k_i . q_j  (PyTorch does kw @ qw^T); lane-dense 128-wide output.
        wei = jnp.einsum('nd,md->nm', k_h, q_h,
                         preferred_element_type=jnp.float32) * scale
        wei = wei + bias
        wei = wei - jnp.max(wei, axis=-1, keepdims=True)
        p = jnp.exp(wei)
        p = p * pl.reciprocal(jnp.sum(p, axis=-1, keepdims=True), approx=True)
        outs.append(jnp.dot(p.astype(jnp.bfloat16), v_h,
                            preferred_element_type=jnp.float32))             # (N, 32)

    # concat heads along channels (no output projection in the reference)
    attn = jnp.concatenate(outs, axis=-1)              # (N, C)
    x = x + attn

    # ---------------- feed-forward branch ----------------
    xn2 = _layernorm(x, ln2g_ref[0], ln2b_ref[0])
    h1 = jnp.dot(xn2.astype(jnp.bfloat16), w1_ref[0],
                 preferred_element_type=jnp.float32) + b1_ref[0]
    h1 = jnp.maximum(h1, 0.0)
    h2 = jnp.dot(h1.astype(jnp.bfloat16), w2_ref[0],
                 preferred_element_type=jnp.float32) + b2_ref[0]
    # TODO(synk): nn.Dropout(0.1) omitted (identity in eval mode).
    x = x + h2
    x_sc[...] = x

    @pl.when(layer == NDEC - 1)
    def _():
        o_ref[...] = _layernorm(x, lnfg_ref[...], lnfb_ref[...])


def decoder_stack(x, mask_bias, p):
    N, C = x.shape
    layer_names = ("ln1_g", "ln1_b", "wqkv", "ln2_g", "ln2_b",
                   "w1", "b1", "w2", "b2")
    stacked = [p[n] for n in layer_names]               # all 3-D, leading NDEC axis

    in_specs = [pl.BlockSpec((N, C), lambda l: (0, 0)),          # activation (resident)
                pl.BlockSpec((N, N), lambda l: (0, 0))]          # mask bias (resident)
    in_specs += [pl.BlockSpec((1,) + a.shape[1:], lambda l: (l, 0, 0))
                 for a in stacked]                               # per-layer weights
    in_specs += [pl.BlockSpec(p["ln_f_g"].shape, lambda l: (0, 0)),
                 pl.BlockSpec(p["ln_f_b"].shape, lambda l: (0, 0))]

    return pl.pallas_call(
        decoder_stack_kernel,
        out_shape=jax.ShapeDtypeStruct((N, C), jnp.float32),
        grid=(NDEC,),
        in_specs=in_specs,
        out_specs=pl.BlockSpec((N, C), lambda l: (0, 0)),
        scratch_shapes=[pltpu.VMEM((N, C), jnp.float32)],
        compiler_params=pltpu.CompilerParams(dimension_semantics=("arbitrary",)),
    )(x, mask_bias, *stacked, p["ln_f_g"], p["ln_f_b"])


# --------------------------------------------------------------------------
# Kernel 2: LM head — (B, T*C) @ (T*C, V) + bias, then log_softmax.
# Gridded over the K = T*C contraction so the ~3 MB bf16 weight is streamed /
# double-buffered instead of fetched in one un-overlapped prologue DMA.
# --------------------------------------------------------------------------
def lm_head_kernel(x_ref, wf_ref, bf_ref, o_ref, acc_sc):
    k = pl.program_id(0)

    @pl.when(k == 0)
    def _():
        acc_sc[...] = jnp.zeros_like(acc_sc)

    acc_sc[...] += jnp.dot(x_ref[...].astype(jnp.bfloat16), wf_ref[...],
                           preferred_element_type=jnp.float32)

    @pl.when(k == pl.num_programs(0) - 1)
    def _():
        logits = acc_sc[...] + bf_ref[...]                       # (B, V)
        z = logits - jnp.max(logits, axis=-1, keepdims=True)
        lse = jnp.log(jnp.sum(jnp.exp(z), axis=-1, keepdims=True))
        o_ref[...] = z - lse


def lm_head(x_flat, wf, bf):
    B, K = x_flat.shape
    nsteps = K // KBLK
    return pl.pallas_call(
        lm_head_kernel,
        out_shape=jax.ShapeDtypeStruct((B, VOCAB), jnp.float32),
        grid=(nsteps,),
        in_specs=[pl.BlockSpec((B, KBLK), lambda k: (0, k)),
                  pl.BlockSpec((KBLK, VOCAB), lambda k: (k, 0)),
                  pl.BlockSpec((1, VOCAB), lambda k: (0, 0))],
        out_specs=pl.BlockSpec((B, VOCAB), lambda k: (0, 0)),
        scratch_shapes=[pltpu.VMEM((B, VOCAB), jnp.float32)],
        compiler_params=pltpu.CompilerParams(dimension_semantics=("arbitrary",)),
    )(x_flat, wf, bf)


# --------------------------------------------------------------------------
# Parameter init (deterministic, synthetic) and full forward pass.
# Per-layer weights are stacked on a leading NDEC axis; matmul weights are bf16.
# --------------------------------------------------------------------------
def init_params(key):
    scale = 0.02
    keys = iter(jax.random.split(key, 8))

    def rnd(shape, dtype=jnp.float32):
        return (scale * jax.random.normal(next(keys), shape)).astype(dtype)

    return {
        "tok_emb": rnd((VOCAB, N_EMBD)),
        "pos_emb": rnd((CONTEXT, N_EMBD)),
        "ln1_g": jnp.ones((NDEC, 1, N_EMBD), jnp.float32),
        "ln1_b": jnp.zeros((NDEC, 1, N_EMBD), jnp.float32),
        # Fused, lane-dense QKV: [K | Q | V] along the 576 output lanes.
        "wqkv": rnd((NDEC, N_EMBD, 3 * N_EMBD), jnp.bfloat16),
        "ln2_g": jnp.ones((NDEC, 1, N_EMBD), jnp.float32),
        "ln2_b": jnp.zeros((NDEC, 1, N_EMBD), jnp.float32),
        "w1": rnd((NDEC, N_EMBD, HIDDEN), jnp.bfloat16),
        "b1": jnp.zeros((NDEC, 1, HIDDEN), jnp.float32),
        "w2": rnd((NDEC, HIDDEN, N_EMBD), jnp.bfloat16),
        "b2": jnp.zeros((NDEC, 1, N_EMBD), jnp.float32),
        "ln_f_g": jnp.ones((1, N_EMBD), jnp.float32),
        "ln_f_b": jnp.zeros((1, N_EMBD), jnp.float32),
        "wf": rnd((CONTEXT * N_EMBD, VOCAB), jnp.bfloat16),
        "bf": jnp.zeros((1, VOCAB), jnp.float32),
    }


@jax.jit
def language_model_forward(tokens, params):
    B, T = tokens.shape
    # Embedding gather + positional add: plain-JAX glue.
    tok = jnp.take(params["tok_emb"], tokens, axis=0)           # (B, T, C)
    x = tok + params["pos_emb"][None, :, :]                     # (B, T, C)
    x = x.reshape(B * T, N_EMBD)                                # fold batch into sublanes
    N = B * T

    # Block-diagonal causal mask as an additive bias, built ONCE (hoisted out of
    # the layer loop); -1e30 (finite) instead of -inf for NaN safety.
    row = jax.lax.broadcasted_iota(jnp.int32, (N, N), 0)
    col = jax.lax.broadcasted_iota(jnp.int32, (N, N), 1)
    keep = (col <= row) & ((row // T) == (col // T))
    mask_bias = jnp.where(keep, 0.0, -1e30).astype(jnp.float32)  # (N, N)

    x = decoder_stack(x, mask_bias, params)                     # fused Pallas kernel
    x_flat = x.reshape(B, T * N_EMBD)                           # free row-major reshape
    return lm_head(x_flat, params["wf"], params["bf"])          # K-pipelined Pallas kernel


if __name__ == "__main__":
    key = jax.random.PRNGKey(0)
    pkey, tkey = jax.random.split(key)
    params = init_params(pkey)

    B = 2
    tokens = jax.random.randint(tkey, (B, CONTEXT), 0, VOCAB, dtype=jnp.int32)

    logprobs = language_model_forward(tokens, params)
    jax.block_until_ready(logprobs)

    assert logprobs.shape == (B, VOCAB), logprobs.shape
    assert bool(jnp.all(jnp.isfinite(logprobs)))
    # log_softmax rows should sum (in prob space) to ~1
    assert bool(jnp.allclose(jnp.sum(jnp.exp(logprobs), axis=-1), 1.0, atol=1e-3))
    print("KERNEL_OK")
</pallas_src>

<mosaic_0001>
module attributes {stable_mosaic.version = 11 : i64} {
  func.func @lm_head_kernel(%arg0: i32, %arg1: memref<2x3072xf32, #tpu.memory_space<vmem>>, %arg2: memref<3072x128xbf16, #tpu.memory_space<vmem>>, %arg3: memref<1x128xf32, #tpu.memory_space<vmem>>, %arg4: memref<2x128xf32, #tpu.memory_space<vmem>>, %arg5: memref<2x128xf32, #tpu.memory_space<vmem>>) attributes {dimension_semantics = [#tpu.dimension_semantics<arbitrary>], iteration_bounds = array<i64: 4>, scalar_prefetch = 0 : i64, scratch_operands = 1 : i64, tpu.core_type = #tpu.core_type<tc>, window_params = [{transform_indices = @transform_0, window_bounds = array<i64: 2, 3072>}, {transform_indices = @transform_1, window_bounds = array<i64: 3072, 128>}, {pipeline_mode = #tpu.pipeline_mode<synchronous>, transform_indices = @transform_2, window_bounds = array<i64: 1, 128>}, {pipeline_mode = #tpu.pipeline_mode<synchronous>, transform_indices = @transform_3, window_bounds = array<i64: 2, 128>}]} {
    %c0_i32 = arith.constant 0 : i32
    %0 = arith.cmpi eq, %arg0, %c0_i32 : i32
    %1 = arith.extui %0 : i1 to i32
    %c0_i32_0 = arith.constant 0 : i32
    %2 = arith.cmpi ne, %1, %c0_i32_0 : i32
    scf.if %2 {
      %cst_9 = arith.constant 0.000000e+00 : f32
      %13 = vector.broadcast %cst_9 : f32 to vector<2x128xf32>
      %c0_10 = arith.constant 0 : index
      %c0_11 = arith.constant 0 : index
      %14 = vector.load %arg5[%c0_10, %c0_11] : memref<2x128xf32, #tpu.memory_space<vmem>>, vector<2x128xf32>
      tpu.vector_store %arg5[%c0_10, %c0_11], %13 {strides = array<i32>} : memref<2x128xf32, #tpu.memory_space<vmem>>, vector<2x128xf32>,
    } else {
    }
    %c0 = arith.constant 0 : index
    %c0_1 = arith.constant 0 : index
    %3 = vector.load %arg5[%c0, %c0_1] : memref<2x128xf32, #tpu.memory_space<vmem>>, vector<2x128xf32>
    %c0_2 = arith.constant 0 : index
    %c0_3 = arith.constant 0 : index
    %4 = vector.load %arg1[%c0_2, %c0_3] : memref<2x3072xf32, #tpu.memory_space<vmem>>, vector<2x3072xf32>
    %5 = arith.truncf %4 : vector<2x3072xf32> to vector<2x3072xbf16>
    %c0_4 = arith.constant 0 : index
    %c0_5 = arith.constant 0 : index
    %6 = vector.load %arg2[%c0_4, %c0_5] : memref<3072x128xbf16, #tpu.memory_space<vmem>>, vector<3072x128xbf16>
    %cst = arith.constant dense<0.000000e+00> : vector<2x128xf32>
    %7 = tpu.matmul %5, %6, %cst {dimension_numbers = #tpu.dot_dimension_numbers<[1], [0], [0], [1], [0, 0, 1, 1], [], []>} : vector<2x3072xbf16>, vector<3072x128xbf16>, vector<2x128xf32> -> vector<2x128xf32>
    %8 = arith.addf %3, %7 : vector<2x128xf32>
    %c0_6 = arith.constant 0 : index
    %c0_7 = arith.constant 0 : index
    %9 = vector.load %arg5[%c0_6, %c0_7] : memref<2x128xf32, #tpu.memory_space<vmem>>, vector<2x128xf32>
    tpu.vector_store %arg5[%c0_6, %c0_7], %8 {strides = array<i32>} : memref<2x128xf32, #tpu.memory_space<vmem>>, vector<2x128xf32>,
    %c3_i32 = arith.constant 3 : i32
    %10 = arith.cmpi eq, %arg0, %c3_i32 : i32
    %11 = arith.extui %10 : i1 to i32
    %c0_i32_8 = arith.constant 0 : i32
    %12 = arith.cmpi ne, %11, %c0_i32_8 : i32
    scf.if %12 {
      %c0_9 = arith.constant 0 : index
      %c0_10 = arith.constant 0 : index
      %13 = vector.load %arg5[%c0_9, %c0_10] : memref<2x128xf32, #tpu.memory_space<vmem>>, vector<2x128xf32>
      %c0_11 = arith.constant 0 : index
      %c0_12 = arith.constant 0 : index
      %14 = vector.load %arg3[%c0_11, %c0_12] : memref<1x128xf32, #tpu.memory_space<vmem>>, vector<1x128xf32>
      %15 = vector.broadcast %14 : vector<1x128xf32> to vector<2x128xf32>
      %16 = arith.addf %13, %15 : vector<2x128xf32>
      %cst_13 = arith.constant dense<0xFF800000> : vector<2xf32>
      %17 = vector.multi_reduction <maximumf>, %16, %cst_13 [1] : vector<2x128xf32> to vector<2xf32>
      %18 = vector.shape_cast %17 : vector<2xf32> to vector<2x1xf32>
      %19 = vector.broadcast %18 : vector<2x1xf32> to vector<2x128xf32>
      %20 = arith.subf %16, %19 : vector<2x128xf32>
      %21 = math.exp %20 : vector<2x128xf32>
      %cst_14 = arith.constant dense<0.000000e+00> : vector<2xf32>
      %22 = vector.multi_reduction <add>, %21, %cst_14 [1] : vector<2x128xf32> to vector<2xf32>
      %23 = vector.shape_cast %22 : vector<2xf32> to vector<2x1xf32>
      %24 = math.log %23 : vector<2x1xf32>
      %25 = vector.broadcast %24 : vector<2x1xf32> to vector<2x128xf32>
      %26 = arith.subf %20, %25 : vector<2x128xf32>
      %c0_15 = arith.constant 0 : index
      %c0_16 = arith.constant 0 : index
      %27 = vector.load %arg4[%c0_15, %c0_16] : memref<2x128xf32, #tpu.memory_space<vmem>>, vector<2x128xf32>
      tpu.vector_store %arg4[%c0_15, %c0_16], %26 {strides = array<i32>} : memref<2x128xf32, #tpu.memory_space<vmem>>, vector<2x128xf32>,
    } else {
    }
    return
  }
  func.func @transform_0(%arg0: i32) -> (i32, i32) {
    %c0_i32 = arith.constant 0 : i32
    %c0_i32_0 = arith.constant 0 : i32
    return %c0_i32, %arg0 : i32, i32
  }
  func.func @transform_1(%arg0: i32) -> (i32, i32) {
    %c0_i32 = arith.constant 0 : i32
    %c0_i32_0 = arith.constant 0 : i32
    return %arg0, %c0_i32 : i32, i32
  }
  func.func @transform_2(%arg0: i32) -> (i32, i32) {
    %c0_i32 = arith.constant 0 : i32
    %c0_i32_0 = arith.constant 0 : i32
    %c0_i32_1 = arith.constant 0 : i32
    return %c0_i32, %c0_i32_0 : i32, i32
  }
  func.func @transform_3(%arg0: i32) -> (i32, i32) {
    %c0_i32 = arith.constant 0 : i32
    %c0_i32_0 = arith.constant 0 : i32
    %c0_i32_1 = arith.constant 0 : i32
    return %c0_i32, %c0_i32_0 : i32, i32
  }
}

module attributes {stable_mosaic.version = 11 : i64} {
  func.func @decoder_stack_kernel(%arg0: i32, %arg1: memref<128x192xf32, #tpu.memory_space<vmem>>, %arg2: memref<128x128xf32, #tpu.memory_space<vmem>>, %arg3: memref<1x1x192xf32, #tpu.memory_space<vmem>>, %arg4: memref<1x1x192xf32, #tpu.memory_space<vmem>>, %arg5: memref<1x192x576xbf16, #tpu.memory_space<vmem>>, %arg6: memref<1x1x192xf32, #tpu.memory_space<vmem>>, %arg7: memref<1x1x192xf32, #tpu.memory_space<vmem>>, %arg8: memref<1x192x768xbf16, #tpu.memory_space<vmem>>, %arg9: memref<1x1x768xf32, #tpu.memory_space<vmem>>, %arg10: memref<1x768x192xbf16, #tpu.memory_space<vmem>>, %arg11: memref<1x1x192xf32, #tpu.memory_space<vmem>>, %arg12: memref<1x192xf32, #tpu.memory_space<vmem>>, %arg13: memref<1x192xf32, #tpu.memory_space<vmem>>, %arg14: memref<128x192xf32, #tpu.memory_space<vmem>>, %arg15: memref<128x192xf32, #tpu.memory_space<vmem>>) attributes {dimension_semantics = [#tpu.dimension_semantics<arbitrary>], iteration_bounds = array<i64: 6>, scalar_prefetch = 0 : i64, scratch_operands = 1 : i64, tpu.core_type = #tpu.core_type<tc>, window_params = [{pipeline_mode = #tpu.pipeline_mode<synchronous>, transform_indices = @transform_0, window_bounds = array<i64: 128, 192>}, {pipeline_mode = #tpu.pipeline_mode<synchronous>, transform_indices = @transform_1, window_bounds = array<i64: 128, 128>}, {transform_indices = @transform_2, window_bounds = array<i64: 1, 1, 192>}, {transform_indices = @transform_3, window_bounds = array<i64: 1, 1, 192>}, {transform_indices = @transform_4, window_bounds = array<i64: 1, 192, 576>}, {transform_indices = @transform_5, window_bounds = array<i64: 1, 1, 192>}, {transform_indices = @transform_6, window_bounds = array<i64: 1, 1, 192>}, {transform_indices = @transform_7, window_bounds = array<i64: 1, 192, 768>}, {transform_indices = @transform_8, window_bounds = array<i64: 1, 1, 768>}, {transform_indices = @transform_9, window_bounds = array<i64: 1, 768, 192>}, {transform_indices = @transform_10, window_bounds = array<i64: 1, 1, 192>}, {pipeline_mode = #tpu.pipeline_mode<synchronous>, transform_indices = @transform_11, window_bounds = array<i64: 1, 192>}, {pipeline_mode = #tpu.pipeline_mode<synchronous>, transform_indices = @transform_12, window_bounds = array<i64: 1, 192>}, {pipeline_mode = #tpu.pipeline_mode<synchronous>, transform_indices = @transform_13, window_bounds = array<i64: 128, 192>}]} {
    %c0_i32 = arith.constant 0 : i32
    %0 = arith.cmpi eq, %arg0, %c0_i32 : i32
    %1 = arith.extui %0 : i1 to i32
    %c0_i32_0 = arith.constant 0 : i32
    %2 = arith.cmpi ne, %1, %c0_i32_0 : i32
    scf.if %2 {
      %c0_77 = arith.constant 0 : index
      %c0_78 = arith.constant 0 : index
      %201 = vector.load %arg1[%c0_77, %c0_78] : memref<128x192xf32, #tpu.memory_space<vmem>>, vector<128x192xf32>
      %c0_79 = arith.constant 0 : index
      %c0_80 = arith.constant 0 : index
      %202 = vector.load %arg15[%c0_79, %c0_80] : memref<128x192xf32, #tpu.memory_space<vmem>>, vector<128x192xf32>
      tpu.vector_store %arg15[%c0_79, %c0_80], %201 {strides = array<i32>} : memref<128x192xf32, #tpu.memory_space<vmem>>, vector<128x192xf32>,
    } else {
    }
    %c0 = arith.constant 0 : index
    %c0_1 = arith.constant 0 : index
    %3 = vector.load %arg15[%c0, %c0_1] : memref<128x192xf32, #tpu.memory_space<vmem>>, vector<128x192xf32>
    %c0_2 = arith.constant 0 : index
    %c0_3 = arith.constant 0 : index
    %c0_4 = arith.constant 0 : index
    %4 = vector.load %arg3[%c0_2, %c0_3, %c0_4] : memref<1x1x192xf32, #tpu.memory_space<vmem>>, vector<1x1x192xf32>
    %5 = vector.shape_cast %4 : vector<1x1x192xf32> to vector<1x192xf32>
    %c0_5 = arith.constant 0 : index
    %c0_6 = arith.constant 0 : index
    %c0_7 = arith.constant 0 : index
    %6 = vector.load %arg4[%c0_5, %c0_6, %c0_7] : memref<1x1x192xf32, #tpu.memory_space<vmem>>, vector<1x1x192xf32>
    %7 = vector.shape_cast %6 : vector<1x1x192xf32> to vector<1x192xf32>
    %cst = arith.constant dense<0.000000e+00> : vector<128xf32>
    %8 = vector.multi_reduction <add>, %3, %cst [1] : vector<128x192xf32> to vector<128xf32>
    %9 = vector.shape_cast %8 : vector<128xf32> to vector<128x1xf32>
    %cst_8 = arith.constant 1.920000e+02 : f32
    %10 = vector.broadcast %cst_8 : f32 to vector<128x1xf32>
    %11 = arith.divf %9, %10 : vector<128x1xf32>
    %12 = vector.broadcast %11 : vector<128x1xf32> to vector<128x192xf32>
    %13 = arith.subf %3, %12 : vector<128x192xf32>
    %14 = arith.mulf %13, %13 : vector<128x192xf32>
    %cst_9 = arith.constant dense<0.000000e+00> : vector<128xf32>
    %15 = vector.multi_reduction <add>, %14, %cst_9 [1] : vector<128x192xf32> to vector<128xf32>
    %16 = vector.shape_cast %15 : vector<128xf32> to vector<128x1xf32>
    %cst_10 = arith.constant 1.920000e+02 : f32
    %17 = vector.broadcast %cst_10 : f32 to vector<128x1xf32>
    %18 = arith.divf %16, %17 : vector<128x1xf32>
    %19 = vector.broadcast %11 : vector<128x1xf32> to vector<128x192xf32>
    %20 = arith.subf %3, %19 : vector<128x192xf32>
    %cst_11 = arith.constant 9.99999974E-6 : f32
    %21 = vector.broadcast %cst_11 : f32 to vector<128x1xf32>
    %22 = arith.addf %18, %21 : vector<128x1xf32>
    %23 = math.rsqrt %22 : vector<128x1xf32>
    %24 = vector.broadcast %23 : vector<128x1xf32> to vector<128x192xf32>
    %25 = arith.mulf %20, %24 : vector<128x192xf32>
    %26 = vector.broadcast %5 : vector<1x192xf32> to vector<128x192xf32>
    %27 = arith.mulf %25, %26 : vector<128x192xf32>
    %28 = vector.broadcast %7 : vector<1x192xf32> to vector<128x192xf32>
    %29 = arith.addf %27, %28 : vector<128x192xf32>
    %30 = arith.truncf %29 : vector<128x192xf32> to vector<128x192xbf16>
    %c0_12 = arith.constant 0 : index
    %c0_13 = arith.constant 0 : index
    %c0_14 = arith.constant 0 : index
    %31 = vector.load %arg5[%c0_12, %c0_13, %c0_14] : memref<1x192x576xbf16, #tpu.memory_space<vmem>>, vector<1x192x576xbf16>
    %32 = vector.shape_cast %31 : vector<1x192x576xbf16> to vector<192x576xbf16>
    %cst_15 = arith.constant dense<0.000000e+00> : vector<128x576xf32>
    %33 = tpu.matmul %30, %32, %cst_15 {dimension_numbers = #tpu.dot_dimension_numbers<[1], [0], [0], [1], [0, 0, 1, 1], [], []>} : vector<128x192xbf16>, vector<192x576xbf16>, vector<128x576xf32> -> vector<128x576xf32>
    %34 = arith.truncf %33 : vector<128x576xf32> to vector<128x576xbf16>
    %c0_16 = arith.constant 0 : index
    %c0_17 = arith.constant 0 : index
    %35 = vector.load %arg2[%c0_16, %c0_17] : memref<128x128xf32, #tpu.memory_space<vmem>>, vector<128x128xf32>
    %36 = vector.extract_strided_slice %34 {offsets = [0, 0], sizes = [128, 32], strides = [1, 1]} : vector<128x576xbf16> to vector<128x32xbf16>
    %37 = vector.extract_strided_slice %34 {offsets = [0, 192], sizes = [128, 32], strides = [1, 1]} : vector<128x576xbf16> to vector<128x32xbf16>
    %38 = vector.extract_strided_slice %34 {offsets = [0, 384], sizes = [128, 32], strides = [1, 1]} : vector<128x576xbf16> to vector<128x32xbf16>
    "tpu.trace_start"() <{level = 10 : i32, message = "nd,md->nm"}> : () -> ()
    %cst_18 = arith.constant dense<0.000000e+00> : vector<128x128xf32>
    %39 = tpu.matmul %36, %37, %cst_18 {dimension_numbers = #tpu.dot_dimension_numbers<[1], [1], [0], [0], [0, 0, 1, 0], [], []>} : vector<128x32xbf16>, vector<128x32xbf16>, vector<128x128xf32> -> vector<128x128xf32>
    "tpu.trace_stop"() : () -> ()
    %cst_19 = arith.constant 0.0721687824 : f32
    %40 = vector.broadcast %cst_19 : f32 to vector<128x128xf32>
    %41 = arith.mulf %39, %40 : vector<128x128xf32>
    %42 = arith.addf %41, %35 : vector<128x128xf32>
    %cst_20 = arith.constant dense<0xFF800000> : vector<128xf32>
    %43 = vector.multi_reduction <maximumf>, %42, %cst_20 [1] : vector<128x128xf32> to vector<128xf32>
    %44 = vector.shape_cast %43 : vector<128xf32> to vector<128x1xf32>
    %45 = vector.broadcast %44 : vector<128x1xf32> to vector<128x128xf32>
    %46 = arith.subf %42, %45 : vector<128x128xf32>
    %47 = math.exp %46 : vector<128x128xf32>
    %cst_21 = arith.constant dense<0.000000e+00> : vector<128xf32>
    %48 = vector.multi_reduction <add>, %47, %cst_21 [1] : vector<128x128xf32> to vector<128xf32>
    %49 = vector.shape_cast %48 : vector<128xf32> to vector<128x1xf32>
    %50 = tpu.reciprocal %49 {approx = true} : vector<128x1xf32> -> vector<128x1xf32>
    %51 = vector.broadcast %50 : vector<128x1xf32> to vector<128x128xf32>
    %52 = arith.mulf %47, %51 : vector<128x128xf32>
    %53 = arith.truncf %52 : vector<128x128xf32> to vector<128x128xbf16>
    %cst_22 = arith.constant dense<0.000000e+00> : vector<128x32xf32>
    %54 = tpu.matmul %53, %38, %cst_22 {dimension_numbers = #tpu.dot_dimension_numbers<[1], [0], [0], [1], [0, 0, 1, 1], [], []>} : vector<128x128xbf16>, vector<128x32xbf16>, vector<128x32xf32> -> vector<128x32xf32>
    %55 = vector.extract_strided_slice %34 {offsets = [0, 32], sizes = [128, 32], strides = [1, 1]} : vector<128x576xbf16> to vector<128x32xbf16>
    %56 = vector.extract_strided_slice %34 {offsets = [0, 224], sizes = [128, 32], strides = [1, 1]} : vector<128x576xbf16> to vector<128x32xbf16>
    %57 = vector.extract_strided_slice %34 {offsets = [0, 416], sizes = [128, 32], strides = [1, 1]} : vector<128x576xbf16> to vector<128x32xbf16>
    "tpu.trace_start"() <{level = 10 : i32, message = "nd,md->nm"}> : () -> ()
    %cst_23 = arith.constant dense<0.000000e+00> : vector<128x128xf32>
    %58 = tpu.matmul %55, %56, %cst_23 {dimension_numbers = #tpu.dot_dimension_numbers<[1], [1], [0], [0], [0, 0, 1, 0], [], []>} : vector<128x32xbf16>, vector<128x32xbf16>, vector<128x128xf32> -> vector<128x128xf32>
    "tpu.trace_stop"() : () -> ()
    %cst_24 = arith.constant 0.0721687824 : f32
    %59 = vector.broadcast %cst_24 : f32 to vector<128x128xf32>
    %60 = arith.mulf %58, %59 : vector<128x128xf32>
    %61 = arith.addf %60, %35 : vector<128x128xf32>
    %cst_25 = arith.constant dense<0xFF800000> : vector<128xf32>
    %62 = vector.multi_reduction <maximumf>, %61, %cst_25 [1] : vector<128x128xf32> to vector<128xf32>
    %63 = vector.shape_cast %62 : vector<128xf32> to vector<128x1xf32>
    %64 = vector.broadcast %63 : vector<128x1xf32> to vector<128x128xf32>
    %65 = arith.subf %61, %64 : vector<128x128xf32>
    %66 = math.exp %65 : vector<128x128xf32>
    %cst_26 = arith.constant dense<0.000000e+00> : vector<128xf32>
    %67 = vector.multi_reduction <add>, %66, %cst_26 [1] : vector<128x128xf32> to vector<128xf32>
    %68 = vector.shape_cast %67 : vector<128xf32> to vector<128x1xf32>
    %69 = tpu.reciprocal %68 {approx = true} : vector<128x1xf32> -> vector<128x1xf32>
    %70 = vector.broadcast %69 : vector<128x1xf32> to vector<128x128xf32>
    %71 = arith.mulf %66, %70 : vector<128x128xf32>
    %72 = arith.truncf %71 : vector<128x128xf32> to vector<128x128xbf16>
    %cst_27 = arith.constant dense<0.000000e+00> : vector<128x32xf32>
    %73 = tpu.matmul %72, %57, %cst_27 {dimension_numbers = #tpu.dot_dimension_numbers<[1], [0], [0], [1], [0, 0, 1, 1], [], []>} : vector<128x128xbf16>, vector<128x32xbf16>, vector<128x32xf32> -> vector<128x32xf32>
    %74 = vector.extract_strided_slice %34 {offsets = [0, 64], sizes = [128, 32], strides = [1, 1]} : vector<128x576xbf16> to vector<128x32xbf16>
    %75 = vector.extract_strided_slice %34 {offsets = [0, 256], sizes = [128, 32], strides = [1, 1]} : vector<128x576xbf16> to vector<128x32xbf16>
    %76 = vector.extract_strided_slice %34 {offsets = [0, 448], sizes = [128, 32], strides = [1, 1]} : vector<128x576xbf16> to vector<128x32xbf16>
    "tpu.trace_start"() <{level = 10 : i32, message = "nd,md->nm"}> : () -> ()
    %cst_28 = arith.constant dense<0.000000e+00> : vector<128x128xf32>
    %77 = tpu.matmul %74, %75, %cst_28 {dimension_numbers = #tpu.dot_dimension_numbers<[1], [1], [0], [0], [0, 0, 1, 0], [], []>} : vector<128x32xbf16>, vector<128x32xbf16>, vector<128x128xf32> -> vector<128x128xf32>
    "tpu.trace_stop"() : () -> ()
    %cst_29 = arith.constant 0.0721687824 : f32
    %78 = vector.broadcast %cst_29 : f32 to vector<128x128xf32>
    %79 = arith.mulf %77, %78 : vector<128x128xf32>
    %80 = arith.addf %79, %35 : vector<128x128xf32>
    %cst_30 = arith.constant dense<0xFF800000> : vector<128xf32>
    %81 = vector.multi_reduction <maximumf>, %80, %cst_30 [1] : vector<128x128xf32> to vector<128xf32>
    %82 = vector.shape_cast %81 : vector<128xf32> to vector<128x1xf32>
    %83 = vector.broadcast %82 : vector<128x1xf32> to vector<128x128xf32>
    %84 = arith.subf %80, %83 : vector<128x128xf32>
    %85 = math.exp %84 : vector<128x128xf32>
    %cst_31 = arith.constant dense<0.000000e+00> : vector<128xf32>
    %86 = vector.multi_reduction <add>, %85, %cst_31 [1] : vector<128x128xf32> to vector<128xf32>
    %87 = vector.shape_cast %86 : vector<128xf32> to vector<128x1xf32>
    %88 = tpu.reciprocal %87 {approx = true} : vector<128x1xf32> -> vector<128x1xf32>
    %89 = vector.broadcast %88 : vector<128x1xf32> to vector<128x128xf32>
    %90 = arith.mulf %85, %89 : vector<128x128xf32>
    %91 = arith.truncf %90 : vector<128x128xf32> to vector<128x128xbf16>
    %cst_32 = arith.constant dense<0.000000e+00> : vector<128x32xf32>
    %92 = tpu.matmul %91, %76, %cst_32 {dimension_numbers = #tpu.dot_dimension_numbers<[1], [0], [0], [1], [0, 0, 1, 1], [], []>} : vector<128x128xbf16>, vector<128x32xbf16>, vector<128x32xf32> -> vector<128x32xf32>
    %93 = vector.extract_strided_slice %34 {offsets = [0, 96], sizes = [128, 32], strides = [1, 1]} : vector<128x576xbf16> to vector<128x32xbf16>
    %94 = vector.extract_strided_slice %34 {offsets = [0, 288], sizes = [128, 32], strides = [1, 1]} : vector<128x576xbf16> to vector<128x32xbf16>
    %95 = vector.extract_strided_slice %34 {offsets = [0, 480], sizes = [128, 32], strides = [1, 1]} : vector<128x576xbf16> to vector<128x32xbf16>
    "tpu.trace_start"() <{level = 10 : i32, message = "nd,md->nm"}> : () -> ()
    %cst_33 = arith.constant dense<0.000000e+00> : vector<128x128xf32>
    %96 = tpu.matmul %93, %94, %cst_33 {dimension_numbers = #tpu.dot_dimension_numbers<[1], [1], [0], [0], [0, 0, 1, 0], [], []>} : vector<128x32xbf16>, vector<128x32xbf16>, vector<128x128xf32> -> vector<128x128xf32>
    "tpu.trace_stop"() : () -> ()
    %cst_34 = arith.constant 0.0721687824 : f32
    %97 = vector.broadcast %cst_34 : f32 to vector<128x128xf32>
    %98 = arith.mulf %96, %97 : vector<128x128xf32>
    %99 = arith.addf %98, %35 : vector<128x128xf32>
    %cst_35 = arith.constant dense<0xFF800000> : vector<128xf32>
    %100 = vector.multi_reduction <maximumf>, %99, %cst_35 [1] : vector<128x128xf32> to vector<128xf32>
    %101 = vector.shape_cast %100 : vector<128xf32> to vector<128x1xf32>
    %102 = vector.broadcast %101 : vector<128x1xf32> to vector<128x128xf32>
    %103 = arith.subf %99, %102 : vector<128x128xf32>
    %104 = math.exp %103 : vector<128x128xf32>
    %cst_36 = arith.constant dense<0.000000e+00> : vector<128xf32>
    %105 = vector.multi_reduction <add>, %104, %cst_36 [1] : vector<128x128xf32> to vector<128xf32>
    %106 = vector.shape_cast %105 : vector<128xf32> to vector<128x1xf32>
    %107 = tpu.reciprocal %106 {approx = true} : vector<128x1xf32> -> vector<128x1xf32>
    %108 = vector.broadcast %107 : vector<128x1xf32> to vector<128x128xf32>
    %109 = arith.mulf %104, %108 : vector<128x128xf32>
    %110 = arith.truncf %109 : vector<128x128xf32> to vector<128x128xbf16>
    %cst_37 = arith.constant dense<0.000000e+00> : vector<128x32xf32>
    %111 = tpu.matmul %110, %95, %cst_37 {dimension_numbers = #tpu.dot_dimension_numbers<[1], [0], [0], [1], [0, 0, 1, 1], [], []>} : vector<128x128xbf16>, vector<128x32xbf16>, vector<128x32xf32> -> vector<128x32xf32>
    %112 = vector.extract_strided_slice %34 {offsets = [0, 128], sizes = [128, 32], strides = [1, 1]} : vector<128x576xbf16> to vector<128x32xbf16>
    %113 = vector.extract_strided_slice %34 {offsets = [0, 320], sizes = [128, 32], strides = [1, 1]} : vector<128x576xbf16> to vector<128x32xbf16>
    %114 = vector.extract_strided_slice %34 {offsets = [0, 512], sizes = [128, 32], strides = [1, 1]} : vector<128x576xbf16> to vector<128x32xbf16>
    "tpu.trace_start"() <{level = 10 : i32, message = "nd,md->nm"}> : () -> ()
    %cst_38 = arith.constant dense<0.000000e+00> : vector<128x128xf32>
    %115 = tpu.matmul %112, %113, %cst_38 {dimension_numbers = #tpu.dot_dimension_numbers<[1], [1], [0], [0], [0, 0, 1, 0], [], []>} : vector<128x32xbf16>, vector<128x32xbf16>, vector<128x128xf32> -> vector<128x128xf32>
    "tpu.trace_stop"() : () -> ()
    %cst_39 = arith.constant 0.0721687824 : f32
    %116 = vector.broadcast %cst_39 : f32 to vector<128x128xf32>
    %117 = arith.mulf %115, %116 : vector<128x128xf32>
    %118 = arith.addf %117, %35 : vector<128x128xf32>
    %cst_40 = arith.constant dense<0xFF800000> : vector<128xf32>
    %119 = vector.multi_reduction <maximumf>, %118, %cst_40 [1] : vector<128x128xf32> to vector<128xf32>
    %120 = vector.shape_cast %119 : vector<128xf32> to vector<128x1xf32>
    %121 = vector.broadcast %120 : vector<128x1xf32> to vector<128x128xf32>
    %122 = arith.subf %118, %121 : vector<128x128xf32>
    %123 = math.exp %122 : vector<128x128xf32>
    %cst_41 = arith.constant dense<0.000000e+00> : vector<128xf32>
    %124 = vector.multi_reduction <add>, %123, %cst_41 [1] : vector<128x128xf32> to vector<128xf32>
    %125 = vector.shape_cast %124 : vector<128xf32> to vector<128x1xf32>
    %126 = tpu.reciprocal %125 {approx = true} : vector<128x1xf32> -> vector<128x1xf32>
    %127 = vector.broadcast %126 : vector<128x1xf32> to vector<128x128xf32>
    %128 = arith.mulf %123, %127 : vector<128x128xf32>
    %129 = arith.truncf %128 : vector<128x128xf32> to vector<128x128xbf16>
    %cst_42 = arith.constant dense<0.000000e+00> : vector<128x32xf32>
    %130 = tpu.matmul %129, %114, %cst_42 {dimension_numbers = #tpu.dot_dimension_numbers<[1], [0], [0], [1], [0, 0, 1, 1], [], []>} : vector<128x128xbf16>, vector<128x32xbf16>, vector<128x32xf32> -> vector<128x32xf32>
    %131 = vector.extract_strided_slice %34 {offsets = [0, 160], sizes = [128, 32], strides = [1, 1]} : vector<128x576xbf16> to vector<128x32xbf16>
    %132 = vector.extract_strided_slice %34 {offsets = [0, 352], sizes = [128, 32], strides = [1, 1]} : vector<128x576xbf16> to vector<128x32xbf16>
    %133 = vector.extract_strided_slice %34 {offsets = [0, 544], sizes = [128, 32], strides = [1, 1]} : vector<128x576xbf16> to vector<128x32xbf16>
    "tpu.trace_start"() <{level = 10 : i32, message = "nd,md->nm"}> : () -> ()
    %cst_43 = arith.constant dense<0.000000e+00> : vector<128x128xf32>
    %134 = tpu.matmul %131, %132, %cst_43 {dimension_numbers = #tpu.dot_dimension_numbers<[1], [1], [0], [0], [0, 0, 1, 0], [], []>} : vector<128x32xbf16>, vector<128x32xbf16>, vector<128x128xf32> -> vector<128x128xf32>
    "tpu.trace_stop"() : () -> ()
    %cst_44 = arith.constant 0.0721687824 : f32
    %135 = vector.broadcast %cst_44 : f32 to vector<128x128xf32>
    %136 = arith.mulf %134, %135 : vector<128x128xf32>
    %137 = arith.addf %136, %35 : vector<128x128xf32>
    %cst_45 = arith.constant dense<0xFF800000> : vector<128xf32>
    %138 = vector.multi_reduction <maximumf>, %137, %cst_45 [1] : vector<128x128xf32> to vector<128xf32>
    %139 = vector.shape_cast %138 : vector<128xf32> to vector<128x1xf32>
    %140 = vector.broadcast %139 : vector<128x1xf32> to vector<128x128xf32>
    %141 = arith.subf %137, %140 : vector<128x128xf32>
    %142 = math.exp %141 : vector<128x128xf32>
    %cst_46 = arith.constant dense<0.000000e+00> : vector<128xf32>
    %143 = vector.multi_reduction <add>, %142, %cst_46 [1] : vector<128x128xf32> to vector<128xf32>
    %144 = vector.shape_cast %143 : vector<128xf32> to vector<128x1xf32>
    %145 = tpu.reciprocal %144 {approx = true} : vector<128x1xf32> -> vector<128x1xf32>
    %146 = vector.broadcast %145 : vector<128x1xf32> to vector<128x128xf32>
    %147 = arith.mulf %142, %146 : vector<128x128xf32>
    %148 = arith.truncf %147 : vector<128x128xf32> to vector<128x128xbf16>
    %cst_47 = arith.constant dense<0.000000e+00> : vector<128x32xf32>
    %149 = tpu.matmul %148, %133, %cst_47 {dimension_numbers = #tpu.dot_dimension_numbers<[1], [0], [0], [1], [0, 0, 1, 1], [], []>} : vector<128x128xbf16>, vector<128x32xbf16>, vector<128x32xf32> -> vector<128x32xf32>
    %150 = tpu.concatenate %54, %73, %92, %111, %130, %149 in 1 : vector<128x32xf32>, vector<128x32xf32>, vector<128x32xf32>, vector<128x32xf32>, vector<128x32xf32>, vector<128x32xf32> -> vector<128x192xf32>
    %151 = arith.addf %3, %150 : vector<128x192xf32>
    %c0_48 = arith.constant 0 : index
    %c0_49 = arith.constant 0 : index
    %c0_50 = arith.constant 0 : index
    %152 = vector.load %arg6[%c0_48, %c0_49, %c0_50] : memref<1x1x192xf32, #tpu.memory_space<vmem>>, vector<1x1x192xf32>
    %153 = vector.shape_cast %152 : vector<1x1x192xf32> to vector<1x192xf32>
    %c0_51 = arith.constant 0 : index
    %c0_52 = arith.constant 0 : index
    %c0_53 = arith.constant 0 : index
    %154 = vector.load %arg7[%c0_51, %c0_52, %c0_53] : memref<1x1x192xf32, #tpu.memory_space<vmem>>, vector<1x1x192xf32>
    %155 = vector.shape_cast %154 : vector<1x1x192xf32> to vector<1x192xf32>
    %cst_54 = arith.constant dense<0.000000e+00> : vector<128xf32>
    %156 = vector.multi_reduction <add>, %151, %cst_54 [1] : vector<128x192xf32> to vector<128xf32>
    %157 = vector.shape_cast %156 : vector<128xf32> to vector<128x1xf32>
    %cst_55 = arith.constant 1.920000e+02 : f32
    %158 = vector.broadcast %cst_55 : f32 to vector<128x1xf32>
    %159 = arith.divf %157, %158 : vector<128x1xf32>
    %160 = vector.broadcast %159 : vector<128x1xf32> to vector<128x192xf32>
    %161 = arith.subf %151, %160 : vector<128x192xf32>
    %162 = arith.mulf %161, %161 : vector<128x192xf32>
    %cst_56 = arith.constant dense<0.000000e+00> : vector<128xf32>
    %163 = vector.multi_reduction <add>, %162, %cst_56 [1] : vector<128x192xf32> to vector<128xf32>
    %164 = vector.shape_cast %163 : vector<128xf32> to vector<128x1xf32>
    %cst_57 = arith.constant 1.920000e+02 : f32
    %165 = vector.broadcast %cst_57 : f32 to vector<128x1xf32>
    %166 = arith.divf %164, %165 : vector<128x1xf32>
    %167 = vector.broadcast %159 : vector<128x1xf32> to vector<128x192xf32>
    %168 = arith.subf %151, %167 : vector<128x192xf32>
    %cst_58 = arith.constant 9.99999974E-6 : f32
    %169 = vector.broadcast %cst_58 : f32 to vector<128x1xf32>
    %170 = arith.addf %166, %169 : vector<128x1xf32>
    %171 = math.rsqrt %170 : vector<128x1xf32>
    %172 = vector.broadcast %171 : vector<128x1xf32> to vector<128x192xf32>
    %173 = arith.mulf %168, %172 : vector<128x192xf32>
    %174 = vector.broadcast %153 : vector<1x192xf32> to vector<128x192xf32>
    %175 = arith.mulf %173, %174 : vector<128x192xf32>
    %176 = vector.broadcast %155 : vector<1x192xf32> to vector<128x192xf32>
    %177 = arith.addf %175, %176 : vector<128x192xf32>
    %178 = arith.truncf %177 : vector<128x192xf32> to vector<128x192xbf16>
    %c0_59 = arith.constant 0 : index
    %c0_60 = arith.constant 0 : index
    %c0_61 = arith.constant 0 : index
    %179 = vector.load %arg8[%c0_59, %c0_60, %c0_61] : memref<1x192x768xbf16, #tpu.memory_space<vmem>>, vector<1x192x768xbf16>
    %180 = vector.shape_cast %179 : vector<1x192x768xbf16> to vector<192x768xbf16>
    %cst_62 = arith.constant dense<0.000000e+00> : vector<128x768xf32>
    %181 = tpu.matmul %178, %180, %cst_62 {dimension_numbers = #tpu.dot_dimension_numbers<[1], [0], [0], [1], [0, 0, 1, 1], [], []>} : vector<128x192xbf16>, vector<192x768xbf16>, vector<128x768xf32> -> vector<128x768xf32>
    %c0_63 = arith.constant 0 : index
    %c0_64 = arith.constant 0 : index
    %c0_65 = arith.constant 0 : index
    %182 = vector.load %arg9[%c0_63, %c0_64, %c0_65] : memref<1x1x768xf32, #tpu.memory_space<vmem>>, vector<1x1x768xf32>
    %183 = vector.shape_cast %182 : vector<1x1x768xf32> to vector<1x768xf32>
    %184 = vector.broadcast %183 : vector<1x768xf32> to vector<128x768xf32>
    %185 = arith.addf %181, %184 : vector<128x768xf32>
    %cst_66 = arith.constant 0.000000e+00 : f32
    %186 = vector.broadcast %cst_66 : f32 to vector<128x768xf32>
    %187 = arith.maximumf %185, %186 : vector<128x768xf32>
    %188 = arith.truncf %187 : vector<128x768xf32> to vector<128x768xbf16>
    %c0_67 = arith.constant 0 : index
    %c0_68 = arith.constant 0 : index
    %c0_69 = arith.constant 0 : index
    %189 = vector.load %arg10[%c0_67, %c0_68, %c0_69] : memref<1x768x192xbf16, #tpu.memory_space<vmem>>, vector<1x768x192xbf16>
    %190 = vector.shape_cast %189 : vector<1x768x192xbf16> to vector<768x192xbf16>
    %cst_70 = arith.constant dense<0.000000e+00> : vector<128x192xf32>
    %191 = tpu.matmul %188, %190, %cst_70 {dimension_numbers = #tpu.dot_dimension_numbers<[1], [0], [0], [1], [0, 0, 1, 1], [], []>} : vector<128x768xbf16>, vector<768x192xbf16>, vector<128x192xf32> -> vector<128x192xf32>
    %c0_71 = arith.constant 0 : index
    %c0_72 = arith.constant 0 : index
    %c0_73 = arith.constant 0 : index
    %192 = vector.load %arg11[%c0_71, %c0_72, %c0_73] : memref<1x1x192xf32, #tpu.memory_space<vmem>>, vector<1x1x192xf32>
    %193 = vector.shape_cast %192 : vector<1x1x192xf32> to vector<1x192xf32>
    %194 = vector.broadcast %193 : vector<1x192xf32> to vector<128x192xf32>
    %195 = arith.addf %191, %194 : vector<128x192xf32>
    %196 = arith.addf %151, %195 : vector<128x192xf32>
    %c0_74 = arith.constant 0 : index
    %c0_75 = arith.constant 0 : index
    %197 = vector.load %arg15[%c0_74, %c0_75] : memref<128x192xf32, #tpu.memory_space<vmem>>, vector<128x192xf32>
    tpu.vector_store %arg15[%c0_74, %c0_75], %196 {strides = array<i32>} : memref<128x192xf32, #tpu.memory_space<vmem>>, vector<128x192xf32>,
    %c5_i32 = arith.constant 5 : i32
    %198 = arith.cmpi eq, %arg0, %c5_i32 : i32
    %199 = arith.extui %198 : i1 to i32
    %c0_i32_76 = arith.constant 0 : i32
    %200 = arith.cmpi ne, %199, %c0_i32_76 : i32
    scf.if %200 {
      %c0_77 = arith.constant 0 : index
      %c0_78 = arith.constant 0 : index
      %201 = vector.load %arg12[%c0_77, %c0_78] : memref<1x192xf32, #tpu.memory_space<vmem>>, vector<1x192xf32>
      %c0_79 = arith.constant 0 : index
      %c0_80 = arith.constant 0 : index
      %202 = vector.load %arg13[%c0_79, %c0_80] : memref<1x192xf32, #tpu.memory_space<vmem>>, vector<1x192xf32>
      %cst_81 = arith.constant dense<0.000000e+00> : vector<128xf32>
      %203 = vector.multi_reduction <add>, %196, %cst_81 [1] : vector<128x192xf32> to vector<128xf32>
      %204 = vector.shape_cast %203 : vector<128xf32> to vector<128x1xf32>
      %cst_82 = arith.constant 1.920000e+02 : f32
      %205 = vector.broadcast %cst_82 : f32 to vector<128x1xf32>
      %206 = arith.divf %204, %205 : vector<128x1xf32>
      %207 = vector.broadcast %206 : vector<128x1xf32> to vector<128x192xf32>
      %208 = arith.subf %196, %207 : vector<128x192xf32>
      %209 = arith.mulf %208, %208 : vector<128x192xf32>
      %cst_83 = arith.constant dense<0.000000e+00> : vector<128xf32>
      %210 = vector.multi_reduction <add>, %209, %cst_83 [1] : vector<128x192xf32> to vector<128xf32>
      %211 = vector.shape_cast %210 : vector<128xf32> to vector<128x1xf32>
      %cst_84 = arith.constant 1.920000e+02 : f32
      %212 = vector.broadcast %cst_84 : f32 to vector<128x1xf32>
      %213 = arith.divf %211, %212 : vector<128x1xf32>
      %214 = vector.broadcast %206 : vector<128x1xf32> to vector<128x192xf32>
      %215 = arith.subf %196, %214 : vector<128x192xf32>
      %cst_85 = arith.constant 9.99999974E-6 : f32
      %216 = vector.broadcast %cst_85 : f32 to vector<128x1xf32>
      %217 = arith.addf %213, %216 : vector<128x1xf32>
      %218 = math.rsqrt %217 : vector<128x1xf32>
      %219 = vector.broadcast %218 : vector<128x1xf32> to vector<128x192xf32>
      %220 = arith.mulf %215, %219 : vector<128x192xf32>
      %221 = vector.broadcast %201 : vector<1x192xf32> to vector<128x192xf32>
      %222 = arith.mulf %220, %221 : vector<128x192xf32>
      %223 = vector.broadcast %202 : vector<1x192xf32> to vector<128x192xf32>
      %224 = arith.addf %222, %223 : vector<128x192xf32>
      %c0_86 = arith.constant 0 : index
      %c0_87 = arith.constant 0 : index
      %225 = vector.load %arg14[%c0_86, %c0_87] : memref<128x192xf32, #tpu.memory_space<vmem>>, vector<128x192xf32>
      tpu.vector_store %arg14[%c0_86, %c0_87], %224 {strides = array<i32>} : memref<128x192xf32, #tpu.memory_space<vmem>>, vector<128x192xf32>,
    } else {
    }
    return
  }
  func.func @transform_0(%arg0: i32) -> (i32, i32) {
    %c0_i32 = arith.constant 0 : i32
    %c0_i32_0 = arith.constant 0 : i32
    %c0_i32_1 = arith.constant 0 : i32
    return %c0_i32, %c0_i32_0 : i32, i32
  }
  func.func @transform_1(%arg0: i32) -> (i32, i32) {
    %c0_i32 = arith.constant 0 : i32
    %c0_i32_0 = arith.constant 0 : i32
    %c0_i32_1 = arith.constant 0 : i32
    return %c0_i32, %c0_i32_0 : i32, i32
  }
  func.func @transform_2(%arg0: i32) -> (i32, i32, i32) {
    %c0_i32 = arith.constant 0 : i32
    %c0_i32_0 = arith.constant 0 : i32
    %c0_i32_1 = arith.constant 0 : i32
    return %arg0, %c0_i32, %c0_i32_0 : i32, i32, i32
  }
  func.func @transform_3(%arg0: i32) -> (i32, i32, i32) {
    %c0_i32 = arith.constant 0 : i32
    %c0_i32_0 = arith.constant 0 : i32
    %c0_i32_1 = arith.constant 0 : i32
    return %arg0, %c0_i32, %c0_i32_0 : i32, i32, i32
  }
  func.func @transform_4(%arg0: i32) -> (i32, i32, i32) {
    %c0_i32 = arith.constant 0 : i32
    %c0_i32_0 = arith.constant 0 : i32
    %c0_i32_1 = arith.constant 0 : i32
    return %arg0, %c0_i32, %c0_i32_0 : i32, i32, i32
  }
  func.func @transform_5(%arg0: i32) -> (i32, i32, i32) {
    %c0_i32 = arith.constant 0 : i32
    %c0_i32_0 = arith.constant 0 : i32
    %c0_i32_1 = arith.constant 0 : i32
    return %arg0, %c0_i32, %c0_i32_0 : i32, i32, i32
  }
  func.func @transform_6(%arg0: i32) -> (i32, i32, i32) {
    %c0_i32 = arith.constant 0 : i32
    %c0_i32_0 = arith.constant 0 : i32
    %c0_i32_1 = arith.constant 0 : i32
    return %arg0, %c0_i32, %c0_i32_0 : i32, i32, i32
  }
  func.func @transform_7(%arg0: i32) -> (i32, i32, i32) {
    %c0_i32 = arith.constant 0 : i32
    %c0_i32_0 = arith.constant 0 : i32
    %c0_i32_1 = arith.constant 0 : i32
    return %arg0, %c0_i32, %c0_i32_0 : i32, i32, i32
  }
  func.func @transform_8(%arg0: i32) -> (i32, i32, i32) {
    %c0_i32 = arith.constant 0 : i32
    %c0_i32_0 = arith.constant 0 : i32
    %c0_i32_1 = arith.constant 0 : i32
    return %arg0, %c0_i32, %c0_i32_0 : i32, i32, i32
  }
  func.func @transform_9(%arg0: i32) -> (i32, i32, i32) {
    %c0_i32 = arith.constant 0 : i32
    %c0_i32_0 = arith.constant 0 : i32
    %c0_i32_1 = arith.constant 0 : i32
    return %arg0, %c0_i32, %c0_i32_0 : i32, i32, i32
  }
  func.func @transform_10(%arg0: i32) -> (i32, i32, i32) {
    %c0_i32 = arith.constant 0 : i32
    %c0_i32_0 = arith.constant 0 : i32
    %c0_i32_1 = arith.constant 0 : i32
    return %arg0, %c0_i32, %c0_i32_0 : i32, i32, i32
  }
  func.func @transform_11(%arg0: i32) -> (i32, i32) {
    %c0_i32 = arith.constant 0 : i32
    %c0_i32_0 = arith.constant 0 : i32
    %c0_i32_1 = arith.constant 0 : i32
    return %c0_i32, %c0_i32_0 : i32, i32
  }
  func.func @transform_12(%arg0: i32) -> (i32, i32) {
    %c0_i32 = arith.constant 0 : i32
    %c0_i32_0 = arith.constant 0 : i32
    %c0_i32_1 = arith.constant 0 : i32
    return %c0_i32, %c0_i32_0 : i32, i32
  }
  func.func @transform_13(%arg0: i32) -> (i32, i32) {
    %c0_i32 = arith.constant 0 : i32
    %c0_i32_0 = arith.constant 0 : i32
    %c0_i32_1 = arith.constant 0 : i32
    return %c0_i32, %c0_i32_0 : i32, i32
  }
}

</mosaic_0001>

<bundles_post_ra>
// kernel: language_model_forward.3
= control target key start
LH: loop header
LB: loop body
LE: loop exit
PB: predicated region body
PF: predicated region fallthrough
CT: control target
= control target key end

     0   :  { %8 = vsyncpa [#allocation4], 0  ;;  %s3200_s12 = smov 0   ;;  %s3454_s0 = inlined_call_operand.vmem [shape: f32[2,12288], index: 0, kind: input, shape index: {}]   ;;  %s3455_s1 = inlined_call_operand.vmem [shape: bf16[12288,128], index: 1, kind: input, shape index: {}]   ;;  %s3456_s2 = inlined_call_operand.vmem [shape: f32[1,128], index: 2, kind: input, shape index: {}]   ;;  %s3457_s3 = inlined_call_operand.hbm [shape: f32[2,128], index: 3, kind: output, shape index: {}]  }
   0x1 LB: > { %s3206_s13 = sadd.s32 4294967295, %s3175_s12   ;;  %p2456_p0 = scmp.ge.s32.totalorder %s3175_s12, 1  ;;  %s3175_s12 = sphi %s3200_s12, %s14_s12  }
   0x2   : > { %p145_p1 = scmp.lt.s32.totalorder %s3175_s12, 5 }
   0x4   : > { %p146_p2 = pnand %p2456_p0, %p145_p1 }
   0x5   : > { %s169_s14 = smul.u32 (!%p146_p2), 24, %s3206_s13  ;;  %p2459_p5 = scmp.ne.s32.totalorder (!%p146_p2), %s3206_s13, 0 }
   0x6   : > { %149 = sbr.rel (%p146_p2) target bundleno = 758 (0x2f6), region = 32 }
   0x7   : > { %s175_s15 = smul.u32 (!%p146_p2), 384, %s3206_s13  ;;  %p170_p3 = scmp.lt.s32.totalorder (!%p146_p2), %s169_s14, 95 }
   0x9   : > { %p176_p4 = scmp.lt.s32.totalorder (!%p146_p2), %s175_s15, 1535 }
   0xb   : > { %s3459_s14 = smov (!%p170_p3, %s169_s14), 95  ;;  %s3461_s15 = smov (!%p176_p4, %s175_s15), 1535 }
   0xc   : > { %s2457_s16 = sshll.u32 %s3459_s14, 1  ;;  %s2458_s20 = sshll.u32 %s3461_s15, 2 }
   0xd   : > { %s3215_s19 = scalar_lea.vmem %s3454_s0, %s2457_s16  ;;  %s3220_s23 = scalar_lea.vmem %s3455_s1, %s2458_s20 }
   0xe   : > { %185 = sbr.rel (%p2459_p5) target bundleno = 21 (0x15), region = 36 }
  0x13   : > { %v3177_v0 = vmov 0.0  }
  0x14   : > { %186 = vst [vmem:[#allocation2] sm:$0x3] %v3177_v0 }
  0x15 PF: > { %v2939_v1 = vld [vmem:[%s3220_s23 + $0x78] sm:$0xff]   ;;  %v2943_v5 = vld [vmem:[%s3220_s23 + $0x70] sm:$0xff]   ;;  %v2947_v9 = vld [vmem:[%s3220_s23 + $0x68] sm:$0xff]   ;;  %v204_v29 = vlaneseq  ;;  %v3178_v37 = vmov 1983009808   ;;  %p2652_p6 = scmp.ne.s32.totalorder %s3206_s13, 3 }
  0x16   : > { %v2940_v2 = vld [vmem:[%s3220_s23 + $0xf8] sm:$0xff]   ;;  %2658 = vmatprep.subr.bf16.mxu0 %v2939_v1  ;;  %v2944_v6 = vld [vmem:[%s3220_s23 + $0xf0] sm:$0xff]   ;;  %v2948_v10 = vld [vmem:[%s3220_s23 + $0xe8] sm:$0xff]   ;;  %v202_v38 = vunpack.c.l.s4 %v3178_v37 }
  0x17   : > { %v2941_v3 = vld [vmem:[%s3220_s23 + $0x38] sm:$0xff]   ;;  %2680 = vmatprep.subr.bf16.mxu1 %v2940_v2  ;;  %v2945_v7 = vld [vmem:[%s3220_s23 + $0x30] sm:$0xff]   ;;  %v2949_v11 = vld [vmem:[%s3220_s23 + $0x28] sm:$0xff]   ;;  %v205_v34 = vshrl.u32 %v204_v29, 7 }
  0x18   : > { %v2942_v4 = vld [vmem:[%s3220_s23 + $0xb8] sm:$0xff]   ;;  %2659 = vmatpush3.bf16.msra.mxu0 %v2941_v3  ;;  %v2946_v8 = vld [vmem:[%s3220_s23 + $0xb0] sm:$0xff]   ;;  %v2950_v12 = vld [vmem:[%s3220_s23 + $0xa8] sm:$0xff]   ;;  %v203_v40 = vunpack.c.0.s8 %v202_v38 }
  0x19   : > { %2681 = vmatpush3.bf16.msra.mxu1 %v2942_v4  ;;  %2660 = vmatprep.subr.bf16.mxu0 %v2943_v5  ;;  %v2951_v13 = vld [vmem:[%s3220_s23 + $0x60] sm:$0xff]   ;;  %v2955_v17 = vld [vmem:[%s3220_s23 + $0x58] sm:$0xff]   ;;  %v2959_v21 = vld [vmem:[%s3220_s23 + $0x50] sm:$0xff]  }
  0x1a   : > { %2682 = vmatprep.subr.bf16.mxu1 %v2944_v6  ;;  %v2952_v14 = vld [vmem:[%s3220_s23 + $0xe0] sm:$0xff]   ;;  %v2956_v18 = vld [vmem:[%s3220_s23 + $0xd8] sm:$0xff]   ;;  %v2960_v22 = vld [vmem:[%s3220_s23 + $0xd0] sm:$0xff]   ;;  %v3258_v42 = vsub.s32 %v203_v40, %v205_v34 }
  0x1b   : > { %v2953_v15 = vld [vmem:[%s3220_s23 + $0x20] sm:$0xff]   ;;  %v2957_v19 = vld [vmem:[%s3220_s23 + $0x18] sm:$0xff]   ;;  %v2961_v23 = vld [vmem:[%s3220_s23 + $0x10] sm:$0xff]  }
  0x1c   : > { %2661 = vmatpush3.bf16.msra.mxu0 %v2945_v7  ;;  %v2954_v16 = vld [vmem:[%s3220_s23 + $0xa0] sm:$0xff]   ;;  %v2958_v20 = vld [vmem:[%s3220_s23 + $0x98] sm:$0xff]   ;;  %v2962_v24 = vld [vmem:[%s3220_s23 + $0x90] sm:$0xff]  }
  0x1d   : > { %2683 = vmatpush3.bf16.msra.mxu1 %v2946_v8  ;;  %2662 = vmatprep.subr.bf16.mxu0 %v2947_v9  ;;  %v2963_v25 = vld [vmem:[%s3220_s23 + $0x48] sm:$0xff]   ;;  %v2967_v30 = vld [vmem:[%s3220_s23 + $0x40] sm:$0xff]   ;;  %v2972_v36 = vld [vmem:[%s3220_s23 + $0x178] sm:$0xff]  }
  0x1e   : > { %2684 = vmatprep.subr.bf16.mxu1 %v2948_v10  ;;  %v2964_v26 = vld [vmem:[%s3220_s23 + $0xc8] sm:$0xff]   ;;  %v2968_v31 = vld [vmem:[%s3220_s23 + $0xc0] sm:$0xff]   ;;  %v2973_v39 = vld [vmem:[%s3220_s23 + $0x1f8] sm:$0xff]  }
  0x1f   : > { %v2965_v27 = vld [vmem:[%s3220_s23 + $0x8] sm:$0xff]   ;;  %v2969_v32 = vld [vmem:[%s3220_s23] sm:$0xff]   ;;  %v2974_v47 = vld [vmem:[%s3220_s23 + $0x138] sm:$0xff]  }
  0x20   : > { %2663 = vmatpush3.bf16.msra.mxu0 %v2949_v11  ;;  %v2966_v28 = vld [vmem:[%s3220_s23 + $0x88] sm:$0xff]   ;;  %v2970_v33 = vld [vmem:[%s3220_s23 + $0x80] sm:$0xff]   ;;  %v2975_v50 = vld [vmem:[%s3220_s23 + $0x1b8] sm:$0xff]  }
  0x21   : > { %2685 = vmatpush3.bf16.msra.mxu1 %v2950_v12  ;;  %2664 = vmatprep.subr.bf16.mxu0 %v2951_v13  ;;  %v188_v35 = vld [vmem:[%s3215_s19] sm:$0xff]  ;;  %v2976_v53 = vld [vmem:[%s3220_s23 + $0x170] sm:$0xff]   ;;  %v2980_v57 = vld [vmem:[%s3220_s23 + $0x168] sm:$0xff]  }
  0x22   : > { %2686 = vmatprep.subr.bf16.mxu1 %v2952_v14  ;;  %v200_v41 = vcombine.high %v188_v35, %v188_v35  ;;  %v207_v43 = vrot.slane %v188_v35, %v3258_v42  ;;  %v2977_v54 = vld [vmem:[%s3220_s23 + $0x1f0] sm:$0xff]   ;;  %v2981_v58 = vld [vmem:[%s3220_s23 + $0x1e8] sm:$0xff]   ;;  %v2984_v61 = vld [vmem:[%s3220_s23 + $0x160] sm:$0xff]  }
  0x23   : > { %v2978_v55 = vld [vmem:[%s3220_s23 + $0x130] sm:$0xff]   ;;  %v2982_v59 = vld [vmem:[%s3220_s23 + $0x128] sm:$0xff]   ;;  %v2985_v62 = vld [vmem:[%s3220_s23 + $0x1e0] sm:$0xff]  }
  0x24   : > { %2665 = vmatpush3.bf16.msra.mxu0 %v2953_v15  ;;  %v214_v44 = vrot.slane %v200_v41, %v3258_v42  ;;  %v215_v45 = vcombine.high %v207_v43, %v207_v43  ;;  %v326_v48 = vpack.c.bf16 %v207_v43, %v207_v43  ;;  %v2979_v56 = vld [vmem:[%s3220_s23 + $0x1b0] sm:$0xff]   ;;  %v2983_v60 = vld [vmem:[%s3220_s23 + $0x1a8] sm:$0xff]   ;;  %v2986_v63 = vld [vmem:[%s3220_s23 + $0x120] sm:$0xff]  }
  0x25   : > { %2687 = vmatpush3.bf16.msra.mxu1 %v2954_v16  ;;  %2666 = vmatprep.subr.bf16.mxu0 %v2955_v17  ;;  %v2987_v0 = vld [vmem:[%s3220_s23 + $0x1a0] sm:$0xff]   ;;  %v2988_v1 = vld [vmem:[%s3220_s23 + $0x158] sm:$0xff]   ;;  %v2992_v5 = vld [vmem:[%s3220_s23 + $0x150] sm:$0xff]  }
  0x26   : > { %2688 = vmatprep.subr.bf16.mxu1 %v2956_v18  ;;  %v216_v46 = vcombine.high %v214_v44, %v214_v44  ;;  %v328_v49 = vpack.c.bf16 %v214_v44, %v214_v44  ;;  %v327_v51 = vpack.c.bf16 %v215_v45, %v215_v45  ;;  %v2989_v2 = vld [vmem:[%s3220_s23 + $0x1d8] sm:$0xff]   ;;  %v2993_v6 = vld [vmem:[%s3220_s23 + $0x1d0] sm:$0xff]   ;;  %v2996_v9 = vld [vmem:[%s3220_s23 + $0x148] sm:$0xff]  }
  0x27   : > { %v2990_v3 = vld [vmem:[%s3220_s23 + $0x118] sm:$0xff]   ;;  %v2994_v7 = vld [vmem:[%s3220_s23 + $0x110] sm:$0xff]   ;;  %v2997_v10 = vld [vmem:[%s3220_s23 + $0x1c8] sm:$0xff]  }
  0x28   : > { %2667 = vmatpush3.bf16.msra.mxu0 %v2957_v19  ;;  %v329_v52 = vpack.c.bf16 %v216_v46, %v216_v46  ;;  %1918 = vmatprep.mubr.bf16.mxu0 %v327_v51  ;;  %v2991_v4 = vld [vmem:[%s3220_s23 + $0x198] sm:$0xff]   ;;  %v2995_v8 = vld [vmem:[%s3220_s23 + $0x190] sm:$0xff]   ;;  %v189_v11 = vld [vmem:[%s3215_s19 + $0x8] sm:$0xff] }
  0x29   : > { %2689 = vmatpush3.bf16.msra.mxu1 %v2958_v20  ;;  %2668 = vmatprep.subr.bf16.mxu0 %v2959_v21  ;;  %v2998_v12 = vld [vmem:[%s3220_s23 + $0x108] sm:$0xff]   ;;  %v224_v13 = vrot.slane %v189_v11, %v3258_v42  ;;  %v217_v14 = vcombine.high %v189_v11, %v189_v11  ;;  %v3000_v16 = vld [vmem:[%s3220_s23 + $0x140] sm:$0xff]   ;;  %v3012_v34 = vld [vmem:[%s3220_s23 + $0x2b0] sm:$0xff]  }
  0x2a   : > { %2690 = vmatprep.subr.bf16.mxu1 %v2960_v22  ;;  %1958 = vmatprep.mubr.bf16.mxu1 %v329_v52  ;;  %v2999_v15 = vld [vmem:[%s3220_s23 + $0x188] sm:$0xff]   ;;  %v3001_v19 = vld [vmem:[%s3220_s23 + $0x1c0] sm:$0xff]   ;;  %v3021_v44 = vld [vmem:[%s3220_s23 + $0x258] sm:$0xff]  }
  0x2b   : > { %v232_v17 = vcombine.high %v224_v13, %v224_v13  ;;  %v231_v18 = vrot.slane %v217_v14, %v3258_v42  ;;  %v3002_v20 = vld [vmem:[%s3220_s23 + $0x100] sm:$0xff]   ;;  %v3013_v35 = vld [vmem:[%s3220_s23 + $0x268] sm:$0xff]   ;;  %v3022_v45 = vld [vmem:[%s3220_s23 + $0x2d8] sm:$0xff]  }
  0x2c   : > { %2669 = vmatpush3.bf16.msra.mxu0 %v2961_v23  ;;  %v3003_v23 = vld [vmem:[%s3220_s23 + $0x180] sm:$0xff]   ;;  %v3015_v37 = vld [vmem:[%s3220_s23 + $0x228] sm:$0xff]   ;;  %v3023_v46 = vld [vmem:[%s3220_s23 + $0x218] sm:$0xff]  }
  0x2d   : > { %2691 = vmatpush3.bf16.msra.mxu1 %v2962_v24  ;;  %2670 = vmatprep.subr.bf16.mxu0 %v2963_v25  ;;  %v331_v21 = vpack.c.bf16 %v232_v17, %v232_v17  ;;  %v233_v22 = vcombine.high %v231_v18, %v231_v18  ;;  %v3005_v25 = vld [vmem:[%s3220_s23 + $0x278] sm:$0xff]   ;;  %v332_v29 = vpack.c.bf16 %v231_v18, %v231_v18  ;;  %v3016_v38 = vld [vmem:[%s3220_s23 + $0x2a8] sm:$0xff]   ;;  %v3018_v40 = vld [vmem:[%s3220_s23 + $0x2e0] sm:$0xff]  }
  0x2e   : > { %2692 = vmatprep.subr.bf16.mxu1 %v2964_v26  ;;  %v3006_v26 = vld [vmem:[%s3220_s23 + $0x2f8] sm:$0xff]   ;;  %v3019_v41 = vld [vmem:[%s3220_s23 + $0x220] sm:$0xff]   ;;  %v3028_v51 = vld [vmem:[%s3220_s23 + $0x290] sm:$0xff]  }
  0x2f   : > { %v333_v24 = vpack.c.bf16 %v233_v22, %v233_v22  ;;  %v3020_v43 = vld [vmem:[%s3220_s23 + $0x2a0] sm:$0xff]   ;;  %v3029_v52 = vld [vmem:[%s3220_s23 + $0x248] sm:$0xff]   ;;  %v3043_v11 = vld [vmem:[%s3220_s23 + $0x3f0] sm:$0xff]  }
  0x30   : > { %2671 = vmatpush3.bf16.msra.mxu0 %v2965_v27  ;;  %v3007_v27 = vld [vmem:[%s3220_s23 + $0x238] sm:$0xff]   ;;  %v3046_v14 = vld [vmem:[%s3220_s23 + $0x368] sm:$0xff]   ;;  %v3050_v18 = vld [vmem:[%s3220_s23 + $0x360] sm:$0xff]  }
  0x31   : > { %2693 = vmatpush3.bf16.msra.mxu1 %v2966_v28  ;;  %2672 = vmatprep.subr.bf16.mxu0 %v2967_v30  ;;  %v330_v28 = vpack.c.bf16 %v224_v13, %v224_v13  ;;  %v3008_v30 = vld [vmem:[%s3220_s23 + $0x2b8] sm:$0xff]   ;;  %v3045_v13 = vld [vmem:[%s3220_s23 + $0x3b0] sm:$0xff]   ;;  %v3049_v17 = vld [vmem:[%s3220_s23 + $0x3a8] sm:$0xff]  }
  0x32   : > { %2694 = vmatprep.subr.bf16.mxu1 %v2968_v31  ;;  %v3009_v31 = vld [vmem:[%s3220_s23 + $0x270] sm:$0xff]   ;;  %v3054_v22 = vld [vmem:[%s3220_s23 + $0x358] sm:$0xff]  }
  0x34   : > { %2673 = vmatpush3.bf16.msra.mxu0 %v2969_v32  ;;  %v3010_v32 = vld [vmem:[%s3220_s23 + $0x2f0] sm:$0xff]  }
  0x35   : > { %2695 = vmatpush3.bf16.msra.mxu1 %v2970_v33  ;;  %2702 = vmatprep.subr.bf16.mxu0 %v2972_v36  ;;  %v3011_v33 = vld [vmem:[%s3220_s23 + $0x230] sm:$0xff]   ;;  %v3014_v36 = vld [vmem:[%s3220_s23 + $0x2e8] sm:$0xff]  }
  0x36   : > { %2724 = vmatprep.subr.bf16.mxu1 %v2973_v39  ;;  %v3017_v39 = vld [vmem:[%s3220_s23 + $0x260] sm:$0xff]  }
  0x37   : > { %1919 = vmatmul.mubr.bf16.vlgmr.msra.gmra.mxu0 %v326_v48  ;;  %v3025_v48 = vld [vmem:[%s3220_s23 + $0x250] sm:$0xff]  }
  0x38   : > { %1959 = vmatmul.mubr.bf16.vlgmr.msra.gmra.mxu1 %v328_v49  ;;  %2703 = vmatpush3.bf16.msra.mxu0 %v2974_v47  ;;  %v3024_v47 = vld [vmem:[%s3220_s23 + $0x298] sm:$0xff]   ;;  %v3026_v49 = vld [vmem:[%s3220_s23 + $0x2d0] sm:$0xff]  }
  0x39   : > { %2725 = vmatpush3.bf16.msra.mxu1 %v2975_v50  ;;  %2704 = vmatprep.subr.bf16.mxu0 %v2976_v53  ;;  %v3027_v50 = vld [vmem:[%s3220_s23 + $0x210] sm:$0xff]   ;;  %v3030_v53 = vld [vmem:[%s3220_s23 + $0x2c8] sm:$0xff]  }
  0x3a   : > { %2726 = vmatprep.subr.bf16.mxu1 %v2977_v54  ;;  %1998 = vmatprep.mubr.bf16.mxu0 %v331_v21  ;;  %v190_v54 = vld [vmem:[%s3215_s19 + $0x10] sm:$0xff]  ;;  %v3053_v21 = vld [vmem:[%s3220_s23 + $0x3a0] sm:$0xff]  }
  0x3b   : > { %2038 = vmatprep.mubr.bf16.mxu1 %v333_v24  ;;  %v3056_v24 = vld [vmem:[%s3220_s23 + $0x318] sm:$0xff]  }
  0x3c   : > { %2705 = vmatpush3.bf16.msra.mxu0 %v2978_v55  ;;  %v3031_v55 = vld [vmem:[%s3220_s23 + $0x208] sm:$0xff]  }
  0x3d   : > { %2727 = vmatpush3.bf16.msra.mxu1 %v2979_v56  ;;  %2706 = vmatprep.subr.bf16.mxu0 %v2980_v57  ;;  %v241_v56 = vrot.slane %v190_v54, %v3258_v42  ;;  %v234_v57 = vcombine.high %v190_v54, %v190_v54  ;;  %v3076_v54 = vld [vmem:[%s3220_s23 + $0x4f0] sm:$0xff]  }
  0x3e   : > { %2728 = vmatprep.subr.bf16.mxu1 %v2981_v58  ;;  %v3032_v58 = vld [vmem:[%s3220_s23 + $0x288] sm:$0xff]  }
  0x40   : > { %2707 = vmatpush3.bf16.msra.mxu0 %v2982_v59  ;;  %v3033_v59 = vld [vmem:[%s3220_s23 + $0x240] sm:$0xff]  }
  0x41   : > { %2729 = vmatpush3.bf16.msra.mxu1 %v2983_v60  ;;  %2708 = vmatprep.subr.bf16.mxu0 %v2984_v61  ;;  %v249_v60 = vcombine.high %v241_v56, %v241_v56  ;;  %v248_v61 = vrot.slane %v234_v57, %v3258_v42  ;;  %v3079_v57 = vld [vmem:[%s3220_s23 + $0x468] sm:$0xff]  }
  0x42   : > { %2730 = vmatprep.subr.bf16.mxu1 %v2985_v62  ;;  %v3034_v62 = vld [vmem:[%s3220_s23 + $0x2c0] sm:$0xff]  }
  0x44   : > { %2709 = vmatpush3.bf16.msra.mxu0 %v2986_v63  ;;  %v3035_v63 = vld [vmem:[%s3220_s23 + $0x200] sm:$0xff]  }
  0x45   : > { %2731 = vmatpush3.bf16.msra.mxu1 %v2987_v0  ;;  %2710 = vmatprep.subr.bf16.mxu0 %v2988_v1  ;;  %v335_v0 = vpack.c.bf16 %v249_v60, %v249_v60  ;;  %v250_v1 = vcombine.high %v248_v61, %v248_v61  ;;  %v3082_v60 = vld [vmem:[%s3220_s23 + $0x4a8] sm:$0xff]  }
  0x46   : > { %2732 = vmatprep.subr.bf16.mxu1 %v2989_v2  ;;  %v3036_v2 = vld [vmem:[%s3220_s23 + $0x280] sm:$0xff]  }
  0x48   : > { %2711 = vmatpush3.bf16.msra.mxu0 %v2990_v3  ;;  %v337_v3 = vpack.c.bf16 %v250_v1, %v250_v1  ;;  %v3087_v1 = vld [vmem:[%s3220_s23 + $0x458] sm:$0xff]  }
  0x49   : > { %2733 = vmatpush3.bf16.msra.mxu1 %v2991_v4  ;;  %2712 = vmatprep.subr.bf16.mxu0 %v2992_v5  ;;  %v3038_v4 = vld [vmem:[%s3220_s23 + $0x378] sm:$0xff]  }
  0x4a   : > { %2734 = vmatprep.subr.bf16.mxu1 %v2993_v6  ;;  %v3039_v5 = vld [vmem:[%s3220_s23 + $0x3f8] sm:$0xff]  }
  0x4b   : > { %v3040_v6 = vld [vmem:[%s3220_s23 + $0x338] sm:$0xff]  }
  0x4c   : > { %2713 = vmatpush3.bf16.msra.mxu0 %v2994_v7  ;;  %v334_v7 = vpack.c.bf16 %v241_v56, %v241_v56  ;;  %v3078_v56 = vld [vmem:[%s3220_s23 + $0x4b0] sm:$0xff]  }
  0x4d   : > { %2735 = vmatpush3.bf16.msra.mxu1 %v2995_v8  ;;  %2714 = vmatprep.subr.bf16.mxu0 %v2996_v9  ;;  %v336_v8 = vpack.c.bf16 %v248_v61, %v248_v61  ;;  %v3041_v9 = vld [vmem:[%s3220_s23 + $0x3b8] sm:$0xff]   ;;  %v3083_v61 = vld [vmem:[%s3220_s23 + $0x460] sm:$0xff]  }
  0x4e   : > { %2736 = vmatprep.subr.bf16.mxu1 %v2997_v10  ;;  %v3042_v10 = vld [vmem:[%s3220_s23 + $0x370] sm:$0xff]  }
  0x50   : > { %2715 = vmatpush3.bf16.msra.mxu0 %v2998_v12  ;;  %v3044_v12 = vld [vmem:[%s3220_s23 + $0x330] sm:$0xff]  }
  0x51   : > { %2737 = vmatpush3.bf16.msra.mxu1 %v2999_v15  ;;  %2716 = vmatprep.subr.bf16.mxu0 %v3000_v16  ;;  %v3047_v15 = vld [vmem:[%s3220_s23 + $0x3e8] sm:$0xff]  }
  0x52   : > { %2738 = vmatprep.subr.bf16.mxu1 %v3001_v19  ;;  %v3048_v16 = vld [vmem:[%s3220_s23 + $0x328] sm:$0xff]   ;;  %v3051_v19 = vld [vmem:[%s3220_s23 + $0x3e0] sm:$0xff]  }
  0x54   : > { %2717 = vmatpush3.bf16.msra.mxu0 %v3002_v20  ;;  %v3052_v20 = vld [vmem:[%s3220_s23 + $0x320] sm:$0xff]  }
  0x55   : > { %2739 = vmatpush3.bf16.msra.mxu1 %v3003_v23  ;;  %2746 = vmatprep.subr.bf16.mxu0 %v3005_v25  ;;  %v3055_v23 = vld [vmem:[%s3220_s23 + $0x3d8] sm:$0xff]  }
  0x56   : > { %2768 = vmatprep.subr.bf16.mxu1 %v3006_v26  ;;  %v3057_v25 = vld [vmem:[%s3220_s23 + $0x398] sm:$0xff]   ;;  %v3058_v26 = vld [vmem:[%s3220_s23 + $0x350] sm:$0xff]  }
  0x57   : > { %1999 = vmatmul.mubr.bf16.vlgmr.msra.gmra.mxu0 %v330_v28  ;;  %v3060_v28 = vld [vmem:[%s3220_s23 + $0x310] sm:$0xff]  }
  0x58   : > { %2039 = vmatmul.mubr.bf16.vlgmr.msra.gmra.mxu1 %v332_v29  ;;  %2747 = vmatpush3.bf16.msra.mxu0 %v3007_v27  ;;  %v3059_v27 = vld [vmem:[%s3220_s23 + $0x3d0] sm:$0xff]  }
  0x59   : > { %2769 = vmatpush3.bf16.msra.mxu1 %v3008_v30  ;;  %2748 = vmatprep.subr.bf16.mxu0 %v3009_v31  ;;  %v3061_v29 = vld [vmem:[%s3220_s23 + $0x390] sm:$0xff]   ;;  %v3062_v30 = vld [vmem:[%s3220_s23 + $0x348] sm:$0xff]  }
  0x5a   : > { %2770 = vmatprep.subr.bf16.mxu1 %v3010_v32  ;;  %2078 = vmatprep.mubr.bf16.mxu0 %v335_v0  ;;  %v3063_v31 = vld [vmem:[%s3220_s23 + $0x3c8] sm:$0xff]   ;;  %v3086_v0 = vld [vmem:[%s3220_s23 + $0x4a0] sm:$0xff]  }
  0x5b   : > { %2118 = vmatprep.mubr.bf16.mxu1 %v337_v3  ;;  %v3064_v32 = vld [vmem:[%s3220_s23 + $0x308] sm:$0xff]   ;;  %v3089_v3 = vld [vmem:[%s3220_s23 + $0x418] sm:$0xff]  }
  0x5c   : > { %2749 = vmatpush3.bf16.msra.mxu0 %v3011_v33  ;;  %v191_v33 = vld [vmem:[%s3215_s19 + $0x18] sm:$0xff] }
  0x5d   : > { %2771 = vmatpush3.bf16.msra.mxu1 %v3012_v34  ;;  %2750 = vmatprep.subr.bf16.mxu0 %v3013_v35  ;;  %v3065_v34 = vld [vmem:[%s3220_s23 + $0x388] sm:$0xff]   ;;  %v258_v35 = vrot.slane %v191_v33, %v3258_v42 }
  0x5e   : > { %2772 = vmatprep.subr.bf16.mxu1 %v3014_v36  ;;  %v251_v36 = vcombine.high %v191_v33, %v191_v33  ;;  %v3110_v33 = vld [vmem:[%s3220_s23 + $0x530] sm:$0xff]  }
  0x60   : > { %2751 = vmatpush3.bf16.msra.mxu0 %v3015_v37  ;;  %v3066_v37 = vld [vmem:[%s3220_s23 + $0x340] sm:$0xff]  }
  0x61   : > { %2773 = vmatpush3.bf16.msra.mxu1 %v3016_v38  ;;  %2752 = vmatprep.subr.bf16.mxu0 %v3017_v39  ;;  %v3067_v38 = vld [vmem:[%s3220_s23 + $0x3c0] sm:$0xff]   ;;  %v266_v39 = vcombine.high %v258_v35, %v258_v35 }
  0x62   : > { %2774 = vmatprep.subr.bf16.mxu1 %v3018_v40  ;;  %v265_v40 = vrot.slane %v251_v36, %v3258_v42  ;;  %v3113_v36 = vld [vmem:[%s3220_s23 + $0x5e8] sm:$0xff]  }
  0x64   : > { %2753 = vmatpush3.bf16.msra.mxu0 %v3019_v41  ;;  %v3068_v41 = vld [vmem:[%s3220_s23 + $0x300] sm:$0xff]  }
  0x65   : > { %2775 = vmatpush3.bf16.msra.mxu1 %v3020_v43  ;;  %2754 = vmatprep.subr.bf16.mxu0 %v3021_v44  ;;  %v3069_v43 = vld [vmem:[%s3220_s23 + $0x380] sm:$0xff]   ;;  %v339_v44 = vpack.c.bf16 %v266_v39, %v266_v39 }
  0x66   : > { %2776 = vmatprep.subr.bf16.mxu1 %v3022_v45  ;;  %v267_v45 = vcombine.high %v265_v40, %v265_v40  ;;  %v3116_v39 = vld [vmem:[%s3220_s23 + $0x560] sm:$0xff]  }
  0x68   : > { %2755 = vmatpush3.bf16.msra.mxu0 %v3023_v46  ;;  %v3071_v46 = vld [vmem:[%s3220_s23 + $0x478] sm:$0xff]  }
  0x69   : > { %2777 = vmatpush3.bf16.msra.mxu1 %v3024_v47  ;;  %2756 = vmatprep.subr.bf16.mxu0 %v3025_v48  ;;  %v341_v47 = vpack.c.bf16 %v267_v45, %v267_v45  ;;  %v3072_v48 = vld [vmem:[%s3220_s23 + $0x4f8] sm:$0xff]  }
  0x6a   : > { %2778 = vmatprep.subr.bf16.mxu1 %v3026_v49  ;;  %v3073_v49 = vld [vmem:[%s3220_s23 + $0x438] sm:$0xff]  }
  0x6b   : > { %v3121_v45 = vld [vmem:[%s3220_s23 + $0x5d8] sm:$0xff]  }
  0x6c   : > { %2757 = vmatpush3.bf16.msra.mxu0 %v3027_v50  ;;  %v338_v50 = vpack.c.bf16 %v258_v35, %v258_v35  ;;  %v3112_v35 = vld [vmem:[%s3220_s23 + $0x568] sm:$0xff]  }
  0x6d   : > { %2779 = vmatpush3.bf16.msra.mxu1 %v3028_v51  ;;  %2758 = vmatprep.subr.bf16.mxu0 %v3029_v52  ;;  %v340_v51 = vpack.c.bf16 %v265_v40, %v265_v40  ;;  %v3074_v52 = vld [vmem:[%s3220_s23 + $0x4b8] sm:$0xff]   ;;  %v3117_v40 = vld [vmem:[%s3220_s23 + $0x5e0] sm:$0xff]  }
  0x6e   : > { %2780 = vmatprep.subr.bf16.mxu1 %v3030_v53  ;;  %v3075_v53 = vld [vmem:[%s3220_s23 + $0x470] sm:$0xff]  }
  0x70   : > { %2759 = vmatpush3.bf16.msra.mxu0 %v3031_v55  ;;  %v3077_v55 = vld [vmem:[%s3220_s23 + $0x430] sm:$0xff]  }
  0x71   : > { %2781 = vmatpush3.bf16.msra.mxu1 %v3032_v58  ;;  %2760 = vmatprep.subr.bf16.mxu0 %v3033_v59  ;;  %v3080_v58 = vld [vmem:[%s3220_s23 + $0x4e8] sm:$0xff]  }
  0x72   : > { %2782 = vmatprep.subr.bf16.mxu1 %v3034_v62  ;;  %v3081_v59 = vld [vmem:[%s3220_s23 + $0x428] sm:$0xff]   ;;  %v3084_v62 = vld [vmem:[%s3220_s23 + $0x4e0] sm:$0xff]  }
  0x74   : > { %2761 = vmatpush3.bf16.msra.mxu0 %v3035_v63  ;;  %v3085_v63 = vld [vmem:[%s3220_s23 + $0x420] sm:$0xff]  }
  0x75   : > { %2783 = vmatpush3.bf16.msra.mxu1 %v3036_v2  ;;  %2790 = vmatprep.subr.bf16.mxu0 %v3038_v4  ;;  %v3088_v2 = vld [vmem:[%s3220_s23 + $0x4d8] sm:$0xff]  }
  0x76   : > { %2812 = vmatprep.subr.bf16.mxu1 %v3039_v5  ;;  %v3090_v4 = vld [vmem:[%s3220_s23 + $0x498] sm:$0xff]   ;;  %v3091_v5 = vld [vmem:[%s3220_s23 + $0x450] sm:$0xff]  }
  0x77   : > { %2079 = vmatmul.mubr.bf16.vlgmr.msra.gmra.mxu0 %v334_v7  ;;  %v3093_v7 = vld [vmem:[%s3220_s23 + $0x410] sm:$0xff]  }
  0x78   : > { %2119 = vmatmul.mubr.bf16.vlgmr.msra.gmra.mxu1 %v336_v8  ;;  %2791 = vmatpush3.bf16.msra.mxu0 %v3040_v6  ;;  %v3092_v6 = vld [vmem:[%s3220_s23 + $0x4d0] sm:$0xff]  }
  0x79   : > { %2813 = vmatpush3.bf16.msra.mxu1 %v3041_v9  ;;  %2792 = vmatprep.subr.bf16.mxu0 %v3042_v10  ;;  %v3094_v8 = vld [vmem:[%s3220_s23 + $0x490] sm:$0xff]   ;;  %v3095_v9 = vld [vmem:[%s3220_s23 + $0x448] sm:$0xff]  }
  0x7a   : > { %2814 = vmatprep.subr.bf16.mxu1 %v3043_v11  ;;  %2158 = vmatprep.mubr.bf16.mxu0 %v339_v44  ;;  %v3096_v10 = vld [vmem:[%s3220_s23 + $0x4c8] sm:$0xff]   ;;  %v3120_v44 = vld [vmem:[%s3220_s23 + $0x558] sm:$0xff]  }
  0x7b   : > { %2198 = vmatprep.mubr.bf16.mxu1 %v341_v47  ;;  %v3097_v11 = vld [vmem:[%s3220_s23 + $0x408] sm:$0xff]   ;;  %v3123_v47 = vld [vmem:[%s3220_s23 + $0x598] sm:$0xff]  }
  0x7c   : > { %2793 = vmatpush3.bf16.msra.mxu0 %v3044_v12  ;;  %v192_v12 = vld [vmem:[%s3215_s19 + $0x20] sm:$0xff] }
  0x7d   : > { %2815 = vmatpush3.bf16.msra.mxu1 %v3045_v13  ;;  %2794 = vmatprep.subr.bf16.mxu0 %v3046_v14  ;;  %v3098_v13 = vld [vmem:[%s3220_s23 + $0x488] sm:$0xff]   ;;  %v275_v14 = vrot.slane %v192_v12, %v3258_v42 }
  0x7e   : > { %2816 = vmatprep.subr.bf16.mxu1 %v3047_v15  ;;  %v268_v15 = vcombine.high %v192_v12, %v192_v12 }
  0x80   : > { %2795 = vmatpush3.bf16.msra.mxu0 %v3048_v16  ;;  %v3099_v16 = vld [vmem:[%s3220_s23 + $0x440] sm:$0xff]  }
  0x81   : > { %2817 = vmatpush3.bf16.msra.mxu1 %v3049_v17  ;;  %2796 = vmatprep.subr.bf16.mxu0 %v3050_v18  ;;  %v3100_v17 = vld [vmem:[%s3220_s23 + $0x4c0] sm:$0xff]   ;;  %v283_v18 = vcombine.high %v275_v14, %v275_v14 }
  0x82   : > { %2818 = vmatprep.subr.bf16.mxu1 %v3051_v19  ;;  %v282_v19 = vrot.slane %v268_v15, %v3258_v42 }
  0x84   : > { %2797 = vmatpush3.bf16.msra.mxu0 %v3052_v20  ;;  %v3101_v20 = vld [vmem:[%s3220_s23 + $0x400] sm:$0xff]  }
  0x85   : > { %2819 = vmatpush3.bf16.msra.mxu1 %v3053_v21  ;;  %2798 = vmatprep.subr.bf16.mxu0 %v3054_v22  ;;  %v3102_v21 = vld [vmem:[%s3220_s23 + $0x480] sm:$0xff]   ;;  %v343_v22 = vpack.c.bf16 %v283_v18, %v283_v18 }
  0x86   : > { %2820 = vmatprep.subr.bf16.mxu1 %v3055_v23  ;;  %v284_v23 = vcombine.high %v282_v19, %v282_v19 }
  0x88   : > { %2799 = vmatpush3.bf16.msra.mxu0 %v3056_v24  ;;  %v3104_v24 = vld [vmem:[%s3220_s23 + $0x578] sm:$0xff]  }
  0x89   : > { %2821 = vmatpush3.bf16.msra.mxu1 %v3057_v25  ;;  %2800 = vmatprep.subr.bf16.mxu0 %v3058_v26  ;;  %v345_v25 = vpack.c.bf16 %v284_v23, %v284_v23  ;;  %v3105_v26 = vld [vmem:[%s3220_s23 + $0x5f8] sm:$0xff]  }
  0x8a   : > { %2822 = vmatprep.subr.bf16.mxu1 %v3059_v27  ;;  %v3106_v27 = vld [vmem:[%s3220_s23 + $0x538] sm:$0xff]  }
  0x8c   : > { %2801 = vmatpush3.bf16.msra.mxu0 %v3060_v28  ;;  %v342_v28 = vpack.c.bf16 %v275_v14, %v275_v14 }
  0x8d   : > { %2823 = vmatpush3.bf16.msra.mxu1 %v3061_v29  ;;  %2802 = vmatprep.subr.bf16.mxu0 %v3062_v30  ;;  %v344_v29 = vpack.c.bf16 %v282_v19, %v282_v19  ;;  %v3107_v30 = vld [vmem:[%s3220_s23 + $0x5b8] sm:$0xff]  }
  0x8e   : > { %2824 = vmatprep.subr.bf16.mxu1 %v3063_v31  ;;  %v3108_v31 = vld [vmem:[%s3220_s23 + $0x570] sm:$0xff]  }
  0x90   : > { %2803 = vmatpush3.bf16.msra.mxu0 %v3064_v32  ;;  %v3109_v32 = vld [vmem:[%s3220_s23 + $0x5f0] sm:$0xff]  }
  0x91   : > { %2825 = vmatpush3.bf16.msra.mxu1 %v3065_v34  ;;  %2804 = vmatprep.subr.bf16.mxu0 %v3066_v37  ;;  %v3111_v34 = vld [vmem:[%s3220_s23 + $0x5b0] sm:$0xff]   ;;  %v3114_v37 = vld [vmem:[%s3220_s23 + $0x528] sm:$0xff]  }
  0x92   : > { %2826 = vmatprep.subr.bf16.mxu1 %v3067_v38  ;;  %v3115_v38 = vld [vmem:[%s3220_s23 + $0x5a8] sm:$0xff]  }
  0x94   : > { %2805 = vmatpush3.bf16.msra.mxu0 %v3068_v41  ;;  %v3118_v41 = vld [vmem:[%s3220_s23 + $0x520] sm:$0xff]  }
  0x95   : > { %2827 = vmatpush3.bf16.msra.mxu1 %v3069_v43  ;;  %2834 = vmatprep.subr.bf16.mxu0 %v3071_v46  ;;  %v3119_v43 = vld [vmem:[%s3220_s23 + $0x5a0] sm:$0xff]   ;;  %v3122_v46 = vld [vmem:[%s3220_s23 + $0x518] sm:$0xff]  }
  0x96   : > { %2856 = vmatprep.subr.bf16.mxu1 %v3072_v48  ;;  %v3124_v48 = vld [vmem:[%s3220_s23 + $0x550] sm:$0xff]  }
  0x97   : > { %2159 = vmatmul.mubr.bf16.vlgmr.msra.gmra.mxu0 %v338_v50  ;;  %v3126_v50 = vld [vmem:[%s3220_s23 + $0x510] sm:$0xff]  }
  0x98   : > { %2199 = vmatmul.mubr.bf16.vlgmr.msra.gmra.mxu1 %v340_v51  ;;  %2835 = vmatpush3.bf16.msra.mxu0 %v3073_v49  ;;  %v3125_v49 = vld [vmem:[%s3220_s23 + $0x5d0] sm:$0xff]  }
  0x99   : > { %2857 = vmatpush3.bf16.msra.mxu1 %v3074_v52  ;;  %2836 = vmatprep.subr.bf16.mxu0 %v3075_v53  ;;  %v3127_v51 = vld [vmem:[%s3220_s23 + $0x590] sm:$0xff]   ;;  %v3128_v52 = vld [vmem:[%s3220_s23 + $0x548] sm:$0xff]  }
  0x9a   : > { %2858 = vmatprep.subr.bf16.mxu1 %v3076_v54  ;;  %2238 = vmatprep.mubr.bf16.mxu0 %v343_v22  ;;  %v3129_v53 = vld [vmem:[%s3220_s23 + $0x5c8] sm:$0xff]  }
  0x9b   : > { %2278 = vmatprep.mubr.bf16.mxu1 %v345_v25  ;;  %v193_v54 = vld [vmem:[%s3215_s19 + $0x28] sm:$0xff] }
  0x9c   : > { %2837 = vmatpush3.bf16.msra.mxu0 %v3077_v55  ;;  %v292_v55 = vrot.slane %v193_v54, %v3258_v42 }
  0x9d   : > { %2859 = vmatpush3.bf16.msra.mxu1 %v3078_v56  ;;  %2838 = vmatprep.subr.bf16.mxu0 %v3079_v57  ;;  %v285_v56 = vcombine.high %v193_v54, %v193_v54  ;;  %v3130_v57 = vld [vmem:[%s3220_s23 + $0x508] sm:$0xff]  }
  0x9e   : > { %2860 = vmatprep.subr.bf16.mxu1 %v3080_v58  ;;  %v3131_v58 = vld [vmem:[%s3220_s23 + $0x588] sm:$0xff]  }
  0xa0   : > { %2839 = vmatpush3.bf16.msra.mxu0 %v3081_v59  ;;  %v3132_v59 = vld [vmem:[%s3220_s23 + $0x540] sm:$0xff]  }
  0xa1   : > { %2861 = vmatpush3.bf16.msra.mxu1 %v3082_v60  ;;  %2840 = vmatprep.subr.bf16.mxu0 %v3083_v61  ;;  %v3133_v60 = vld [vmem:[%s3220_s23 + $0x5c0] sm:$0xff]   ;;  %v300_v61 = vcombine.high %v292_v55, %v292_v55 }
  0xa2   : > { %2862 = vmatprep.subr.bf16.mxu1 %v3084_v62  ;;  %v299_v62 = vrot.slane %v285_v56, %v3258_v42 }
  0xa4   : > { %2841 = vmatpush3.bf16.msra.mxu0 %v3085_v63  ;;  %v347_v63 = vpack.c.bf16 %v300_v61, %v300_v61 }
  0xa5   : > { %2863 = vmatpush3.bf16.msra.mxu1 %v3086_v0  ;;  %2842 = vmatprep.subr.bf16.mxu0 %v3087_v1  ;;  %v301_v0 = vcombine.high %v299_v62, %v299_v62  ;;  %v3134_v1 = vld [vmem:[%s3220_s23 + $0x500] sm:$0xff]  }
  0xa6   : > { %2864 = vmatprep.subr.bf16.mxu1 %v3088_v2  ;;  %v3135_v2 = vld [vmem:[%s3220_s23 + $0x580] sm:$0xff]  }
  0xa8   : > { %2843 = vmatpush3.bf16.msra.mxu0 %v3089_v3  ;;  %v349_v3 = vpack.c.bf16 %v301_v0, %v301_v0 }
  0xa9   : > { %2865 = vmatpush3.bf16.msra.mxu1 %v3090_v4  ;;  %2844 = vmatprep.subr.bf16.mxu0 %v3091_v5  ;;  %v346_v4 = vpack.c.bf16 %v292_v55, %v292_v55  ;;  %v348_v5 = vpack.c.bf16 %v299_v62, %v299_v62 }
  0xaa   : > { %2866 = vmatprep.subr.bf16.mxu1 %v3092_v6 }
  0xac   : > { %2845 = vmatpush3.bf16.msra.mxu0 %v3093_v7 }
  0xad   : > { %2867 = vmatpush3.bf16.msra.mxu1 %v3094_v8  ;;  %2846 = vmatprep.subr.bf16.mxu0 %v3095_v9 }
  0xae   : > { %2868 = vmatprep.subr.bf16.mxu1 %v3096_v10 }
  0xb0   : > { %2847 = vmatpush3.bf16.msra.mxu0 %v3097_v11 }
  0xb1   : > { %2869 = vmatpush3.bf16.msra.mxu1 %v3098_v13  ;;  %2848 = vmatprep.subr.bf16.mxu0 %v3099_v16 }
  0xb2   : > { %2870 = vmatprep.subr.bf16.mxu1 %v3100_v17 }
  0xb4   : > { %2849 = vmatpush3.bf16.msra.mxu0 %v3101_v20 }
  0xb5   : > { %2871 = vmatpush3.bf16.msra.mxu1 %v3102_v21  ;;  %2878 = vmatprep.subr.bf16.mxu0 %v3104_v24 }
  0xb6   : > { %2900 = vmatprep.subr.bf16.mxu1 %v3105_v26 }
  0xb7   : > { %2239 = vmatmul.mubr.bf16.vlgmr.msra.gmra.mxu0 %v342_v28 }
  0xb8   : > { %2279 = vmatmul.mubr.bf16.vlgmr.msra.gmra.mxu1 %v344_v29  ;;  %2879 = vmatpush3.bf16.msra.mxu0 %v3106_v27 }
  0xb9   : > { %2901 = vmatpush3.bf16.msra.mxu1 %v3107_v30  ;;  %2880 = vmatprep.subr.bf16.mxu0 %v3108_v31 }
  0xba   : > { %2902 = vmatprep.subr.bf16.mxu1 %v3109_v32  ;;  %2318 = vmatprep.mubr.bf16.mxu0 %v347_v63 }
  0xbb   : > { %2358 = vmatprep.mubr.bf16.mxu1 %v349_v3 }
  0xbc   : > { %2881 = vmatpush3.bf16.msra.mxu0 %v3110_v33 }
  0xbd   : > { %2903 = vmatpush3.bf16.msra.mxu1 %v3111_v34  ;;  %2882 = vmatprep.subr.bf16.mxu0 %v3112_v35 }
  0xbe   : > { %2904 = vmatprep.subr.bf16.mxu1 %v3113_v36 }
  0xc0   : > { %2883 = vmatpush3.bf16.msra.mxu0 %v3114_v37 }
  0xc1   : > { %2905 = vmatpush3.bf16.msra.mxu1 %v3115_v38  ;;  %2884 = vmatprep.subr.bf16.mxu0 %v3116_v39 }
  0xc2   : > { %2906 = vmatprep.subr.bf16.mxu1 %v3117_v40 }
  0xc4   : > { %2885 = vmatpush3.bf16.msra.mxu0 %v3118_v41 }
  0xc5   : > { %2907 = vmatpush3.bf16.msra.mxu1 %v3119_v43  ;;  %2886 = vmatprep.subr.bf16.mxu0 %v3120_v44 }
  0xc6   : > { %2908 = vmatprep.subr.bf16.mxu1 %v3121_v45 }
  0xc8   : > { %2887 = vmatpush3.bf16.msra.mxu0 %v3122_v46 }
  0xc9   : > { %2909 = vmatpush3.bf16.msra.mxu1 %v3123_v47  ;;  %2888 = vmatprep.subr.bf16.mxu0 %v3124_v48 }
  0xca   : > { %2910 = vmatprep.subr.bf16.mxu1 %v3125_v49 }
  0xcc   : > { %2889 = vmatpush3.bf16.msra.mxu0 %v3126_v50 }
  0xcd   : > { %2911 = vmatpush3.bf16.msra.mxu1 %v3127_v51  ;;  %2890 = vmatprep.subr.bf16.mxu0 %v3128_v52 }
  0xce   : > { %2912 = vmatprep.subr.bf16.mxu1 %v3129_v53 }
  0xd0   : > { %2891 = vmatpush3.bf16.msra.mxu0 %v3130_v57 }
  0xd1   : > { %2913 = vmatpush3.bf16.msra.mxu1 %v3131_v58  ;;  %2892 = vmatprep.subr.bf16.mxu0 %v3132_v59 }
  0xd2   : > { %2914 = vmatprep.subr.bf16.mxu1 %v3133_v60 }
  0xd4   : > { %2893 = vmatpush3.bf16.msra.mxu0 %v3134_v1 }
  0xd5   : > { %2915 = vmatpush3.bf16.msra.mxu1 %v3135_v2 }
  0xd7   : > { %2319 = vmatmul.mubr.bf16.vlgmr.msra.gmra.mxu0 %v346_v4 }
  0xd8   : > { %2359 = vmatmul.mubr.bf16.vlgmr.msra.gmra.mxu1 %v348_v5 }
  0xf7   : > { %v2674_v6 = vpop.f32.mrf.mxu0 }
  0xf8   : > { %v2696_v7 = vpop.f32.mrf.mxu1 }
  0xf9   : > { %v2675_v42 = vpop.f32.mrf.mxu0 }
  0xfa   : > { %v2697_v8 = vpop.f32.mrf.mxu1  ;;  %v2676_v9 = vadd.f32 %v2675_v42, %v2674_v6 }
  0xfb   : > { %v2698_v10 = vadd.f32 %v2697_v8, %v2696_v7  ;;  %v2677_v11 = vpop.f32.mrf.mxu0 }
  0xfc   : > { %v2699_v12 = vpop.f32.mrf.mxu1 }
  0xfd   : > { %v1961_v13 = vadd.f32 %v2698_v10, %v2676_v9  ;;  %v2678_v14 = vpop.f32.mrf.mxu0  ;;  %v187_v9 = vld [vmem:[#allocation2] sm:$0x3] }
  0xfe   : > { %v2700_v15 = vpop.f32.mrf.mxu1 }
 0x117   : > { %v2718_v16 = vpop.f32.mrf.mxu0 }
 0x118   : > { %v2740_v17 = vpop.f32.mrf.mxu1 }
 0x119   : > { %v2719_v18 = vpop.f32.mrf.mxu0 }
 0x11a   : > { %v2741_v19 = vpop.f32.mrf.mxu1  ;;  %v2720_v20 = vadd.f32 %v2719_v18, %v2718_v16 }
 0x11b   : > { %v2742_v21 = vadd.f32 %v2741_v19, %v2740_v17  ;;  %v2721_v22 = vpop.f32.mrf.mxu0 }
 0x11c   : > { %v2743_v23 = vpop.f32.mrf.mxu1  ;;  %v2001_v24 = vadd.f32 %v2720_v20, %v1961_v13 }
 0x11d   : > { %v2722_v25 = vpop.f32.mrf.mxu0 }
 0x11e   : > { %v2744_v26 = vpop.f32.mrf.mxu1  ;;  %v2041_v27 = vadd.f32 %v2742_v21, %v2001_v24 }
 0x137   : > { %v2762_v28 = vpop.f32.mrf.mxu0 }
 0x138   : > { %v2784_v29 = vpop.f32.mrf.mxu1 }
 0x139   : > { %v2763_v30 = vpop.f32.mrf.mxu0 }
 0x13a   : > { %v2785_v31 = vpop.f32.mrf.mxu1  ;;  %v2764_v32 = vadd.f32 %v2763_v30, %v2762_v28 }
 0x13b   : > { %v2786_v33 = vadd.f32 %v2785_v31, %v2784_v29  ;;  %v2765_v34 = vpop.f32.mrf.mxu0 }
 0x13c   : > { %v2787_v35 = vpop.f32.mrf.mxu1  ;;  %v2081_v36 = vadd.f32 %v2764_v32, %v2041_v27 }
 0x13d   : > { %v2766_v37 = vpop.f32.mrf.mxu0 }
 0x13e   : > { %v2788_v38 = vpop.f32.mrf.mxu1  ;;  %v2121_v39 = vadd.f32 %v2786_v33, %v2081_v36 }
 0x157   : > { %v2806_v40 = vpop.f32.mrf.mxu0 }
 0x158   : > { %v2828_v41 = vpop.f32.mrf.mxu1 }
 0x159   : > { %v2807_v43 = vpop.f32.mrf.mxu0 }
 0x15a   : > { %v2829_v44 = vpop.f32.mrf.mxu1  ;;  %v2808_v57 = vadd.f32 %v2807_v43, %v2806_v40 }
 0x15b   : > { %v2809_v45 = vpop.f32.mrf.mxu0  ;;  %v2830_v59 = vadd.f32 %v2829_v44, %v2828_v41 }
 0x15c   : > { %v2831_v46 = vpop.f32.mrf.mxu1  ;;  %v2161_v58 = vadd.f32 %v2808_v57, %v2121_v39 }
 0x15d   : > { %v2810_v47 = vpop.f32.mrf.mxu0 }
 0x15e   : > { %v2832_v48 = vpop.f32.mrf.mxu1  ;;  %v2201_v61 = vadd.f32 %v2830_v59, %v2161_v58 }
 0x177   : > { %v2850_v49 = vpop.f32.mrf.mxu0 }
 0x178   : > { %v2872_v50 = vpop.f32.mrf.mxu1 }
 0x179   : > { %v2851_v51 = vpop.f32.mrf.mxu0 }
 0x17a   : > { %v2873_v52 = vpop.f32.mrf.mxu1  ;;  %v2852_v60 = vadd.f32 %v2851_v51, %v2850_v49 }
 0x17b   : > { %v2853_v53 = vpop.f32.mrf.mxu0  ;;  %v2874_v63 = vadd.f32 %v2873_v52, %v2872_v50 }
 0x17c   : > { %v2875_v54 = vpop.f32.mrf.mxu1  ;;  %v2241_v62 = vadd.f32 %v2852_v60, %v2201_v61 }
 0x17d   : > { %v2854_v55 = vpop.f32.mrf.mxu0 }
 0x17e   : > { %v2876_v56 = vpop.f32.mrf.mxu1  ;;  %v2281_v4 = vadd.f32 %v2874_v63, %v2241_v62 }
 0x197   : > { %v2894_v0 = vpop.f32.mrf.mxu0 }
 0x198   : > { %v2916_v1 = vpop.f32.mrf.mxu1 }
 0x199   : > { %v2895_v2 = vpop.f32.mrf.mxu0 }
 0x19a   : > { %v2917_v3 = vpop.f32.mrf.mxu1  ;;  %v2896_v5 = vadd.f32 %v2895_v2, %v2894_v0 }
 0x19b   : > { %v2897_v6 = vpop.f32.mrf.mxu0  ;;  %v2918_v8 = vadd.f32 %v2917_v3, %v2916_v1 }
 0x19c   : > { %v2919_v7 = vpop.f32.mrf.mxu1  ;;  %v2321_v42 = vadd.f32 %v2896_v5, %v2281_v4 }
 0x19d   : > { %v2898_v10 = vpop.f32.mrf.mxu0 }
 0x19e   : > { %v2920_v11 = vpop.f32.mrf.mxu1  ;;  %v2361_v12 = vadd.f32 %v2918_v8, %v2321_v42  ;;  %2371 = sbr.rel (%p2652_p6) target bundleno = 743 (0x2e7), region = 40 }
 0x1a0   : > { %v2366_v13 = vadd.f32 %v2361_v12, %v187_v9 }
 0x1a2   : > { %2367 = vst [vmem:[#allocation2] sm:$0x3] %v2366_v13 }
 0x1a3   : > { %v2653_v15 = vld [vmem:[%s3456_s2] ss:$0 sm:$0xff]  ;;  %vm2381_vm0 = vcmask 1041408  }
 0x1a9   : > { %v2372_v14 = vld [vmem:[#allocation2] sm:$0x3] }
 0x1aa   : > { %v2380_v16 = vadd.f32 %v2653_v15, %v2372_v14 }
 0x1ac   : > { %v2382_v17 = vsel %vm2381_vm0, %v2380_v16, -inf }
 0x1ad   : > { %2383 = vmax.xlane.f32.xlu0 %v2382_v17 }
 0x236   : > { %v2384_v18 = vpop.xlane.xlu0 %2383 }
 0x237   : > { %v2385_v19 = vsub.f32 %v2380_v16, %v2384_v18 }
 0x239   : > { %v2386_v20 = vmul.f32 1.442695, %v2385_v19 }
 0x23b   : > { %3137 = vpow2.f32 %v2386_v20 }
 0x248   : > { %v3138_v21 = vpop.eup %3137 }
 0x249   : > { %v2388_v22 = vsel %vm2381_vm0, %v3138_v21, 0.0 }
 0x24a   : > { %2389 = vadd.xlane.f32.xlu0 %v2388_v22 }
 0x2d3   : > { %v2390_v23 = vpop.xlane.xlu0 %2389 }
 0x2d4   : > { %3139 = vlog2.f32 %v2390_v23 }
 0x2e1   : > { %v3140_v24 = vpop.eup %3139 }
 0x2e2   : > { %v2392_v25 = vmul.f32 0.6931472, %v3140_v24 }
 0x2e4   : > { %v2393_v26 = vsub.f32 %v2385_v19, %v2392_v25 }
 0x2e6   : > { %2394 = vst [vmem:[#allocation3] sm:$0x3] %v2393_v26 }
 0x2e7 PF: > { %p2926_p7 = scmp.eq.s32.totalorder %s3206_s13, 3  ;;  %s3179_s26 = smov [#allocation3]  }
 0x2e8   : > { %s2402_s27 = sshll.u32 %s3179_s26, 4  ;;  %s2403_s27 = int_to_ptr.vmem [resolvable:$true] %s2402_s27 }
 0x2e9   : > { %s3141_s28 = scalar_lea.vmem %s2403_s27, 32  ;;  %p3148_p11 = scmp.lt.s32.totalorder %s2403_s27, %s2403_s27 }
 0x2ea   : > { %p3142_p8 = scmp.ne.s32.totalorder %s2403_s27, %s3141_s28  ;;  %p3149_p12 = scmp.lt.s32.totalorder %s3141_s28, %s3141_s28 }
 0x2ec   : > { %p3143_p9 = pnand %p3142_p8, %p2926_p7  ;;  %p3150_p13 = por %p3149_p12, %p3148_p11 }
 0x2ee   : > { %p3144_p10 = pneg %p3143_p9 }
 0x2f0   : > { %p3151_p0 = pnand %p3150_p13, %p3144_p10 }
 0x2f2   : > { %3154 = shalt.err (!%p3151_p0)
}
 0x2f3   : > { %2923 = dma.vmem_to_hbm [thread:$0]  (%p2926_p7), %s2403_s27, 32, %s3457_s3, [#allocation4]  }
 0x2f4   : > { %3170 = dma.done.wait (%p2926_p7), [#allocation4], 32  }
 0x2f5   : > { %3172 = vsyncadd (%p2926_p7), [#allocation4], 4294967264 }
 0x2f6 PF: > { %s14_s12 = sadd.s32 1, %s3175_s12  }
 0x2f7   : > { %p11_p1 = scmp.ge.s32.totalorder %s14_s12, 6  }
 0x2f9   :  { %13 = sbr.rel (!%p11_p1) target bundleno = 1 (0x1), region = 70 }
 0x2fe   :  { %2415 = vsyncpa [#allocation4], 1 }
 0x2ff   :  { %2417 = vsyncpa [#allocation4 + $0x1], 1 }

// kernel: language_model_forward.2
= control target key start
LH: loop header
LB: loop body
LE: loop exit
PB: predicated region body
PF: predicated region fallthrough
CT: control target
= control target key end

     0   :  { %s9873_s25 = smov 0   ;;  %s14399_s0 = inlined_call_operand.vmem [shape: f32[128,192], index: 0, kind: input, shape index: {}]   ;;  %s14400_s1 = inlined_call_operand.vmem [shape: f32[128,128], index: 1, kind: input, shape index: {}]   ;;  %s14401_s2 = inlined_call_operand.vmem [shape: f32[6,1,192], index: 2, kind: input, shape index: {}]   ;;  %s14402_s3 = inlined_call_operand.vmem [shape: f32[6,1,192], index: 3, kind: input, shape index: {}]   ;;  %s14403_s4 = inlined_call_operand.vmem [shape: bf16[6,192,576], index: 4, kind: input, shape index: {}]   ;;  %s14404_s5 = inlined_call_operand.vmem [shape: f32[6,1,192], index: 5, kind: input, shape index: {}]   ;;  %s14405_s6 = inlined_call_operand.vmem [shape: f32[6,1,192], index: 6, kind: input, shape index: {}]   ;;  %s14406_s7 = inlined_call_operand.vmem [shape: bf16[6,192,768], index: 7, kind: input, shape index: {}]   ;;  %s14407_s8 = inlined_call_operand.vmem [shape: f32[6,1,768], index: 8, kind: input, shape index: {}]   ;;  %s14408_s9 = inlined_call_operand.vmem [shape: bf16[6,768,192], index: 9, kind: input, shape index: {}]   ;;  %s14409_s10 = inlined_call_operand.vmem [shape: f32[6,1,192], index: 10, kind: input, shape index: {}]   ;;  %s14410_s11 = inlined_call_operand.vmem [shape: f32[1,192], index: 11, kind: input, shape index: {}]   ;;  %s14411_s12 = inlined_call_operand.vmem [shape: f32[1,192], index: 12, kind: input, shape index: {}]   ;;  %s14412_s13 = inlined_call_operand.vmem [shape: f32[128,192], index: 13, kind: output, shape index: {}]  }
   0x1   :  { %14529 = sst [smem:[#allocation71_spill]] %s14403_s4 }
   0x2   :  { %14530 = sst [smem:[#allocation72_spill]] %s14410_s11 }
   0x3   :  { %14531 = sst [smem:[#allocation73_spill]] %s14411_s12 }
   0x4   :  { %14532 = sst [smem:[#allocation74_spill]] %s14412_s13 }
   0x5 LB: > { %14533 = sst [smem:[#allocation3_spill]] %s9797_s25  ;;  %s9879_s26 = sadd.s32 4294967295, %s9797_s25   ;;  %s9797_s25 = sphi %s9873_s25, %s23_s25  }
   0x6   : > { %p7934_p0 = scmp.ge.s32.totalorder %s9797_s25, 1  ;;  %p456_p1 = scmp.lt.s32.totalorder %s9797_s25, 7 }
   0x8   : > { %p457_p2 = pnand %p7934_p0, %p456_p1 }
   0xa   : > { %460 = sbr.rel (%p457_p2) target bundleno = 4803 (0x12c3), region = 72 }
   0xf   : > { %p529_p3 = scmp.lt.s32.totalorder %s9879_s26, 5  ;;  %s14534_s4 = sld [smem:[#allocation71_spill]] }
  0x10   : > { %p7943_p4 = scmp.ne.s32.totalorder %s9879_s26, 0 }
  0x11   : > { %s530_s27 = scalar_select %p529_p3, %s9879_s26, 5 }
  0x13   : > { %s9885_s28 = sshll.u32 %s530_s27, 1  ;;  %s8895_s29 = smul.u32 480, %s530_s27 }
  0x14   : > { %s545_s24 = scalar_lea.vmem %s14404_s5, %s9885_s28  ;;  %s549_s12 = scalar_lea.vmem %s14405_s6, %s9885_s28 }
  0x15   : > { %s9898_s21 = scalar_lea.vmem %s14534_s4, %s8895_s29  ;;  %s8896_s11 = smul.u32 576, %s530_s27 }
  0x16   : > { %s8897_s30 = smul.u32 6, %s530_s27  ;;  %s567_s16 = scalar_lea.vmem %s14409_s10, %s9885_s28 }
  0x17   : > { %s9915_s19 = scalar_lea.vmem %s14406_s7, %s8896_s11  ;;  %s8898_s29 = smul.u32 768, %s530_s27 }
  0x18   : > { %s9920_s22 = scalar_lea.vmem %s14407_s8, %s8897_s30  ;;  %572 = sbr.rel (%p7943_p4) target bundleno = 46 (0x2e), region = 76 }
  0x19   : > { %s9925_s25 = scalar_lea.vmem %s14408_s9, %s8898_s29 }
  0x1d   : > { %v573_v0 = vld [vmem:[%s14399_s0] sm:$0xff]  ;;  %v574_v1 = vld [vmem:[%s14399_s0 + $0x8] sm:$0xff]  ;;  %vm606_vm0 = vcmask 523264   ;;  %v575_v2 = vld [vmem:[%s14399_s0 + $0x10] sm:$0xff] }
  0x1e   : > { %605 = vst [vmem:[#allocation2] sm:$0xff] %v573_v0  ;;  %607 = vst.msk [vmem:[#allocation2 + $0x8] sm:$0xff] %vm606_vm0, %v574_v1  ;;  %v576_v3 = vld [vmem:[%s14399_s0 + $0x18] sm:$0xff]  ;;  %v577_v4 = vld [vmem:[%s14399_s0 + $0x20] sm:$0xff] }
  0x1f   : > { %608 = vst [vmem:[#allocation2 + $0x10] sm:$0xff] %v575_v2  ;;  %v578_v5 = vld [vmem:[%s14399_s0 + $0x28] sm:$0xff]  ;;  %609 = vst.msk [vmem:[#allocation2 + $0x18] sm:$0xff] %vm606_vm0, %v576_v3  ;;  %v579_v6 = vld [vmem:[%s14399_s0 + $0x30] sm:$0xff] }
  0x20   : > { %610 = vst [vmem:[#allocation2 + $0x20] sm:$0xff] %v577_v4  ;;  %611 = vst.msk [vmem:[#allocation2 + $0x28] sm:$0xff] %vm606_vm0, %v578_v5  ;;  %v580_v7 = vld [vmem:[%s14399_s0 + $0x38] sm:$0xff]  ;;  %v581_v8 = vld [vmem:[%s14399_s0 + $0x40] sm:$0xff] }
  0x21   : > { %612 = vst [vmem:[#allocation2 + $0x30] sm:$0xff] %v579_v6  ;;  %613 = vst.msk [vmem:[#allocation2 + $0x38] sm:$0xff] %vm606_vm0, %v580_v7  ;;  %v582_v9 = vld [vmem:[%s14399_s0 + $0x48] sm:$0xff]  ;;  %v583_v10 = vld [vmem:[%s14399_s0 + $0x50] sm:$0xff] }
  0x22   : > { %614 = vst [vmem:[#allocation2 + $0x40] sm:$0xff] %v581_v8  ;;  %v584_v11 = vld [vmem:[%s14399_s0 + $0x58] sm:$0xff]  ;;  %615 = vst.msk [vmem:[#allocation2 + $0x48] sm:$0xff] %vm606_vm0, %v582_v9  ;;  %v585_v12 = vld [vmem:[%s14399_s0 + $0x60] sm:$0xff] }
  0x23   : > { %616 = vst [vmem:[#allocation2 + $0x50] sm:$0xff] %v583_v10  ;;  %617 = vst.msk [vmem:[#allocation2 + $0x58] sm:$0xff] %vm606_vm0, %v584_v11  ;;  %v586_v13 = vld [vmem:[%s14399_s0 + $0x68] sm:$0xff]  ;;  %v587_v14 = vld [vmem:[%s14399_s0 + $0x70] sm:$0xff] }
  0x24   : > { %618 = vst [vmem:[#allocation2 + $0x60] sm:$0xff] %v585_v12  ;;  %619 = vst.msk [vmem:[#allocation2 + $0x68] sm:$0xff] %vm606_vm0, %v586_v13  ;;  %v588_v15 = vld [vmem:[%s14399_s0 + $0x78] sm:$0xff]  ;;  %v589_v16 = vld [vmem:[%s14399_s0 + $0x80] sm:$0xff] }
  0x25   : > { %620 = vst [vmem:[#allocation2 + $0x70] sm:$0xff] %v587_v14  ;;  %v590_v17 = vld [vmem:[%s14399_s0 + $0x88] sm:$0xff]  ;;  %621 = vst.msk [vmem:[#allocation2 + $0x78] sm:$0xff] %vm606_vm0, %v588_v15  ;;  %v591_v18 = vld [vmem:[%s14399_s0 + $0x90] sm:$0xff] }
  0x26   : > { %622 = vst [vmem:[#allocation2 + $0x80] sm:$0xff] %v589_v16  ;;  %623 = vst.msk [vmem:[#allocation2 + $0x88] sm:$0xff] %vm606_vm0, %v590_v17  ;;  %v592_v19 = vld [vmem:[%s14399_s0 + $0x98] sm:$0xff]  ;;  %v593_v20 = vld [vmem:[%s14399_s0 + $0xa0] sm:$0xff] }
  0x27   : > { %624 = vst [vmem:[#allocation2 + $0x90] sm:$0xff] %v591_v18  ;;  %625 = vst.msk [vmem:[#allocation2 + $0x98] sm:$0xff] %vm606_vm0, %v592_v19  ;;  %v594_v21 = vld [vmem:[%s14399_s0 + $0xa8] sm:$0xff]  ;;  %v595_v22 = vld [vmem:[%s14399_s0 + $0xb0] sm:$0xff] }
  0x28   : > { %626 = vst [vmem:[#allocation2 + $0xa0] sm:$0xff] %v593_v20  ;;  %v596_v23 = vld [vmem:[%s14399_s0 + $0xb8] sm:$0xff]  ;;  %627 = vst.msk [vmem:[#allocation2 + $0xa8] sm:$0xff] %vm606_vm0, %v594_v21  ;;  %v597_v24 = vld [vmem:[%s14399_s0 + $0xc0] sm:$0xff] }
  0x29   : > { %628 = vst [vmem:[#allocation2 + $0xb0] sm:$0xff] %v595_v22  ;;  %629 = vst.msk [vmem:[#allocation2 + $0xb8] sm:$0xff] %vm606_vm0, %v596_v23  ;;  %v598_v25 = vld [vmem:[%s14399_s0 + $0xc8] sm:$0xff]  ;;  %v599_v26 = vld [vmem:[%s14399_s0 + $0xd0] sm:$0xff] }
  0x2a   : > { %630 = vst [vmem:[#allocation2 + $0xc0] sm:$0xff] %v597_v24  ;;  %631 = vst.msk [vmem:[#allocation2 + $0xc8] sm:$0xff] %vm606_vm0, %v598_v25  ;;  %v600_v27 = vld [vmem:[%s14399_s0 + $0xd8] sm:$0xff]  ;;  %v601_v28 = vld [vmem:[%s14399_s0 + $0xe0] sm:$0xff] }
  0x2b   : > { %632 = vst [vmem:[#allocation2 + $0xd0] sm:$0xff] %v599_v26  ;;  %v602_v29 = vld [vmem:[%s14399_s0 + $0xe8] sm:$0xff]  ;;  %633 = vst.msk [vmem:[#allocation2 + $0xd8] sm:$0xff] %vm606_vm0, %v600_v27  ;;  %v603_v30 = vld [vmem:[%s14399_s0 + $0xf0] sm:$0xff] }
  0x2c   : > { %634 = vst [vmem:[#allocation2 + $0xe0] sm:$0xff] %v601_v28  ;;  %635 = vst.msk [vmem:[#allocation2 + $0xe8] sm:$0xff] %vm606_vm0, %v602_v29  ;;  %v604_v31 = vld [vmem:[%s14399_s0 + $0xf8] sm:$0xff] }
  0x2d   : > { %636 = vst [vmem:[#allocation2 + $0xf0] sm:$0xff] %v603_v30  ;;  %637 = vst.msk [vmem:[#allocation2 + $0xf8] sm:$0xff] %vm606_vm0, %v604_v31 }
  0x2e PF: > { %v10040_v32 = vld [vmem:[#allocation2] sm:$0xff]  ;;  %v10042_v33 = vld [vmem:[#allocation2 + $0x8] sm:$0xff]  ;;  %vm672_vm1 = vcmask 523264   ;;  %v10050_v37 = vld [vmem:[#allocation2 + $0x10] sm:$0xff]  ;;  %s14538_s30 = scalar_lea.vmem %s14401_s2, %s9885_s28  ;;  %s14539_s20 = scalar_lea.vmem %s14402_s3, %s9885_s28  ;;  %vm1875_vm2 = vcmask 261120   ;;  %vm4976_vm3 = vcmask 785408  }
  0x2f   : > { %v10044_v34 = vld [vmem:[#allocation2 + $0x20] sm:$0xff]  ;;  %v673_v35 = vsel %vm672_vm1, %v10042_v33, 0.0  ;;  %v10048_v36 = vld [vmem:[#allocation2 + $0x28] sm:$0xff]  ;;  %v10052_v38 = vld [vmem:[#allocation2 + $0x18] sm:$0xff]  ;;  %s9801_s23 = smov 64   ;;  %s9802_s13 = smov 96  }
  0x30   : > { %v674_v39 = vadd.f32 %v673_v35, %v10040_v32  ;;  %v681_v40 = vsel %vm672_vm1, %v10048_v36, 0.0  ;;  %v677_v41 = vsel %vm672_vm1, %v10052_v38, 0.0  ;;  %v10059_v42 = vld [vmem:[#allocation2 + $0x30] sm:$0xff]  ;;  %v10061_v43 = vld [vmem:[#allocation2 + $0x38] sm:$0xff]  ;;  %v10066_v46 = vld [vmem:[#allocation2 + $0x48] sm:$0xff]  ;;  %p8268_p5 = scmp.ne.s32.totalorder %s9879_s26, 5 }
  0x31   : > { %v682_v44 = vadd.f32 %v681_v40, %v10044_v34  ;;  %v685_v45 = vsel %vm672_vm1, %v10061_v43, 0.0  ;;  %v10068_v47 = vld [vmem:[#allocation2 + $0x58] sm:$0xff]  ;;  %v678_v48 = vadd.f32 %v677_v41, %v10050_v37  ;;  %v10072_v50 = vld [vmem:[#allocation2 + $0x40] sm:$0xff]  ;;  %v689_v51 = vsel %vm672_vm1, %v10066_v46, 0.0  ;;  %v10076_v52 = vld [vmem:[#allocation2 + $0x50] sm:$0xff] }
  0x32   : > { %675 = vadd.xlane.f32.xlu0 %v674_v39  ;;  %v686_v49 = vadd.f32 %v685_v45, %v10059_v42  ;;  %v693_v53 = vsel %vm672_vm1, %v10068_v47, 0.0  ;;  %v10080_v54 = vld [vmem:[#allocation2 + $0x68] sm:$0xff]  ;;  %v10082_v55 = vld [vmem:[#allocation2 + $0x78] sm:$0xff]  ;;  %v690_v56 = vadd.f32 %v689_v51, %v10072_v50  ;;  %v10086_v58 = vld [vmem:[#allocation2 + $0x60] sm:$0xff] }
  0x33   : > { %683 = vadd.xlane.f32.xlu1 %v682_v44  ;;  %v694_v57 = vadd.f32 %v693_v53, %v10076_v52  ;;  %v697_v59 = vsel %vm672_vm1, %v10080_v54, 0.0  ;;  %v10090_v60 = vld [vmem:[#allocation2 + $0x70] sm:$0xff]  ;;  %v701_v61 = vsel %vm672_vm1, %v10082_v55, 0.0  ;;  %v10094_v62 = vld [vmem:[#allocation2 + $0x88] sm:$0xff]  ;;  %v10096_v63 = vld [vmem:[#allocation2 + $0x98] sm:$0xff] }
  0x34   : > { %v10098_v0 = vld [vmem:[#allocation2 + $0x80] sm:$0xff]  ;;  %v698_v1 = vadd.f32 %v697_v59, %v10086_v58  ;;  %v10101_v2 = vld [vmem:[#allocation2 + $0x90] sm:$0xff]  ;;  %v10103_v3 = vld [vmem:[#allocation2 + $0xa8] sm:$0xff]  ;;  %v702_v4 = vadd.f32 %v701_v61, %v10090_v60  ;;  %v705_v5 = vsel %vm672_vm1, %v10094_v62, 0.0  ;;  %v709_v7 = vsel %vm672_vm1, %v10096_v63, 0.0 }
  0x35   : > { %v10108_v6 = vld [vmem:[#allocation2 + $0xb8] sm:$0xff]  ;;  %v10112_v8 = vld [vmem:[#allocation2 + $0xa0] sm:$0xff]  ;;  %v706_v9 = vadd.f32 %v705_v5, %v10098_v0  ;;  %v10115_v10 = vld [vmem:[#allocation2 + $0xb0] sm:$0xff]  ;;  %v710_v12 = vadd.f32 %v709_v7, %v10101_v2  ;;  %v713_v13 = vsel %vm672_vm1, %v10103_v3, 0.0 }
  0x36   : > { %679 = vadd.xlane.f32.xlu0 %v678_v48  ;;  %v10117_v11 = vld [vmem:[#allocation2 + $0xc8] sm:$0xff]  ;;  %v10122_v14 = vld [vmem:[#allocation2 + $0xd8] sm:$0xff]  ;;  %v717_v15 = vsel %vm672_vm1, %v10108_v6, 0.0  ;;  %v10126_v16 = vld [vmem:[#allocation2 + $0xc0] sm:$0xff]  ;;  %v714_v17 = vadd.f32 %v713_v13, %v10112_v8 }
  0x37   : > { %687 = vadd.xlane.f32.xlu1 %v686_v49  ;;  %v10129_v18 = vld [vmem:[#allocation2 + $0xd0] sm:$0xff]  ;;  %v10131_v19 = vld [vmem:[#allocation2 + $0xe8] sm:$0xff]  ;;  %v718_v20 = vadd.f32 %v717_v15, %v10115_v10  ;;  %v721_v21 = vsel %vm672_vm1, %v10117_v11, 0.0  ;;  %v10136_v22 = vld [vmem:[#allocation2 + $0xf8] sm:$0xff]  ;;  %v725_v23 = vsel %vm672_vm1, %v10122_v14, 0.0 }
  0x38   : > { %v10140_v24 = vld [vmem:[#allocation2 + $0xe0] sm:$0xff]  ;;  %v722_v25 = vadd.f32 %v721_v21, %v10126_v16  ;;  %v10143_v26 = vld [vmem:[#allocation2 + $0xf0] sm:$0xff]  ;;  %v726_v27 = vadd.f32 %v725_v23, %v10129_v18  ;;  %v729_v28 = vsel %vm672_vm1, %v10131_v19, 0.0  ;;  %v733_v29 = vsel %vm672_vm1, %v10136_v22, 0.0  ;;  %v8915_v40 = vld [vmem:[%s9898_s21 + $0x118] ss:$20 sps:$4 sm:$0xff]  }
  0x39   : > { %v730_v30 = vadd.f32 %v729_v28, %v10140_v24  ;;  %v734_v31 = vadd.f32 %v733_v29, %v10143_v26  ;;  %v8911_v35 = vld [vmem:[%s9898_s21 + $0x11c] ss:$20 sps:$4 sm:$0xff]   ;;  %v8913_v39 = vld [vmem:[%s9898_s21 + $0x124] ss:$20 sps:$4 sm:$0xff]   ;;  %v8916_v41 = vld [vmem:[%s9898_s21 + $0x120] ss:$20 sps:$4 sm:$0xff]  }
  0x3a   : > { %691 = vadd.xlane.f32.xlu0 %v690_v56  ;;  %v8917_v44 = vld [vmem:[%s9898_s21 + $0xf4] ss:$20 sps:$4 sm:$0xff]   ;;  %v8919_v45 = vld [vmem:[%s9898_s21 + $0xfc] ss:$20 sps:$4 sm:$0xff]   ;;  %1472 = vmatprep.subr.bf16.mxu0 %v8911_v35  ;;  %v8922_v49 = vld [vmem:[%s9898_s21 + $0xf8] ss:$20 sps:$4 sm:$0xff]  }
  0x3b   : > { %695 = vadd.xlane.f32.xlu1 %v694_v57  ;;  %1585 = vmatprep.subr.bf16.mxu1 %v8913_v39  ;;  %v8921_v48 = vld [vmem:[%s9898_s21 + $0xf0] ss:$20 sps:$4 sm:$0xff]   ;;  %v8923_v51 = vld [vmem:[%s9898_s21 + $0xcc] ss:$20 sps:$4 sm:$0xff]   ;;  %v8925_v53 = vld [vmem:[%s9898_s21 + $0xd4] ss:$20 sps:$4 sm:$0xff]  }
  0x3c   : > { %1473 = vmatpush1.bf16.msra.mxu0 %v8915_v40  ;;  %1586 = vmatpush1.bf16.msra.mxu1 %v8916_v41  ;;  %v8927_v56 = vld [vmem:[%s9898_s21 + $0xc8] ss:$20 sps:$4 sm:$0xff]   ;;  %v8928_v57 = vld [vmem:[%s9898_s21 + $0xd0] ss:$20 sps:$4 sm:$0xff]   ;;  %v8931_v61 = vld [vmem:[%s9898_s21 + $0xac] ss:$20 sps:$4 sm:$0xff]  }
  0x3d   : > { %1474 = vmatprep.subr.bf16.mxu0 %v8917_v44  ;;  %1587 = vmatprep.subr.bf16.mxu1 %v8919_v45  ;;  %v8929_v59 = vld [vmem:[%s9898_s21 + $0xa4] ss:$20 sps:$4 sm:$0xff]   ;;  %v8935_v5 = vld [vmem:[%s9898_s21 + $0x7c] ss:$20 sps:$4 sm:$0xff]  }
  0x3e   : > { %699 = vadd.xlane.f32.xlu0 %v698_v1  ;;  %v8933_v1 = vld [vmem:[%s9898_s21 + $0xa0] ss:$20 sps:$4 sm:$0xff]   ;;  %v8937_v7 = vld [vmem:[%s9898_s21 + $0x84] ss:$20 sps:$4 sm:$0xff]  }
  0x3f   : > { %703 = vadd.xlane.f32.xlu1 %v702_v4  ;;  %v8934_v4 = vld [vmem:[%s9898_s21 + $0xa8] ss:$20 sps:$4 sm:$0xff]  }
  0x40   : > { %1475 = vmatpush1.bf16.msra.mxu0 %v8921_v48  ;;  %1588 = vmatpush1.bf16.msra.mxu1 %v8922_v49 }
  0x41   : > { %1476 = vmatprep.subr.bf16.mxu0 %v8923_v51  ;;  %1589 = vmatprep.subr.bf16.mxu1 %v8925_v53 }
  0x42   : > { %707 = vadd.xlane.f32.xlu0 %v706_v9 }
  0x43   : > { %711 = vadd.xlane.f32.xlu1 %v710_v12 }
  0x44   : > { %1477 = vmatpush1.bf16.msra.mxu0 %v8927_v56  ;;  %1590 = vmatpush1.bf16.msra.mxu1 %v8928_v57 }
  0x45   : > { %1478 = vmatprep.subr.bf16.mxu0 %v8929_v59  ;;  %1591 = vmatprep.subr.bf16.mxu1 %v8931_v61 }
  0x46   : > { %715 = vadd.xlane.f32.xlu0 %v714_v17 }
  0x47   : > { %719 = vadd.xlane.f32.xlu1 %v718_v20 }
  0x48   : > { %1479 = vmatpush1.bf16.msra.mxu0 %v8933_v1  ;;  %1592 = vmatpush1.bf16.msra.mxu1 %v8934_v4 }
  0x49   : > { %1480 = vmatprep.subr.bf16.mxu0 %v8935_v5  ;;  %1593 = vmatprep.subr.bf16.mxu1 %v8937_v7 }
  0x4a   : > { %723 = vadd.xlane.f32.xlu0 %v722_v25 }
  0x4b   : > { %727 = vadd.xlane.f32.xlu1 %v726_v27 }
  0x4e   : > { %731 = vadd.xlane.f32.xlu0 %v730_v30 }
  0x4f   : > { %735 = vadd.xlane.f32.xlu1 %v734_v31 }
  0xbb   : > { %v676_v9 = vpop.xlane.xlu0 %675 }
  0xbc   : > { %v738_v12 = vmul.f32 0.0052083335, %v676_v9  ;;  %v684_v13 = vpop.xlane.xlu1 %683 }
  0xbd   : > { %v740_v15 = vmul.f32 0.0052083335, %v684_v13 }
  0xbe   : > { %v10171_v17 = vsub.f32 %v10040_v32, %v738_v12  ;;  %v10174_v20 = vsub.f32 %v10042_v33, %v738_v12 }
  0xbf   : > { %v10177_v21 = vsub.f32 %v10044_v34, %v740_v15  ;;  %v10180_v23 = vsub.f32 %v10048_v36, %v740_v15  ;;  %v680_v25 = vpop.xlane.xlu0 %679 }
  0xc0   : > { %v739_v27 = vmul.f32 0.0052083335, %v680_v25  ;;  %v688_v28 = vpop.xlane.xlu1 %687  ;;  %v786_v29 = vmul.f32 %v10171_v17, %v10171_v17  ;;  %v787_v30 = vmul.f32 %v10174_v20, %v10174_v20 }
  0xc1   : > { %v741_v32 = vmul.f32 0.0052083335, %v688_v28  ;;  %v790_v33 = vmul.f32 %v10177_v21, %v10177_v21  ;;  %v791_v34 = vmul.f32 %v10180_v23, %v10180_v23 }
  0xc2   : > { %v10191_v31 = vsub.f32 %v10050_v37, %v739_v27  ;;  %v10194_v36 = vsub.f32 %v10052_v38, %v739_v27  ;;  %v818_v35 = vsel %vm672_vm1, %v787_v30, 0.0 }
  0xc3   : > { %v10198_v39 = vsub.f32 %v10059_v42, %v741_v32  ;;  %v10201_v40 = vsub.f32 %v10061_v43, %v741_v32  ;;  %v692_v41 = vpop.xlane.xlu0 %691  ;;  %v819_v44 = vadd.f32 %v818_v35, %v786_v29  ;;  %v826_v45 = vsel %vm672_vm1, %v791_v34, 0.0 }
  0xc4   : > { %v742_v48 = vmul.f32 0.0052083335, %v692_v41  ;;  %v696_v49 = vpop.xlane.xlu1 %695  ;;  %v788_v37 = vmul.f32 %v10191_v31, %v10191_v31  ;;  %v789_v38 = vmul.f32 %v10194_v36, %v10194_v36  ;;  %v827_v53 = vadd.f32 %v826_v45, %v790_v33 }
  0xc5   : > { %820 = vadd.xlane.f32.xlu0 %v819_v44  ;;  %v743_v51 = vmul.f32 0.0052083335, %v696_v49  ;;  %v792_v42 = vmul.f32 %v10198_v39, %v10198_v39  ;;  %v793_v43 = vmul.f32 %v10201_v40, %v10201_v40  ;;  %v8940_v49 = vld [vmem:[%s9898_s21 + $0x80] ss:$20 sps:$4 sm:$0xff]  }
  0xc6   : > { %v10213_v56 = vsub.f32 %v10072_v50, %v742_v48  ;;  %v10216_v57 = vsub.f32 %v10066_v46, %v742_v48  ;;  %v822_v59 = vsel %vm672_vm1, %v789_v38, 0.0  ;;  %v8939_v48 = vld [vmem:[%s9898_s21 + $0x78] ss:$20 sps:$4 sm:$0xff]   ;;  %1594 = vmatpush1.bf16.msra.mxu1 %v8940_v49 }
  0xc7   : > { %v10220_v61 = vsub.f32 %v10076_v52, %v743_v51  ;;  %v10223_v1 = vsub.f32 %v10068_v47, %v743_v51  ;;  %v700_v4 = vpop.xlane.xlu0 %699  ;;  %v823_v5 = vadd.f32 %v822_v59, %v788_v37  ;;  %v830_v7 = vsel %vm672_vm1, %v793_v43, 0.0  ;;  %1481 = vmatpush1.bf16.msra.mxu0 %v8939_v48 }
  0xc8   : > { %v744_v9 = vmul.f32 0.0052083335, %v700_v4  ;;  %v704_v12 = vpop.xlane.xlu1 %703  ;;  %v794_v50 = vmul.f32 %v10213_v56, %v10213_v56  ;;  %v795_v46 = vmul.f32 %v10216_v57, %v10216_v57  ;;  %v831_v52 = vadd.f32 %v830_v7, %v792_v42  ;;  %v8941_v7 = vld [vmem:[%s9898_s21 + $0x54] ss:$20 sps:$4 sm:$0xff]  }
  0xc9   : > { %828 = vadd.xlane.f32.xlu0 %v827_v53  ;;  %824 = vadd.xlane.f32.xlu1 %v823_v5  ;;  %v745_v13 = vmul.f32 0.0052083335, %v704_v12  ;;  %v796_v47 = vmul.f32 %v10220_v61, %v10220_v61  ;;  %v797_v15 = vmul.f32 %v10223_v1, %v10223_v1 }
  0xca   : > { %v10235_v25 = vsub.f32 %v10086_v58, %v744_v9  ;;  %v10238_v27 = vsub.f32 %v10080_v54, %v744_v9  ;;  %v834_v28 = vsel %vm672_vm1, %v795_v46, 0.0  ;;  %v8943_v9 = vld [vmem:[%s9898_s21 + $0x5c] ss:$20 sps:$4 sm:$0xff]   ;;  %1482 = vmatprep.subr.bf16.mxu0 %v8941_v7 }
  0xcb   : > { %v10242_v29 = vsub.f32 %v10090_v60, %v745_v13  ;;  %v10245_v30 = vsub.f32 %v10082_v55, %v745_v13  ;;  %v708_v32 = vpop.xlane.xlu0 %707  ;;  %v835_v33 = vadd.f32 %v834_v28, %v794_v50  ;;  %v838_v34 = vsel %vm672_vm1, %v797_v15, 0.0  ;;  %1595 = vmatprep.subr.bf16.mxu1 %v8943_v9  ;;  %v8945_v15 = vld [vmem:[%s9898_s21 + $0x50] ss:$20 sps:$4 sm:$0xff]   ;;  %v8946_v28 = vld [vmem:[%s9898_s21 + $0x58] ss:$20 sps:$4 sm:$0xff]  }
  0xcc   : > { %v746_v35 = vmul.f32 0.0052083335, %v708_v32  ;;  %v712_v58 = vpop.xlane.xlu1 %711  ;;  %v798_v54 = vmul.f32 %v10235_v25, %v10235_v25  ;;  %v799_v41 = vmul.f32 %v10238_v27, %v10238_v27  ;;  %v839_v44 = vadd.f32 %v838_v34, %v796_v47  ;;  %1483 = vmatpush1.bf16.msra.mxu0 %v8945_v15  ;;  %1596 = vmatpush1.bf16.msra.mxu1 %v8946_v28 }
  0xcd   : > { %832 = vadd.xlane.f32.xlu1 %v831_v52  ;;  %836 = vadd.xlane.f32.xlu0 %v835_v33  ;;  %v747_v60 = vmul.f32 0.0052083335, %v712_v58  ;;  %v800_v55 = vmul.f32 %v10242_v29, %v10242_v29  ;;  %v801_v45 = vmul.f32 %v10245_v30, %v10245_v30 }
  0xce   : > { %v10259_v37 = vsub.f32 %v10098_v0, %v746_v35  ;;  %v10262_v38 = vsub.f32 %v10094_v62, %v746_v35  ;;  %v842_v51 = vsel %vm672_vm1, %v799_v41, 0.0 }
  0xcf   : > { %v10266_v53 = vsub.f32 %v10101_v2, %v747_v60  ;;  %v10269_v42 = vsub.f32 %v10096_v63, %v747_v60  ;;  %v716_v43 = vpop.xlane.xlu0 %715  ;;  %v843_v59 = vadd.f32 %v842_v51, %v798_v54  ;;  %v846_v4 = vsel %vm672_vm1, %v801_v45, 0.0  ;;  %v8949_v45 = vld [vmem:[%s9898_s21 + $0x34] ss:$20 sps:$4 sm:$0xff]  }
  0xd0   : > { %v748_v5 = vmul.f32 0.0052083335, %v716_v43  ;;  %v720_v0 = vpop.xlane.xlu1 %719  ;;  %v802_v62 = vmul.f32 %v10259_v37, %v10259_v37  ;;  %v803_v2 = vmul.f32 %v10262_v38, %v10262_v38  ;;  %v847_v12 = vadd.f32 %v846_v4, %v800_v55  ;;  %v8947_v55 = vld [vmem:[%s9898_s21 + $0x2c] ss:$20 sps:$4 sm:$0xff]   ;;  %v8951_v43 = vld [vmem:[%s9898_s21 + $0x28] ss:$20 sps:$4 sm:$0xff]   ;;  %1597 = vmatprep.subr.bf16.mxu1 %v8949_v45 }
  0xd1   : > { %840 = vadd.xlane.f32.xlu1 %v839_v44  ;;  %844 = vadd.xlane.f32.xlu0 %v843_v59  ;;  %v749_v63 = vmul.f32 0.0052083335, %v720_v0  ;;  %v804_v50 = vmul.f32 %v10266_v53, %v10266_v53  ;;  %v805_v46 = vmul.f32 %v10269_v42, %v10269_v42  ;;  %v8952_v59 = vld [vmem:[%s9898_s21 + $0x30] ss:$20 sps:$4 sm:$0xff]  }
  0xd2   : > { %v10283_v13 = vsub.f32 %v10112_v8, %v748_v5  ;;  %v10286_v52 = vsub.f32 %v10103_v3, %v748_v5  ;;  %v850_v47 = vsel %vm672_vm1, %v803_v2, 0.0  ;;  %1484 = vmatprep.subr.bf16.mxu0 %v8947_v55  ;;  %1598 = vmatpush1.bf16.msra.mxu1 %v8952_v59  ;;  %v8964_v55 = vld [vmem:[%s9898_s21 + $0x1c0] ss:$20 sps:$4 sm:$0xff]  }
  0xd3   : > { %v10292_v32 = vsub.f32 %v10115_v10, %v749_v63  ;;  %v10295_v33 = vsub.f32 %v10108_v6, %v749_v63  ;;  %v724_v34 = vpop.xlane.xlu0 %723  ;;  %v851_v8 = vadd.f32 %v850_v47, %v802_v62  ;;  %v854_v35 = vsel %vm672_vm1, %v805_v46, 0.0  ;;  %1485 = vmatpush1.bf16.msra.mxu0 %v8951_v43  ;;  %v8955_v46 = vld [vmem:[%s9898_s21 + $0xc] ss:$20 sps:$4 sm:$0xff]   ;;  %v8965_v59 = vld [vmem:[%s9898_s21 + $0x194] ss:$20 sps:$4 sm:$0xff]  }
  0xd4   : > { %v750_v3 = vmul.f32 0.0052083335, %v724_v34  ;;  %v728_v58 = vpop.xlane.xlu1 %727  ;;  %v806_v54 = vmul.f32 %v10283_v13, %v10283_v13  ;;  %v807_v10 = vmul.f32 %v10286_v52, %v10286_v52  ;;  %v855_v41 = vadd.f32 %v854_v35, %v804_v50  ;;  %v8953_v50 = vld [vmem:[%s9898_s21 + $0x4] ss:$20 sps:$4 sm:$0xff]   ;;  %v8957_v34 = vld [vmem:[%s9898_s21] ss:$20 sps:$4 sm:$0xff]   ;;  %1599 = vmatprep.subr.bf16.mxu1 %v8955_v46 }
  0xd5   : > { %848 = vadd.xlane.f32.xlu1 %v847_v12  ;;  %852 = vadd.xlane.f32.xlu0 %v851_v8  ;;  %v751_v6 = vmul.f32 0.0052083335, %v728_v58  ;;  %v808_v60 = vmul.f32 %v10292_v32, %v10292_v32  ;;  %v809_v44 = vmul.f32 %v10295_v33, %v10295_v33  ;;  %v8958_v8 = vld [vmem:[%s9898_s21 + $0x8] ss:$20 sps:$4 sm:$0xff]  }
  0xd6   : > { %v10309_v48 = vsub.f32 %v10126_v16, %v750_v3  ;;  %v10312_v49 = vsub.f32 %v10117_v11, %v750_v3  ;;  %v858_v51 = vsel %vm672_vm1, %v807_v10, 0.0  ;;  %1486 = vmatprep.subr.bf16.mxu0 %v8953_v50  ;;  %1600 = vmatpush1.bf16.msra.mxu1 %v8958_v8  ;;  %v9799_v50 = vmov 0  }
  0xd7   : > { %v10318_v4 = vsub.f32 %v10129_v18, %v751_v6  ;;  %v10321_v5 = vsub.f32 %v10122_v14, %v751_v6  ;;  %v732_v0 = vpop.xlane.xlu0 %731  ;;  %v859_v62 = vadd.f32 %v858_v51, %v806_v54  ;;  %v862_v2 = vsel %vm672_vm1, %v809_v44, 0.0  ;;  %1487 = vmatpush1.bf16.msra.mxu0 %v8957_v34  ;;  %v8959_v6 = vld [vmem:[%s9898_s21 + $0x1bc] ss:$20 sps:$4 sm:$0xff]   ;;  %v8963_v44 = vld [vmem:[%s9898_s21 + $0x1b8] ss:$20 sps:$4 sm:$0xff]  }
  0xd8   : > { %v752_v11 = vmul.f32 0.0052083335, %v732_v0  ;;  %v736_v16 = vpop.xlane.xlu1 %735  ;;  %v810_v7 = vmul.f32 %v10309_v48, %v10309_v48  ;;  %v811_v18 = vmul.f32 %v10312_v49, %v10312_v49  ;;  %v863_v9 = vadd.f32 %v862_v2, %v808_v60  ;;  %1496 = vmatprep.subr.bf16.mxu0 %v8959_v6  ;;  %v8967_v0 = vld [vmem:[%s9898_s21 + $0x19c] ss:$20 sps:$4 sm:$0xff]   ;;  %v8970_v2 = vld [vmem:[%s9898_s21 + $0x198] ss:$20 sps:$4 sm:$0xff]  }
  0xd9   : > { %856 = vadd.xlane.f32.xlu1 %v855_v41  ;;  %860 = vadd.xlane.f32.xlu0 %v859_v62  ;;  %v753_v14 = vmul.f32 0.0052083335, %v736_v16  ;;  %v812_v63 = vmul.f32 %v10318_v4, %v10318_v4  ;;  %v813_v12 = vmul.f32 %v10321_v5, %v10321_v5  ;;  %v8961_v41 = vld [vmem:[%s9898_s21 + $0x1c4] ss:$20 sps:$4 sm:$0xff]   ;;  %v8973_v16 = vld [vmem:[%s9898_s21 + $0x174] ss:$20 sps:$4 sm:$0xff]  }
  0xda   : > { %v10335_v47 = vsub.f32 %v10140_v24, %v752_v11  ;;  %v10338_v15 = vsub.f32 %v10131_v19, %v752_v11  ;;  %v866_v28 = vsel %vm672_vm1, %v811_v18, 0.0  ;;  %1609 = vmatprep.subr.bf16.mxu1 %v8961_v41  ;;  %v8969_v62 = vld [vmem:[%s9898_s21 + $0x190] ss:$20 sps:$4 sm:$0xff]   ;;  %v8971_v11 = vld [vmem:[%s9898_s21 + $0x16c] ss:$20 sps:$4 sm:$0xff]  }
  0xdb   : > { %v10344_v35 = vsub.f32 %v10143_v26, %v753_v14  ;;  %v10347_v3 = vsub.f32 %v10136_v22, %v753_v14  ;;  %v867_v58 = vadd.f32 %v866_v28, %v810_v7  ;;  %v870_v24 = vsel %vm672_vm1, %v813_v12, 0.0  ;;  %1497 = vmatpush2.bf16.msra.mxu0 %v8963_v44  ;;  %1610 = vmatpush2.bf16.msra.mxu1 %v8964_v55  ;;  %v8975_v7 = vld [vmem:[%s9898_s21 + $0x168] ss:$20 sps:$4 sm:$0xff]   ;;  %v8976_v18 = vld [vmem:[%s9898_s21 + $0x170] ss:$20 sps:$4 sm:$0xff]  }
  0xdc   : > { %v814_v19 = vmul.f32 %v10335_v47, %v10335_v47  ;;  %v815_v54 = vmul.f32 %v10338_v15, %v10338_v15  ;;  %v871_v26 = vadd.f32 %v870_v24, %v812_v63  ;;  %1498 = vmatprep.subr.bf16.mxu0 %v8965_v59  ;;  %1611 = vmatprep.subr.bf16.mxu1 %v8967_v0  ;;  %v8977_v14 = vld [vmem:[%s9898_s21 + $0x144] ss:$20 sps:$4 sm:$0xff]   ;;  %v8981_v63 = vld [vmem:[%s9898_s21 + $0x140] ss:$20 sps:$4 sm:$0xff]   ;;  %v8982_v12 = vld [vmem:[%s9898_s21 + $0x148] ss:$20 sps:$4 sm:$0xff]  }
  0xdd   : > { %864 = vadd.xlane.f32.xlu1 %v863_v9  ;;  %868 = vadd.xlane.f32.xlu0 %v867_v58  ;;  %v816_v22 = vmul.f32 %v10344_v35, %v10344_v35  ;;  %v817_v10 = vmul.f32 %v10347_v3, %v10347_v3  ;;  %v8979_v9 = vld [vmem:[%s9898_s21 + $0x14c] ss:$20 sps:$4 sm:$0xff]  }
  0xde   : > { %v874_v60 = vsel %vm672_vm1, %v815_v54, 0.0  ;;  %v963_v54 = vlaneseq }
  0xdf   : > { %v875_v45 = vadd.f32 %v874_v60, %v814_v19  ;;  %v878_v51 = vsel %vm672_vm1, %v817_v10, 0.0  ;;  %1499 = vmatpush2.bf16.msra.mxu0 %v8969_v62  ;;  %1612 = vmatpush2.bf16.msra.mxu1 %v8970_v2 }
  0xe0   : > { %v879_v43 = vadd.f32 %v878_v51, %v816_v22  ;;  %1500 = vmatprep.subr.bf16.mxu0 %v8971_v11  ;;  %1613 = vmatprep.subr.bf16.mxu1 %v8973_v16  ;;  %v10377_v44 = vshrl.u32 %v963_v54, 7  ;;  %v670_v16 = vld [vmem:[%s14538_s30] sm:$0x3] }
  0xe1   : > { %872 = vadd.xlane.f32.xlu1 %v871_v26  ;;  %876 = vadd.xlane.f32.xlu0 %v875_v45 }
  0xe2   : > { %14535 = vst [vmem:[#allocation4_spill] sm:$0xff] %v10377_v44  ;;  %v10380_v62 = vsub.s32 1, %v10377_v44  ;;  %v10383_v2 = vsub.s32 0, %v10377_v44 }
  0xe3   : > { %1501 = vmatpush2.bf16.msra.mxu0 %v8975_v7  ;;  %1614 = vmatpush2.bf16.msra.mxu1 %v8976_v18 }
  0xe4   : > { %1502 = vmatprep.subr.bf16.mxu0 %v8977_v14  ;;  %1615 = vmatprep.subr.bf16.mxu1 %v8979_v9  ;;  %14536 = vst [vmem:[#allocation5_spill] sm:$0xff] %v10380_v62  ;;  %14537 = vst [vmem:[#allocation6_spill] sm:$0xff] %v10383_v2 }
  0xe5   : > { %880 = vadd.xlane.f32.xlu1 %v879_v43 }
  0xe7   : > { %1503 = vmatpush2.bf16.msra.mxu0 %v8981_v63  ;;  %1616 = vmatpush2.bf16.msra.mxu1 %v8982_v12  ;;  %v10391_v12 = vrot.slane %v670_v16, %v10380_v62 }
  0xe8   : > { %1698 = vmatprep.subr.bf16.mxu0 %v9799_v50 }
 0x14e   : > { %v821_v46 = vpop.xlane.xlu0 %820 }
 0x14f   : > { %v882_v28 = vmul.f32 0.0052083335, %v821_v46  ;;  %v10394_v46 = vrot.slane %v670_v16, %v10383_v2 }
 0x151   : > { %v898_v34 = vadd.f32 1e-05, %v882_v28 }
 0x152   : > { %v825_v8 = vpop.xlane.xlu1 %824  ;;  %v829_v58 = vpop.xlane.xlu0 %828 }
 0x153   : > { %9247 = vrsqrt.f32 %v898_v34  ;;  %v883_v24 = vmul.f32 0.0052083335, %v825_v8  ;;  %v884_v19 = vmul.f32 0.0052083335, %v829_v58  ;;  %v671_v34 = vld [vmem:[%s14539_s20] sm:$0x3] }
 0x154   : > { %s14856_s20 = sld [smem:[#allocation74_spill]] (!%p8268_p5) }
 0x155   : > { %v899_v26 = vadd.f32 1e-05, %v883_v24  ;;  %v900_v22 = vadd.f32 1e-05, %v884_v19 }
 0x156   : > { %v833_v10 = vpop.xlane.xlu1 %832  ;;  %v837_v6 = vpop.xlane.xlu0 %836 }
 0x157   : > { %9249 = vrsqrt.f32 %v899_v26  ;;  %v885_v41 = vmul.f32 0.0052083335, %v833_v10  ;;  %v886_v60 = vmul.f32 0.0052083335, %v837_v6  ;;  %v10405_v10 = vrot.slane %v671_v34, %v10380_v62 }
 0x158   : > { %9251 = vrsqrt.f32 %v900_v22 }
 0x159   : > { %v901_v55 = vadd.f32 1e-05, %v885_v41  ;;  %v902_v45 = vadd.f32 1e-05, %v886_v60  ;;  %v10409_v41 = vrot.slane %v671_v34, %v10383_v2 }
 0x15a   : > { %v841_v51 = vpop.xlane.xlu1 %840  ;;  %v845_v43 = vpop.xlane.xlu0 %844 }
 0x15b   : > { %9253 = vrsqrt.f32 %v901_v55  ;;  %v887_v59 = vmul.f32 0.0052083335, %v841_v51  ;;  %v888_v0 = vmul.f32 0.0052083335, %v845_v43 }
 0x15c   : > { %9255 = vrsqrt.f32 %v902_v45 }
 0x15d   : > { %v903_v11 = vadd.f32 1e-05, %v887_v59  ;;  %v904_v7 = vadd.f32 1e-05, %v888_v0 }
 0x15e   : > { %v849_v18 = vpop.xlane.xlu1 %848  ;;  %v853_v63 = vpop.xlane.xlu0 %852 }
 0x15f   : > { %9257 = vrsqrt.f32 %v903_v11  ;;  %v889_v14 = vmul.f32 0.0052083335, %v849_v18  ;;  %v890_v19 = vmul.f32 0.0052083335, %v853_v63 }
 0x160   : > { %v9248_v9 = vpop.eup %9247  ;;  %9259 = vrsqrt.f32 %v904_v7 }
 0x161   : > { %v905_v28 = vadd.f32 1e-05, %v889_v14  ;;  %v931_v8 = vmul.f32 %v9248_v9, %v10174_v20  ;;  %v930_v58 = vmul.f32 %v9248_v9, %v10171_v17  ;;  %v906_v43 = vadd.f32 1e-05, %v890_v19 }
 0x162   : > { %v857_v24 = vpop.xlane.xlu1 %856  ;;  %v861_v11 = vpop.xlane.xlu0 %860 }
 0x163   : > { %9261 = vrsqrt.f32 %v905_v28  ;;  %v891_v54 = vmul.f32 0.0052083335, %v857_v24  ;;  %v974_v22 = vmul.f32 %v10391_v12, %v931_v8  ;;  %v973_v6 = vmul.f32 %v10394_v46, %v930_v58  ;;  %v8983_v24 = vld [vmem:[%s9898_s21 + $0x128] ss:$20 sps:$4 sm:$0xff]  }
 0x164   : > { %v9250_v26 = vpop.eup %9249  ;;  %v892_v8 = vmul.f32 0.0052083335, %v861_v11 }
 0x165   : > { %v9252_v60 = vpop.eup %9251  ;;  %v907_v20 = vadd.f32 1e-05, %v891_v54  ;;  %v933_v17 = vmul.f32 %v9250_v26, %v10194_v36  ;;  %v932_v45 = vmul.f32 %v9250_v26, %v10191_v31  ;;  %v1017_v16 = vadd.f32 %v10405_v10, %v974_v22 }
 0x166   : > { %v865_v55 = vpop.xlane.xlu1 %864  ;;  %v935_v51 = vmul.f32 %v9252_v60, %v10180_v23  ;;  %v1016_v18 = vadd.f32 %v10409_v41, %v973_v6  ;;  %v934_v28 = vmul.f32 %v9252_v60, %v10177_v21 }
 0x167   : > { %v976_v59 = vmul.f32 %v10391_v12, %v933_v17  ;;  %v975_v7 = vmul.f32 %v10394_v46, %v932_v45  ;;  %9263 = vrsqrt.f32 %v907_v20  ;;  %v893_v14 = vmul.f32 0.0052083335, %v865_v55 }
 0x168   : > { %v9254_v0 = vpop.eup %9253  ;;  %v978_v63 = vmul.f32 %v10391_v12, %v935_v51  ;;  %9265 = vrsqrt.f32 %v906_v43  ;;  %v977_v17 = vmul.f32 %v10394_v46, %v934_v28  ;;  %v908_v45 = vadd.f32 1e-05, %v892_v8  ;;  %v8985_v8 = vld [vmem:[%s9898_s21 + $0xd8] ss:$20 sps:$4 sm:$0xff]  }
 0x169   : > { %v1019_v36 = vadd.f32 %v10405_v10, %v976_v59  ;;  %v937_v31 = vmul.f32 %v9254_v0, %v10201_v40  ;;  %v9256_v9 = vpop.eup %9255  ;;  %v1018_v23 = vadd.f32 %v10409_v41, %v975_v7  ;;  %v936_v34 = vmul.f32 %v9254_v0, %v10198_v39  ;;  %v869_v59 = vpop.xlane.xlu0 %868 }
 0x16a   : > { %v909_v22 = vadd.f32 1e-05, %v893_v14  ;;  %v939_v21 = vmul.f32 %v9256_v9, %v10216_v57  ;;  %v873_v6 = vpop.xlane.xlu1 %872  ;;  %v1021_v60 = vadd.f32 %v10405_v10, %v978_v63  ;;  %v8984_v57 = vld [vmem:[%s9898_s21 + $0x100] ss:$20 sps:$4 sm:$0xff]   ;;  %v1020_v14 = vadd.f32 %v10409_v41, %v977_v17 }
 0x16b   : > { %v10424_v58 = vpack.c.bf16 %v1019_v36, %v1017_v16  ;;  %v10427_v54 = vpack.c.bf16 %v1018_v23, %v1016_v18  ;;  %v980_v26 = vmul.f32 %v10391_v12, %v937_v31  ;;  %v979_v40 = vmul.f32 %v10394_v46, %v936_v34 }
 0x16c   : > { %v9258_v19 = vpop.eup %9257  ;;  %v982_v51 = vmul.f32 %v10391_v12, %v939_v21  ;;  %9267 = vrsqrt.f32 %v909_v22  ;;  %v895_v7 = vmul.f32 0.0052083335, %v873_v6  ;;  %v938_v36 = vmul.f32 %v9256_v9, %v10213_v56 }
 0x16d   : > { %8004 = vmatprep.mubr.msk.bf16.mxu0 %vm672_vm1, %v10424_v58  ;;  %8012 = vmatprep.mubr.msk.bf16.mxu1 %vm672_vm1, %v10424_v58  ;;  %v941_v39 = vmul.f32 %v9258_v19, %v10223_v1  ;;  %v1023_v20 = vadd.f32 %v10405_v10, %v980_v26  ;;  %v9260_v55 = vpop.eup %9259  ;;  %v1022_v11 = vadd.f32 %v10409_v41, %v979_v40  ;;  %9269 = vrsqrt.f32 %v908_v45  ;;  %v877_v21 = vpop.xlane.xlu0 %876 }
 0x16e   : > { %1505 = vmatmul.mubr.bf16.vlgmr.msra.gmra.mxu0 %v10427_v54  ;;  %1618 = vmatmul.mubr.bf16.vlgmr.msra.gmra.mxu1 %v10427_v54  ;;  %v940_v16 = vmul.f32 %v9258_v19, %v10220_v61  ;;  %v894_v61 = vmul.f32 0.0052083335, %v869_v59  ;;  %v1025_v23 = vadd.f32 %v10405_v10, %v982_v51  ;;  %v943_v63 = vmul.f32 %v9260_v55, %v10238_v27  ;;  %v881_v9 = vpop.xlane.xlu1 %880 }
 0x16f   : > { %v984_v43 = vmul.f32 %v10391_v12, %v941_v39  ;;  %1699 = vmatpush1.bf16.msra.mxu0 %v8983_v24  ;;  %v10445_v0 = vpack.c.bf16 %v1023_v20, %v1021_v60  ;;  %v10460_v28 = vpack.c.bf16 %v1022_v11, %v1020_v14  ;;  %v911_v24 = vadd.f32 1e-05, %v895_v7  ;;  %v8986_v60 = vld [vmem:[%s9898_s21 + $0xb0] ss:$20 sps:$4 sm:$0xff]  }
 0x170   : > { %v9262_v1 = vpop.eup %9261  ;;  %1700 = vmatprep.subr.bf16.mxu0 %v9799_v50  ;;  %v983_v34 = vmul.f32 %v10394_v46, %v940_v16  ;;  %v981_v27 = vmul.f32 %v10394_v46, %v938_v36  ;;  %v910_v26 = vadd.f32 1e-05, %v894_v61  ;;  %v986_v40 = vmul.f32 %v10391_v12, %v943_v63  ;;  %v8987_v16 = vld [vmem:[%s9898_s21 + $0x88] ss:$20 sps:$4 sm:$0xff]  }
 0x171   : > { %v1027_v18 = vadd.f32 %v10405_v10, %v984_v43  ;;  %8005 = vmatprep.mubr.msk.bf16.mxu0 %vm672_vm1, %v10445_v0  ;;  %8013 = vmatprep.mubr.msk.bf16.mxu1 %vm672_vm1, %v10445_v0  ;;  %v945_v31 = vmul.f32 %v9262_v1, %v10245_v30  ;;  %v944_v6 = vmul.f32 %v9262_v1, %v10242_v29  ;;  %9271 = vrsqrt.f32 %v911_v24 }
 0x172   : > { %v1026_v39 = vadd.f32 %v10409_v41, %v983_v34  ;;  %v897_v20 = vmul.f32 0.0052083335, %v881_v9  ;;  %v1024_v51 = vadd.f32 %v10409_v41, %v981_v27  ;;  %v942_v43 = vmul.f32 %v9260_v55, %v10235_v25 }
 0x173   : > { %1701 = vmatpush1.bf16.msra.mxu0 %v8984_v57  ;;  %v10465_v19 = vpack.c.bf16 %v1027_v18, %v1025_v23  ;;  %v988_v56 = vmul.f32 %v10391_v12, %v945_v31  ;;  %9273 = vrsqrt.f32 %v910_v26  ;;  %v896_v57 = vmul.f32 0.0052083335, %v877_v21  ;;  %v8988_v23 = vld [vmem:[%s9898_s21 + $0x60] ss:$20 sps:$4 sm:$0xff]  }
 0x174   : > { %1702 = vmatprep.subr.bf16.mxu0 %v9799_v50  ;;  %v9264_v30 = vpop.eup %9263  ;;  %v1029_v59 = vadd.f32 %v10405_v10, %v986_v40  ;;  %v10486_v1 = vpack.c.bf16 %v1026_v39, %v1024_v51  ;;  %v987_v11 = vmul.f32 %v10394_v46, %v944_v6  ;;  %v913_v7 = vadd.f32 1e-05, %v897_v20  ;;  %v8990_v6 = vld [vmem:[%s9898_s21 + $0x10] ss:$20 sps:$4 sm:$0xff]  }
 0x175   : > { %v9266_v22 = vpop.eup %9265  ;;  %v1031_v17 = vadd.f32 %v10405_v10, %v988_v56  ;;  %v949_v45 = vmul.f32 %v9264_v30, %v10269_v42  ;;  %v912_v55 = vadd.f32 1e-05, %v896_v57  ;;  %v948_v61 = vmul.f32 %v9264_v30, %v10266_v53  ;;  %v8989_v30 = vld [vmem:[%s9898_s21 + $0x38] ss:$20 sps:$4 sm:$0xff]  }
 0x176   : > { %1515 = vmatmul.mubr.bf16.gmra.mxu0 %v10460_v28  ;;  %1628 = vmatmul.mubr.bf16.gmra.mxu1 %v10460_v28  ;;  %v947_v29 = vmul.f32 %v9266_v22, %v10262_v38  ;;  %v985_v38 = vmul.f32 %v10394_v46, %v942_v43  ;;  %v1030_v31 = vadd.f32 %v10409_v41, %v987_v11  ;;  %9275 = vrsqrt.f32 %v913_v7 }
 0x177   : > { %8006 = vmatprep.mubr.msk.bf16.mxu0 %vm672_vm1, %v10465_v19  ;;  %8014 = vmatprep.mubr.msk.bf16.mxu1 %vm672_vm1, %v10465_v19  ;;  %v10490_v42 = vpack.c.bf16 %v1031_v17, %v1029_v59  ;;  %v992_v18 = vmul.f32 %v10391_v12, %v949_v45  ;;  %v946_v24 = vmul.f32 %v9266_v22, %v10259_v37  ;;  %9277 = vrsqrt.f32 %v912_v55  ;;  %v8991_v59 = vld [vmem:[%s9898_s21 + $0x1c8] ss:$20 sps:$4 sm:$0xff]  }
 0x178   : > { %1703 = vmatpush1.bf16.msra.mxu0 %v8985_v8  ;;  %v990_v14 = vmul.f32 %v10391_v12, %v947_v29  ;;  %v1028_v8 = vadd.f32 %v10409_v41, %v985_v38  ;;  %v991_v53 = vmul.f32 %v10394_v46, %v948_v61 }
 0x179   : > { %1704 = vmatprep.subr.bf16.mxu0 %v9799_v50  ;;  %v9268_v25 = vpop.eup %9267  ;;  %v1035_v63 = vadd.f32 %v10405_v10, %v992_v18  ;;  %v989_v37 = vmul.f32 %v10394_v46, %v946_v24 }
 0x17a   : > { %v9270_v36 = vpop.eup %9269  ;;  %v953_v34 = vmul.f32 %v9268_v25, %v10295_v33  ;;  %v1033_v56 = vadd.f32 %v10405_v10, %v990_v14  ;;  %v10512_v27 = vpack.c.bf16 %v1030_v31, %v1028_v8  ;;  %v1034_v21 = vadd.f32 %v10409_v41, %v991_v53 }
 0x17b   : > { %v951_v9 = vmul.f32 %v9270_v36, %v10286_v52  ;;  %v952_v39 = vmul.f32 %v9268_v25, %v10292_v32  ;;  %v1032_v17 = vadd.f32 %v10409_v41, %v989_v37  ;;  %v950_v45 = vmul.f32 %v9270_v36, %v10283_v13  ;;  %v8992_v25 = vld [vmem:[%s9898_s21 + $0x1a0] ss:$20 sps:$4 sm:$0xff]  }
 0x17c   : > { %1705 = vmatpush1.bf16.msra.mxu0 %v8986_v60  ;;  %v10516_v26 = vpack.c.bf16 %v1035_v63, %v1033_v56  ;;  %v996_v33 = vmul.f32 %v10391_v12, %v953_v34  ;;  %v8993_v63 = vld [vmem:[%s9898_s21 + $0x178] ss:$20 sps:$4 sm:$0xff]   ;;  %v8994_v56 = vld [vmem:[%s9898_s21 + $0x150] ss:$20 sps:$4 sm:$0xff]   ;;  %s9800_s21 = smov 32  }
 0x17d   : > { %1706 = vmatprep.subr.bf16.mxu0 %v9799_v50  ;;  %v994_v52 = vmul.f32 %v10391_v12, %v951_v9  ;;  %v10538_v57 = vpack.c.bf16 %v1034_v21, %v1032_v17  ;;  %v995_v32 = vmul.f32 %v10394_v46, %v952_v39  ;;  %v993_v13 = vmul.f32 %v10394_v46, %v950_v45 }
 0x17e   : > { %1525 = vmatmul.mubr.bf16.gmra.mxu0 %v10486_v1  ;;  %1638 = vmatmul.mubr.bf16.gmra.mxu1 %v10486_v1  ;;  %v9272_v40 = vpop.eup %9271  ;;  %v1039_v60 = vadd.f32 %v10405_v10, %v996_v33 }
 0x17f   : > { %8007 = vmatprep.mubr.msk.bf16.mxu0 %vm672_vm1, %v10490_v42  ;;  %8015 = vmatprep.mubr.msk.bf16.mxu1 %vm672_vm1, %v10490_v42  ;;  %v957_v20 = vmul.f32 %v9272_v40, %v10321_v5  ;;  %v1037_v51 = vadd.f32 %v10405_v10, %v994_v52  ;;  %v1038_v7 = vadd.f32 %v10409_v41, %v995_v32 }
 0x180   : > { %1707 = vmatpush1.bf16.msra.mxu0 %v8987_v16  ;;  %v9274_v22 = vpop.eup %9273  ;;  %v956_v18 = vmul.f32 %v9272_v40, %v10318_v4  ;;  %v1036_v14 = vadd.f32 %v10409_v41, %v993_v13 }
 0x181   : > { %1708 = vmatprep.subr.bf16.mxu0 %v9799_v50  ;;  %v955_v43 = vmul.f32 %v9274_v22, %v10312_v49  ;;  %v10542_v29 = vpack.c.bf16 %v1039_v60, %v1037_v51  ;;  %v1000_v5 = vmul.f32 %v10391_v12, %v957_v20  ;;  %v954_v36 = vmul.f32 %v9274_v22, %v10309_v48 }
 0x182   : > { %v999_v4 = vmul.f32 %v10394_v46, %v956_v18 }
 0x183   : > { %v9276_v11 = vpop.eup %9275  ;;  %v998_v49 = vmul.f32 %v10391_v12, %v955_v43  ;;  %v1043_v38 = vadd.f32 %v10405_v10, %v1000_v5 }
 0x184   : > { %1709 = vmatpush1.bf16.msra.mxu0 %v8988_v23  ;;  %v9278_v16 = vpop.eup %9277  ;;  %v961_v55 = vmul.f32 %v9276_v11, %v10347_v3  ;;  %v1058_v23 = vpack.c.bf16 %v1038_v7, %v1036_v14  ;;  %v997_v3 = vmul.f32 %v10394_v46, %v954_v36  ;;  %v960_v24 = vmul.f32 %v9276_v11, %v10344_v35 }
 0x185   : > { %1710 = vmatprep.subr.bf16.mxu0 %v9799_v50  ;;  %v1041_v31 = vadd.f32 %v10405_v10, %v998_v49  ;;  %v959_v61 = vmul.f32 %v9278_v16, %v10338_v15  ;;  %v1042_v15 = vadd.f32 %v10409_v41, %v999_v4 }
 0x186   : > { %1535 = vmatmul.mubr.bf16.gmra.mxu0 %v10512_v27  ;;  %1648 = vmatmul.mubr.bf16.gmra.mxu1 %v10512_v27  ;;  %v1004_v8 = vmul.f32 %v10391_v12, %v961_v55  ;;  %v1040_v53 = vadd.f32 %v10409_v41, %v997_v3  ;;  %v1003_v37 = vmul.f32 %v10394_v46, %v960_v24 }
 0x187   : > { %8008 = vmatprep.mubr.msk.bf16.mxu0 %vm672_vm1, %v10516_v26  ;;  %8016 = vmatprep.mubr.msk.bf16.mxu1 %vm672_vm1, %v10516_v26  ;;  %v1061_v34 = vpack.c.bf16 %v1043_v38, %v1041_v31  ;;  %v1002_v48 = vmul.f32 %v10391_v12, %v959_v61 }
 0x188   : > { %1711 = vmatpush1.bf16.msra.mxu0 %v8989_v30  ;;  %v1047_v9 = vadd.f32 %v10405_v10, %v1004_v8  ;;  %v958_v30 = vmul.f32 %v9278_v16, %v10335_v47  ;;  %v1060_v40 = vpack.c.bf16 %v1042_v15, %v1040_v53 }
 0x189   : > { %1712 = vmatprep.subr.bf16.mxu0 %v9799_v50  ;;  %v1045_v33 = vadd.f32 %v10405_v10, %v1002_v48 }
 0x18a   : > { %v1001_v35 = vmul.f32 %v10394_v46, %v958_v30 }
 0x18b   : > { %v1063_v12 = vpack.c.bf16 %v1047_v9, %v1045_v33 }
 0x18c   : > { %1713 = vmatpush1.bf16.msra.mxu0 %v8990_v6  ;;  %v1044_v52 = vadd.f32 %v10409_v41, %v1001_v35 }
 0x18d   : > { %1722 = vmatprep.subr.bf16.mxu0 %v9799_v50 }
 0x18e   : > { %1545 = vmatmul.mubr.bf16.gmra.mxu0 %v10538_v57  ;;  %1658 = vmatmul.mubr.bf16.gmra.mxu1 %v10538_v57 }
 0x18f   : > { %8009 = vmatprep.mubr.msk.bf16.mxu0 %vm672_vm1, %v10542_v29  ;;  %8017 = vmatprep.mubr.msk.bf16.mxu1 %vm672_vm1, %v10542_v29 }
 0x190   : > { %1723 = vmatpush2.bf16.msra.mxu0 %v8991_v59 }
 0x191   : > { %1724 = vmatprep.subr.bf16.mxu0 %v9799_v50 }
 0x194   : > { %1725 = vmatpush2.bf16.msra.mxu0 %v8992_v25 }
 0x195   : > { %1726 = vmatprep.subr.bf16.mxu0 %v9799_v50 }
 0x196   : > { %1555 = vmatmul.mubr.bf16.gmra.mxu0 %v1058_v23  ;;  %1668 = vmatmul.mubr.bf16.gmra.mxu1 %v1058_v23 }
 0x197   : > { %8010 = vmatprep.mubr.msk.bf16.mxu0 %vm672_vm1, %v1061_v34  ;;  %8018 = vmatprep.mubr.msk.bf16.mxu1 %vm672_vm1, %v1061_v34 }
 0x198   : > { %1727 = vmatpush2.bf16.msra.mxu0 %v8993_v63 }
 0x199   : > { %1728 = vmatprep.subr.bf16.mxu0 %v9799_v50  ;;  %v1046_v50 = vadd.f32 %v10409_v41, %v1003_v37 }
 0x19b   : > { %v1062_v47 = vpack.c.bf16 %v1046_v50, %v1044_v52 }
 0x19c   : > { %1729 = vmatpush2.bf16.msra.mxu0 %v8994_v56 }
 0x19e   : > { %1565 = vmatmul.mubr.bf16.gmra.mxu0 %v1060_v40  ;;  %1678 = vmatmul.mubr.bf16.gmra.mxu1 %v1060_v40 }
 0x19f   : > { %8011 = vmatprep.mubr.msk.bf16.mxu0 %vm672_vm1, %v1063_v12  ;;  %8019 = vmatprep.mubr.msk.bf16.mxu1 %vm672_vm1, %v1063_v12 }
 0x1a6   : > { %1575 = vmatmul.mubr.bf16.gmra.mxu0 %v1062_v47  ;;  %1688 = vmatmul.mubr.bf16.gmra.mxu1 %v1062_v47 }
 0x1a7   : > { %8020 = vmatprep.mubr.msk.bf16.mxu0 %vm672_vm1, %v10424_v58 }
 0x1ae   : > { %1731 = vmatmul.mubr.bf16.vlgmr.msra.gmra.mxu0 %v10427_v54 }
 0x1af   : > { %8021 = vmatprep.mubr.msk.bf16.mxu0 %vm672_vm1, %v10445_v0 }
 0x1b6   : > { %1739 = vmatmul.mubr.bf16.gmra.mxu0 %v10460_v28 }
 0x1b7   : > { %8022 = vmatprep.mubr.msk.bf16.mxu0 %vm672_vm1, %v10465_v19 }
 0x1be   : > { %1747 = vmatmul.mubr.bf16.gmra.mxu0 %v10486_v1 }
 0x1bf   : > { %8023 = vmatprep.mubr.msk.bf16.mxu0 %vm672_vm1, %v10490_v42 }
 0x1c6   : > { %1755 = vmatmul.mubr.bf16.gmra.mxu0 %v10512_v27 }
 0x1c7   : > { %8024 = vmatprep.mubr.msk.bf16.mxu0 %vm672_vm1, %v10516_v26 }
 0x1ce   : > { %1763 = vmatmul.mubr.bf16.gmra.mxu0 %v10538_v57 }
 0x1cf   : > { %8025 = vmatprep.mubr.msk.bf16.mxu0 %vm672_vm1, %v10542_v29 }
 0x1d6   : > { %1771 = vmatmul.mubr.bf16.gmra.mxu0 %v1058_v23 }
 0x1d7   : > { %8026 = vmatprep.mubr.msk.bf16.mxu0 %vm672_vm1, %v1061_v34 }
 0x1de   : > { %1779 = vmatmul.mubr.bf16.gmra.mxu0 %v1060_v40 }
 0x1df   : > { %8027 = vmatprep.mubr.msk.bf16.mxu0 %vm672_vm1, %v1063_v12 }
 0x1e6   : > { %1787 = vmatmul.mubr.bf16.gmra.mxu0 %v1062_v47 }
 0x22e   : > { %v1506_v46 = vpop.f32.mrf.mxu0  ;;  %v1619_v10 = vpop.f32.mrf.mxu1 }
 0x230   : > { %v10605_v41 = vpop.f32.mrf.mxu0  ;;  %v10607_v58 = vpop.f32.mrf.mxu1 }
 0x232   : > { %v1510_v54 = vpop.f32.mrf.mxu0  ;;  %v1623_v0 = vpop.f32.mrf.mxu1 }
 0x233   : > { %v10609_v28 = vpack.c.bf16 %v1510_v54, %v1506_v46  ;;  %v10611_v19 = vpack.c.bf16 %v1623_v0, %v1619_v10 }
 0x234   : > { %v10613_v1 = vpop.f32.mrf.mxu0  ;;  %v10615_v42 = vpop.f32.mrf.mxu1 }
 0x235   : > { %14540 = vst [vmem:[#allocation7_spill] sm:$0xff] %v10609_v28  ;;  %14541 = vst [vmem:[#allocation8_spill] sm:$0xff] %v10611_v19  ;;  %8479 = vmatprep.mubr.msk.bf16.mxu1 %vm1875_vm2, %v10609_v28 }
 0x236   : > { %v1516_v27 = vpop.f32.mrf.mxu0  ;;  %v1629_v26 = vpop.f32.mrf.mxu1 }
 0x238   : > { %v10619_v22 = vpop.f32.mrf.mxu0  ;;  %v10621_v21 = vpop.f32.mrf.mxu1 }
 0x23a   : > { %v1520_v39 = vpop.f32.mrf.mxu0  ;;  %v1633_v6 = vpop.f32.mrf.mxu1 }
 0x23b   : > { %v10623_v60 = vpack.c.bf16 %v1520_v39, %v1516_v27  ;;  %v10625_v20 = vpack.c.bf16 %v1633_v6, %v1629_v26 }
 0x23c   : > { %v10627_v17 = vpop.f32.mrf.mxu0  ;;  %v10629_v45 = vpop.f32.mrf.mxu1 }
 0x23d   : > { %14542 = vst [vmem:[#allocation9_spill] sm:$0xff] %v10623_v60  ;;  %14543 = vst [vmem:[#allocation10_spill] sm:$0xff] %v10625_v20 }
 0x23e   : > { %v1526_v51 = vpop.f32.mrf.mxu0  ;;  %v1639_v43 = vpop.f32.mrf.mxu1 }
 0x240   : > { %v10631_v57 = vpop.f32.mrf.mxu0  ;;  %v10633_v32 = vpop.f32.mrf.mxu1 }
 0x242   : > { %v1530_v59 = vpop.f32.mrf.mxu0  ;;  %v1643_v29 = vpop.f32.mrf.mxu1 }
 0x243   : > { %v10635_v5 = vpack.c.bf16 %v1530_v59, %v1526_v51  ;;  %v10637_v11 = vpack.c.bf16 %v1643_v29, %v1639_v43 }
 0x244   : > { %v1532_v13 = vpop.f32.mrf.mxu0  ;;  %v10639_v49 = vpop.f32.mrf.mxu1 }
 0x245   : > { %14544 = vst [vmem:[#allocation11_spill] sm:$0xff] %v10635_v5  ;;  %14545 = vst [vmem:[#allocation12_spill] sm:$0xff] %v10637_v11 }
 0x246   : > { %v1536_v16 = vpop.f32.mrf.mxu0  ;;  %v1649_v7 = vpop.f32.mrf.mxu1 }
 0x248   : > { %v1538_v18 = vpop.f32.mrf.mxu0  ;;  %v10641_v25 = vpop.f32.mrf.mxu1 }
 0x24a   : > { %v1540_v38 = vpop.f32.mrf.mxu0  ;;  %v1653_v55 = vpop.f32.mrf.mxu1 }
 0x24b   : > { %v10643_v14 = vpack.c.bf16 %v1540_v38, %v1536_v16  ;;  %v10645_v36 = vpack.c.bf16 %v1653_v55, %v1649_v7  ;;  %v10700_v38 = vpack.c.bf16 %v1532_v13, %v10631_v57  ;;  %v10718_v13 = vpack.c.bf16 %v10613_v1, %v10605_v41 }
 0x24c   : > { %v1542_v31 = vpop.f32.mrf.mxu0  ;;  %v10647_v61 = vpop.f32.mrf.mxu1 }
 0x24d   : > { %14546 = vst [vmem:[#allocation13_spill] sm:$0xff] %v10643_v14  ;;  %14547 = vst [vmem:[#allocation14_spill] sm:$0xff] %v10645_v36  ;;  %v10691_v59 = vpack.c.bf16 %v1542_v31, %v1538_v18  ;;  %v10708_v31 = vpack.c.bf16 %v10627_v17, %v10619_v22 }
 0x24e   : > { %v10649_v23 = vpop.f32.mrf.mxu0  ;;  %v1659_v4 = vpop.f32.mrf.mxu1  ;;  %14556 = vst [vmem:[#allocation23_spill] sm:$0xff] %v10700_v38  ;;  %14559 = vst [vmem:[#allocation26_spill] sm:$0xff] %v10718_v13 }
 0x24f   : > { %14554 = vst [vmem:[#allocation21_spill] sm:$0xff] %v10691_v59  ;;  %14557 = vst [vmem:[#allocation24_spill] sm:$0xff] %v10708_v31 }
 0x250   : > { %v1548_v63 = vpop.f32.mrf.mxu0  ;;  %v10651_v34 = vpop.f32.mrf.mxu1 }
 0x252   : > { %v10653_v8 = vpop.f32.mrf.mxu0  ;;  %v1663_v3 = vpop.f32.mrf.mxu1 }
 0x253   : > { %v10655_v48 = vpack.c.bf16 %v1663_v3, %v1659_v4 }
 0x254   : > { %v1552_v15 = vpop.f32.mrf.mxu0  ;;  %v1665_v1 = vpop.f32.mrf.mxu1 }
 0x255   : > { %14548 = vst [vmem:[#allocation15_spill] sm:$0xff] %v10655_v48  ;;  %v10685_v6 = vpack.c.bf16 %v1552_v15, %v1548_v63 }
 0x256   : > { %v10657_v24 = vpop.f32.mrf.mxu0 }
 0x257   : > { %14553 = vst [vmem:[#allocation20_spill] sm:$0xff] %v10685_v6 }
 0x258   : > { %v1558_v56 = vpop.f32.mrf.mxu0 }
 0x25a   : > { %v10659_v9 = vpop.f32.mrf.mxu0 }
 0x25c   : > { %v1562_v53 = vpop.f32.mrf.mxu0 }
 0x25d   : > { %v10675_v54 = vpack.c.bf16 %v1562_v53, %v1558_v56 }
 0x25e   : > { %v10661_v30 = vpop.f32.mrf.mxu0 }
 0x25f   : > { %14550 = vst [vmem:[#allocation17_spill] sm:$0xff] %v10675_v54 }
 0x260   : > { %v1568_v33 = vpop.f32.mrf.mxu0 }
 0x262   : > { %v10663_v40 = vpop.f32.mrf.mxu0 }
 0x264   : > { %v1572_v37 = vpop.f32.mrf.mxu0 }
 0x265   : > { %v10677_v0 = vpack.c.bf16 %v1572_v37, %v1568_v33  ;;  %v10736_v33 = vpack.c.bf16 %v10653_v8, %v10649_v23  ;;  %v10738_v37 = vpop.f32.mrf.mxu1  ;;  %v10756_v8 = vpack.c.bf16 %v10659_v9, %v10657_v24 }
 0x266   : > { %v10665_v12 = vpop.f32.mrf.mxu0 }
 0x267   : > { %14551 = vst [vmem:[#allocation18_spill] sm:$0xff] %v10677_v0  ;;  %14561 = vst [vmem:[#allocation28_spill] sm:$0xff] %v10736_v33 }
 0x268   : > { %v1578_v35 = vpop.f32.mrf.mxu0  ;;  %14564 = vst [vmem:[#allocation31_spill] sm:$0xff] %v10756_v8 }
 0x26a   : > { %v10667_v50 = vpop.f32.mrf.mxu0 }
 0x26c   : > { %v1582_v52 = vpop.f32.mrf.mxu0 }
 0x26d   : > { %v10669_v47 = vpack.c.bf16 %v1582_v52, %v1578_v35 }
 0x26e   : > { %v1732_v46 = vpop.f32.mrf.mxu0 }
 0x26f   : > { %14549 = vst [vmem:[#allocation16_spill] sm:$0xff] %v10669_v47  ;;  %2340 = vrot.lane.b32.xlu1 %v10669_v47, %s9800_s21  ;;  %1873 = vrot.lane.b32.xlu0 %v10669_v47, %s9801_s23 }
 0x270   : > { %v1734_v10 = vpop.f32.mrf.mxu0 }
 0x271   : > { %v10748_v10 = vpack.c.bf16 %v10663_v40, %v10661_v30  ;;  %v10766_v40 = vpack.c.bf16 %v10667_v50, %v10665_v12 }
 0x272   : > { %v1735_v27 = vpop.f32.mrf.mxu0 }
 0x273   : > { %v10679_v26 = vpack.c.bf16 %v1735_v27, %v1732_v46  ;;  %1871 = vrot.lane.b32.xlu1 %v10677_v0, %s9801_s23  ;;  %1869 = vrot.lane.b32.xlu0 %v10675_v54, %s9801_s23  ;;  %14563 = vst [vmem:[#allocation30_spill] sm:$0xff] %v10748_v10  ;;  %v1671_v27 = vpop.f32.mrf.mxu1  ;;  %14566 = vst [vmem:[#allocation33_spill] sm:$0xff] %v10766_v40 }
 0x274   : > { %v1737_v39 = vpop.f32.mrf.mxu0 }
 0x275   : > { %14552 = vst [vmem:[#allocation19_spill] sm:$0xff] %v10679_v26 }
 0x276   : > { %v1740_v51 = vpop.f32.mrf.mxu0 }
 0x277   : > { %2338 = vrot.lane.b32.xlu1 %v10677_v0, %s9800_s21  ;;  %1867 = vrot.lane.b32.xlu0 %v10685_v6, %s9801_s23  ;;  %v11020_v0 = vld [vmem:[%s14400_s1] sm:$0xff] }
 0x278   : > { %v1742_v43 = vpop.f32.mrf.mxu0 }
 0x27a   : > { %v1743_v29 = vpop.f32.mrf.mxu0 }
 0x27b   : > { %v10693_v16 = vpack.c.bf16 %v1743_v29, %v1740_v51  ;;  %2336 = vrot.lane.b32.xlu1 %v10675_v54, %s9800_s21  ;;  %1865 = vrot.lane.b32.xlu0 %v10691_v59, %s9801_s23  ;;  %v1673_v51 = vpop.f32.mrf.mxu1 }
 0x27c   : > { %v1745_v7 = vpop.f32.mrf.mxu0 }
 0x27d   : > { %14555 = vst [vmem:[#allocation22_spill] sm:$0xff] %v10693_v16  ;;  %v1675_v7 = vpop.f32.mrf.mxu1 }
 0x27e   : > { %v1748_v55 = vpop.f32.mrf.mxu0 }
 0x27f   : > { %2334 = vrot.lane.b32.xlu1 %v10685_v6, %s9800_s21  ;;  %1863 = vrot.lane.b32.xlu0 %v10700_v38, %s9801_s23  ;;  %v1679_v9 = vpop.f32.mrf.mxu1 }
 0x280   : > { %v1750_v18 = vpop.f32.mrf.mxu0 }
 0x281   : > { %v1681_v50 = vpop.f32.mrf.mxu1 }
 0x282   : > { %v1751_v4 = vpop.f32.mrf.mxu0 }
 0x283   : > { %v10710_v63 = vpack.c.bf16 %v1751_v4, %v1748_v55  ;;  %2332 = vrot.lane.b32.xlu1 %v10691_v59, %s9800_s21  ;;  %1861 = vrot.lane.b32.xlu0 %v10708_v31, %s9801_s23 }
 0x284   : > { %v1753_v57 = vpop.f32.mrf.mxu0 }
 0x285   : > { %14558 = vst [vmem:[#allocation25_spill] sm:$0xff] %v10710_v63 }
 0x286   : > { %v1756_v3 = vpop.f32.mrf.mxu0 }
 0x287   : > { %2330 = vrot.lane.b32.xlu1 %v10700_v38, %s9800_s21  ;;  %1859 = vrot.lane.b32.xlu0 %v10718_v13, %s9801_s23 }
 0x288   : > { %v1758_v22 = vpop.f32.mrf.mxu0 }
 0x289   : > { %v10783_v22 = vpack.c.bf16 %v1665_v1, %v10651_v34  ;;  %v10801_v34 = vpack.c.bf16 %v10615_v42, %v10607_v58  ;;  %v10817_v58 = vpack.c.bf16 %v10629_v45, %v10621_v21  ;;  %v10821_v42 = vpack.c.bf16 %v10647_v61, %v10641_v25 }
 0x28a   : > { %v1759_v17 = vpop.f32.mrf.mxu0  ;;  %v10834_v21 = vpack.c.bf16 %v1673_v51, %v10738_v37 }
 0x28b   : > { %v10724_v15 = vpack.c.bf16 %v1759_v17, %v1756_v3  ;;  %2328 = vrot.lane.b32.xlu1 %v10708_v31, %s9800_s21  ;;  %2310 = vrot.lane.b32.xlu0 %v10609_v28, %s9802_s13  ;;  %14568 = vst [vmem:[#allocation35_spill] sm:$0xff] %v10783_v22  ;;  %v1683_v17 = vpop.f32.mrf.mxu1  ;;  %14571 = vst [vmem:[#allocation38_spill] sm:$0xff] %v10801_v34 }
 0x28c   : > { %v1761_v41 = vpop.f32.mrf.mxu0  ;;  %14574 = vst [vmem:[#allocation41_spill] sm:$0xff] %v10817_v58  ;;  %14575 = vst [vmem:[#allocation42_spill] sm:$0xff] %v10821_v42  ;;  %v10852_v61 = vpack.c.bf16 %v1683_v17, %v1679_v9 }
 0x28d   : > { %14560 = vst [vmem:[#allocation27_spill] sm:$0xff] %v10724_v15  ;;  %14577 = vst [vmem:[#allocation44_spill] sm:$0xff] %v10834_v21 }
 0x28e   : > { %v1764_v56 = vpop.f32.mrf.mxu0  ;;  %14579 = vst [vmem:[#allocation46_spill] sm:$0xff] %v10852_v61 }
 0x28f   : > { %2326 = vrot.lane.b32.xlu1 %v10718_v13, %s9800_s21  ;;  %2314 = vrot.lane.b32.xlu0 %v10635_v5, %s9802_s13 }
 0x290   : > { %v1766_v53 = vpop.f32.mrf.mxu0 }
 0x292   : > { %v1767_v35 = vpop.f32.mrf.mxu0 }
 0x293   : > { %v10740_v52 = vpack.c.bf16 %v1767_v35, %v1764_v56  ;;  %2312 = vrot.lane.b32.xlu1 %v10623_v60, %s9802_s13  ;;  %2318 = vrot.lane.b32.xlu0 %v10736_v33, %s9802_s13  ;;  %v10793_v35 = vpack.c.bf16 %v10639_v49, %v10633_v32  ;;  %v10809_v32 = vpack.c.bf16 %v1675_v7, %v1671_v27 }
 0x294   : > { %v1769_v46 = vpop.f32.mrf.mxu0 }
 0x295   : > { %14562 = vst [vmem:[#allocation29_spill] sm:$0xff] %v10740_v52  ;;  %14570 = vst [vmem:[#allocation37_spill] sm:$0xff] %v10793_v35  ;;  %v1685_v46 = vpop.f32.mrf.mxu1  ;;  %v11085_v52 = vld [vmem:[%s14400_s1 + $0x20] sm:$0xff] }
 0x296   : > { %v1772_v39 = vpop.f32.mrf.mxu0  ;;  %v10803_v1 = vpack.c.bf16 %v1685_v46, %v1681_v50  ;;  %14573 = vst [vmem:[#allocation40_spill] sm:$0xff] %v10809_v32 }
 0x297   : > { %2316 = vrot.lane.b32.xlu1 %v10643_v14, %s9802_s13  ;;  %2322 = vrot.lane.b32.xlu0 %v10748_v10, %s9802_s13 }
 0x298   : > { %v1774_v23 = vpop.f32.mrf.mxu0  ;;  %14572 = vst [vmem:[#allocation39_spill] sm:$0xff] %v10803_v1 }
 0x29a   : > { %v1775_v43 = vpop.f32.mrf.mxu0 }
 0x29b   : > { %v10758_v29 = vpack.c.bf16 %v1775_v43, %v1772_v39  ;;  %2320 = vrot.lane.b32.xlu1 %v10756_v8, %s9802_s13  ;;  %2800 = vrot.lane.b32.xlu0 %v10609_v28, %s9801_s23  ;;  %v1689_v39 = vpop.f32.mrf.mxu1 }
 0x29c   : > { %v1777_v30 = vpop.f32.mrf.mxu0 }
 0x29d   : > { %14565 = vst [vmem:[#allocation32_spill] sm:$0xff] %v10758_v29  ;;  %v1691_v49 = vpop.f32.mrf.mxu1 }
 0x29e   : > { %v1780_v55 = vpop.f32.mrf.mxu0 }
 0x29f   : > { %2324 = vrot.lane.b32.xlu1 %v10766_v40, %s9802_s13  ;;  %2804 = vrot.lane.b32.xlu0 %v10635_v5, %s9801_s23  ;;  %v1693_v23 = vpop.f32.mrf.mxu1 }
 0x2a0   : > { %v1782_v24 = vpop.f32.mrf.mxu0  ;;  %v10827_v27 = vpack.c.bf16 %v1693_v23, %v1689_v39 }
 0x2a1   : > { %v1695_v45 = vpop.f32.mrf.mxu1 }
 0x2a2   : > { %v1783_v18 = vpop.f32.mrf.mxu0  ;;  %14576 = vst [vmem:[#allocation43_spill] sm:$0xff] %v10827_v27  ;;  %v10840_v25 = vpack.c.bf16 %v1695_v45, %v1691_v49 }
 0x2a3   : > { %v10772_v4 = vpack.c.bf16 %v1783_v18, %v1780_v55  ;;  %2802 = vrot.lane.b32.xlu1 %v10623_v60, %s9801_s23  ;;  %2808 = vrot.lane.b32.xlu0 %v10736_v33, %s9801_s23 }
 0x2a4   : > { %v1785_v12 = vpop.f32.mrf.mxu0  ;;  %14578 = vst [vmem:[#allocation45_spill] sm:$0xff] %v10840_v25 }
 0x2a5   : > { %14567 = vst [vmem:[#allocation34_spill] sm:$0xff] %v10772_v4 }
 0x2a6   : > { %v1788_v57 = vpop.f32.mrf.mxu0 }
 0x2a7   : > { %2806 = vrot.lane.b32.xlu1 %v10643_v14, %s9801_s23  ;;  %2812 = vrot.lane.b32.xlu0 %v10748_v10, %s9801_s23 }
 0x2a8   : > { %v1790_v3 = vpop.f32.mrf.mxu0 }
 0x2aa   : > { %v1791_v41 = vpop.f32.mrf.mxu0 }
 0x2ab   : > { %v10785_v56 = vpack.c.bf16 %v1791_v41, %v1788_v57  ;;  %2810 = vrot.lane.b32.xlu1 %v10756_v8, %s9801_s23  ;;  %2687 = vrot.lane.b32.xlu0 %v10783_v22, %s9802_s13 }
 0x2ac   : > { %v1793_v53 = vpop.f32.mrf.mxu0 }
 0x2ad   : > { %14569 = vst [vmem:[#allocation36_spill] sm:$0xff] %v10785_v56 }
 0x2af   : > { %2814 = vrot.lane.b32.xlu1 %v10766_v40, %s9801_s23  ;;  %2683 = vrot.lane.b32.xlu0 %v10793_v35, %s9802_s13 }
 0x2b3   : > { %2691 = vrot.lane.b32.xlu1 %v10803_v1, %s9802_s13  ;;  %2679 = vrot.lane.b32.xlu0 %v10801_v34, %s9802_s13 }
 0x2b7   : > { %2689 = vrot.lane.b32.xlu1 %v10809_v32, %s9802_s13  ;;  %3155 = vrot.lane.b32.xlu0 %v10809_v32, %s9801_s23 }
 0x2bb   : > { %2685 = vrot.lane.b32.xlu1 %v10821_v42, %s9802_s13  ;;  %3147 = vrot.lane.b32.xlu0 %v10817_v58, %s9801_s23 }
 0x2bf   : > { %2681 = vrot.lane.b32.xlu1 %v10817_v58, %s9802_s13  ;;  %3304 = vrot.lane.b32.xlu0 %v10827_v27, %s9802_s13 }
 0x2c3   : > { %3157 = vrot.lane.b32.xlu1 %v10803_v1, %s9801_s23  ;;  %3300 = vrot.lane.b32.xlu0 %v10834_v21, %s9802_s13 }
 0x2c7   : > { %3153 = vrot.lane.b32.xlu1 %v10783_v22, %s9801_s23  ;;  %2693 = vrot.lane.b32.xlu0 %v10840_v25, %s9802_s13 }
 0x2cb   : > { %3151 = vrot.lane.b32.xlu1 %v10821_v42, %s9801_s23 }
 0x2cf   : > { %3149 = vrot.lane.b32.xlu1 %v10793_v35, %s9801_s23 }
 0x2d3   : > { %3145 = vrot.lane.b32.xlu1 %v10801_v34, %s9801_s23 }
 0x2d7   : > { %3302 = vrot.lane.b32.xlu1 %v10852_v61, %s9802_s13 }
 0x2db   : > { %3159 = vrot.lane.b32.xlu1 %v10840_v25, %s9801_s23 }
 0x2e1   : > { %v2341_v37 = vpop.permute.xlu1 %2340  ;;  %v1874_v51 = vpop.permute.xlu0 %1873 }
 0x2e2   : > { %8847 = vmatprep.subr.msk.bf16.mxu1 %vm1875_vm2, %v1874_v51  ;;  %8855 = vmatprep.subr.msk.bf16.mxu0 %vm1875_vm2, %v2341_v37  ;;  %v1922_v43 = vsel %vm1875_vm2, %v1874_v51, 0  ;;  %v2388_v30 = vsel %vm1875_vm2, %v2341_v37, 0 }
 0x2e3   : > { %8464 = vmatpush3.bf16.xpose.msra.mxu1 %v1922_v43  ;;  %8528 = vmatpush3.bf16.xpose.msra.mxu0 %v2388_v30 }
 0x2e5   : > { %v1872_v7 = vpop.permute.xlu1 %1871  ;;  %v1870_v55 = vpop.permute.xlu0 %1869 }
 0x2e6   : > { %8848 = vmatprep.subr.msk.bf16.mxu1 %vm1875_vm2, %v1872_v7  ;;  %v1919_v18 = vsel %vm1875_vm2, %v1872_v7, 0  ;;  %v1916_v17 = vsel %vm1875_vm2, %v1870_v55, 0 }
 0x2e9   : > { %v2339_v24 = vpop.permute.xlu1 %2338  ;;  %v1868_v9 = vpop.permute.xlu0 %1867 }
 0x2ea   : > { %8856 = vmatprep.subr.msk.bf16.mxu0 %vm1875_vm2, %v2339_v24  ;;  %v2385_v12 = vsel %vm1875_vm2, %v2339_v24, 0  ;;  %v1913_v49 = vsel %vm1875_vm2, %v1868_v9, 0 }
 0x2eb   : > { %8466 = vmatpush3.bf16.xpose.msra.mxu1 %v1919_v18  ;;  %8530 = vmatpush3.bf16.xpose.msra.mxu0 %v2385_v12 }
 0x2ec   : > { %8849 = vmatprep.subr.msk.bf16.mxu1 %vm1875_vm2, %v1870_v55 }
 0x2ed   : > { %v2337_v50 = vpop.permute.xlu1 %2336  ;;  %v1866_v57 = vpop.permute.xlu0 %1865 }
 0x2ee   : > { %8857 = vmatprep.subr.msk.bf16.mxu0 %vm1875_vm2, %v2337_v50  ;;  %v2382_v41 = vsel %vm1875_vm2, %v2337_v50, 0  ;;  %v1910_v43 = vsel %vm1875_vm2, %v1866_v57, 0 }
 0x2f1   : > { %v1864_v3 = vpop.permute.xlu0 %1863  ;;  %v2335_v53 = vpop.permute.xlu1 %2334 }
 0x2f2   : > { %v2379_v23 = vsel %vm1875_vm2, %v2335_v53, 0 }
 0x2f3   : > { %8468 = vmatpush3.bf16.xpose.msra.mxu1 %v1916_v17  ;;  %8532 = vmatpush3.bf16.xpose.msra.mxu0 %v2382_v41 }
 0x2f4   : > { %8850 = vmatprep.subr.msk.bf16.mxu1 %vm1875_vm2, %v1868_v9  ;;  %8858 = vmatprep.subr.msk.bf16.mxu0 %vm1875_vm2, %v2335_v53  ;;  %v1907_v9 = vsel %vm1875_vm2, %v1864_v3, 0 }
 0x2f5   : > { %v1862_v46 = vpop.permute.xlu0 %1861  ;;  %v2333_v45 = vpop.permute.xlu1 %2332 }
 0x2f6   : > { %v2376_v30 = vsel %vm1875_vm2, %v2333_v45, 0  ;;  %v1904_v17 = vsel %vm1875_vm2, %v1862_v46, 0 }
 0x2f9   : > { %v1860_v39 = vpop.permute.xlu0 %1859  ;;  %v2331_v7 = vpop.permute.xlu1 %2330 }
 0x2fa   : > { %v2373_v18 = vsel %vm1875_vm2, %v2331_v7, 0 }
 0x2fb   : > { %8470 = vmatpush3.bf16.xpose.msra.mxu1 %v1913_v49  ;;  %8534 = vmatpush3.bf16.xpose.msra.mxu0 %v2379_v23  ;;  %v1901_v23 = vsel %vm1875_vm2, %v1860_v39, 0 }
 0x2fc   : > { %8851 = vmatprep.subr.msk.bf16.mxu1 %vm1875_vm2, %v1866_v57  ;;  %8859 = vmatprep.subr.msk.bf16.mxu0 %vm1875_vm2, %v2333_v45 }
 0x2fd   : > { %v2311_v37 = vpop.permute.xlu0 %2310  ;;  %v2329_v12 = vpop.permute.xlu1 %2328 }
 0x2fe   : > { %8543 = vmatprep.mubr.msk.bf16.mxu0 %vm1875_vm2, %v2311_v37  ;;  %v2370_v41 = vsel %vm1875_vm2, %v2329_v12, 0 }
 0x301   : > { %v2315_v51 = vpop.permute.xlu0 %2314  ;;  %v2327_v53 = vpop.permute.xlu1 %2326 }
 0x302   : > { %v2367_v45 = vsel %vm1875_vm2, %v2327_v53, 0 }
 0x303   : > { %8472 = vmatpush3.bf16.xpose.msra.mxu1 %v1910_v43  ;;  %8536 = vmatpush3.bf16.xpose.msra.mxu0 %v2376_v30 }
 0x304   : > { %8852 = vmatprep.subr.msk.bf16.mxu1 %vm1875_vm2, %v1864_v3  ;;  %8860 = vmatprep.subr.msk.bf16.mxu0 %vm1875_vm2, %v2331_v7 }
 0x305   : > { %v2319_v55 = vpop.permute.xlu0 %2318  ;;  %v2313_v37 = vpop.permute.xlu1 %2312 }
 0x309   : > { %v2323_v24 = vpop.permute.xlu0 %2322  ;;  %v2317_v7 = vpop.permute.xlu1 %2316 }
 0x30b   : > { %8474 = vmatpush3.bf16.xpose.msra.mxu1 %v1907_v9  ;;  %8538 = vmatpush3.bf16.xpose.msra.mxu0 %v2373_v18 }
 0x30c   : > { %8853 = vmatprep.subr.msk.bf16.mxu1 %vm1875_vm2, %v1862_v46  ;;  %8861 = vmatprep.subr.msk.bf16.mxu0 %vm1875_vm2, %v2329_v12 }
 0x30d   : > { %v10885_v50 = vpop.permute.xlu0 %2800  ;;  %v2321_v12 = vpop.permute.xlu1 %2320 }
 0x311   : > { %v10887_v57 = vpop.permute.xlu0 %2804 }
 0x313   : > { %8476 = vmatpush3.bf16.xpose.msra.mxu1 %v1904_v17  ;;  %8540 = vmatpush3.bf16.xpose.msra.mxu0 %v2370_v41  ;;  %v2325_v41 = vpop.permute.xlu1 %2324 }
 0x314   : > { %8854 = vmatprep.subr.msk.bf16.mxu1 %vm1875_vm2, %v1860_v39  ;;  %8862 = vmatprep.subr.msk.bf16.mxu0 %vm1875_vm2, %v2327_v53  ;;  %v2862_v39 = vsel %vm1875_vm2, %v10827_v27, 0 }
 0x315   : > { %v10893_v3 = vpop.permute.xlu0 %2808 }
 0x319   : > { %v10895_v49 = vpop.permute.xlu0 %2812 }
 0x31b   : > { %8478 = vmatpush3.bf16.xpose.msra.mxu1 %v1901_v23  ;;  %8542 = vmatpush3.bf16.xpose.msra.mxu0 %v2367_v45  ;;  %v2850_v45 = vsel %vm1875_vm2, %v10645_v36, 0 }
 0x31c   : > { %8495 = vmatprep.subr.bf16.mxu1 %v10840_v25  ;;  %8863 = vmatprep.subr.msk.bf16.mxu0 %vm1875_vm2, %v10827_v27 }
 0x31d   : > { %v10902_v46 = vpop.permute.xlu0 %2687 }
 0x31e   : > { %14580 = vst [vmem:[#allocation47_spill] sm:$0xff] %v10902_v46 }
 0x321   : > { %v10904_v43 = vpop.permute.xlu0 %2683 }
 0x322   : > { %14581 = vst [vmem:[#allocation48_spill] sm:$0xff] %v10904_v43  ;;  %8480 = vmatmul.mubr.msk.bf16.vlgmr.msra.gmra.mxu1 %vm1875_vm2, %v10623_v60  ;;  %8544 = vmatmul.mubr.msk.bf16.vlgmr.msra.gmra.mxu0 %vm1875_vm2, %v2313_v37  ;;  %v2844_v37 = vsel %vm1875_vm2, %v10625_v20, 0 }
 0x323   : > { %8483 = vmatprep.mubr.msk.bf16.mxu1 %vm1875_vm2, %v10635_v5  ;;  %8496 = vmatpush3.bf16.msra.mxu1 %v10840_v25 }
 0x324   : > { %8547 = vmatprep.mubr.msk.bf16.mxu0 %vm1875_vm2, %v2315_v51  ;;  %8592 = vmatpush3.bf16.xpose.msra.mxu0 %v2862_v39  ;;  %v2859_v51 = vsel %vm1875_vm2, %v10852_v61, 0  ;;  %v2841_v39 = vsel %vm1875_vm2, %v10611_v19, 0 }
 0x325   : > { %8497 = vmatprep.subr.bf16.mxu1 %v10803_v1  ;;  %8864 = vmatprep.subr.msk.bf16.mxu0 %vm1875_vm2, %v10852_v61  ;;  %v10918_v30 = vpop.permute.xlu0 %2679  ;;  %v11059_v61 = vld [vmem:[%s14400_s1 + $0x30] sm:$0xff] }
 0x326   : > { %14582 = vst [vmem:[#allocation49_spill] sm:$0xff] %v10918_v30 }
 0x327   : > { %8498 = vmatpush3.bf16.msra.mxu1 %v10803_v1  ;;  %v11137_v1 = vld [vmem:[%s14400_s1 + $0x40] sm:$0xff] }
 0x328   : > { %8499 = vmatprep.subr.bf16.mxu1 %v10809_v32 }
 0x329   : > { %v10922_v9 = vpop.permute.xlu0 %3155 }
 0x32a   : > { %14583 = vst [vmem:[#allocation50_spill] sm:$0xff] %v10922_v9  ;;  %8484 = vmatmul.mubr.msk.bf16.gmra.mxu1 %vm1875_vm2, %v10643_v14  ;;  %8548 = vmatmul.mubr.msk.bf16.gmra.mxu0 %vm1875_vm2, %v2317_v7  ;;  %v2803_v7 = vpop.permute.xlu1 %2802 }
 0x32b   : > { %8487 = vmatprep.mubr.msk.bf16.mxu1 %vm1875_vm2, %v10736_v33  ;;  %8500 = vmatpush3.bf16.msra.mxu1 %v10809_v32 }
 0x32c   : > { %8551 = vmatprep.mubr.msk.bf16.mxu0 %vm1875_vm2, %v2319_v55  ;;  %8594 = vmatpush3.bf16.xpose.msra.mxu0 %v2859_v51  ;;  %v2856_v55 = vsel %vm1875_vm2, %v10834_v21, 0 }
 0x32d   : > { %8501 = vmatprep.subr.bf16.mxu1 %v10783_v22  ;;  %8865 = vmatprep.subr.msk.bf16.mxu0 %vm1875_vm2, %v10834_v21  ;;  %v10936_v18 = vpop.permute.xlu0 %3147 }
 0x32e   : > { %14584 = vst [vmem:[#allocation51_spill] sm:$0xff] %v10936_v18  ;;  %v2807_v51 = vpop.permute.xlu1 %2806 }
 0x32f   : > { %8502 = vmatpush3.bf16.msra.mxu1 %v10783_v22 }
 0x330   : > { %8503 = vmatprep.subr.bf16.mxu1 %v10821_v42 }
 0x331   : > { %v10943_v17 = vpop.permute.xlu0 %3304 }
 0x332   : > { %8488 = vmatmul.mubr.msk.bf16.gmra.mxu1 %vm1875_vm2, %v10756_v8  ;;  %8552 = vmatmul.mubr.msk.bf16.gmra.mxu0 %vm1875_vm2, %v2321_v12  ;;  %14585 = vst [vmem:[#allocation52_spill] sm:$0xff] %v10943_v17  ;;  %v2811_v12 = vpop.permute.xlu1 %2810 }
 0x333   : > { %8491 = vmatprep.mubr.msk.bf16.mxu1 %vm1875_vm2, %v10748_v10  ;;  %8504 = vmatpush3.bf16.msra.mxu1 %v10821_v42 }
 0x334   : > { %8555 = vmatprep.mubr.msk.bf16.mxu0 %vm1875_vm2, %v2323_v24  ;;  %8596 = vmatpush3.bf16.xpose.msra.mxu0 %v2856_v55  ;;  %v2853_v24 = vsel %vm1875_vm2, %v10655_v48, 0 }
 0x335   : > { %8505 = vmatprep.subr.bf16.mxu1 %v10793_v35  ;;  %8866 = vmatprep.subr.msk.bf16.mxu0 %vm1875_vm2, %v10655_v48  ;;  %v10956_v53 = vpop.permute.xlu0 %3300 }
 0x336   : > { %14586 = vst [vmem:[#allocation53_spill] sm:$0xff] %v10956_v53  ;;  %v2815_v55 = vpop.permute.xlu1 %2814 }
 0x337   : > { %8506 = vmatpush3.bf16.msra.mxu1 %v10793_v35 }
 0x338   : > { %8507 = vmatprep.subr.bf16.mxu1 %v10817_v58 }
 0x339   : > { %v10969_v23 = vpop.permute.xlu0 %2693 }
 0x33a   : > { %8492 = vmatmul.mubr.msk.bf16.gmra.mxu1 %vm1875_vm2, %v10766_v40  ;;  %8556 = vmatmul.mubr.msk.bf16.gmra.mxu0 %vm1875_vm2, %v2325_v41  ;;  %14587 = vst [vmem:[#allocation54_spill] sm:$0xff] %v10969_v23 }
 0x33b   : > { %8508 = vmatpush3.bf16.msra.mxu1 %v10817_v58  ;;  %8607 = vmatprep.mubr.msk.bf16.mxu0 %vm1875_vm2, %v10885_v50  ;;  %v2847_v50 = vsel %vm1875_vm2, %v10637_v11, 0 }
 0x33c   : > { %8598 = vmatpush3.bf16.xpose.msra.mxu0 %v2853_v24  ;;  %8509 = vmatprep.subr.bf16.mxu1 %v10801_v34 }
 0x33d   : > { %8867 = vmatprep.subr.msk.bf16.mxu0 %vm1875_vm2, %v10645_v36 }
 0x33f   : > { %8510 = vmatpush3.bf16.msra.mxu1 %v10801_v34 }
 0x340   : > { %8559 = vmatprep.subr.bf16.mxu1 %v10969_v23 }
 0x344   : > { %8600 = vmatpush3.bf16.xpose.msra.mxu0 %v2850_v45 }
 0x345   : > { %8868 = vmatprep.subr.msk.bf16.mxu0 %vm1875_vm2, %v10637_v11 }
 0x34c   : > { %8602 = vmatpush3.bf16.xpose.msra.mxu0 %v2847_v50 }
 0x34d   : > { %8869 = vmatprep.subr.msk.bf16.mxu0 %vm1875_vm2, %v10625_v20 }
 0x354   : > { %8604 = vmatpush3.bf16.xpose.msra.mxu0 %v2844_v37 }
 0x355   : > { %8870 = vmatprep.subr.msk.bf16.mxu0 %vm1875_vm2, %v10611_v19 }
 0x35c   : > { %8606 = vmatpush3.bf16.xpose.msra.mxu0 %v2841_v39 }
 0x363   : > { %8608 = vmatmul.mubr.msk.bf16.vlgmr.msra.gmra.mxu0 %vm1875_vm2, %v2803_v7 }
 0x364   : > { %8611 = vmatprep.mubr.msk.bf16.mxu0 %vm1875_vm2, %v10887_v57  ;;  %v11000_v57 = vld [vmem:[%s14400_s1 + $0x10] sm:$0xff] }
 0x36b   : > { %8612 = vmatmul.mubr.msk.bf16.gmra.mxu0 %vm1875_vm2, %v2807_v51 }
 0x36c   : > { %8615 = vmatprep.mubr.msk.bf16.mxu0 %vm1875_vm2, %v10893_v3 }
 0x373   : > { %8616 = vmatmul.mubr.msk.bf16.gmra.mxu0 %vm1875_vm2, %v2811_v12 }
 0x374   : > { %8619 = vmatprep.mubr.msk.bf16.mxu0 %vm1875_vm2, %v10895_v49  ;;  %v11008_v49 = vld [vmem:[%s14400_s1 + $0x18] sm:$0xff] }
 0x37b   : > { %8620 = vmatmul.mubr.msk.bf16.gmra.mxu0 %vm1875_vm2, %v2815_v55 }
 0x3e2   : > { %v8481_v41 = vpop.f32.mrf.mxu1  ;;  %v8545_v24 = vpop.f32.mrf.mxu0 }
 0x3e3   : > { %v2023_v45 = vmul.f32 0.07216878, %v8481_v41  ;;  %v2489_v3 = vmul.f32 0.07216878, %v8545_v24 }
 0x3e4   : > { %v1958_v50 = vpop.f32.mrf.mxu1  ;;  %v2424_v37 = vpop.f32.mrf.mxu0 }
 0x3e5   : > { %v11003_v39 = vadd.f32 %v2023_v45, %v11000_v57  ;;  %v2021_v62 = vmul.f32 0.07216878, %v1958_v50  ;;  %v11012_v2 = vadd.f32 %v2489_v3, %v11000_v57  ;;  %v2487_v3 = vmul.f32 0.07216878, %v2424_v37 }
 0x3e6   : > { %v8482_v7 = vpop.f32.mrf.mxu1  ;;  %v8546_v51 = vpop.f32.mrf.mxu0 }
 0x3e7   : > { %v2490_v12 = vmul.f32 0.07216878, %v8546_v51  ;;  %2057 = vmax.xlane.f32.xlu0 %v11003_v39  ;;  %v11025_v51 = vld [vmem:[%s14400_s1 + $0x8] sm:$0xff]  ;;  %v2024_v38 = vmul.f32 0.07216878, %v8482_v7  ;;  %v11038_v13 = vadd.f32 %v2487_v3, %v11020_v0 }
 0x3e8   : > { %v1961_v55 = vpop.f32.mrf.mxu1  ;;  %v2427_v44 = vpop.f32.mrf.mxu0 }
 0x3e9   : > { %v2022_v41 = vmul.f32 0.07216878, %v1961_v55  ;;  %v11015_v24 = vadd.f32 %v2490_v12, %v11008_v49  ;;  %v2488_v12 = vmul.f32 0.07216878, %v2427_v44  ;;  %v11030_v55 = vadd.f32 %v2021_v62, %v11020_v0 }
 0x3ea   : > { %v8485_v45 = vpop.f32.mrf.mxu1  ;;  %v8549_v47 = vpop.f32.mrf.mxu0 }
 0x3eb   : > { %2523 = vmax.xlane.f32.xlu0 %v11012_v2  ;;  %2525 = vmax.xlane.f32.xlu1 %v11015_v24  ;;  %v11033_v54 = vadd.f32 %v2022_v41, %v11025_v51  ;;  %v11041_v37 = vadd.f32 %v2488_v12, %v11025_v51  ;;  %v11046_v41 = vld [vmem:[%s14400_s1 + $0x38] sm:$0xff]  ;;  %v2027_v21 = vmul.f32 0.07216878, %v8485_v45  ;;  %v2493_v58 = vmul.f32 0.07216878, %v8549_v47 }
 0x3ec   : > { %v1974_v50 = vpop.f32.mrf.mxu1  ;;  %v2440_v6 = vpop.f32.mrf.mxu0 }
 0x3ed   : > { %v2025_v63 = vmul.f32 0.07216878, %v1974_v50  ;;  %v2491_v29 = vmul.f32 0.07216878, %v2440_v6 }
 0x3ee   : > { %v8486_v59 = vpop.f32.mrf.mxu1  ;;  %v8550_v44 = vpop.f32.mrf.mxu0 }
 0x3ef   : > { %2053 = vmax.xlane.f32.xlu0 %v11030_v55  ;;  %2055 = vmax.xlane.f32.xlu1 %v11033_v54  ;;  %v2028_v31 = vmul.f32 0.07216878, %v8486_v59  ;;  %v2494_v7 = vmul.f32 0.07216878, %v8550_v44  ;;  %v11051_v59 = vadd.f32 %v2024_v38, %v11008_v49  ;;  %v11064_v44 = vadd.f32 %v2027_v21, %v11059_v61 }
 0x3f0   : > { %v1977_v62 = vpop.f32.mrf.mxu1  ;;  %v2443_v12 = vpop.f32.mrf.mxu0 }
 0x3f1   : > { %v11054_v3 = vadd.f32 %v2028_v31, %v11046_v41  ;;  %v2026_v45 = vmul.f32 0.07216878, %v1977_v62  ;;  %v11067_v38 = vadd.f32 %v2494_v7, %v11046_v41  ;;  %v11072_v31 = vld [vmem:[%s14400_s1 + $0x28] sm:$0xff]  ;;  %v2492_v21 = vmul.f32 0.07216878, %v2443_v12 }
 0x3f2   : > { %v8489_v27 = vpop.f32.mrf.mxu1  ;;  %v8553_v26 = vpop.f32.mrf.mxu0  ;;  %v11080_v62 = vadd.f32 %v2493_v58, %v11059_v61  ;;  %v11093_v12 = vadd.f32 %v2025_v63, %v11085_v52  ;;  %v11098_v58 = vld [vmem:[%s14400_s1 + $0x58] sm:$0xff]  ;;  %v11111_v63 = vld [vmem:[%s14400_s1 + $0x50] sm:$0xff] }
 0x3f3   : > { %2519 = vmax.xlane.f32.xlu0 %v11038_v13  ;;  %2521 = vmax.xlane.f32.xlu1 %v11041_v37  ;;  %v11077_v47 = vadd.f32 %v2026_v45, %v11072_v31  ;;  %v11090_v50 = vadd.f32 %v2492_v21, %v11072_v31  ;;  %v2031_v53 = vmul.f32 0.07216878, %v8489_v27  ;;  %v2497_v9 = vmul.f32 0.07216878, %v8553_v26 }
 0x3f4   : > { %v1990_v16 = vpop.f32.mrf.mxu1  ;;  %v2456_v7 = vpop.f32.mrf.mxu0 }
 0x3f5   : > { %v11129_v26 = vadd.f32 %v2497_v9, %v11111_v63  ;;  %v2495_v9 = vmul.f32 0.07216878, %v2456_v7 }
 0x3f6   : > { %v8490_v15 = vpop.f32.mrf.mxu1  ;;  %v8554_v4 = vpop.f32.mrf.mxu0 }
 0x3f7   : > { %2059 = vmax.xlane.f32.xlu0 %v11051_v59  ;;  %2067 = vmax.xlane.f32.xlu1 %v11054_v3  ;;  %v2032_v45 = vmul.f32 0.07216878, %v8490_v15  ;;  %v2498_v21 = vmul.f32 0.07216878, %v8554_v4  ;;  %v11106_v15 = vadd.f32 %v2491_v29, %v11085_v52  ;;  %v11119_v4 = vadd.f32 %v2031_v53, %v11111_v63  ;;  %v11124_v29 = vld [vmem:[%s14400_s1 + $0x48] sm:$0xff] }
 0x3f8   : > { %v1993_v56 = vpop.f32.mrf.mxu1  ;;  %v2459_v17 = vpop.f32.mrf.mxu0  ;;  %v11155_v60 = vadd.f32 %v2495_v9, %v11137_v1 }
 0x3f9   : > { %v11103_v6 = vadd.f32 %v2032_v45, %v11098_v58  ;;  %v11116_v27 = vadd.f32 %v2498_v21, %v11098_v58  ;;  %v2030_v45 = vmul.f32 0.07216878, %v1993_v56  ;;  %v2029_v21 = vmul.f32 0.07216878, %v1990_v16 }
 0x3fa   : > { %v8493_v18 = vpop.f32.mrf.mxu1  ;;  %v8557_v34 = vpop.f32.mrf.mxu0  ;;  %v2496_v53 = vmul.f32 0.07216878, %v2459_v17  ;;  %v11150_v17 = vld [vmem:[%s14400_s1 + $0x78] sm:$0xff] }
 0x3fb   : > { %2065 = vmax.xlane.f32.xlu0 %v11064_v44  ;;  %2533 = vmax.xlane.f32.xlu1 %v11067_v38  ;;  %v11132_v56 = vadd.f32 %v2030_v45, %v11124_v29  ;;  %v11142_v14 = vadd.f32 %v2029_v21, %v11137_v1  ;;  %v2035_v21 = vmul.f32 0.07216878, %v8493_v18  ;;  %v2501_v9 = vmul.f32 0.07216878, %v8557_v34 }
 0x3fc   : > { %v2006_v35 = vpop.f32.mrf.mxu1  ;;  %v2472_v40 = vpop.f32.mrf.mxu0  ;;  %v11145_v16 = vadd.f32 %v2496_v53, %v11124_v29 }
 0x3fd   : > { %v2499_v43 = vmul.f32 0.07216878, %v2472_v40 }
 0x3fe   : > { %v8494_v8 = vpop.f32.mrf.mxu1  ;;  %v8558_v42 = vpop.f32.mrf.mxu0 }
 0x3ff   : > { %2531 = vmax.xlane.f32.xlu0 %v11080_v62  ;;  %2063 = vmax.xlane.f32.xlu1 %v11077_v47  ;;  %v2036_v45 = vmul.f32 0.07216878, %v8494_v8  ;;  %v2502_v53 = vmul.f32 0.07216878, %v8558_v42  ;;  %v11163_v8 = vld [vmem:[%s14400_s1 + $0x70] sm:$0xff]  ;;  %v11176_v42 = vld [vmem:[%s14400_s1 + $0x68] sm:$0xff] }
 0x400   : > { %v2009_v22 = vpop.f32.mrf.mxu1  ;;  %v11168_v19 = vadd.f32 %v2035_v21, %v11163_v8  ;;  %v2475_v30 = vpop.f32.mrf.mxu0  ;;  %v11181_v32 = vadd.f32 %v2501_v9, %v11163_v8  ;;  %v2033_v21 = vmul.f32 0.07216878, %v2006_v35 }
 0x401   : > { %v11158_v7 = vadd.f32 %v2036_v45, %v11150_v17  ;;  %v11171_v18 = vadd.f32 %v2502_v53, %v11150_v17  ;;  %v2034_v45 = vmul.f32 0.07216878, %v2009_v22  ;;  %v2500_v53 = vmul.f32 0.07216878, %v2475_v30  ;;  %v11189_v22 = vld [vmem:[%s14400_s1 + $0x60] sm:$0xff] }
 0x402   : > { %v11194_v25 = vadd.f32 %v2033_v21, %v11189_v22  ;;  %v11202_v30 = vadd.f32 %v2499_v43, %v11189_v22 }
 0x403   : > { %2061 = vmax.xlane.f32.xlu0 %v11093_v12  ;;  %2529 = vmax.xlane.f32.xlu1 %v11090_v50  ;;  %v11184_v34 = vadd.f32 %v2034_v45, %v11176_v42  ;;  %v11197_v9 = vadd.f32 %v2500_v53, %v11176_v42 }
 0x407   : > { %2527 = vmax.xlane.f32.xlu0 %v11106_v15  ;;  %2075 = vmax.xlane.f32.xlu1 %v11103_v6 }
 0x40b   : > { %2073 = vmax.xlane.f32.xlu0 %v11119_v4  ;;  %2541 = vmax.xlane.f32.xlu1 %v11116_v27 }
 0x40f   : > { %2539 = vmax.xlane.f32.xlu0 %v11129_v26  ;;  %2071 = vmax.xlane.f32.xlu1 %v11132_v56 }
 0x413   : > { %2069 = vmax.xlane.f32.xlu0 %v11142_v14  ;;  %2537 = vmax.xlane.f32.xlu1 %v11145_v16 }
 0x417   : > { %2535 = vmax.xlane.f32.xlu0 %v11155_v60  ;;  %2083 = vmax.xlane.f32.xlu1 %v11158_v7 }
 0x41b   : > { %2081 = vmax.xlane.f32.xlu0 %v11168_v19  ;;  %2549 = vmax.xlane.f32.xlu1 %v11171_v18 }
 0x41f   : > { %2547 = vmax.xlane.f32.xlu0 %v11181_v32  ;;  %2079 = vmax.xlane.f32.xlu1 %v11184_v34 }
 0x423   : > { %v8609_v35 = vpop.f32.mrf.mxu0  ;;  %2077 = vmax.xlane.f32.xlu0 %v11194_v25  ;;  %2545 = vmax.xlane.f32.xlu1 %v11197_v9 }
 0x424   : > { %v2963_v45 = vmul.f32 0.07216878, %v8609_v35 }
 0x425   : > { %v2898_v10 = vpop.f32.mrf.mxu0 }
 0x426   : > { %v11206_v21 = vadd.f32 %v2963_v45, %v11000_v57  ;;  %v2961_v40 = vmul.f32 0.07216878, %v2898_v10 }
 0x427   : > { %v8610_v33 = vpop.f32.mrf.mxu0  ;;  %2543 = vmax.xlane.f32.xlu0 %v11202_v30 }
 0x428   : > { %v2964_v46 = vmul.f32 0.07216878, %v8610_v33  ;;  %v11214_v43 = vadd.f32 %v2961_v40, %v11020_v0 }
 0x429   : > { %v2901_v53 = vpop.f32.mrf.mxu0 }
 0x42a   : > { %v11209_v5 = vadd.f32 %v2964_v46, %v11008_v49  ;;  %v2962_v28 = vmul.f32 0.07216878, %v2901_v53 }
 0x42b   : > { %v8613_v20 = vpop.f32.mrf.mxu0  ;;  %2997 = vmax.xlane.f32.xlu0 %v11206_v21 }
 0x42c   : > { %2999 = vmax.xlane.f32.xlu1 %v11209_v5  ;;  %v2967_v35 = vmul.f32 0.07216878, %v8613_v20  ;;  %v11217_v33 = vadd.f32 %v2962_v28, %v11025_v51  ;;  %v11228_v28 = vpop.permute.xlu1 %2691 }
 0x42d   : > { %v2914_v23 = vpop.f32.mrf.mxu0  ;;  %14588 = vst [vmem:[#allocation55_spill] sm:$0xff] %v11228_v28 }
 0x42e   : > { %v11222_v46 = vadd.f32 %v2967_v35, %v11059_v61  ;;  %v2965_v49 = vmul.f32 0.07216878, %v2914_v23 }
 0x42f   : > { %v8614_v57 = vpop.f32.mrf.mxu0  ;;  %2993 = vmax.xlane.f32.xlu0 %v11214_v43 }
 0x430   : > { %v2968_v10 = vmul.f32 0.07216878, %v8614_v57  ;;  %2995 = vmax.xlane.f32.xlu1 %v11217_v33  ;;  %v11232_v51 = vadd.f32 %v2965_v49, %v11085_v52  ;;  %v11242_v28 = vpop.permute.xlu1 %2689 }
 0x431   : > { %v2917_v45 = vpop.f32.mrf.mxu0  ;;  %14589 = vst [vmem:[#allocation56_spill] sm:$0xff] %v11242_v28 }
 0x432   : > { %v11225_v53 = vadd.f32 %v2968_v10, %v11046_v41  ;;  %v2966_v0 = vmul.f32 0.07216878, %v2917_v45 }
 0x433   : > { %v8617_v20 = vpop.f32.mrf.mxu0  ;;  %3005 = vmax.xlane.f32.xlu0 %v11222_v46 }
 0x434   : > { %3007 = vmax.xlane.f32.xlu1 %v11225_v53  ;;  %v2971_v40 = vmul.f32 0.07216878, %v8617_v20  ;;  %v11235_v61 = vadd.f32 %v2966_v0, %v11072_v31 }
 0x435   : > { %v2930_v57 = vpop.f32.mrf.mxu0 }
 0x436   : > { %v11240_v35 = vadd.f32 %v2971_v40, %v11111_v63  ;;  %v2969_v10 = vmul.f32 0.07216878, %v2930_v57  ;;  %v11256_v57 = vpop.permute.xlu1 %2685 }
 0x437   : > { %v8618_v23 = vpop.f32.mrf.mxu0  ;;  %3001 = vmax.xlane.f32.xlu0 %v11232_v51  ;;  %14591 = vst [vmem:[#allocation58_spill] sm:$0xff] %v11256_v57 }
 0x438   : > { %v2972_v41 = vmul.f32 0.07216878, %v8618_v23  ;;  %3003 = vmax.xlane.f32.xlu1 %v11235_v61  ;;  %v11250_v31 = vadd.f32 %v2969_v10, %v11137_v1 }
 0x439   : > { %v2933_v45 = vpop.f32.mrf.mxu0 }
 0x43a   : > { %v11245_v52 = vadd.f32 %v2972_v41, %v11098_v58  ;;  %v2970_v49 = vmul.f32 0.07216878, %v2933_v45  ;;  %v11263_v1 = vpop.permute.xlu1 %2681 }
 0x43b   : > { %v8621_v20 = vpop.f32.mrf.mxu0  ;;  %3013 = vmax.xlane.f32.xlu0 %v11240_v35  ;;  %14592 = vst [vmem:[#allocation59_spill] sm:$0xff] %v11263_v1 }
 0x43c   : > { %3015 = vmax.xlane.f32.xlu1 %v11245_v52  ;;  %v11253_v0 = vadd.f32 %v2970_v49, %v11124_v29  ;;  %v2975_v63 = vmul.f32 0.07216878, %v8621_v20 }
 0x43d   : > { %v2946_v40 = vpop.f32.mrf.mxu0 }
 0x43e   : > { %14590 = vst [vmem:[#allocation57_spill] sm:$0xff] %v11253_v0  ;;  %v11260_v58 = vadd.f32 %v2975_v63, %v11163_v8  ;;  %v2973_v23 = vmul.f32 0.07216878, %v2946_v40  ;;  %v11272_v57 = vpop.permute.xlu1 %3157 }
 0x43f   : > { %3009 = vmax.xlane.f32.xlu0 %v11250_v31  ;;  %v8622_v41 = vpop.f32.mrf.mxu0  ;;  %14593 = vst [vmem:[#allocation60_spill] sm:$0xff] %v11272_v57 }
 0x440   : > { %3011 = vmax.xlane.f32.xlu1 %v11253_v0  ;;  %v11266_v29 = vadd.f32 %v2973_v23, %v11189_v22  ;;  %v2976_v10 = vmul.f32 0.07216878, %v8622_v41 }
 0x441   : > { %v2949_v45 = vpop.f32.mrf.mxu0 }
 0x442   : > { %v11270_v49 = vadd.f32 %v2976_v10, %v11150_v17  ;;  %v2974_v20 = vmul.f32 0.07216878, %v2949_v45  ;;  %v11279_v63 = vpop.permute.xlu1 %3153 }
 0x443   : > { %14595 = vst [vmem:[#allocation62_spill] sm:$0xff] %v11279_v63 }
 0x444   : > { %3021 = vmax.xlane.f32.xlu1 %v11260_v58  ;;  %v11276_v8 = vadd.f32 %v2974_v20, %v11176_v42 }
 0x446   : > { %14594 = vst [vmem:[#allocation61_spill] sm:$0xff] %v11276_v8  ;;  %v11281_v22 = vpop.permute.xlu1 %3151 }
 0x447   : > { %14596 = vst [vmem:[#allocation63_spill] sm:$0xff] %v11281_v22 }
 0x448   : > { %3017 = vmax.xlane.f32.xlu1 %v11266_v29 }
 0x44a   : > { %v11283_v40 = vpop.permute.xlu1 %3149 }
 0x44b   : > { %14597 = vst [vmem:[#allocation64_spill] sm:$0xff] %v11283_v40 }
 0x44c   : > { %3023 = vmax.xlane.f32.xlu1 %v11270_v49 }
 0x44e   : > { %v11285_v23 = vpop.permute.xlu1 %3145 }
 0x44f   : > { %14598 = vst [vmem:[#allocation65_spill] sm:$0xff] %v11285_v23 }
 0x450   : > { %3019 = vmax.xlane.f32.xlu1 %v11276_v8 }
 0x452   : > { %v11287_v17 = vpop.permute.xlu1 %3302 }
 0x453   : > { %14599 = vst [vmem:[#allocation66_spill] sm:$0xff] %v11287_v17 }
 0x456   : > { %v11289_v41 = vpop.permute.xlu1 %3159 }
 0x457   : > { %14600 = vst [vmem:[#allocation67_spill] sm:$0xff] %v11289_v41 }
 0x470   : > { %v2058_v10 = vpop.xlane.xlu0 %2057 }
 0x471   : > { %v2087_v45 = vsub.f32 %v11003_v39, %v2058_v10 }
 0x473   : > { %v2105_v57 = vmul.f32 1.442695, %v2087_v45 }
 0x474   : > { %v2524_v42 = vpop.xlane.xlu0 %2523  ;;  %v2526_v20 = vpop.xlane.xlu1 %2525 }
 0x475   : > { %9279 = vpow2.f32 %v2105_v57  ;;  %v2553_v1 = vsub.f32 %v11012_v2, %v2524_v42  ;;  %v2554_v39 = vsub.f32 %v11015_v24, %v2526_v20 }
 0x477   : > { %v2571_v63 = vmul.f32 1.442695, %v2553_v1 }
 0x478   : > { %v2054_v28 = vpop.xlane.xlu0 %2053  ;;  %v2056_v22 = vpop.xlane.xlu1 %2055 }
 0x479   : > { %9281 = vpow2.f32 %v2571_v63  ;;  %v2085_v40 = vsub.f32 %v11030_v55, %v2054_v28  ;;  %v2573_v55 = vmul.f32 1.442695, %v2554_v39  ;;  %v2086_v28 = vsub.f32 %v11033_v54, %v2056_v22 }
 0x47b   : > { %v2101_v23 = vmul.f32 1.442695, %v2085_v40 }
 0x47c   : > { %v2520_v8 = vpop.xlane.xlu0 %2519  ;;  %v2522_v17 = vpop.xlane.xlu1 %2521 }
 0x47d   : > { %9283 = vpow2.f32 %v2101_v23  ;;  %v2551_v41 = vsub.f32 %v11038_v13, %v2520_v8 }
 0x47f   : > { %v2567_v0 = vmul.f32 1.442695, %v2551_v41 }
 0x480   : > { %v2060_v10 = vpop.xlane.xlu0 %2059  ;;  %v2068_v45 = vpop.xlane.xlu1 %2067 }
 0x481   : > { %9285 = vpow2.f32 %v2567_v0  ;;  %v2088_v2 = vsub.f32 %v11051_v59, %v2060_v10  ;;  %v2103_v59 = vmul.f32 1.442695, %v2086_v28  ;;  %v2552_v0 = vsub.f32 %v11041_v37, %v2522_v17 }
 0x482   : > { %v11297_v57 = vpop.eup %9279 }
 0x483   : > { %v2107_v1 = vmul.f32 1.442695, %v2088_v2  ;;  %2137 = vadd.xlane.f32.xlu0 %v11297_v57 }
 0x484   : > { %v2066_v63 = vpop.xlane.xlu0 %2065  ;;  %v2534_v40 = vpop.xlane.xlu1 %2533 }
 0x485   : > { %9287 = vpow2.f32 %v2107_v1  ;;  %v2091_v13 = vsub.f32 %v11064_v44, %v2066_v63  ;;  %v2569_v44 = vmul.f32 1.442695, %v2552_v0  ;;  %v2558_v20 = vsub.f32 %v11067_v38, %v2534_v40 }
 0x486   : > { %v11302_v8 = vpop.eup %9281  ;;  %9289 = vpow2.f32 %v2573_v55 }
 0x487   : > { %v2113_v24 = vmul.f32 1.442695, %v2091_v13  ;;  %2603 = vadd.xlane.f32.xlu0 %v11302_v8  ;;  %v2581_v1 = vmul.f32 1.442695, %v2558_v20 }
 0x488   : > { %v2532_v23 = vpop.xlane.xlu0 %2531  ;;  %v2064_v41 = vpop.xlane.xlu1 %2063 }
 0x489   : > { %9291 = vpow2.f32 %v2113_v24  ;;  %v2557_v42 = vsub.f32 %v11080_v62, %v2532_v23  ;;  %v2092_v62 = vsub.f32 %v11054_v3, %v2068_v45  ;;  %v2090_v24 = vsub.f32 %v11077_v47, %v2064_v41 }
 0x48a   : > { %v11307_v54 = vpop.eup %9283  ;;  %9293 = vpow2.f32 %v2103_v59 }
 0x48b   : > { %v2579_v22 = vmul.f32 1.442695, %v2557_v42  ;;  %2133 = vadd.xlane.f32.xlu0 %v11307_v54 }
 0x48c   : > { %v2062_v39 = vpop.xlane.xlu0 %2061  ;;  %v2530_v10 = vpop.xlane.xlu1 %2529 }
 0x48d   : > { %9295 = vpow2.f32 %v2579_v22  ;;  %v2089_v2 = vsub.f32 %v11093_v12, %v2062_v39  ;;  %v2556_v63 = vsub.f32 %v11090_v50, %v2530_v10  ;;  %v2115_v12 = vmul.f32 1.442695, %v2092_v62 }
 0x48e   : > { %v11312_v37 = vpop.eup %9285  ;;  %9297 = vpow2.f32 %v2569_v44 }
 0x48f   : > { %v2109_v17 = vmul.f32 1.442695, %v2089_v2  ;;  %2599 = vadd.xlane.f32.xlu1 %v11312_v37  ;;  %v2577_v45 = vmul.f32 1.442695, %v2556_v63 }
 0x490   : > { %v2528_v55 = vpop.xlane.xlu0 %2527  ;;  %v2076_v28 = vpop.xlane.xlu1 %2075 }
 0x491   : > { %9299 = vpow2.f32 %v2109_v17  ;;  %v2555_v38 = vsub.f32 %v11106_v15, %v2528_v55  ;;  %v2111_v15 = vmul.f32 1.442695, %v2090_v24  ;;  %v2096_v42 = vsub.f32 %v11103_v6, %v2076_v28 }
 0x492   : > { %v11318_v40 = vpop.eup %9287  ;;  %9301 = vpow2.f32 %v2581_v1 }
 0x493   : > { %v2575_v13 = vmul.f32 1.442695, %v2555_v38  ;;  %2139 = vadd.xlane.f32.xlu1 %v11318_v40  ;;  %v11322_v3 = vpop.eup %9289 }
 0x494   : > { %v2074_v59 = vpop.xlane.xlu0 %2073  ;;  %v2542_v0 = vpop.xlane.xlu1 %2541 }
 0x495   : > { %9303 = vpow2.f32 %v2575_v13  ;;  %v2095_v23 = vsub.f32 %v11119_v4, %v2074_v59  ;;  %v2123_v4 = vmul.f32 1.442695, %v2096_v42 }
 0x496   : > { %v11325_v50 = vpop.eup %9291  ;;  %9305 = vpow2.f32 %v2115_v12 }
 0x497   : > { %2145 = vadd.xlane.f32.xlu0 %v11325_v50  ;;  %2605 = vadd.xlane.f32.xlu1 %v11322_v3  ;;  %v11330_v41 = vpop.eup %9293  ;;  %9307 = vpow2.f32 %v2577_v45  ;;  %v2121_v44 = vmul.f32 1.442695, %v2095_v23 }
 0x498   : > { %v2540_v22 = vpop.xlane.xlu0 %2539  ;;  %v2072_v47 = vpop.xlane.xlu1 %2071  ;;  %9309 = vpow2.f32 %v2111_v15 }
 0x499   : > { %v2561_v20 = vsub.f32 %v11129_v26, %v2540_v22  ;;  %v2094_v10 = vsub.f32 %v11132_v56, %v2072_v47  ;;  %9311 = vpow2.f32 %v2121_v44 }
 0x49a   : > { %v11333_v39 = vpop.eup %9295  ;;  %9313 = vpow2.f32 %v2123_v4 }
 0x49b   : > { %2611 = vadd.xlane.f32.xlu0 %v11333_v39  ;;  %2135 = vadd.xlane.f32.xlu1 %v11330_v41  ;;  %v11338_v17 = vpop.eup %9297  ;;  %v2587_v62 = vmul.f32 1.442695, %v2561_v20  ;;  %v2119_v26 = vmul.f32 1.442695, %v2094_v10 }
 0x49c   : > { %v2070_v2 = vpop.xlane.xlu0 %2069  ;;  %v2538_v6 = vpop.xlane.xlu1 %2537 }
 0x49d   : > { %v2093_v1 = vsub.f32 %v11142_v14, %v2070_v2  ;;  %v2560_v28 = vsub.f32 %v11145_v16, %v2538_v6  ;;  %9315 = vpow2.f32 %v2587_v62  ;;  %v2562_v14 = vsub.f32 %v11116_v27, %v2542_v0 }
 0x49e   : > { %v11341_v55 = vpop.eup %9299  ;;  %9317 = vpow2.f32 %v2119_v26 }
 0x49f   : > { %2141 = vadd.xlane.f32.xlu0 %v11341_v55  ;;  %2601 = vadd.xlane.f32.xlu1 %v11338_v17  ;;  %v11346_v38 = vpop.eup %9301  ;;  %v2117_v13 = vmul.f32 1.442695, %v2093_v1  ;;  %v2585_v59 = vmul.f32 1.442695, %v2560_v28 }
 0x4a0   : > { %v2536_v63 = vpop.xlane.xlu0 %2535  ;;  %v2084_v56 = vpop.xlane.xlu1 %2083 }
 0x4a1   : > { %v2559_v12 = vsub.f32 %v11155_v60, %v2536_v63  ;;  %9319 = vpow2.f32 %v2117_v13  ;;  %v2100_v42 = vsub.f32 %v11158_v7, %v2084_v56  ;;  %v2589_v60 = vmul.f32 1.442695, %v2562_v14 }
 0x4a2   : > { %v11349_v24 = vpop.eup %9303  ;;  %9321 = vpow2.f32 %v2585_v59 }
 0x4a3   : > { %2613 = vadd.xlane.f32.xlu0 %v11346_v38  ;;  %2607 = vadd.xlane.f32.xlu1 %v11349_v24  ;;  %v11354_v23 = vpop.eup %9305  ;;  %v2583_v15 = vmul.f32 1.442695, %v2559_v12  ;;  %v2131_v20 = vmul.f32 1.442695, %v2100_v42 }
 0x4a4   : > { %v2082_v45 = vpop.xlane.xlu0 %2081  ;;  %v2550_v16 = vpop.xlane.xlu1 %2549 }
 0x4a5   : > { %v11357_v22 = vpop.eup %9307  ;;  %v2099_v27 = vsub.f32 %v11168_v19, %v2082_v45  ;;  %9323 = vpow2.f32 %v2583_v15  ;;  %v2566_v45 = vsub.f32 %v11171_v18, %v2550_v16 }
 0x4a6   : > { %v11362_v44 = vpop.eup %9309  ;;  %9325 = vpow2.f32 %v2589_v60 }
 0x4a7   : > { %2609 = vadd.xlane.f32.xlu0 %v11357_v22  ;;  %2147 = vadd.xlane.f32.xlu1 %v11354_v23  ;;  %v11365_v10 = vpop.eup %9311  ;;  %v2129_v7 = vmul.f32 1.442695, %v2099_v27  ;;  %9327 = vpow2.f32 %v2131_v20 }
 0x4a8   : > { %v2548_v0 = vpop.xlane.xlu0 %2547  ;;  %v2080_v47 = vpop.xlane.xlu1 %2079 }
 0x4a9   : > { %v2098_v4 = vsub.f32 %v11184_v34, %v2080_v47  ;;  %v11369_v6 = vpop.eup %9313  ;;  %v2565_v19 = vsub.f32 %v11181_v32, %v2548_v0  ;;  %9329 = vpow2.f32 %v2129_v7  ;;  %v2597_v0 = vmul.f32 1.442695, %v2566_v45 }
 0x4aa   : > { %v11372_v1 = vpop.eup %9315 }
 0x4ab   : > { %2153 = vadd.xlane.f32.xlu0 %v11365_v10  ;;  %2143 = vadd.xlane.f32.xlu1 %v11362_v44  ;;  %v2127_v62 = vmul.f32 1.442695, %v2098_v4  ;;  %v11376_v34 = vpop.eup %9317  ;;  %v2595_v26 = vmul.f32 1.442695, %v2565_v19 }
 0x4ac   : > { %v2078_v2 = vpop.xlane.xlu0 %2077 }
 0x4ad   : > { %9331 = vpow2.f32 %v2127_v62  ;;  %v2097_v28 = vsub.f32 %v11194_v25, %v2078_v2  ;;  %v2546_v25 = vpop.xlane.xlu1 %2545 }
 0x4ae   : > { %v11379_v63 = vpop.eup %9319  ;;  %9333 = vpow2.f32 %v2595_v26 }
 0x4af   : > { %2619 = vadd.xlane.f32.xlu0 %v11372_v1  ;;  %2155 = vadd.xlane.f32.xlu1 %v11369_v6  ;;  %v11383_v32 = vpop.eup %9321  ;;  %v2125_v13 = vmul.f32 1.442695, %v2097_v28 }
 0x4b0   : > { %v2544_v56 = vpop.xlane.xlu0 %2543 }
 0x4b1   : > { %v2563_v12 = vsub.f32 %v11202_v30, %v2544_v56  ;;  %9335 = vpow2.f32 %v2125_v13  ;;  %v2564_v13 = vsub.f32 %v11197_v9, %v2546_v25 }
 0x4b2   : > { %v11386_v14 = vpop.eup %9323 }
 0x4b3   : > { %2149 = vadd.xlane.f32.xlu0 %v11379_v63  ;;  %2151 = vadd.xlane.f32.xlu1 %v11376_v34  ;;  %v11390_v59 = vpop.eup %9325  ;;  %v2591_v15 = vmul.f32 1.442695, %v2563_v12  ;;  %v2593_v45 = vmul.f32 1.442695, %v2564_v13 }
 0x4b4   : > { %v11393_v42 = vpop.eup %9327  ;;  %v2998_v60 = vpop.xlane.xlu0 %2997 }
 0x4b5   : > { %v3000_v30 = vpop.xlane.xlu1 %2999  ;;  %9337 = vpow2.f32 %v2591_v15  ;;  %v3027_v47 = vsub.f32 %v11206_v21, %v2998_v60 }
 0x4b6   : > { %v11397_v27 = vpop.eup %9329  ;;  %9339 = vpow2.f32 %v2597_v0  ;;  %v3028_v16 = vsub.f32 %v11209_v5, %v3000_v30 }
 0x4b7   : > { %2615 = vadd.xlane.f32.xlu0 %v11386_v14  ;;  %2617 = vadd.xlane.f32.xlu1 %v11383_v32  ;;  %v3045_v18 = vmul.f32 1.442695, %v3027_v47 }
 0x4b8   : > { %v3047_v2 = vmul.f32 1.442695, %v3028_v16  ;;  %v2994_v12 = vpop.xlane.xlu0 %2993 }
 0x4b9   : > { %v2996_v7 = vpop.xlane.xlu1 %2995  ;;  %9341 = vpow2.f32 %v3045_v18  ;;  %v3025_v15 = vsub.f32 %v11214_v43, %v2994_v12 }
 0x4ba   : > { %v11400_v20 = vpop.eup %9331  ;;  %v3026_v19 = vsub.f32 %v11217_v33, %v2996_v7  ;;  %9343 = vpow2.f32 %v3047_v2 }
 0x4bb   : > { %2621 = vadd.xlane.f32.xlu0 %v11390_v59  ;;  %2163 = vadd.xlane.f32.xlu1 %v11393_v42  ;;  %v11405_v4 = vpop.eup %9333  ;;  %v3041_v60 = vmul.f32 1.442695, %v3025_v15 }
 0x4bc   : > { %v3043_v62 = vmul.f32 1.442695, %v3026_v19  ;;  %v3006_v16 = vpop.xlane.xlu0 %3005 }
 0x4bd   : > { %v3008_v30 = vpop.xlane.xlu1 %3007  ;;  %v3031_v25 = vsub.f32 %v11222_v46, %v3006_v16 }
 0x4be   : > { %v11409_v21 = vpop.eup %9335  ;;  %9345 = vpow2.f32 %v3043_v62  ;;  %v3032_v13 = vsub.f32 %v11225_v53, %v3008_v30 }
 0x4bf   : > { %2161 = vadd.xlane.f32.xlu0 %v11397_v27  ;;  %2159 = vadd.xlane.f32.xlu1 %v11400_v20  ;;  %9347 = vpow2.f32 %v2593_v45  ;;  %v3053_v2 = vmul.f32 1.442695, %v3031_v25 }
 0x4c0   : > { %9349 = vpow2.f32 %v3041_v60  ;;  %v3002_v7 = vpop.xlane.xlu0 %3001  ;;  %v3055_v15 = vmul.f32 1.442695, %v3032_v13 }
 0x4c1   : > { %v3004_v0 = vpop.xlane.xlu1 %3003  ;;  %v3029_v19 = vsub.f32 %v11232_v51, %v3002_v7  ;;  %9351 = vpow2.f32 %v3053_v2 }
 0x4c2   : > { %v11412_v26 = vpop.eup %9337  ;;  %v3030_v13 = vsub.f32 %v11235_v61, %v3004_v0 }
 0x4c3   : > { %2627 = vadd.xlane.f32.xlu0 %v11405_v4  ;;  %v11415_v5 = vpop.eup %9339  ;;  %v3049_v12 = vmul.f32 1.442695, %v3029_v19 }
 0x4c4   : > { %v3014_v60 = vpop.xlane.xlu0 %3013 }
 0x4c5   : > { %v11435_v18 = vpop.xlane.xlu1 %3015  ;;  %9353 = vpow2.f32 %v3049_v12  ;;  %v3035_v12 = vsub.f32 %v11240_v35, %v3014_v60 }
 0x4c6   : > { %v11420_v28 = vpop.eup %9341  ;;  %9355 = vpow2.f32 %v3055_v15  ;;  %v3051_v15 = vmul.f32 1.442695, %v3030_v13  ;;  %v3036_v60 = vsub.f32 %v11245_v52, %v11435_v18 }
 0x4c7   : > { %2157 = vadd.xlane.f32.xlu0 %v11409_v21  ;;  %v11423_v33 = vpop.eup %9343 }
 0x4c8   : > { %v3010_v51 = vpop.xlane.xlu0 %3009 }
 0x4c9   : > { %v11441_v43 = vpop.xlane.xlu1 %3011 }
 0x4cb   : > { %2623 = vadd.xlane.f32.xlu0 %v11412_v26  ;;  %v11426_v56 = vpop.eup %9345 }
 0x4cc   : > { %v11433_v47 = vpop.eup %9347 }
 0x4cd   : > { %v11438_v9 = vpop.eup %9349  ;;  %v3022_v62 = vpop.xlane.xlu1 %3021 }
 0x4ce   : > { %v11451_v30 = vpop.eup %9351 }
 0x4cf   : > { %2629 = vadd.xlane.f32.xlu0 %v11415_v5 }
 0x4d0   : > { %3298 = vrot.lane.b32.xlu1 %v10655_v48, %s9802_s13  ;;  %v14605_v48 = vld [vmem:[#allocation61_spill] sm:$0xff] }
 0x4d1   : > { %v3018_v45 = vpop.xlane.xlu1 %3017 }
 0x4d2   : > { %v3037_v16 = vsub.f32 %v11266_v29, %v3018_v45  ;;  %v11454_v19 = vpop.eup %9353 }
 0x4d3   : > { %3077 = vadd.xlane.f32.xlu0 %v11420_v28  ;;  %v11459_v29 = vpop.eup %9355 }
 0x4d4   : > { %v3065_v7 = vmul.f32 1.442695, %v3037_v16 }
 0x4d5   : > { %v3024_v25 = vpop.xlane.xlu1 %3023 }
 0x4d6   : > { %v3040_v53 = vsub.f32 %v11270_v49, %v3024_v25  ;;  %v3061_v25 = vmul.f32 1.442695, %v3035_v12 }
 0x4d7   : > { %3079 = vadd.xlane.f32.xlu0 %v11423_v33 }
 0x4db   : > { %3075 = vadd.xlane.f32.xlu0 %v11426_v56 }
 0x4f1   : > { %3296 = vrot.lane.b32.xlu0 %v10645_v36, %s9802_s13  ;;  %v3039_v36 = vsub.f32 %v11260_v58, %v3022_v62  ;;  %v3071_v58 = vmul.f32 1.442695, %v3040_v53  ;;  %v3020_v62 = vpop.xlane.xlu1 %3019  ;;  %v3033_v53 = vsub.f32 %v11250_v31, %v3010_v51  ;;  %v3063_v31 = vmul.f32 1.442695, %v3036_v60  ;;  %v14604_v51 = vld [vmem:[#allocation57_spill] sm:$0xff] }
 0x4f2   : > { %v3038_v52 = vsub.f32 %v14605_v48, %v3020_v62 }
 0x4f3   : > { %v3069_v46 = vmul.f32 1.442695, %v3039_v36 }
 0x4f4   : > { %2625 = vadd.xlane.f32.xlu1 %v11433_v47 }
 0x4f5   : > { %9357 = vpow2.f32 %v3069_v46 }
 0x4f6   : > { %9359 = vpow2.f32 %v3065_v7 }
 0x4f7   : > { %9361 = vpow2.f32 %v3071_v58  ;;  %v3057_v58 = vmul.f32 1.442695, %v3033_v53 }
 0x4f8   : > { %3073 = vadd.xlane.f32.xlu1 %v11438_v9  ;;  %9363 = vpow2.f32 %v3051_v15  ;;  %v3034_v15 = vsub.f32 %v14604_v51, %v11441_v43 }
 0x4f9   : > { %9365 = vpow2.f32 %v3061_v25 }
 0x4fa   : > { %v3059_v18 = vmul.f32 1.442695, %v3034_v15 }
 0x502   : > { %v11466_v45 = vpop.eup %9357 }
 0x503   : > { %14601 = vst [vmem:[#allocation68_spill] sm:$0xff] %v11466_v45  ;;  %v11469_v7 = vpop.eup %9359 }
 0x504   : > { %14602 = vst [vmem:[#allocation69_spill] sm:$0xff] %v11469_v7  ;;  %v11475_v35 = vpop.eup %9361 }
 0x505   : > { %14603 = vst [vmem:[#allocation70_spill] sm:$0xff] %v11475_v35 }
 0x509   : > { %3294 = vrot.lane.b32.xlu1 %v10637_v11, %s9802_s13 }
 0x50c   : > { %v2138_v2 = vpop.xlane.xlu0 %2137 }
 0x510   : > { %3085 = vadd.xlane.f32.xlu0 %v11451_v30  ;;  %v11457_v36 = vpop.xlane.xlu0 %2603 }
 0x514   : > { %3081 = vadd.xlane.f32.xlu0 %v11454_v19  ;;  %v2134_v46 = vpop.xlane.xlu0 %2133 }
 0x518   : > { %3087 = vadd.xlane.f32.xlu0 %v11459_v29  ;;  %v11463_v49 = vpop.xlane.xlu1 %2599 }
 0x51c   : > { %3101 = vadd.xlane.f32.xlu0 %v11466_v45  ;;  %v2140_v16 = vpop.xlane.xlu1 %2139 }
 0x51d   : > { %9367 = vrcp.f32 %v2140_v16 }
 0x51e   : > { %9369 = vrcp.f32 %v2134_v46  ;;  %v11487_v46 = vpop.eup %9363 }
 0x51f   : > { %9371 = vrcp.f32 %v2138_v2  ;;  %v3067_v2 = vmul.f32 1.442695, %v3038_v52  ;;  %v11494_v60 = vpop.eup %9365 }
 0x520   : > { %v2146_v61 = vpop.xlane.xlu0 %2145  ;;  %3097 = vadd.xlane.f32.xlu0 %v11469_v7  ;;  %v11473_v0 = vpop.xlane.xlu1 %2605  ;;  %14606 = vst [vmem:[#allocation57_spill] sm:$0xff] %v11494_v60 }
 0x524   : > { %v11479_v13 = vpop.xlane.xlu0 %2611  ;;  %3103 = vadd.xlane.f32.xlu0 %v11475_v35  ;;  %v2136_v12 = vpop.xlane.xlu1 %2135 }
 0x525   : > { %9373 = vrcp.f32 %v2136_v12 }
 0x526   : > { %9375 = vpow2.f32 %v3057_v58 }
 0x527   : > { %9377 = vpow2.f32 %v3063_v31 }
 0x528   : > { %v2142_v25 = vpop.xlane.xlu0 %2141  ;;  %v11484_v11 = vpop.xlane.xlu1 %2601  ;;  %9379 = vpow2.f32 %v3059_v18 }
 0x529   : > { %9381 = vpow2.f32 %v3067_v2 }
 0x52a   : > { %v9368_v43 = vpop.eup %9367 }
 0x52b   : > { %v9370_v51 = vpop.eup %9369  ;;  %v2184_v31 = vmul.f32 %v9368_v43, %v11318_v40  ;;  %v14614_v43 = vld [vmem:[#allocation56_spill] sm:$0xff] }
 0x52c   : > { %v11489_v16 = vpop.xlane.xlu0 %2613  ;;  %v11491_v53 = vpop.xlane.xlu1 %2607  ;;  %v2181_v18 = vmul.f32 %v9370_v51, %v11307_v54  ;;  %v14608_v54 = vld [vmem:[#allocation54_spill] sm:$0xff] }
 0x52d   : > { %3083 = vadd.xlane.f32.xlu1 %v11487_v46  ;;  %v9372_v48 = vpop.eup %9371 }
 0x52e   : > { %v2183_v7 = vmul.f32 %v9372_v48, %v11297_v57 }
 0x530   : > { %v11496_v58 = vpop.xlane.xlu0 %2609  ;;  %v2148_v12 = vpop.xlane.xlu1 %2147 }
 0x531   : > { %3093 = vadd.xlane.f32.xlu1 %v11494_v60  ;;  %9383 = vrcp.f32 %v2148_v12  ;;  %v2198_v60 = vpack.c.bf16 %v2184_v31, %v2183_v7 }
 0x532   : > { %v9374_v62 = vpop.eup %9373  ;;  %9385 = vrcp.f32 %v2142_v25 }
 0x533   : > { %v11500_v15 = vpop.eup %9375  ;;  %v2182_v35 = vmul.f32 %v9374_v62, %v11330_v41  ;;  %9387 = vrcp.f32 %v2146_v61  ;;  %v14609_v41 = vld [vmem:[#allocation10_spill] sm:$0xff]  ;;  %v14610_v61 = vld [vmem:[#allocation55_spill] sm:$0xff] }
 0x534   : > { %14607 = vst [vmem:[#allocation61_spill] sm:$0xff] %v11500_v15  ;;  %v2154_v52 = vpop.xlane.xlu0 %2153  ;;  %v2144_v45 = vpop.xlane.xlu1 %2143 }
 0x535   : > { %3089 = vadd.xlane.f32.xlu1 %v11500_v15  ;;  %9389 = vrcp.f32 %v2144_v45  ;;  %v2197_v2 = vpack.c.bf16 %v2182_v35, %v2181_v18  ;;  %v11506_v12 = vpop.eup %9377  ;;  %v14612_v35 = vld [vmem:[#allocation7_spill] sm:$0xff] }
 0x536   : > { %v11515_v57 = vpop.eup %9379  ;;  %v14615_v18 = vld [vmem:[#allocation11_spill] sm:$0xff] }
 0x537   : > { %8511 = vmatprep.mubr.bf16.mxu1 %v2197_v2  ;;  %14611 = vst [vmem:[#allocation54_spill] sm:$0xff] %v11515_v57 }
 0x538   : > { %v11508_v40 = vpop.xlane.xlu0 %2619  ;;  %v2156_v25 = vpop.xlane.xlu1 %2155  ;;  %8512 = vmatmul.mubr.bf16.vlgmr.msra.gmra.mxu1 %v2198_v60 }
 0x539   : > { %3095 = vadd.xlane.f32.xlu1 %v11506_v12  ;;  %8560 = vmatpush3.bf16.msra.mxu1 %v14608_v54  ;;  %9391 = vrcp.f32 %v2156_v25  ;;  %v11521_v60 = vpop.eup %9381  ;;  %v14616_v25 = vld [vmem:[#allocation47_spill] sm:$0xff] }
 0x53a   : > { %3292 = vrot.lane.b32.xlu0 %v14609_v41, %s9802_s13  ;;  %8561 = vmatprep.subr.bf16.mxu1 %v14610_v61  ;;  %9393 = vrcp.f32 %v2154_v52  ;;  %14613 = vst [vmem:[#allocation55_spill] sm:$0xff] %v11521_v60 }
 0x53c   : > { %v2150_v45 = vpop.xlane.xlu0 %2149  ;;  %v2152_v7 = vpop.xlane.xlu1 %2151 }
 0x53d   : > { %9395 = vrcp.f32 %v2150_v45  ;;  %3091 = vadd.xlane.f32.xlu1 %v11515_v57  ;;  %8562 = vmatpush3.bf16.msra.mxu1 %v14610_v61 }
 0x53e   : > { %9397 = vrcp.f32 %v2152_v7  ;;  %3266 = vrot.lane.b32.xlu0 %v14612_v35, %s9800_s21  ;;  %8563 = vmatprep.subr.bf16.mxu1 %v14614_v43  ;;  %v9384_v51 = vpop.eup %9383 }
 0x53f   : > { %v9386_v31 = vpop.eup %9385  ;;  %v2188_v54 = vmul.f32 %v9384_v51, %v11354_v23  ;;  %9399 = vrcp.f32 %v11463_v49 }
 0x540   : > { %v11524_v48 = vpop.xlane.xlu0 %2615  ;;  %v11526_v62 = vpop.xlane.xlu1 %2617  ;;  %v2185_v45 = vmul.f32 %v9386_v31, %v11341_v55  ;;  %v14620_v31 = vld [vmem:[#allocation48_spill] sm:$0xff]  ;;  %9401 = vrcp.f32 %v11484_v11 }
 0x541   : > { %3099 = vadd.xlane.f32.xlu1 %v11521_v60  ;;  %v9388_v52 = vpop.eup %9387  ;;  %8564 = vmatpush3.bf16.msra.mxu1 %v14614_v43  ;;  %v14617_v43 = vld [vmem:[#allocation28_spill] sm:$0xff]  ;;  %v14618_v60 = vld [vmem:[#allocation58_spill] sm:$0xff] }
 0x542   : > { %3270 = vrot.lane.b32.xlu0 %v14615_v18, %s9800_s21  ;;  %v9390_v2 = vpop.eup %9389  ;;  %8565 = vmatprep.subr.bf16.mxu1 %v14616_v25  ;;  %v2187_v35 = vmul.f32 %v9388_v52, %v11325_v50  ;;  %v14619_v50 = vld [vmem:[#allocation30_spill] sm:$0xff]  ;;  %v14623_v11 = vld [vmem:[#allocation40_spill] sm:$0xff] }
 0x543   : > { %v2186_v7 = vmul.f32 %v9390_v2, %v11362_v44 }
 0x544   : > { %v11534_v61 = vpop.xlane.xlu0 %2621  ;;  %v2164_v41 = vpop.xlane.xlu1 %2163  ;;  %v2200_v57 = vpack.c.bf16 %v2188_v54, %v2187_v35  ;;  %v14628_v35 = vld [vmem:[#allocation9_spill] sm:$0xff] }
 0x545   : > { %8566 = vmatpush3.bf16.msra.mxu1 %v14616_v25  ;;  %v2199_v18 = vpack.c.bf16 %v2186_v7, %v2185_v45  ;;  %v14621_v45 = vld [vmem:[#allocation45_spill] sm:$0xff]  ;;  %v14627_v7 = vld [vmem:[#allocation67_spill] sm:$0xff] }
 0x546   : > { %3274 = vrot.lane.b32.xlu0 %v14617_v43, %s9800_s21  ;;  %8567 = vmatprep.subr.bf16.mxu1 %v14618_v60  ;;  %v9392_v15 = vpop.eup %9391 }
 0x547   : > { %8515 = vmatprep.mubr.bf16.mxu1 %v2199_v18  ;;  %v9394_v51 = vpop.eup %9393  ;;  %v2192_v2 = vmul.f32 %v9392_v15, %v11369_v6  ;;  %v14622_v6 = vld [vmem:[#allocation59_spill] sm:$0xff] }
 0x548   : > { %v2162_v23 = vpop.xlane.xlu0 %2161  ;;  %8516 = vmatmul.mubr.bf16.gmra.mxu1 %v2200_v57  ;;  %v2160_v25 = vpop.xlane.xlu1 %2159 }
 0x549   : > { %8568 = vmatpush3.bf16.msra.mxu1 %v14618_v60  ;;  %v2191_v60 = vmul.f32 %v9394_v51, %v11365_v10  ;;  %9403 = vrcp.f32 %v2162_v23  ;;  %v14624_v10 = vld [vmem:[#allocation49_spill] sm:$0xff] }
 0x54a   : > { %v9396_v55 = vpop.eup %9395  ;;  %3278 = vrot.lane.b32.xlu0 %v14619_v50, %s9800_s21  ;;  %8569 = vmatprep.subr.bf16.mxu1 %v14620_v31  ;;  %9405 = vrcp.f32 %v2160_v25  ;;  %v14630_v51 = vld [vmem:[#allocation13_spill] sm:$0xff] }
 0x54b   : > { %v9398_v44 = vpop.eup %9397  ;;  %v2189_v52 = vmul.f32 %v9396_v55, %v11379_v63  ;;  %v2202_v49 = vpack.c.bf16 %v2192_v2, %v2191_v60  ;;  %9407 = vrcp.f32 %v2164_v41  ;;  %v14626_v41 = vld [vmem:[#allocation35_spill] sm:$0xff] }
 0x54c   : > { %v11550_v54 = vpop.xlane.xlu0 %2627  ;;  %v2190_v57 = vmul.f32 %v9398_v44, %v11376_v34  ;;  %v14625_v34 = vld [vmem:[#allocation8_spill] sm:$0xff]  ;;  %v9400_v43 = vpop.eup %9399 }
 0x54d   : > { %8570 = vmatpush3.bf16.msra.mxu1 %v14620_v31  ;;  %v9402_v18 = vpop.eup %9401 }
 0x54e   : > { %3649 = vrot.lane.b32.xlu0 %v14621_v45, %s9800_s21  ;;  %v2201_v63 = vpack.c.bf16 %v2190_v57, %v2189_v52  ;;  %8571 = vmatprep.subr.bf16.mxu1 %v14622_v6  ;;  %v2648_v52 = vmul.f32 %v9402_v18, %v11338_v17 }
 0x550   : > { %8519 = vmatprep.mubr.bf16.mxu1 %v2201_v63  ;;  %v2158_v15 = vpop.xlane.xlu0 %2157 }
 0x551   : > { %9409 = vrcp.f32 %v2158_v15  ;;  %8520 = vmatmul.mubr.bf16.gmra.mxu1 %v2202_v49 }
 0x552   : > { %8572 = vmatpush3.bf16.msra.mxu1 %v14622_v6  ;;  %3645 = vrot.lane.b32.xlu0 %v14623_v11, %s9800_s21  ;;  %9411 = vrcp.f32 %v11473_v0  ;;  %v14629_v0 = vld [vmem:[#allocation42_spill] sm:$0xff] }
 0x553   : > { %8573 = vmatprep.subr.bf16.mxu1 %v14624_v10  ;;  %3290 = vrot.lane.b32.xlu1 %v14625_v34, %s9802_s13  ;;  %9413 = vrcp.f32 %v11496_v58 }
 0x554   : > { %9415 = vrcp.f32 %v11457_v36 }
 0x555   : > { %9417 = vrcp.f32 %v11491_v53  ;;  %v14631_v53 = vld [vmem:[#allocation31_spill] sm:$0xff] }
 0x556   : > { %8574 = vmatpush3.bf16.msra.mxu1 %v14624_v10  ;;  %3643 = vrot.lane.b32.xlu0 %v14626_v41, %s9800_s21  ;;  %v9404_v23 = vpop.eup %9403  ;;  %9419 = vrcp.f32 %v11489_v16  ;;  %v14634_v10 = vld [vmem:[#allocation37_spill] sm:$0xff] }
 0x557   : > { %8623 = vmatprep.subr.bf16.mxu1 %v14627_v7  ;;  %3268 = vrot.lane.b32.xlu1 %v14628_v35, %s9800_s21  ;;  %v9406_v55 = vpop.eup %9405  ;;  %9421 = vrcp.f32 %v11524_v48  ;;  %v2195_v36 = vmul.f32 %v9404_v23, %v11397_v27  ;;  %v2647_v48 = vmul.f32 %v9400_v43, %v11312_v37 }
 0x558   : > { %v9408_v58 = vpop.eup %9407  ;;  %9423 = vrcp.f32 %v11526_v62  ;;  %v2194_v31 = vmul.f32 %v9406_v55, %v11400_v20  ;;  %v14632_v62 = vld [vmem:[#allocation33_spill] sm:$0xff]  ;;  %v2624_v20 = vpop.xlane.xlu0 %2623 }
 0x559   : > { %9425 = vrcp.f32 %v11479_v13  ;;  %v2196_v16 = vmul.f32 %v9408_v58, %v11393_v42  ;;  %v2663_v57 = vpack.c.bf16 %v2648_v52, %v2647_v48  ;;  %v14633_v13 = vld [vmem:[#allocation39_spill] sm:$0xff]  ;;  %v11617_v58 = vpop.permute.xlu1 %3298  ;;  %v14642_v52 = vld [vmem:[#allocation65_spill] sm:$0xff]  ;;  %v14643_v48 = vld [vmem:[#allocation52_spill] sm:$0xff] }
 0x55a   : > { %3641 = vrot.lane.b32.xlu0 %v14629_v0, %s9800_s21  ;;  %9427 = vrcp.f32 %v11534_v61  ;;  %v14637_v0 = vld [vmem:[#allocation50_spill] sm:$0xff] }
 0x55b   : > { %3272 = vrot.lane.b32.xlu1 %v14630_v51, %s9800_s21  ;;  %v2204_v25 = vpack.c.bf16 %v2196_v16, %v2195_v36  ;;  %9429 = vrcp.f32 %v11508_v40 }
 0x55c   : > { %v2630_v11 = vpop.xlane.xlu0 %2629 }
 0x55d   : > { %9431 = vrcp.f32 %v2630_v11  ;;  %v14644_v11 = vld [vmem:[#allocation66_spill] sm:$0xff] }
 0x55e   : > { %v9410_v50 = vpop.eup %9409  ;;  %9433 = vrcp.f32 %v2624_v20 }
 0x55f   : > { %3276 = vrot.lane.b32.xlu1 %v14631_v53, %s9800_s21  ;;  %v2193_v44 = vmul.f32 %v9410_v50, %v11409_v21  ;;  %v9412_v27 = vpop.eup %9411  ;;  %v14639_v50 = vld [vmem:[#allocation63_spill] sm:$0xff]  ;;  %9435 = vrcp.f32 %v11550_v54 }
 0x560   : > { %v9414_v60 = vpop.eup %9413  ;;  %v2650_v42 = vmul.f32 %v9412_v27, %v11322_v3  ;;  %v3078_v18 = vpop.xlane.xlu0 %3077 }
 0x561   : > { %v2203_v2 = vpack.c.bf16 %v2194_v31, %v2193_v44  ;;  %v9416_v21 = vpop.eup %9415  ;;  %v2652_v37 = vmul.f32 %v9414_v60, %v11357_v22  ;;  %v14635_v22 = vld [vmem:[#allocation60_spill] sm:$0xff]  ;;  %v14641_v31 = vld [vmem:[#allocation51_spill] sm:$0xff] }
 0x562   : > { %v9418_v17 = vpop.eup %9417  ;;  %v2649_v45 = vmul.f32 %v9416_v21, %v11302_v8 }
 0x563   : > { %3280 = vrot.lane.b32.xlu1 %v14632_v62, %s9800_s21  ;;  %8523 = vmatprep.mubr.bf16.mxu1 %v2203_v2  ;;  %v2651_v63 = vmul.f32 %v9418_v17, %v11349_v24  ;;  %v9420_v6 = vpop.eup %9419  ;;  %v14636_v24 = vld [vmem:[#allocation38_spill] sm:$0xff] }
 0x564   : > { %8524 = vmatmul.mubr.bf16.gmra.mxu1 %v2204_v25  ;;  %v2664_v49 = vpack.c.bf16 %v2650_v42, %v2649_v45  ;;  %v9422_v15 = vpop.eup %9421  ;;  %v2654_v8 = vmul.f32 %v9420_v6, %v11346_v38  ;;  %v14638_v38 = vld [vmem:[#allocation62_spill] sm:$0xff] }
 0x565   : > { %8575 = vmatprep.mubr.bf16.mxu1 %v2663_v57  ;;  %v2665_v61 = vpack.c.bf16 %v2652_v37, %v2651_v63  ;;  %v9424_v3 = vpop.eup %9423  ;;  %v2655_v40 = vmul.f32 %v9422_v15, %v11386_v14  ;;  %v3352_v15 = vsel %vm1875_vm2, %v14643_v48, 0 }
 0x566   : > { %v9426_v41 = vpop.eup %9425  ;;  %v2656_v35 = vmul.f32 %v9424_v3, %v11383_v32  ;;  %v3080_v32 = vpop.xlane.xlu0 %3079 }
 0x567   : > { %3647 = vrot.lane.b32.xlu1 %v14633_v13, %s9800_s21  ;;  %v2653_v43 = vmul.f32 %v9426_v41, %v11333_v39  ;;  %v9428_v23 = vpop.eup %9427 }
 0x568   : > { %v2667_v51 = vpack.c.bf16 %v2656_v35, %v2655_v40  ;;  %v9430_v55 = vpop.eup %9429  ;;  %v2658_v14 = vmul.f32 %v9428_v23, %v11390_v59  ;;  %v14640_v59 = vld [vmem:[#allocation64_spill] sm:$0xff] }
 0x569   : > { %v2657_v39 = vmul.f32 %v9430_v55, %v11372_v1 }
 0x56a   : > { %v3076_v53 = vpop.xlane.xlu0 %3075  ;;  %v9432_v54 = vpop.eup %9431 }
 0x56b   : > { %3639 = vrot.lane.b32.xlu1 %v14634_v10, %s9800_s21  ;;  %v2668_v36 = vpack.c.bf16 %v2658_v14, %v2657_v39  ;;  %v9434_v16 = vpop.eup %9433  ;;  %v2662_v27 = vmul.f32 %v9432_v54, %v11415_v5  ;;  %v3349_v10 = vsel %vm1875_vm2, %v14644_v11, 0 }
 0x56c   : > { %8576 = vmatmul.mubr.bf16.vlgmr.msra.gmra.mxu1 %v2664_v49  ;;  %v9436_v2 = vpop.eup %9435  ;;  %v2659_v62 = vmul.f32 %v9434_v16, %v11412_v26 }
 0x56d   : > { %8624 = vmatpush3.bf16.msra.mxu1 %v14627_v7  ;;  %8579 = vmatprep.mubr.bf16.mxu1 %v2665_v61  ;;  %v2666_v7 = vpack.c.bf16 %v2654_v8, %v2653_v43  ;;  %v2661_v21 = vmul.f32 %v9436_v2, %v11405_v4  ;;  %v3343_v8 = vsel %vm1875_vm2, %v11617_v58, 0 }
 0x56e   : > { %8625 = vmatprep.subr.bf16.mxu1 %v14635_v22  ;;  %v3297_v26 = vpop.permute.xlu0 %3296 }
 0x56f   : > { %3635 = vrot.lane.b32.xlu1 %v14636_v24, %s9800_s21  ;;  %v2670_v42 = vpack.c.bf16 %v2662_v27, %v2661_v21  ;;  %v14648_v21 = vld [vmem:[#allocation54_spill] sm:$0xff] }
 0x571   : > { %8626 = vmatpush3.bf16.msra.mxu1 %v14635_v22 }
 0x572   : > { %8627 = vmatprep.subr.bf16.mxu1 %v14637_v0 }
 0x574   : > { %8580 = vmatmul.mubr.bf16.gmra.mxu1 %v2666_v7 }
 0x575   : > { %8628 = vmatpush3.bf16.msra.mxu1 %v14637_v0  ;;  %8583 = vmatprep.mubr.bf16.mxu1 %v2667_v51 }
 0x576   : > { %8629 = vmatprep.subr.bf16.mxu1 %v14638_v38 }
 0x579   : > { %8630 = vmatpush3.bf16.msra.mxu1 %v14638_v38 }
 0x57a   : > { %8631 = vmatprep.subr.bf16.mxu1 %v14639_v50 }
 0x57c   : > { %8584 = vmatmul.mubr.bf16.gmra.mxu1 %v2668_v36 }
 0x57d   : > { %8632 = vmatpush3.bf16.msra.mxu1 %v14639_v50  ;;  %v2626_v44 = vpop.xlane.xlu1 %2625 }
 0x57e   : > { %8633 = vmatprep.subr.bf16.mxu1 %v14640_v59  ;;  %9437 = vrcp.f32 %v2626_v44 }
 0x57f   : > { %9439 = vrcp.f32 %v3076_v53 }
 0x581   : > { %8634 = vmatpush3.bf16.msra.mxu1 %v14640_v59  ;;  %v3074_v1 = vpop.xlane.xlu1 %3073 }
 0x582   : > { %8635 = vmatprep.subr.bf16.mxu1 %v14641_v31  ;;  %9441 = vrcp.f32 %v3074_v1 }
 0x583   : > { %9443 = vrcp.f32 %v3080_v32 }
 0x584   : > { %9445 = vrcp.f32 %v3078_v18  ;;  %v3340_v18 = vsel %vm1875_vm2, %v3297_v26, 0 }
 0x585   : > { %8636 = vmatpush3.bf16.msra.mxu1 %v14641_v31  ;;  %v3295_v24 = vpop.permute.xlu1 %3294 }
 0x586   : > { %8637 = vmatprep.subr.bf16.mxu1 %v14642_v52  ;;  %v3337_v38 = vsel %vm1875_vm2, %v3295_v24, 0 }
 0x589   : > { %8638 = vmatpush3.bf16.msra.mxu1 %v14642_v52 }
 0x58a   : > { %8871 = vmatprep.subr.msk.bf16.mxu1 %vm1875_vm2, %v14643_v48 }
 0x58b   : > { %v9438_v25 = vpop.eup %9437 }
 0x58c   : > { %v2660_v57 = vmul.f32 %v9438_v25, %v11433_v47  ;;  %v9440_v60 = vpop.eup %9439  ;;  %v14646_v25 = vld [vmem:[#allocation36_spill] sm:$0xff] }
 0x58d   : > { %v3122_v45 = vmul.f32 %v9440_v60, %v11426_v56 }
 0x58e   : > { %v2669_v20 = vpack.c.bf16 %v2660_v57, %v2659_v62  ;;  %v14647_v57 = vld [vmem:[#allocation61_spill] sm:$0xff] }
 0x58f   : > { %v9442_v17 = vpop.eup %9441 }
 0x590   : > { %v9444_v13 = vpop.eup %9443  ;;  %8587 = vmatprep.mubr.bf16.mxu1 %v2669_v20  ;;  %v3121_v37 = vmul.f32 %v9442_v17, %v11438_v9 }
 0x591   : > { %8588 = vmatmul.mubr.bf16.gmra.mxu1 %v2670_v42  ;;  %v9446_v63 = vpop.eup %9445  ;;  %v3124_v5 = vmul.f32 %v9444_v13, %v11423_v33  ;;  %v14645_v33 = vld [vmem:[#allocation53_spill] sm:$0xff] }
 0x592   : > { %v3137_v6 = vpack.c.bf16 %v3122_v45, %v3121_v37  ;;  %v3123_v47 = vmul.f32 %v9446_v63, %v11420_v28  ;;  %v3346_v3 = vsel %vm1875_vm2, %v14645_v33, 0  ;;  %v14649_v13 = vld [vmem:[#allocation57_spill] sm:$0xff] }
 0x594   : > { %8639 = vmatprep.mubr.bf16.mxu1 %v3137_v6  ;;  %v3138_v49 = vpack.c.bf16 %v3124_v5, %v3123_v47 }
 0x599   : > { %v3086_v4 = vpop.xlane.xlu0 %3085  ;;  %8640 = vmatmul.mubr.bf16.vlgmr.msra.gmra.mxu1 %v3138_v49  ;;  %v14651_v49 = vld [vmem:[#allocation55_spill] sm:$0xff] }
 0x59a   : > { %8656 = vmatpush3.bf16.xpose.msra.mxu1 %v3352_v15 }
 0x59b   : > { %8872 = vmatprep.subr.msk.bf16.mxu1 %vm1875_vm2, %v14644_v11 }
 0x59d   : > { %v3082_v56 = vpop.xlane.xlu0 %3081 }
 0x59e   : > { %9447 = vrcp.f32 %v3082_v56  ;;  %v14652_v56 = vld [vmem:[#allocation70_spill] sm:$0xff] }
 0x5a1   : > { %v3088_v9 = vpop.xlane.xlu0 %3087 }
 0x5a2   : > { %8658 = vmatpush3.bf16.xpose.msra.mxu1 %v3349_v10  ;;  %9449 = vrcp.f32 %v3088_v9 }
 0x5a3   : > { %8873 = vmatprep.subr.msk.bf16.mxu1 %vm1875_vm2, %v14645_v33  ;;  %9451 = vrcp.f32 %v3086_v4  ;;  %v14653_v33 = vld [vmem:[#allocation68_spill] sm:$0xff] }
 0x5a5   : > { %v3102_v28 = vpop.xlane.xlu0 %3101 }
 0x5a9   : > { %v3098_v61 = vpop.xlane.xlu0 %3097 }
 0x5aa   : > { %8660 = vmatpush3.bf16.xpose.msra.mxu1 %v3346_v3 }
 0x5ab   : > { %8874 = vmatprep.subr.msk.bf16.mxu1 %vm1875_vm2, %v11617_v58  ;;  %v9448_v51 = vpop.eup %9447 }
 0x5ac   : > { %v3125_v36 = vmul.f32 %v9448_v51, %v11454_v19  ;;  %v14661_v51 = vld [vmem:[#allocation19_spill] sm:$0xff] }
 0x5ad   : > { %v3104_v41 = vpop.xlane.xlu0 %3103 }
 0x5af   : > { %v9450_v14 = vpop.eup %9449 }
 0x5b0   : > { %v9452_v39 = vpop.eup %9451  ;;  %v3128_v44 = vmul.f32 %v9450_v14, %v11459_v29 }
 0x5b1   : > { %v3293_v22 = vpop.permute.xlu0 %3292  ;;  %v3127_v31 = vmul.f32 %v9452_v39, %v11451_v30 }
 0x5b2   : > { %8662 = vmatpush3.bf16.xpose.msra.mxu1 %v3343_v8  ;;  %v3334_v52 = vsel %vm1875_vm2, %v3293_v22, 0 }
 0x5b3   : > { %8875 = vmatprep.subr.msk.bf16.mxu1 %vm1875_vm2, %v3297_v26  ;;  %v3140_v54 = vpack.c.bf16 %v3128_v44, %v3127_v31  ;;  %v14650_v26 = vld [vmem:[#allocation69_spill] sm:$0xff] }
 0x5b5   : > { %v11654_v40 = vpop.permute.xlu0 %3266 }
 0x5b6   : > { %v3084_v35 = vpop.xlane.xlu1 %3083 }
 0x5b7   : > { %9453 = vrcp.f32 %v3084_v35  ;;  %v14655_v35 = vld [vmem:[#allocation32_spill] sm:$0xff] }
 0x5b9   : > { %v11656_v43 = vpop.permute.xlu0 %3270 }
 0x5ba   : > { %8664 = vmatpush3.bf16.xpose.msra.mxu1 %v3340_v18  ;;  %v3094_v0 = vpop.xlane.xlu1 %3093  ;;  %v14657_v18 = vld [vmem:[#allocation27_spill] sm:$0xff] }
 0x5bb   : > { %8876 = vmatprep.subr.msk.bf16.mxu1 %vm1875_vm2, %v3295_v24  ;;  %v14654_v24 = vld [vmem:[#allocation34_spill] sm:$0xff] }
 0x5bd   : > { %v11660_v7 = vpop.permute.xlu0 %3274 }
 0x5be   : > { %v3090_v23 = vpop.xlane.xlu1 %3089 }
 0x5c1   : > { %v11662_v55 = vpop.permute.xlu0 %3278 }
 0x5c2   : > { %8666 = vmatpush3.bf16.xpose.msra.mxu1 %v3337_v38  ;;  %v3096_v32 = vpop.xlane.xlu1 %3095 }
 0x5c3   : > { %8877 = vmatprep.subr.msk.bf16.mxu1 %vm1875_vm2, %v3293_v22  ;;  %9455 = vrcp.f32 %v3096_v32 }
 0x5c4   : > { %v9454_v58 = vpop.eup %9453  ;;  %9457 = vrcp.f32 %v3090_v23  ;;  %v14659_v23 = vld [vmem:[#allocation22_spill] sm:$0xff] }
 0x5c5   : > { %v3650_v50 = vpop.permute.xlu0 %3649  ;;  %v3126_v53 = vmul.f32 %v9454_v58, %v11487_v46  ;;  %9459 = vrcp.f32 %v3094_v0  ;;  %v14658_v0 = vld [vmem:[#allocation25_spill] sm:$0xff] }
 0x5c6   : > { %8687 = vmatprep.subr.bf16.mxu0 %v3650_v50  ;;  %v3092_v59 = vpop.xlane.xlu1 %3091 }
 0x5c7   : > { %9461 = vrcp.f32 %v3092_v59  ;;  %8688 = vmatpush3.bf16.msra.mxu0 %v3650_v50  ;;  %v3139_v1 = vpack.c.bf16 %v3126_v53, %v3125_v36 }
 0x5c8   : > { %9463 = vrcp.f32 %v3098_v61 }
 0x5c9   : > { %8643 = vmatprep.mubr.bf16.mxu1 %v3139_v1  ;;  %v3646_v61 = vpop.permute.xlu0 %3645 }
 0x5ca   : > { %8668 = vmatpush3.bf16.xpose.msra.mxu1 %v3334_v52  ;;  %v3100_v16 = vpop.xlane.xlu1 %3099 }
 0x5cb   : > { %8644 = vmatmul.mubr.bf16.gmra.mxu1 %v3140_v54  ;;  %9465 = vrcp.f32 %v3100_v16 }
 0x5cc   : > { %9467 = vrcp.f32 %v3104_v41 }
 0x5cd   : > { %9469 = vrcp.f32 %v3102_v28  ;;  %v3644_v22 = vpop.permute.xlu0 %3643 }
 0x5ce   : > { %v3291_v19 = vpop.permute.xlu1 %3290 }
 0x5cf   : > { %8878 = vmatprep.subr.msk.bf16.mxu1 %vm1875_vm2, %v3291_v19  ;;  %v3331_v29 = vsel %vm1875_vm2, %v3291_v19, 0 }
 0x5d0   : > { %v9456_v46 = vpop.eup %9455 }
 0x5d1   : > { %v9458_v2 = vpop.eup %9457  ;;  %v3132_v62 = vmul.f32 %v9456_v46, %v11506_v12  ;;  %v3642_v8 = vpop.permute.xlu0 %3641 }
 0x5d2   : > { %8670 = vmatpush3.bf16.xpose.msra.mxu1 %v3331_v29  ;;  %v3269_v30 = vpop.permute.xlu1 %3268  ;;  %v9460_v48 = vpop.eup %9459  ;;  %v3129_v60 = vmul.f32 %v9458_v2, %v14647_v57 }
 0x5d3   : > { %8751 = vmatprep.subr.bf16.mxu1 %v14646_v25  ;;  %v3131_v37 = vmul.f32 %v9460_v48, %v14649_v13 }
 0x5d4   : > { %v9462_v27 = vpop.eup %9461 }
 0x5d5   : > { %v3130_v20 = vmul.f32 %v9462_v27, %v14648_v21  ;;  %v9464_v17 = vpop.eup %9463  ;;  %v3142_v6 = vpack.c.bf16 %v3132_v62, %v3131_v37 }
 0x5d6   : > { %v3273_v42 = vpop.permute.xlu1 %3272  ;;  %v3133_v47 = vmul.f32 %v9464_v17, %v14650_v26 }
 0x5d7   : > { %v3141_v45 = vpack.c.bf16 %v3130_v20, %v3129_v60 }
 0x5d8   : > { %v9466_v63 = vpop.eup %9465 }
 0x5d9   : > { %v9468_v5 = vpop.eup %9467  ;;  %8647 = vmatprep.mubr.bf16.mxu1 %v3141_v45  ;;  %v3134_v4 = vmul.f32 %v9466_v63, %v14651_v49 }
 0x5da   : > { %8648 = vmatmul.mubr.bf16.gmra.mxu1 %v3142_v6  ;;  %v3277_v15 = vpop.permute.xlu1 %3276  ;;  %v9470_v12 = vpop.eup %9469  ;;  %v3136_v9 = vmul.f32 %v9468_v5, %v14652_v56 }
 0x5db   : > { %v3143_v11 = vpack.c.bf16 %v3134_v4, %v3133_v47  ;;  %v3135_v28 = vmul.f32 %v9470_v12, %v14653_v33 }
 0x5dd   : > { %8651 = vmatprep.mubr.bf16.mxu1 %v3143_v11  ;;  %v3144_v3 = vpack.c.bf16 %v3136_v9, %v3135_v28 }
 0x5de   : > { %v3281_v10 = vpop.permute.xlu1 %3280 }
 0x5e2   : > { %8652 = vmatmul.mubr.bf16.gmra.mxu1 %v3144_v3  ;;  %v3648_v41 = vpop.permute.xlu1 %3647 }
 0x5e3   : > { %8671 = vmatprep.mubr.msk.bf16.mxu1 %vm1875_vm2, %v11654_v40  ;;  %8689 = vmatprep.subr.bf16.mxu0 %v3648_v41 }
 0x5e4   : > { %8690 = vmatpush3.bf16.msra.mxu0 %v3648_v41  ;;  %v11808_v41 = vld [vmem:[%s14400_s1 + $0x10] sm:$0xff] }
 0x5e5   : > { %8691 = vmatprep.subr.bf16.mxu0 %v3646_v61 }
 0x5e6   : > { %v3640_v40 = vpop.permute.xlu1 %3639 }
 0x5e8   : > { %8692 = vmatpush3.bf16.msra.mxu0 %v3646_v61 }
 0x5e9   : > { %8693 = vmatprep.subr.bf16.mxu0 %v3644_v22 }
 0x5ea   : > { %8672 = vmatmul.mubr.msk.bf16.vlgmr.msra.gmra.mxu1 %vm1875_vm2, %v3269_v30 }
 0x5eb   : > { %8752 = vmatpush3.bf16.msra.mxu1 %v14646_v25  ;;  %8675 = vmatprep.mubr.msk.bf16.mxu1 %vm1875_vm2, %v11656_v43  ;;  %v14656_v43 = vld [vmem:[#allocation29_spill] sm:$0xff] }
 0x5ec   : > { %8753 = vmatprep.subr.bf16.mxu1 %v14654_v24  ;;  %8694 = vmatpush3.bf16.msra.mxu0 %v3644_v22 }
 0x5ed   : > { %8695 = vmatprep.subr.bf16.mxu0 %v3642_v8 }
 0x5ef   : > { %8754 = vmatpush3.bf16.msra.mxu1 %v14654_v24 }
 0x5f0   : > { %8755 = vmatprep.subr.bf16.mxu1 %v14655_v35  ;;  %8696 = vmatpush3.bf16.msra.mxu0 %v3642_v8 }
 0x5f1   : > { %8697 = vmatprep.subr.bf16.mxu0 %v3640_v40 }
 0x5f2   : > { %8676 = vmatmul.mubr.msk.bf16.gmra.mxu1 %vm1875_vm2, %v3273_v42 }
 0x5f3   : > { %8756 = vmatpush3.bf16.msra.mxu1 %v14655_v35  ;;  %8679 = vmatprep.mubr.msk.bf16.mxu1 %vm1875_vm2, %v11660_v7 }
 0x5f4   : > { %8757 = vmatprep.subr.bf16.mxu1 %v14656_v43  ;;  %8698 = vmatpush3.bf16.msra.mxu0 %v3640_v40 }
 0x5f7   : > { %8758 = vmatpush3.bf16.msra.mxu1 %v14656_v43 }
 0x5f8   : > { %8759 = vmatprep.subr.bf16.mxu1 %v14657_v18  ;;  %v11707_v7 = vpop.f32.mrf.mxu1 }
 0x5f9   : > { %14660 = vst [vmem:[#allocation7_spill] sm:$0xff] %v11707_v7 }
 0x5fa   : > { %8680 = vmatmul.mubr.msk.bf16.gmra.mxu1 %vm1875_vm2, %v3277_v15  ;;  %v11711_v38 = vpop.f32.mrf.mxu1 }
 0x5fb   : > { %8760 = vmatpush3.bf16.msra.mxu1 %v14657_v18  ;;  %8683 = vmatprep.mubr.msk.bf16.mxu1 %vm1875_vm2, %v11662_v55  ;;  %14662 = vst [vmem:[#allocation56_spill] sm:$0xff] %v11711_v38 }
 0x5fc   : > { %8761 = vmatprep.subr.bf16.mxu1 %v14658_v0  ;;  %v11713_v14 = vpop.f32.mrf.mxu1 }
 0x5fd   : > { %14663 = vst [vmem:[#allocation11_spill] sm:$0xff] %v11713_v14 }
 0x5fe   : > { %v11715_v55 = vpop.f32.mrf.mxu1 }
 0x5ff   : > { %8762 = vmatpush3.bf16.msra.mxu1 %v14658_v0  ;;  %14664 = vst [vmem:[#allocation47_spill] sm:$0xff] %v11715_v55 }
 0x600   : > { %8763 = vmatprep.subr.bf16.mxu1 %v14659_v23 }
 0x602   : > { %8684 = vmatmul.mubr.msk.bf16.gmra.mxu1 %vm1875_vm2, %v3281_v10 }
 0x603   : > { %8764 = vmatpush3.bf16.msra.mxu1 %v14659_v23 }
 0x604   : > { %8765 = vmatprep.subr.bf16.mxu1 %v14661_v51 }
 0x607   : > { %8766 = vmatpush3.bf16.msra.mxu1 %v14661_v51 }
 0x608   : > { %v11717_v32 = vpop.f32.mrf.mxu1 }
 0x609   : > { %14665 = vst [vmem:[#allocation28_spill] sm:$0xff] %v11717_v32 }
 0x60a   : > { %v11719_v39 = vpop.f32.mrf.mxu1 }
 0x60b   : > { %14666 = vst [vmem:[#allocation58_spill] sm:$0xff] %v11719_v39  ;;  %v11886_v39 = vld [vmem:[%s14400_s1 + $0x30] sm:$0xff] }
 0x60c   : > { %v11721_v58 = vpop.f32.mrf.mxu1 }
 0x60d   : > { %14667 = vst [vmem:[#allocation30_spill] sm:$0xff] %v11721_v58 }
 0x60e   : > { %v11723_v50 = vpop.f32.mrf.mxu1 }
 0x60f   : > { %14668 = vst [vmem:[#allocation48_spill] sm:$0xff] %v11723_v50  ;;  %v14709_v50 = vld [vmem:[#allocation46_spill] sm:$0xff] }
 0x611   : > { %v11725_v36 = vpop.f32.mrf.mxu1 }
 0x612   : > { %14669 = vst [vmem:[#allocation45_spill] sm:$0xff] %v11725_v36 }
 0x613   : > { %v11727_v53 = vpop.f32.mrf.mxu1 }
 0x614   : > { %14670 = vst [vmem:[#allocation59_spill] sm:$0xff] %v11727_v53  ;;  %v14708_v53 = vld [vmem:[#allocation41_spill] sm:$0xff] }
 0x615   : > { %v11729_v44 = vpop.f32.mrf.mxu1 }
 0x616   : > { %14671 = vst [vmem:[#allocation40_spill] sm:$0xff] %v11729_v44 }
 0x617   : > { %v11731_v59 = vpop.f32.mrf.mxu1 }
 0x618   : > { %14672 = vst [vmem:[#allocation49_spill] sm:$0xff] %v11731_v59 }
 0x624   : > { %v11733_v1 = vpop.f32.mrf.mxu1 }
 0x625   : > { %14673 = vst [vmem:[#allocation8_spill] sm:$0xff] %v11733_v1  ;;  %v11817_v1 = vld [vmem:[%s14400_s1] sm:$0xff] }
 0x626   : > { %v11735_v31 = vpop.f32.mrf.mxu1 }
 0x627   : > { %14674 = vst [vmem:[#allocation35_spill] sm:$0xff] %v11735_v31 }
 0x628   : > { %v11737_v52 = vpop.f32.mrf.mxu1 }
 0x629   : > { %14675 = vst [vmem:[#allocation67_spill] sm:$0xff] %v11737_v52 }
 0x62a   : > { %v11739_v54 = vpop.f32.mrf.mxu1 }
 0x62b   : > { %14676 = vst [vmem:[#allocation9_spill] sm:$0xff] %v11739_v54 }
 0x62c   : > { %v11741_v16 = vpop.f32.mrf.mxu1 }
 0x62d   : > { %14677 = vst [vmem:[#allocation42_spill] sm:$0xff] %v11741_v16 }
 0x62e   : > { %v11743_v19 = vpop.f32.mrf.mxu1 }
 0x62f   : > { %14678 = vst [vmem:[#allocation13_spill] sm:$0xff] %v11743_v19 }
 0x630   : > { %v11745_v29 = vpop.f32.mrf.mxu1 }
 0x631   : > { %14679 = vst [vmem:[#allocation31_spill] sm:$0xff] %v11745_v29 }
 0x632   : > { %v11747_v46 = vpop.f32.mrf.mxu1 }
 0x634   : > { %v11749_v2 = vpop.f32.mrf.mxu1 }
 0x635   : > { %14680 = vst [vmem:[#allocation33_spill] sm:$0xff] %v11749_v2 }
 0x636   : > { %v11751_v30 = vpop.f32.mrf.mxu1 }
 0x637   : > { %14681 = vst [vmem:[#allocation39_spill] sm:$0xff] %v11751_v30 }
 0x638   : > { %v11753_v48 = vpop.f32.mrf.mxu1 }
 0x639   : > { %14682 = vst [vmem:[#allocation37_spill] sm:$0xff] %v11753_v48 }
 0x63a   : > { %v11755_v27 = vpop.f32.mrf.mxu1 }
 0x63b   : > { %14683 = vst [vmem:[#allocation60_spill] sm:$0xff] %v11755_v27 }
 0x63c   : > { %v11757_v62 = vpop.f32.mrf.mxu1 }
 0x63d   : > { %14684 = vst [vmem:[#allocation38_spill] sm:$0xff] %v11757_v62 }
 0x63e   : > { %v11759_v57 = vpop.f32.mrf.mxu1 }
 0x63f   : > { %14685 = vst [vmem:[#allocation50_spill] sm:$0xff] %v11759_v57 }
 0x640   : > { %v11761_v60 = vpop.f32.mrf.mxu1 }
 0x641   : > { %14686 = vst [vmem:[#allocation62_spill] sm:$0xff] %v11761_v60 }
 0x642   : > { %v11763_v21 = vpop.f32.mrf.mxu1 }
 0x643   : > { %14687 = vst [vmem:[#allocation63_spill] sm:$0xff] %v11763_v21  ;;  %v14711_v21 = vld [vmem:[#allocation43_spill] sm:$0xff] }
 0x651   : > { %v11765_v20 = vpop.f32.mrf.mxu1 }
 0x652   : > { %14688 = vst [vmem:[#allocation64_spill] sm:$0xff] %v11765_v20 }
 0x653   : > { %v11767_v17 = vpop.f32.mrf.mxu1 }
 0x654   : > { %14689 = vst [vmem:[#allocation51_spill] sm:$0xff] %v11767_v17 }
 0x655   : > { %v11769_v42 = vpop.f32.mrf.mxu1 }
 0x656   : > { %14690 = vst [vmem:[#allocation65_spill] sm:$0xff] %v11769_v42 }
 0x657   : > { %v11771_v13 = vpop.f32.mrf.mxu1 }
 0x658   : > { %14691 = vst [vmem:[#allocation52_spill] sm:$0xff] %v11771_v13 }
 0x659   : > { %v11773_v37 = vpop.f32.mrf.mxu1 }
 0x65a   : > { %14692 = vst [vmem:[#allocation66_spill] sm:$0xff] %v11773_v37 }
 0x65b   : > { %v11775_v45 = vpop.f32.mrf.mxu1 }
 0x65c   : > { %14693 = vst [vmem:[#allocation53_spill] sm:$0xff] %v11775_v45 }
 0x65d   : > { %v11777_v63 = vpop.f32.mrf.mxu1 }
 0x65e   : > { %14694 = vst [vmem:[#allocation36_spill] sm:$0xff] %v11777_v63 }
 0x65f   : > { %v11779_v6 = vpop.f32.mrf.mxu1 }
 0x660   : > { %14695 = vst [vmem:[#allocation61_spill] sm:$0xff] %v11779_v6 }
 0x68b   : > { %v11781_v5 = vpop.f32.mrf.mxu1 }
 0x68c   : > { %14696 = vst [vmem:[#allocation54_spill] sm:$0xff] %v11781_v5  ;;  %v3636_v5 = vpop.permute.xlu1 %3635 }
 0x68d   : > { %v11783_v26 = vpop.f32.mrf.mxu1 }
 0x68e   : > { %14697 = vst [vmem:[#allocation57_spill] sm:$0xff] %v11783_v26 }
 0x68f   : > { %v11785_v47 = vpop.f32.mrf.mxu1 }
 0x690   : > { %14698 = vst [vmem:[#allocation69_spill] sm:$0xff] %v11785_v47 }
 0x691   : > { %v11787_v49 = vpop.f32.mrf.mxu1 }
 0x692   : > { %14699 = vst [vmem:[#allocation55_spill] sm:$0xff] %v11787_v49 }
 0x69a   : > { %v11789_v4 = vpop.f32.mrf.mxu1 }
 0x69b   : > { %14700 = vst [vmem:[#allocation70_spill] sm:$0xff] %v11789_v4 }
 0x69c   : > { %v11791_v15 = vpop.f32.mrf.mxu1 }
 0x69d   : > { %14701 = vst [vmem:[#allocation68_spill] sm:$0xff] %v11791_v15  ;;  %v11939_v15 = vld [vmem:[%s14400_s1 + $0x78] sm:$0xff] }
 0x69e   : > { %v11793_v12 = vpop.f32.mrf.mxu1 }
 0x69f   : > { %14702 = vst [vmem:[#allocation34_spill] sm:$0xff] %v11793_v12 }
 0x6a0   : > { %v11795_v11 = vpop.f32.mrf.mxu1 }
 0x6a1   : > { %14703 = vst [vmem:[#allocation32_spill] sm:$0xff] %v11795_v11 }
 0x6a2   : > { %v11797_v56 = vpop.f32.mrf.mxu1 }
 0x6a3   : > { %14704 = vst [vmem:[#allocation29_spill] sm:$0xff] %v11797_v56 }
 0x6a4   : > { %v11799_v9 = vpop.f32.mrf.mxu1 }
 0x6a5   : > { %14705 = vst [vmem:[#allocation27_spill] sm:$0xff] %v11799_v9 }
 0x6a6   : > { %v11801_v10 = vpop.f32.mrf.mxu1 }
 0x6a7   : > { %14706 = vst [vmem:[#allocation25_spill] sm:$0xff] %v11801_v10  ;;  %v11834_v10 = vld [vmem:[%s14400_s1 + $0x18] sm:$0xff] }
 0x6a8   : > { %v11803_v33 = vpop.f32.mrf.mxu1 }
 0x6a9   : > { %14707 = vst [vmem:[#allocation22_spill] sm:$0xff] %v11803_v33 }
 0x6aa   : > { %v8673_v28 = vpop.f32.mrf.mxu1 }
 0x6ab   : > { %v3453_v61 = vmul.f32 0.07216878, %v8673_v28 }
 0x6ac   : > { %v3388_v3 = vpop.f32.mrf.mxu1 }
 0x6ad   : > { %v11811_v22 = vadd.f32 %v11808_v41, %v3453_v61  ;;  %v3451_v8 = vmul.f32 0.07216878, %v3388_v3  ;;  %v11825_v61 = vld [vmem:[%s14400_s1 + $0x8] sm:$0xff] }
 0x6ae   : > { %v8674_v40 = vpop.f32.mrf.mxu1 }
 0x6af   : > { %3487 = vmax.xlane.f32.xlu0 %v11811_v22  ;;  %v11820_v28 = vadd.f32 %v11817_v1, %v3451_v8  ;;  %v3454_v58 = vmul.f32 0.07216878, %v8674_v40 }
 0x6b0   : > { %v3391_v52 = vpop.f32.mrf.mxu1 }
 0x6b1   : > { %v3452_v32 = vmul.f32 0.07216878, %v3391_v52  ;;  %v11837_v8 = vadd.f32 %v11834_v10, %v3454_v58 }
 0x6b2   : > { %v8677_v54 = vpop.f32.mrf.mxu1 }
 0x6b3   : > { %v11828_v3 = vadd.f32 %v11825_v61, %v3452_v32  ;;  %3483 = vmax.xlane.f32.xlu0 %v11820_v28  ;;  %v11844_v32 = vld [vmem:[%s14400_s1 + $0x38] sm:$0xff] }
 0x6b4   : > { %v3404_v31 = vpop.f32.mrf.mxu1 }
 0x6b5   : > { %3485 = vmax.xlane.f32.xlu1 %v11828_v3  ;;  %v3455_v14 = vmul.f32 0.07216878, %v3404_v31 }
 0x6b6   : > { %v8678_v52 = vpop.f32.mrf.mxu1 }
 0x6b7   : > { %v3458_v40 = vmul.f32 0.07216878, %v8678_v52  ;;  %3489 = vmax.xlane.f32.xlu0 %v11837_v8  ;;  %v11853_v52 = vld [vmem:[%s14400_s1 + $0x28] sm:$0xff] }
 0x6b8   : > { %v3407_v42 = vpop.f32.mrf.mxu1 }
 0x6b9   : > { %v11847_v56 = vadd.f32 %v11844_v32, %v3458_v40  ;;  %v3456_v20 = vmul.f32 0.07216878, %v3407_v42  ;;  %v11862_v42 = vld [vmem:[%s14400_s1 + $0x58] sm:$0xff] }
 0x6ba   : > { %v8681_v33 = vpop.f32.mrf.mxu1 }
 0x6bb   : > { %3497 = vmax.xlane.f32.xlu1 %v11847_v56  ;;  %v11856_v13 = vadd.f32 %v11853_v52, %v3456_v20  ;;  %v11871_v20 = vld [vmem:[%s14400_s1 + $0x48] sm:$0xff] }
 0x6bc   : > { %v3420_v58 = vpop.f32.mrf.mxu1 }
 0x6bd   : > { %v3459_v38 = vmul.f32 0.07216878, %v3420_v58 }
 0x6be   : > { %v8682_v9 = vpop.f32.mrf.mxu1 }
 0x6bf   : > { %v3462_v44 = vmul.f32 0.07216878, %v8682_v9  ;;  %3493 = vmax.xlane.f32.xlu1 %v11856_v13 }
 0x6c0   : > { %v3423_v36 = vpop.f32.mrf.mxu1 }
 0x6c1   : > { %v11865_v40 = vadd.f32 %v11862_v42, %v3462_v44  ;;  %v3460_v59 = vmul.f32 0.07216878, %v3423_v36  ;;  %v14710_v36 = vld [vmem:[#allocation15_spill] sm:$0xff]  ;;  %v3457_v44 = vmul.f32 0.07216878, %v8677_v54 }
 0x6c2   : > { %v3461_v54 = vmul.f32 0.07216878, %v8681_v33  ;;  %v8685_v55 = vpop.f32.mrf.mxu1 }
 0x6c3   : > { %3505 = vmax.xlane.f32.xlu1 %v11865_v40  ;;  %v11874_v9 = vadd.f32 %v11871_v20, %v3460_v59  ;;  %v11889_v59 = vadd.f32 %v11886_v39, %v3457_v44  ;;  %v11904_v44 = vld [vmem:[%s14400_s1 + $0x50] sm:$0xff]  ;;  %v3465_v12 = vmul.f32 0.07216878, %v8685_v55 }
 0x6c4   : > { %v11907_v31 = vadd.f32 %v11904_v44, %v3461_v54  ;;  %v3436_v17 = vpop.f32.mrf.mxu1  ;;  %v11922_v54 = vld [vmem:[%s14400_s1 + $0x70] sm:$0xff] }
 0x6c5   : > { %v11925_v58 = vadd.f32 %v11922_v54, %v3465_v12  ;;  %v3463_v60 = vmul.f32 0.07216878, %v3436_v17 }
 0x6c6   : > { %v8686_v4 = vpop.f32.mrf.mxu1 }
 0x6c7   : > { %3501 = vmax.xlane.f32.xlu1 %v11874_v9  ;;  %v3466_v62 = vmul.f32 0.07216878, %v8686_v4  ;;  %v11949_v4 = vld [vmem:[%s14400_s1 + $0x68] sm:$0xff] }
 0x6c8   : > { %v3439_v11 = vpop.f32.mrf.mxu1 }
 0x6c9   : > { %v11942_v12 = vadd.f32 %v11939_v15, %v3466_v62  ;;  %v3464_v17 = vmul.f32 0.07216878, %v3439_v11  ;;  %v14712_v62 = vld [vmem:[#allocation44_spill] sm:$0xff]  ;;  %v14713_v11 = vld [vmem:[#allocation14_spill] sm:$0xff] }
 0x6cd   : > { %3637 = vrot.lane.b32.xlu0 %v14708_v53, %s9800_s21  ;;  %v11895_v53 = vld [vmem:[%s14400_s1 + $0x20] sm:$0xff] }
 0x6ce   : > { %v11898_v7 = vadd.f32 %v11895_v53, %v3455_v14  ;;  %v11913_v14 = vld [vmem:[%s14400_s1 + $0x40] sm:$0xff] }
 0x6cf   : > { %v11916_v33 = vadd.f32 %v11913_v14, %v3459_v38  ;;  %v11931_v38 = vld [vmem:[%s14400_s1 + $0x60] sm:$0xff] }
 0x6d0   : > { %v11934_v55 = vadd.f32 %v11931_v38, %v3463_v60  ;;  %v11952_v60 = vadd.f32 %v11949_v4, %v3464_v17 }
 0x6d8   : > { %3768 = vrot.lane.b32.xlu1 %v14709_v50, %s9801_s23 }
 0x6dc   : > { %3764 = vrot.lane.b32.xlu1 %v14710_v36, %s9801_s23 }
 0x6ec   : > { %3495 = vmax.xlane.f32.xlu0 %v11889_v59 }
 0x6f0   : > { %3491 = vmax.xlane.f32.xlu0 %v11898_v7 }
 0x6f4   : > { %3503 = vmax.xlane.f32.xlu0 %v11907_v31 }
 0x6f8   : > { %3499 = vmax.xlane.f32.xlu0 %v11916_v33 }
 0x6fc   : > { %3511 = vmax.xlane.f32.xlu0 %v11925_v58 }
 0x700   : > { %3507 = vmax.xlane.f32.xlu0 %v11934_v55  ;;  %3513 = vmax.xlane.f32.xlu1 %v11942_v12 }
 0x704   : > { %3509 = vmax.xlane.f32.xlu1 %v11952_v60 }
 0x716   : > { %3770 = vrot.lane.b32.xlu0 %v14711_v21, %s9801_s23 }
 0x71a   : > { %3766 = vrot.lane.b32.xlu0 %v14712_v62, %s9801_s23 }
 0x71e   : > { %3762 = vrot.lane.b32.xlu0 %v14713_v11, %s9801_s23 }
 0x738   : > { %v3488_v57 = vpop.xlane.xlu0 %3487 }
 0x739   : > { %v3517_v47 = vsub.f32 %v11811_v22, %v3488_v57 }
 0x73b   : > { %v3535_v48 = vmul.f32 1.442695, %v3517_v47 }
 0x73c   : > { %v3484_v2 = vpop.xlane.xlu0 %3483 }
 0x73d   : > { %9471 = vpow2.f32 %v3535_v48  ;;  %v3515_v17 = vsub.f32 %v11820_v28, %v3484_v2 }
 0x73e   : > { %v3486_v49 = vpop.xlane.xlu1 %3485 }
 0x73f   : > { %v3531_v26 = vmul.f32 1.442695, %v3515_v17  ;;  %v3516_v30 = vsub.f32 %v11828_v3, %v3486_v49 }
 0x740   : > { %v3490_v27 = vpop.xlane.xlu0 %3489 }
 0x741   : > { %9473 = vpow2.f32 %v3531_v26  ;;  %v3518_v63 = vsub.f32 %v11837_v8, %v3490_v27  ;;  %v3533_v16 = vmul.f32 1.442695, %v3516_v30 }
 0x743   : > { %v3537_v37 = vmul.f32 1.442695, %v3518_v63 }
 0x744   : > { %v3638_v29 = vpop.permute.xlu0 %3637 }
 0x745   : > { %9475 = vpow2.f32 %v3537_v37  ;;  %8699 = vmatprep.subr.bf16.mxu0 %v3638_v29 }
 0x746   : > { %8700 = vmatpush3.bf16.msra.mxu0 %v3638_v29  ;;  %9477 = vpow2.f32 %v3533_v16  ;;  %v3498_v29 = vpop.xlane.xlu1 %3497  ;;  %v14714_v16 = vld [vmem:[#allocation12_spill] sm:$0xff] }
 0x747   : > { %8701 = vmatprep.subr.bf16.mxu0 %v3636_v5  ;;  %v3522_v49 = vsub.f32 %v11847_v56, %v3498_v29 }
 0x749   : > { %v3545_v6 = vmul.f32 1.442695, %v3522_v49 }
 0x74a   : > { %v11965_v57 = vpop.eup %9471  ;;  %8702 = vmatpush3.bf16.msra.mxu0 %v3636_v5  ;;  %v3494_v30 = vpop.xlane.xlu1 %3493 }
 0x74b   : > { %3567 = vadd.xlane.f32.xlu1 %v11965_v57  ;;  %v3520_v63 = vsub.f32 %v11856_v13, %v3494_v30 }
 0x74d   : > { %v3541_v22 = vmul.f32 1.442695, %v3520_v63 }
 0x74e   : > { %v11968_v2 = vpop.eup %9473  ;;  %v3506_v37 = vpop.xlane.xlu1 %3505 }
 0x74f   : > { %3563 = vadd.xlane.f32.xlu1 %v11968_v2 }
 0x752   : > { %v11971_v48 = vpop.eup %9475  ;;  %v3502_v28 = vpop.xlane.xlu1 %3501 }
 0x753   : > { %3569 = vadd.xlane.f32.xlu1 %v11971_v48  ;;  %v11974_v27 = vpop.eup %9477 }
 0x756   : > { %v11984_v13 = vpop.permute.xlu1 %3768 }
 0x757   : > { %3565 = vadd.xlane.f32.xlu1 %v11974_v27 }
 0x768   : > { %3760 = vrot.lane.b32.xlu1 %v14714_v16, %s9801_s23 }
 0x775   : > { %v3496_v5 = vpop.xlane.xlu0 %3495 }
 0x776   : > { %v3521_v26 = vsub.f32 %v11889_v59, %v3496_v5  ;;  %v3526_v59 = vsub.f32 %v11865_v40, %v3506_v37 }
 0x778   : > { %v3543_v47 = vmul.f32 1.442695, %v3521_v26  ;;  %v3553_v5 = vmul.f32 1.442695, %v3526_v59  ;;  %v11989_v26 = vpop.permute.xlu1 %3764 }
 0x779   : > { %v3492_v3 = vpop.xlane.xlu0 %3491 }
 0x77a   : > { %9479 = vpow2.f32 %v3543_v47  ;;  %v3519_v8 = vsub.f32 %v11898_v7, %v3492_v3  ;;  %v3524_v7 = vsub.f32 %v11874_v9, %v3502_v28 }
 0x77b   : > { %9481 = vpow2.f32 %v3541_v22 }
 0x77c   : > { %v3539_v17 = vmul.f32 1.442695, %v3519_v8 }
 0x77d   : > { %v3504_v19 = vpop.xlane.xlu0 %3503 }
 0x77e   : > { %9483 = vpow2.f32 %v3539_v17  ;;  %v3525_v45 = vsub.f32 %v11907_v31, %v3504_v19 }
 0x77f   : > { %9485 = vpow2.f32 %v3545_v6  ;;  %v3549_v6 = vmul.f32 1.442695, %v3524_v7 }
 0x780   : > { %v3551_v30 = vmul.f32 1.442695, %v3525_v45 }
 0x781   : > { %v3500_v56 = vpop.xlane.xlu0 %3499 }
 0x782   : > { %9487 = vpow2.f32 %v3551_v30  ;;  %v3523_v29 = vsub.f32 %v11916_v33, %v3500_v56 }
 0x784   : > { %v3547_v63 = vmul.f32 1.442695, %v3523_v29 }
 0x785   : > { %v3512_v47 = vpop.xlane.xlu0 %3511 }
 0x786   : > { %9489 = vpow2.f32 %v3547_v63  ;;  %v3529_v19 = vsub.f32 %v11925_v58, %v3512_v47  ;;  %v14715_v47 = vld [vmem:[#allocation10_spill] sm:$0xff] }
 0x787   : > { %v11992_v31 = vpop.eup %9479  ;;  %9491 = vpow2.f32 %v3553_v5 }
 0x788   : > { %v3559_v45 = vmul.f32 1.442695, %v3529_v19  ;;  %3575 = vadd.xlane.f32.xlu0 %v11992_v31  ;;  %v11995_v33 = vpop.eup %9481 }
 0x789   : > { %v3508_v40 = vpop.xlane.xlu0 %3507  ;;  %v3514_v37 = vpop.xlane.xlu1 %3513 }
 0x78a   : > { %9493 = vpow2.f32 %v3559_v45  ;;  %v3527_v9 = vsub.f32 %v11934_v55, %v3508_v40  ;;  %v3530_v49 = vsub.f32 %v11942_v12, %v3514_v37 }
 0x78b   : > { %v11999_v22 = vpop.eup %9483  ;;  %9495 = vpow2.f32 %v3549_v6 }
 0x78c   : > { %v3555_v28 = vmul.f32 1.442695, %v3527_v9  ;;  %3571 = vadd.xlane.f32.xlu0 %v11999_v22  ;;  %3573 = vadd.xlane.f32.xlu1 %v11995_v33  ;;  %v3561_v58 = vmul.f32 1.442695, %v3530_v49  ;;  %v12003_v17 = vpop.eup %9485 }
 0x78d   : > { %v3771_v3 = vpop.permute.xlu0 %3770  ;;  %v3510_v8 = vpop.xlane.xlu1 %3509 }
 0x78e   : > { %9497 = vpow2.f32 %v3555_v28  ;;  %v3528_v30 = vsub.f32 %v11952_v60, %v3510_v8  ;;  %8879 = vmatprep.subr.msk.bf16.mxu0 %vm1875_vm2, %v3771_v3 }
 0x78f   : > { %v12007_v55 = vpop.eup %9487  ;;  %9499 = vpow2.f32 %v3561_v58 }
 0x790   : > { %v3557_v12 = vmul.f32 1.442695, %v3528_v30  ;;  %3577 = vadd.xlane.f32.xlu0 %v12003_v17  ;;  %3583 = vadd.xlane.f32.xlu1 %v12007_v55 }
 0x792   : > { %9501 = vpow2.f32 %v3557_v12 }
 0x793   : > { %v12011_v59 = vpop.eup %9489 }
 0x794   : > { %3579 = vadd.xlane.f32.xlu1 %v12011_v59  ;;  %v12014_v56 = vpop.eup %9491 }
 0x797   : > { %v12016_v29 = vpop.eup %9493 }
 0x798   : > { %3591 = vadd.xlane.f32.xlu0 %v12016_v29  ;;  %3585 = vadd.xlane.f32.xlu1 %v12014_v56  ;;  %v12020_v60 = vpop.eup %9495 }
 0x79b   : > { %v12022_v63 = vpop.eup %9497 }
 0x79c   : > { %3587 = vadd.xlane.f32.xlu0 %v12022_v63  ;;  %3581 = vadd.xlane.f32.xlu1 %v12020_v60  ;;  %v12026_v5 = vpop.eup %9499 }
 0x79f   : > { %v12028_v7 = vpop.eup %9501 }
 0x7a0   : > { %3593 = vadd.xlane.f32.xlu0 %v12026_v5  ;;  %3589 = vadd.xlane.f32.xlu1 %v12028_v7 }
 0x7b1   : > { %3756 = vrot.lane.b32.xlu1 %v14625_v34, %s9801_s23 }
 0x7b5   : > { %4226 = vrot.lane.b32.xlu1 %v14709_v50, %s9800_s21 }
 0x7b6   : > { %3758 = vrot.lane.b32.xlu0 %v14715_v47, %s9801_s23 }
 0x7ba   : > { %4228 = vrot.lane.b32.xlu0 %v14711_v21, %s9800_s21 }
 0x7d4   : > { %v3568_v19 = vpop.xlane.xlu1 %3567 }
 0x7d8   : > { %v3564_v45 = vpop.xlane.xlu1 %3563 }
 0x7dc   : > { %v3570_v6 = vpop.xlane.xlu1 %3569 }
 0x7dd   : > { %9503 = vrcp.f32 %v3570_v6 }
 0x7de   : > { %9505 = vrcp.f32 %v3564_v45  ;;  %v3815_v45 = vsel %vm1875_vm2, %v11984_v13, 0 }
 0x7df   : > { %9507 = vrcp.f32 %v3568_v19  ;;  %v3818_v19 = vsel %vm1875_vm2, %v3771_v3, 0 }
 0x7e0   : > { %v3566_v40 = vpop.xlane.xlu1 %3565 }
 0x7e1   : > { %9509 = vrcp.f32 %v3566_v40 }
 0x7e4   : > { %v3761_v3 = vpop.permute.xlu1 %3760 }
 0x7ea   : > { %v9504_v37 = vpop.eup %9503 }
 0x7eb   : > { %v9506_v9 = vpop.eup %9505  ;;  %v3614_v50 = vmul.f32 %v9504_v37, %v11971_v48  ;;  %v3767_v48 = vpop.permute.xlu0 %3766 }
 0x7ec   : > { %v9508_v49 = vpop.eup %9507  ;;  %v3611_v58 = vmul.f32 %v9506_v9, %v11968_v2  ;;  %v3812_v2 = vsel %vm1875_vm2, %v3767_v48, 0 }
 0x7ed   : > { %v3613_v21 = vmul.f32 %v9508_v49, %v11965_v57  ;;  %v3809_v57 = vsel %vm1875_vm2, %v11989_v26, 0 }
 0x7ee   : > { %v9510_v28 = vpop.eup %9509 }
 0x7ef   : > { %v3612_v8 = vmul.f32 %v9510_v28, %v11974_v27  ;;  %v3628_v12 = vpack.c.bf16 %v3614_v50, %v3613_v21  ;;  %v3763_v27 = vpop.permute.xlu0 %3762 }
 0x7f1   : > { %v3627_v30 = vpack.c.bf16 %v3612_v8, %v3611_v58 }
 0x7f3   : > { %8703 = vmatprep.mubr.bf16.mxu0 %v3627_v30 }
 0x7f4   : > { %8704 = vmatmul.mubr.bf16.vlgmr.msra.gmra.mxu0 %v3628_v12 }
 0x7f5   : > { %8720 = vmatpush3.bf16.xpose.msra.mxu0 %v3818_v19 }
 0x7f6   : > { %8880 = vmatprep.subr.msk.bf16.mxu0 %vm1875_vm2, %v11984_v13  ;;  %v3806_v13 = vsel %vm1875_vm2, %v3763_v27, 0 }
 0x7fd   : > { %8722 = vmatpush3.bf16.xpose.msra.mxu0 %v3815_v45 }
 0x7fe   : > { %8881 = vmatprep.subr.msk.bf16.mxu0 %vm1875_vm2, %v3767_v48 }
 0x805   : > { %8724 = vmatpush3.bf16.xpose.msra.mxu0 %v3812_v2 }
 0x806   : > { %8882 = vmatprep.subr.msk.bf16.mxu0 %vm1875_vm2, %v11989_v26  ;;  %v3803_v26 = vsel %vm1875_vm2, %v3761_v3, 0 }
 0x80d   : > { %8726 = vmatpush3.bf16.xpose.msra.mxu0 %v3809_v57 }
 0x80e   : > { %8883 = vmatprep.subr.msk.bf16.mxu0 %vm1875_vm2, %v3763_v27 }
 0x811   : > { %v3576_v6 = vpop.xlane.xlu0 %3575 }
 0x815   : > { %8728 = vmatpush3.bf16.xpose.msra.mxu0 %v3806_v13  ;;  %v3572_v40 = vpop.xlane.xlu0 %3571  ;;  %v3574_v37 = vpop.xlane.xlu1 %3573 }
 0x816   : > { %9511 = vrcp.f32 %v3572_v40  ;;  %8884 = vmatprep.subr.msk.bf16.mxu0 %vm1875_vm2, %v3761_v3 }
 0x817   : > { %9513 = vrcp.f32 %v3574_v37 }
 0x818   : > { %9515 = vrcp.f32 %v3576_v6 }
 0x819   : > { %v3578_v9 = vpop.xlane.xlu0 %3577  ;;  %v3584_v49 = vpop.xlane.xlu1 %3583 }
 0x81a   : > { %9517 = vrcp.f32 %v3578_v9 }
 0x81d   : > { %8730 = vmatpush3.bf16.xpose.msra.mxu0 %v3803_v26  ;;  %v3580_v28 = vpop.xlane.xlu1 %3579 }
 0x821   : > { %v3592_v50 = vpop.xlane.xlu0 %3591  ;;  %v3586_v58 = vpop.xlane.xlu1 %3585 }
 0x822   : > { %9519 = vrcp.f32 %v3586_v58 }
 0x823   : > { %v9512_v8 = vpop.eup %9511  ;;  %9521 = vrcp.f32 %v3580_v28 }
 0x824   : > { %v9514_v21 = vpop.eup %9513  ;;  %v3615_v30 = vmul.f32 %v9512_v8, %v11999_v22  ;;  %9523 = vrcp.f32 %v3584_v49 }
 0x825   : > { %v9516_v12 = vpop.eup %9515  ;;  %v3588_v19 = vpop.xlane.xlu0 %3587  ;;  %v3616_v48 = vmul.f32 %v9514_v21, %v11995_v33 }
 0x826   : > { %v3582_v45 = vpop.xlane.xlu1 %3581  ;;  %v3617_v27 = vmul.f32 %v9516_v12, %v11992_v31 }
 0x827   : > { %v9518_v2 = vpop.eup %9517  ;;  %9525 = vrcp.f32 %v3582_v45  ;;  %v3629_v57 = vpack.c.bf16 %v3616_v48, %v3615_v30 }
 0x828   : > { %v3618_v3 = vmul.f32 %v9518_v2, %v12003_v17  ;;  %9527 = vrcp.f32 %v3588_v19 }
 0x829   : > { %8707 = vmatprep.mubr.bf16.mxu0 %v3629_v57  ;;  %v3594_v6 = vpop.xlane.xlu0 %3593 }
 0x82a   : > { %v3590_v13 = vpop.xlane.xlu1 %3589  ;;  %v3630_v40 = vpack.c.bf16 %v3618_v3, %v3617_v27 }
 0x82b   : > { %9529 = vrcp.f32 %v3590_v13  ;;  %v14718_v13 = vld [vmem:[#allocation23_spill] sm:$0xff] }
 0x82c   : > { %9531 = vrcp.f32 %v3594_v6  ;;  %8708 = vmatmul.mubr.bf16.gmra.mxu0 %v3630_v40  ;;  %v14717_v6 = vld [vmem:[#allocation24_spill] sm:$0xff] }
 0x82d   : > { %v3759_v22 = vpop.permute.xlu0 %3758  ;;  %9533 = vrcp.f32 %v3592_v50  ;;  %v14723_v40 = vld [vmem:[#allocation16_spill] sm:$0xff] }
 0x82e   : > { %8885 = vmatprep.subr.msk.bf16.mxu0 %vm1875_vm2, %v3759_v22  ;;  %v3800_v33 = vsel %vm1875_vm2, %v3759_v22, 0  ;;  %v3757_v37 = vpop.permute.xlu1 %3756 }
 0x82f   : > { %8732 = vmatpush3.bf16.xpose.msra.mxu0 %v3800_v33  ;;  %v9520_v31 = vpop.eup %9519  ;;  %v3797_v21 = vsel %vm1875_vm2, %v3757_v37, 0 }
 0x830   : > { %8886 = vmatprep.subr.msk.bf16.mxu0 %vm1875_vm2, %v3757_v37  ;;  %v9522_v9 = vpop.eup %9521  ;;  %v3622_v28 = vmul.f32 %v9520_v31, %v12014_v56 }
 0x831   : > { %v12066_v17 = vpop.permute.xlu0 %4228  ;;  %v9524_v49 = vpop.eup %9523  ;;  %v3619_v50 = vmul.f32 %v9522_v9, %v12011_v59 }
 0x832   : > { %8887 = vmatprep.subr.msk.bf16.mxu1 %vm1875_vm2, %v12066_v17  ;;  %v3621_v30 = vmul.f32 %v9524_v49, %v12007_v55  ;;  %v14716_v55 = vld [vmem:[#allocation26_spill] sm:$0xff] }
 0x834   : > { %v9526_v26 = vpop.eup %9525  ;;  %v3632_v45 = vpack.c.bf16 %v3622_v28, %v3621_v30 }
 0x835   : > { %v3620_v58 = vmul.f32 %v9526_v26, %v12020_v60  ;;  %v9528_v8 = vpop.eup %9527 }
 0x836   : > { %v3623_v2 = vmul.f32 %v9528_v8, %v12022_v63  ;;  %v14719_v63 = vld [vmem:[#allocation21_spill] sm:$0xff] }
 0x837   : > { %8734 = vmatpush3.bf16.xpose.msra.mxu0 %v3797_v21  ;;  %v3631_v12 = vpack.c.bf16 %v3620_v58, %v3619_v50 }
 0x838   : > { %v9530_v19 = vpop.eup %9529 }
 0x839   : > { %v9532_v48 = vpop.eup %9531  ;;  %8711 = vmatprep.mubr.bf16.mxu0 %v3631_v12  ;;  %v3624_v57 = vmul.f32 %v9530_v19, %v12028_v7  ;;  %v14720_v7 = vld [vmem:[#allocation20_spill] sm:$0xff] }
 0x83a   : > { %8712 = vmatmul.mubr.bf16.gmra.mxu0 %v3632_v45  ;;  %v9534_v56 = vpop.eup %9533  ;;  %v3626_v60 = vmul.f32 %v9532_v48, %v12026_v5  ;;  %v14721_v5 = vld [vmem:[#allocation17_spill] sm:$0xff] }
 0x83b   : > { %v3633_v59 = vpack.c.bf16 %v3624_v57, %v3623_v2  ;;  %v3625_v27 = vmul.f32 %v9534_v56, %v12016_v29  ;;  %v14722_v29 = vld [vmem:[#allocation18_spill] sm:$0xff] }
 0x83d   : > { %8715 = vmatprep.mubr.bf16.mxu0 %v3633_v59  ;;  %v3634_v3 = vpack.c.bf16 %v3626_v60, %v3625_v27 }
 0x842   : > { %8716 = vmatmul.mubr.bf16.gmra.mxu0 %v3634_v3 }
 0x843   : > { %8735 = vmatprep.mubr.msk.bf16.mxu0 %vm1875_vm2, %v14716_v55 }
 0x84a   : > { %8736 = vmatmul.mubr.msk.bf16.vlgmr.msra.gmra.mxu0 %vm1875_vm2, %v14717_v6 }
 0x84b   : > { %8739 = vmatprep.mubr.msk.bf16.mxu0 %vm1875_vm2, %v14718_v13 }
 0x852   : > { %8740 = vmatmul.mubr.msk.bf16.gmra.mxu0 %vm1875_vm2, %v14719_v63 }
 0x853   : > { %8743 = vmatprep.mubr.msk.bf16.mxu0 %vm1875_vm2, %v14720_v7 }
 0x85a   : > { %8744 = vmatmul.mubr.msk.bf16.gmra.mxu0 %vm1875_vm2, %v14721_v5 }
 0x85b   : > { %8747 = vmatprep.mubr.msk.bf16.mxu0 %vm1875_vm2, %v14722_v29 }
 0x862   : > { %8748 = vmatmul.mubr.msk.bf16.gmra.mxu0 %vm1875_vm2, %v14723_v40 }
 0x8b4   : > { %v12095_v22 = vpop.f32.mrf.mxu0 }
 0x8b6   : > { %v12097_v33 = vpop.f32.mrf.mxu0 }
 0x8b8   : > { %v12099_v37 = vpop.f32.mrf.mxu0 }
 0x8ba   : > { %v12101_v31 = vpop.f32.mrf.mxu0 }
 0x8ec   : > { %v12103_v9 = vpop.f32.mrf.mxu0 }
 0x8ee   : > { %v12105_v49 = vpop.f32.mrf.mxu0 }
 0x8f0   : > { %v12107_v26 = vpop.f32.mrf.mxu0 }
 0x8f2   : > { %v12109_v28 = vpop.f32.mrf.mxu0 }
 0x8fa   : > { %v12111_v50 = vpop.f32.mrf.mxu0 }
 0x8fb   : > { %14724 = vst [vmem:[#allocation19_spill] sm:$0xff] %v12111_v50 }
 0x8fc   : > { %v12113_v58 = vpop.f32.mrf.mxu0 }
 0x8fd   : > { %14725 = vst [vmem:[#allocation41_spill] sm:$0xff] %v12113_v58 }
 0x8fe   : > { %v12115_v8 = vpop.f32.mrf.mxu0 }
 0x8ff   : > { %14726 = vst [vmem:[#allocation46_spill] sm:$0xff] %v12115_v8 }
 0x900   : > { %v12117_v21 = vpop.f32.mrf.mxu0 }
 0x901   : > { %14727 = vst [vmem:[#allocation15_spill] sm:$0xff] %v12117_v21 }
 0x902   : > { %v12119_v30 = vpop.f32.mrf.mxu0 }
 0x903   : > { %14728 = vst [vmem:[#allocation43_spill] sm:$0xff] %v12119_v30 }
 0x904   : > { %v12121_v12 = vpop.f32.mrf.mxu0 }
 0x905   : > { %14729 = vst [vmem:[#allocation44_spill] sm:$0xff] %v12121_v12 }
 0x906   : > { %v12123_v19 = vpop.f32.mrf.mxu0 }
 0x907   : > { %14730 = vst [vmem:[#allocation14_spill] sm:$0xff] %v12123_v19 }
 0x908   : > { %v12125_v45 = vpop.f32.mrf.mxu0 }
 0x909   : > { %14731 = vst [vmem:[#allocation12_spill] sm:$0xff] %v12125_v45 }
 0x90a   : > { %v8737_v48 = vpop.f32.mrf.mxu0 }
 0x90b   : > { %v3919_v2 = vmul.f32 0.07216878, %v8737_v48 }
 0x90c   : > { %v3854_v57 = vpop.f32.mrf.mxu0 }
 0x90d   : > { %v12128_v56 = vadd.f32 %v11808_v41, %v3919_v2  ;;  %v3917_v59 = vmul.f32 0.07216878, %v3854_v57 }
 0x90e   : > { %v8738_v60 = vpop.f32.mrf.mxu0 }
 0x90f   : > { %3953 = vmax.xlane.f32.xlu0 %v12128_v56  ;;  %v12132_v3 = vadd.f32 %v11817_v1, %v3917_v59  ;;  %v3920_v30 = vmul.f32 0.07216878, %v8738_v60 }
 0x910   : > { %v3857_v27 = vpop.f32.mrf.mxu0 }
 0x911   : > { %v3918_v12 = vmul.f32 0.07216878, %v3857_v27  ;;  %v12139_v41 = vadd.f32 %v11834_v10, %v3920_v30 }
 0x912   : > { %v8741_v8 = vpop.f32.mrf.mxu0 }
 0x913   : > { %v12135_v19 = vadd.f32 %v11825_v61, %v3918_v12  ;;  %3949 = vmax.xlane.f32.xlu0 %v12132_v3  ;;  %v3923_v2 = vmul.f32 0.07216878, %v8741_v8 }
 0x914   : > { %v3870_v48 = vpop.f32.mrf.mxu0 }
 0x915   : > { %3951 = vmax.xlane.f32.xlu1 %v12135_v19  ;;  %v12144_v59 = vadd.f32 %v11886_v39, %v3923_v2  ;;  %v3921_v60 = vmul.f32 0.07216878, %v3870_v48 }
 0x916   : > { %v8742_v57 = vpop.f32.mrf.mxu0 }
 0x917   : > { %v3924_v45 = vmul.f32 0.07216878, %v8742_v57  ;;  %3955 = vmax.xlane.f32.xlu0 %v12139_v41  ;;  %v12152_v8 = vadd.f32 %v11895_v53, %v3921_v60 }
 0x918   : > { %v3873_v1 = vpop.f32.mrf.mxu0 }
 0x919   : > { %v12147_v61 = vadd.f32 %v11844_v32, %v3924_v45  ;;  %v3922_v12 = vmul.f32 0.07216878, %v3873_v1 }
 0x91a   : > { %v8745_v27 = vpop.f32.mrf.mxu0 }
 0x91b   : > { %3961 = vmax.xlane.f32.xlu0 %v12144_v59  ;;  %3963 = vmax.xlane.f32.xlu1 %v12147_v61  ;;  %v12155_v30 = vadd.f32 %v11853_v52, %v3922_v12  ;;  %v3927_v57 = vmul.f32 0.07216878, %v8745_v27 }
 0x91c   : > { %v3886_v10 = vpop.f32.mrf.mxu0 }
 0x91d   : > { %v12160_v45 = vadd.f32 %v11904_v44, %v3927_v57  ;;  %v3925_v48 = vmul.f32 0.07216878, %v3886_v10 }
 0x91e   : > { %v8746_v39 = vpop.f32.mrf.mxu0 }
 0x91f   : > { %v3928_v2 = vmul.f32 0.07216878, %v8746_v39  ;;  %3957 = vmax.xlane.f32.xlu0 %v12152_v8  ;;  %3959 = vmax.xlane.f32.xlu1 %v12155_v30  ;;  %v12168_v52 = vadd.f32 %v11913_v14, %v3925_v48  ;;  %v12193_v48 = vpop.permute.xlu1 %4226 }
 0x920   : > { %v3889_v32 = vpop.f32.mrf.mxu0 }
 0x921   : > { %v12163_v1 = vadd.f32 %v11862_v42, %v3928_v2  ;;  %v3926_v53 = vmul.f32 0.07216878, %v3889_v32 }
 0x922   : > { %v8749_v60 = vpop.f32.mrf.mxu0 }
 0x923   : > { %3969 = vmax.xlane.f32.xlu0 %v12160_v45  ;;  %3971 = vmax.xlane.f32.xlu1 %v12163_v1  ;;  %v12171_v12 = vadd.f32 %v11871_v20, %v3926_v53  ;;  %v3931_v27 = vmul.f32 0.07216878, %v8749_v60 }
 0x924   : > { %v3902_v39 = vpop.f32.mrf.mxu0 }
 0x925   : > { %v3947_v42 = vadd.f32 %v11922_v54, %v3931_v27  ;;  %v3929_v44 = vmul.f32 0.07216878, %v3902_v39 }
 0x926   : > { %v8750_v20 = vpop.f32.mrf.mxu0 }
 0x927   : > { %3965 = vmax.xlane.f32.xlu0 %v12168_v52  ;;  %3967 = vmax.xlane.f32.xlu1 %v12171_v12  ;;  %v12177_v10 = vadd.f32 %v11931_v38, %v3929_v44  ;;  %v3932_v14 = vmul.f32 0.07216878, %v8750_v20 }
 0x928   : > { %v3905_v57 = vpop.f32.mrf.mxu0 }
 0x929   : > { %v12185_v2 = vadd.f32 %v11939_v15, %v3932_v14  ;;  %v3930_v54 = vmul.f32 0.07216878, %v3905_v57 }
 0x92b   : > { %3977 = vmax.xlane.f32.xlu0 %v3947_v42  ;;  %v12189_v38 = vadd.f32 %v11949_v4, %v3930_v54 }
 0x92f   : > { %3973 = vmax.xlane.f32.xlu0 %v12177_v10 }
 0x938   : > { %4222 = vrot.lane.b32.xlu1 %v14710_v36, %s9800_s21 }
 0x945   : > { %4224 = vrot.lane.b32.xlu0 %v14712_v62, %s9800_s21 }
 0x95c   : > { %3979 = vmax.xlane.f32.xlu1 %v12185_v2 }
 0x960   : > { %3975 = vmax.xlane.f32.xlu1 %v12189_v38 }
 0x998   : > { %v3954_v32 = vpop.xlane.xlu0 %3953 }
 0x999   : > { %v3983_v36 = vsub.f32 %v12128_v56, %v3954_v32 }
 0x99b   : > { %v4001_v62 = vmul.f32 1.442695, %v3983_v36 }
 0x99c   : > { %v3950_v53 = vpop.xlane.xlu0 %3949 }
 0x99d   : > { %9535 = vpow2.f32 %v4001_v62  ;;  %v3981_v60 = vsub.f32 %v12132_v3, %v3950_v53 }
 0x99e   : > { %v3952_v15 = vpop.xlane.xlu1 %3951 }
 0x99f   : > { %v3997_v27 = vmul.f32 1.442695, %v3981_v60  ;;  %v3982_v44 = vsub.f32 %v12135_v19, %v3952_v15 }
 0x9a0   : > { %v3956_v39 = vpop.xlane.xlu0 %3955 }
 0x9a1   : > { %9537 = vpow2.f32 %v3997_v27  ;;  %v3984_v4 = vsub.f32 %v12139_v41, %v3956_v39  ;;  %v3999_v14 = vmul.f32 1.442695, %v3982_v44 }
 0x9a3   : > { %v4003_v20 = vmul.f32 1.442695, %v3984_v4 }
 0x9a4   : > { %v3962_v19 = vpop.xlane.xlu0 %3961  ;;  %v3964_v36 = vpop.xlane.xlu1 %3963 }
 0x9a5   : > { %9539 = vpow2.f32 %v4003_v20  ;;  %v3987_v53 = vsub.f32 %v12144_v59, %v3962_v19 }
 0x9a6   : > { %9541 = vpow2.f32 %v3999_v14 }
 0x9a7   : > { %v4009_v27 = vmul.f32 1.442695, %v3987_v53 }
 0x9a8   : > { %v3958_v41 = vpop.xlane.xlu0 %3957  ;;  %v3960_v60 = vpop.xlane.xlu1 %3959 }
 0x9a9   : > { %v3986_v39 = vsub.f32 %v12155_v30, %v3960_v60  ;;  %v3985_v44 = vsub.f32 %v12152_v8, %v3958_v41  ;;  %9543 = vpow2.f32 %v4009_v27 }
 0x9aa   : > { %v12198_v56 = vpop.eup %9535 }
 0x9ab   : > { %4033 = vadd.xlane.f32.xlu0 %v12198_v56  ;;  %v4007_v20 = vmul.f32 1.442695, %v3986_v39  ;;  %v4005_v21 = vmul.f32 1.442695, %v3985_v44 }
 0x9ac   : > { %v3970_v32 = vpop.xlane.xlu0 %3969  ;;  %v3972_v4 = vpop.xlane.xlu1 %3971 }
 0x9ad   : > { %9545 = vpow2.f32 %v4007_v20  ;;  %v3991_v53 = vsub.f32 %v12160_v45, %v3970_v32 }
 0x9ae   : > { %v12201_v57 = vpop.eup %9537  ;;  %9547 = vpow2.f32 %v4005_v21  ;;  %v3992_v21 = vsub.f32 %v12163_v1, %v3972_v4 }
 0x9af   : > { %4029 = vadd.xlane.f32.xlu0 %v12201_v57 }
 0x9b0   : > { %v3966_v62 = vpop.xlane.xlu0 %3965  ;;  %v3968_v59 = vpop.xlane.xlu1 %3967  ;;  %v4019_v32 = vmul.f32 1.442695, %v3992_v21 }
 0x9b1   : > { %v3989_v8 = vsub.f32 %v12168_v52, %v3966_v62  ;;  %v3990_v62 = vsub.f32 %v12171_v12, %v3968_v59  ;;  %v4276_v59 = vsel %vm1875_vm2, %v12066_v17, 0 }
 0x9b2   : > { %v12204_v3 = vpop.eup %9539 }
 0x9b3   : > { %4035 = vadd.xlane.f32.xlu1 %v12204_v3  ;;  %v12207_v54 = vpop.eup %9541 }
 0x9b4   : > { %v3978_v15 = vpop.xlane.xlu0 %3977  ;;  %v12221_v41 = vpop.permute.xlu1 %4222 }
 0x9b5   : > { %v3995_v14 = vsub.f32 %v3947_v42, %v3978_v15  ;;  %v4017_v42 = vmul.f32 1.442695, %v3991_v53  ;;  %v4267_v17 = vsel %vm1875_vm2, %v12221_v41, 0 }
 0x9b7   : > { %4031 = vadd.xlane.f32.xlu1 %v12207_v54 }
 0x9b8   : > { %v3974_v50 = vpop.xlane.xlu0 %3973 }
 0x9b9   : > { %v3993_v58 = vsub.f32 %v12177_v10, %v3974_v50 }
 0x9bb   : > { %v4021_v30 = vmul.f32 1.442695, %v3993_v58 }
 0x9c5   : > { %4220 = vrot.lane.b32.xlu0 %v14713_v11, %s9800_s21  ;;  %v3988_v11 = vsub.f32 %v12147_v61, %v3964_v36  ;;  %v12223_v61 = vpop.eup %9543  ;;  %v4013_v36 = vmul.f32 1.442695, %v3989_v8 }
 0x9c6   : > { %v12228_v10 = vpop.eup %9545 }
 0x9c7   : > { %v4011_v19 = vmul.f32 1.442695, %v3988_v11  ;;  %v12231_v52 = vpop.eup %9547 }
 0x9c8   : > { %4218 = vrot.lane.b32.xlu1 %v14714_v16, %s9800_s21  ;;  %v4025_v16 = vmul.f32 1.442695, %v3995_v14 }
 0x9ca   : > { %9549 = vpow2.f32 %v4025_v16 }
 0x9cb   : > { %9551 = vpow2.f32 %v4011_v19 }
 0x9cc   : > { %9553 = vpow2.f32 %v4021_v30 }
 0x9cd   : > { %9555 = vpow2.f32 %v4017_v42 }
 0x9ce   : > { %9557 = vpow2.f32 %v4013_v36 }
 0x9d7   : > { %v12234_v60 = vpop.eup %9549 }
 0x9d8   : > { %v12238_v1 = vpop.eup %9551 }
 0x9d9   : > { %v12241_v39 = vpop.eup %9553 }
 0x9da   : > { %v12245_v44 = vpop.eup %9555 }
 0x9db   : > { %v12248_v4 = vpop.eup %9557 }
 0x9e4   : > { %4041 = vadd.xlane.f32.xlu0 %v12223_v61 }
 0x9e5   : > { %v3980_v50 = vpop.xlane.xlu1 %3979 }
 0x9e6   : > { %v3996_v45 = vsub.f32 %v12185_v2, %v3980_v50  ;;  %v4015_v2 = vmul.f32 1.442695, %v3990_v62 }
 0x9e8   : > { %v4027_v58 = vmul.f32 1.442695, %v3996_v45  ;;  %4039 = vadd.xlane.f32.xlu0 %v12228_v10 }
 0x9e9   : > { %v3976_v15 = vpop.xlane.xlu1 %3975 }
 0x9ea   : > { %9559 = vpow2.f32 %v4027_v58  ;;  %v3994_v27 = vsub.f32 %v12189_v38, %v3976_v15 }
 0x9eb   : > { %9561 = vpow2.f32 %v4019_v32 }
 0x9ec   : > { %4037 = vadd.xlane.f32.xlu1 %v12231_v52  ;;  %4057 = vadd.xlane.f32.xlu0 %v12234_v60  ;;  %9563 = vpow2.f32 %v4015_v2  ;;  %v4023_v12 = vmul.f32 1.442695, %v3994_v27 }
 0x9ee   : > { %9565 = vpow2.f32 %v4023_v12 }
 0x9f0   : > { %4043 = vadd.xlane.f32.xlu1 %v12238_v1  ;;  %4053 = vadd.xlane.f32.xlu0 %v12241_v39 }
 0x9f4   : > { %4049 = vadd.xlane.f32.xlu1 %v12245_v44 }
 0x9f7   : > { %v12250_v20 = vpop.eup %9559 }
 0x9f8   : > { %4045 = vadd.xlane.f32.xlu1 %v12248_v4  ;;  %4059 = vadd.xlane.f32.xlu0 %v12250_v20  ;;  %v12254_v38 = vpop.eup %9561 }
 0x9f9   : > { %v12257_v14 = vpop.eup %9563 }
 0x9fb   : > { %v12260_v11 = vpop.eup %9565 }
 0x9fc   : > { %4051 = vadd.xlane.f32.xlu1 %v12254_v38 }
 0xa00   : > { %4047 = vadd.xlane.f32.xlu1 %v12257_v14 }
 0xa04   : > { %4055 = vadd.xlane.f32.xlu1 %v12260_v11 }
 0xa0e   : > { %4216 = vrot.lane.b32.xlu0 %v14715_v47, %s9800_s21 }
 0xa12   : > { %4198 = vrot.lane.b32.xlu0 %v14716_v55, %s9802_s13 }
 0xa15   : > { %4214 = vrot.lane.b32.xlu1 %v14625_v34, %s9800_s21  ;;  %v4225_v34 = vpop.permute.xlu0 %4224 }
 0xa16   : > { %4202 = vrot.lane.b32.xlu0 %v14718_v13, %s9802_s13 }
 0xa19   : > { %4200 = vrot.lane.b32.xlu1 %v14717_v6, %s9802_s13 }
 0xa1a   : > { %4206 = vrot.lane.b32.xlu0 %v14720_v7, %s9802_s13 }
 0xa1d   : > { %4204 = vrot.lane.b32.xlu1 %v14719_v63, %s9802_s13 }
 0xa1e   : > { %4210 = vrot.lane.b32.xlu0 %v14722_v29, %s9802_s13 }
 0xa21   : > { %4208 = vrot.lane.b32.xlu1 %v14721_v5, %s9802_s13 }
 0xa22   : > { %4581 = vrot.lane.b32.xlu0 %v14646_v25, %s9802_s13 }
 0xa25   : > { %4212 = vrot.lane.b32.xlu1 %v14723_v40, %s9802_s13 }
 0xa26   : > { %4577 = vrot.lane.b32.xlu0 %v14655_v35, %s9802_s13 }
 0xa29   : > { %4579 = vrot.lane.b32.xlu1 %v14654_v24, %s9802_s13 }
 0xa2a   : > { %4575 = vrot.lane.b32.xlu0 %v14656_v43, %s9802_s13 }
 0xa34   : > { %v4034_v47 = vpop.xlane.xlu0 %4033 }
 0xa38   : > { %v4030_v55 = vpop.xlane.xlu0 %4029 }
 0xa3c   : > { %v4036_v6 = vpop.xlane.xlu1 %4035 }
 0xa3d   : > { %9567 = vrcp.f32 %v4036_v6 }
 0xa3e   : > { %9569 = vrcp.f32 %v4030_v55 }
 0xa3f   : > { %9571 = vrcp.f32 %v4034_v47 }
 0xa40   : > { %v4032_v25 = vpop.xlane.xlu1 %4031 }
 0xa41   : > { %9573 = vrcp.f32 %v4032_v25 }
 0xa44   : > { %v4219_v19 = vpop.permute.xlu1 %4218 }
 0xa4a   : > { %v9568_v13 = vpop.eup %9567 }
 0xa4b   : > { %v9570_v63 = vpop.eup %9569  ;;  %v4080_v35 = vmul.f32 %v9568_v13, %v12204_v3  ;;  %v4273_v3 = vsel %vm1875_vm2, %v12193_v48, 0 }
 0xa4c   : > { %v9572_v7 = vpop.eup %9571  ;;  %v4077_v24 = vmul.f32 %v9570_v63, %v12201_v57  ;;  %v4270_v57 = vsel %vm1875_vm2, %v4225_v34, 0 }
 0xa4d   : > { %v4079_v43 = vmul.f32 %v9572_v7, %v12198_v56  ;;  %v4221_v56 = vpop.permute.xlu0 %4220 }
 0xa4e   : > { %v9574_v5 = vpop.eup %9573 }
 0xa4f   : > { %v4078_v29 = vmul.f32 %v9574_v5, %v12207_v54  ;;  %v4094_v16 = vpack.c.bf16 %v4080_v35, %v4079_v43 }
 0xa51   : > { %v4093_v40 = vpack.c.bf16 %v4078_v29, %v4077_v24 }
 0xa53   : > { %8767 = vmatprep.mubr.bf16.mxu1 %v4093_v40 }
 0xa54   : > { %8768 = vmatmul.mubr.bf16.vlgmr.msra.gmra.mxu1 %v4094_v16 }
 0xa55   : > { %8784 = vmatpush3.bf16.xpose.msra.mxu1 %v4276_v59 }
 0xa56   : > { %8888 = vmatprep.subr.msk.bf16.mxu1 %vm1875_vm2, %v12193_v48  ;;  %v4264_v48 = vsel %vm1875_vm2, %v4221_v56, 0 }
 0xa5d   : > { %8786 = vmatpush3.bf16.xpose.msra.mxu1 %v4273_v3 }
 0xa5e   : > { %8889 = vmatprep.subr.msk.bf16.mxu1 %vm1875_vm2, %v4225_v34 }
 0xa65   : > { %8788 = vmatpush3.bf16.xpose.msra.mxu1 %v4270_v57 }
 0xa66   : > { %8890 = vmatprep.subr.msk.bf16.mxu1 %vm1875_vm2, %v12221_v41  ;;  %v4261_v41 = vsel %vm1875_vm2, %v4219_v19, 0 }
 0xa6d   : > { %8790 = vmatpush3.bf16.xpose.msra.mxu1 %v4267_v17  ;;  %v4042_v54 = vpop.xlane.xlu0 %4041 }
 0xa6e   : > { %8891 = vmatprep.subr.msk.bf16.mxu1 %vm1875_vm2, %v4221_v56 }
 0xa71   : > { %v4040_v53 = vpop.xlane.xlu0 %4039 }
 0xa72   : > { %9575 = vrcp.f32 %v4040_v53 }
 0xa75   : > { %8792 = vmatpush3.bf16.xpose.msra.mxu1 %v4264_v48  ;;  %v4038_v30 = vpop.xlane.xlu1 %4037  ;;  %v4058_v8 = vpop.xlane.xlu0 %4057 }
 0xa76   : > { %8892 = vmatprep.subr.msk.bf16.mxu1 %vm1875_vm2, %v4219_v19  ;;  %9577 = vrcp.f32 %v4038_v30 }
 0xa77   : > { %9579 = vrcp.f32 %v4042_v54 }
 0xa79   : > { %v4044_v42 = vpop.xlane.xlu1 %4043  ;;  %v4054_v36 = vpop.xlane.xlu0 %4053 }
 0xa7a   : > { %9581 = vrcp.f32 %v4044_v42 }
 0xa7d   : > { %8794 = vmatpush3.bf16.xpose.msra.mxu1 %v4261_v41  ;;  %v4050_v50 = vpop.xlane.xlu1 %4049 }
 0xa7f   : > { %v9576_v58 = vpop.eup %9575 }
 0xa80   : > { %v4082_v27 = vmul.f32 %v9576_v58, %v12228_v10 }
 0xa81   : > { %v4060_v21 = vpop.xlane.xlu0 %4059  ;;  %v4046_v45 = vpop.xlane.xlu1 %4045 }
 0xa83   : > { %v9578_v32 = vpop.eup %9577 }
 0xa84   : > { %v4081_v2 = vmul.f32 %v9578_v32, %v12231_v52  ;;  %v9580_v12 = vpop.eup %9579 }
 0xa85   : > { %v4217_v62 = vpop.permute.xlu0 %4216  ;;  %v4052_v15 = vpop.xlane.xlu1 %4051  ;;  %v4083_v13 = vmul.f32 %v9580_v12, %v12223_v61 }
 0xa86   : > { %8893 = vmatprep.subr.msk.bf16.mxu1 %vm1875_vm2, %v4217_v62  ;;  %v4258_v34 = vsel %vm1875_vm2, %v4217_v62, 0  ;;  %9583 = vrcp.f32 %v4052_v15  ;;  %v4095_v47 = vpack.c.bf16 %v4082_v27, %v4081_v2 }
 0xa87   : > { %8796 = vmatpush3.bf16.xpose.msra.mxu1 %v4258_v34  ;;  %v9582_v55 = vpop.eup %9581  ;;  %9585 = vrcp.f32 %v4046_v45 }
 0xa88   : > { %9587 = vrcp.f32 %v4050_v50  ;;  %8771 = vmatprep.mubr.bf16.mxu1 %v4095_v47  ;;  %v4084_v52 = vmul.f32 %v9582_v55, %v12238_v1 }
 0xa89   : > { %v4199_v6 = vpop.permute.xlu0 %4198  ;;  %v4048_v25 = vpop.xlane.xlu1 %4047 }
 0xa8a   : > { %9589 = vrcp.f32 %v4048_v25  ;;  %v4096_v10 = vpack.c.bf16 %v4084_v52, %v4083_v13 }
 0xa8b   : > { %9591 = vrcp.f32 %v4054_v36 }
 0xa8c   : > { %8772 = vmatmul.mubr.bf16.gmra.mxu1 %v4096_v10 }
 0xa8d   : > { %v4203_v63 = vpop.permute.xlu0 %4202  ;;  %v4056_v7 = vpop.xlane.xlu1 %4055 }
 0xa8e   : > { %9593 = vrcp.f32 %v4056_v7 }
 0xa8f   : > { %9595 = vrcp.f32 %v4060_v21 }
 0xa90   : > { %9597 = vrcp.f32 %v4058_v8 }
 0xa91   : > { %v4207_v5 = vpop.permute.xlu0 %4206  ;;  %v4215_v35 = vpop.permute.xlu1 %4214 }
 0xa92   : > { %8894 = vmatprep.subr.msk.bf16.mxu1 %vm1875_vm2, %v4215_v35  ;;  %v4255_v24 = vsel %vm1875_vm2, %v4215_v35, 0 }
 0xa93   : > { %8798 = vmatpush3.bf16.xpose.msra.mxu1 %v4255_v24  ;;  %v9584_v29 = vpop.eup %9583 }
 0xa94   : > { %v9586_v61 = vpop.eup %9585  ;;  %v4088_v59 = vmul.f32 %v9584_v29, %v12254_v38 }
 0xa95   : > { %v4211_v43 = vpop.permute.xlu0 %4210  ;;  %v4201_v1 = vpop.permute.xlu1 %4200  ;;  %v4085_v3 = vmul.f32 %v9586_v61, %v12248_v4 }
 0xa96   : > { %v9588_v40 = vpop.eup %9587 }
 0xa97   : > { %v9590_v16 = vpop.eup %9589  ;;  %v4087_v19 = vmul.f32 %v9588_v40, %v12245_v44 }
 0xa98   : > { %v4086_v57 = vmul.f32 %v9590_v16, %v12257_v14  ;;  %v9592_v56 = vpop.eup %9591 }
 0xa99   : > { %v4582_v17 = vpop.permute.xlu0 %4581  ;;  %v4205_v54 = vpop.permute.xlu1 %4204  ;;  %v4098_v30 = vpack.c.bf16 %v4088_v59, %v4087_v19  ;;  %v4089_v42 = vmul.f32 %v9592_v56, %v12241_v39 }
 0xa9a   : > { %8815 = vmatprep.subr.bf16.mxu0 %v4582_v17  ;;  %v4097_v53 = vpack.c.bf16 %v4086_v57, %v4085_v3  ;;  %v9713_v3 = vld [vmem:[%s14400_s1 + $0x8] sm:$0xff] }
 0xa9b   : > { %v9594_v48 = vpop.eup %9593  ;;  %8816 = vmatpush3.bf16.msra.mxu0 %v4582_v17  ;;  %v9714_v17 = vld [vmem:[%s14400_s1 + $0x18] sm:$0xff] }
 0xa9c   : > { %v9596_v8 = vpop.eup %9595  ;;  %8775 = vmatprep.mubr.bf16.mxu1 %v4097_v53  ;;  %v4090_v38 = vmul.f32 %v9594_v48, %v12260_v11 }
 0xa9d   : > { %8776 = vmatmul.mubr.bf16.gmra.mxu1 %v4098_v30  ;;  %v4209_v4 = vpop.permute.xlu1 %4208  ;;  %v9598_v41 = vpop.eup %9597  ;;  %v4092_v36 = vmul.f32 %v9596_v8, %v12250_v20  ;;  %v9715_v8 = vld [vmem:[%s14400_s1 + $0x30] sm:$0xff] }
 0xa9e   : > { %v4099_v14 = vpack.c.bf16 %v4090_v38, %v4089_v42  ;;  %v4091_v44 = vmul.f32 %v9598_v41, %v12234_v60  ;;  %v4578_v45 = vpop.permute.xlu0 %4577 }
 0xaa0   : > { %8779 = vmatprep.mubr.bf16.mxu1 %v4099_v14  ;;  %v4100_v21 = vpack.c.bf16 %v4092_v36, %v4091_v44  ;;  %v9717_v44 = vld [vmem:[%s14400_s1 + $0x20] sm:$0xff] }
 0xaa1   : > { %v4213_v50 = vpop.permute.xlu1 %4212 }
 0xaa2   : > { %v4576_v39 = vpop.permute.xlu0 %4575 }
 0xaa5   : > { %8780 = vmatmul.mubr.bf16.gmra.mxu1 %v4100_v21  ;;  %v4580_v58 = vpop.permute.xlu1 %4579 }
 0xaa6   : > { %8799 = vmatprep.mubr.msk.bf16.mxu1 %vm1875_vm2, %v4199_v6  ;;  %8817 = vmatprep.subr.bf16.mxu0 %v4580_v58 }
 0xaa7   : > { %8818 = vmatpush3.bf16.msra.mxu0 %v4580_v58 }
 0xaa8   : > { %8819 = vmatprep.subr.bf16.mxu0 %v4578_v45 }
 0xaab   : > { %8820 = vmatpush3.bf16.msra.mxu0 %v4578_v45  ;;  %v9718_v45 = vld [vmem:[%s14400_s1 + $0x28] sm:$0xff] }
 0xaac   : > { %8821 = vmatprep.subr.bf16.mxu0 %v4576_v39 }
 0xaad   : > { %8800 = vmatmul.mubr.msk.bf16.vlgmr.msra.gmra.mxu1 %vm1875_vm2, %v4201_v1 }
 0xaae   : > { %8803 = vmatprep.mubr.msk.bf16.mxu1 %vm1875_vm2, %v4203_v63 }
 0xaaf   : > { %8822 = vmatpush3.bf16.msra.mxu0 %v4576_v39 }
 0xab5   : > { %8804 = vmatmul.mubr.msk.bf16.gmra.mxu1 %vm1875_vm2, %v4205_v54 }
 0xab6   : > { %8807 = vmatprep.mubr.msk.bf16.mxu1 %vm1875_vm2, %v4207_v5  ;;  %v9711_v5 = vld [vmem:[%s14400_s1 + $0x10] sm:$0xff] }
 0xabd   : > { %8808 = vmatmul.mubr.msk.bf16.gmra.mxu1 %vm1875_vm2, %v4209_v4  ;;  %v9716_v4 = vld [vmem:[%s14400_s1 + $0x38] sm:$0xff] }
 0xabe   : > { %8811 = vmatprep.mubr.msk.bf16.mxu1 %vm1875_vm2, %v4211_v43  ;;  %v9712_v43 = vld [vmem:[%s14400_s1] sm:$0xff] }
 0xac5   : > { %8812 = vmatmul.mubr.msk.bf16.gmra.mxu1 %vm1875_vm2, %v4213_v50 }
 0xb14   : > { %v12335_v60 = vpop.f32.mrf.mxu1 }
 0xb16   : > { %v12337_v20 = vpop.f32.mrf.mxu1 }
 0xb18   : > { %v12339_v11 = vpop.f32.mrf.mxu1 }
 0xb1a   : > { %v12341_v32 = vpop.f32.mrf.mxu1 }
 0xb4c   : > { %v12343_v62 = vpop.f32.mrf.mxu1 }
 0xb4e   : > { %v12345_v15 = vpop.f32.mrf.mxu1 }
 0xb50   : > { %v12347_v2 = vpop.f32.mrf.mxu1 }
 0xb52   : > { %v12349_v27 = vpop.f32.mrf.mxu1 }
 0xb5d   : > { %v12351_v12 = vpop.f32.mrf.mxu1 }
 0xb5f   : > { %v12353_v34 = vpop.f32.mrf.mxu1 }
 0xb61   : > { %v12355_v47 = vpop.f32.mrf.mxu1 }
 0xb63   : > { %v12357_v55 = vpop.f32.mrf.mxu1 }
 0xb65   : > { %v12359_v6 = vpop.f32.mrf.mxu1 }
 0xb67   : > { %v12361_v25 = vpop.f32.mrf.mxu1 }
 0xb69   : > { %v12363_v13 = vpop.f32.mrf.mxu1 }
 0xb6b   : > { %v12365_v52 = vpop.f32.mrf.mxu1 }
 0xb6d   : > { %v8801_v10 = vpop.f32.mrf.mxu1 }
 0xb6e   : > { %v4377_v63 = vmul.f32 0.07216878, %v8801_v10 }
 0xb6f   : > { %v4312_v7 = vpop.f32.mrf.mxu1 }
 0xb70   : > { %v12370_v35 = vadd.f32 %v9711_v5, %v4377_v63  ;;  %v4375_v24 = vmul.f32 0.07216878, %v4312_v7  ;;  %v9719_v5 = vld [vmem:[%s14400_s1 + $0x50] sm:$0xff] }
 0xb71   : > { %v8802_v29 = vpop.f32.mrf.mxu1 }
 0xb72   : > { %4411 = vmax.xlane.f32.xlu0 %v12370_v35  ;;  %v12376_v1 = vadd.f32 %v9712_v43, %v4375_v24  ;;  %v4378_v40 = vmul.f32 0.07216878, %v8802_v29 }
 0xb73   : > { %v4315_v61 = vpop.f32.mrf.mxu1 }
 0xb74   : > { %v4376_v16 = vmul.f32 0.07216878, %v4315_v61  ;;  %v12387_v54 = vadd.f32 %v9714_v17, %v4378_v40  ;;  %v9720_v61 = vld [vmem:[%s14400_s1 + $0x58] sm:$0xff] }
 0xb75   : > { %v8805_v59 = vpop.f32.mrf.mxu1 }
 0xb76   : > { %v12381_v57 = vadd.f32 %v9713_v3, %v4376_v16  ;;  %4407 = vmax.xlane.f32.xlu0 %v12376_v1  ;;  %v4381_v19 = vmul.f32 0.07216878, %v8805_v59  ;;  %v9721_v59 = vld [vmem:[%s14400_s1 + $0x40] sm:$0xff] }
 0xb77   : > { %v4328_v56 = vpop.f32.mrf.mxu1 }
 0xb78   : > { %4409 = vmax.xlane.f32.xlu1 %v12381_v57  ;;  %v12394_v42 = vadd.f32 %v9715_v8, %v4381_v19  ;;  %v4379_v38 = vmul.f32 0.07216878, %v4328_v56  ;;  %v9722_v56 = vld [vmem:[%s14400_s1 + $0x48] sm:$0xff] }
 0xb79   : > { %v8806_v53 = vpop.f32.mrf.mxu1 }
 0xb7a   : > { %v4382_v48 = vmul.f32 0.07216878, %v8806_v53  ;;  %4413 = vmax.xlane.f32.xlu0 %v12387_v54  ;;  %v12406_v21 = vadd.f32 %v9717_v44, %v4379_v38  ;;  %v9724_v38 = vld [vmem:[%s14400_s1 + $0x60] sm:$0xff]  ;;  %v9725_v44 = vld [vmem:[%s14400_s1 + $0x78] sm:$0xff] }
 0xb7b   : > { %v4331_v30 = vpop.f32.mrf.mxu1 }
 0xb7c   : > { %v12399_v41 = vadd.f32 %v9716_v4, %v4382_v48  ;;  %v4380_v14 = vmul.f32 0.07216878, %v4331_v30  ;;  %v9723_v48 = vld [vmem:[%s14400_s1 + $0x70] sm:$0xff] }
 0xb7d   : > { %v8809_v36 = vpop.f32.mrf.mxu1 }
 0xb7e   : > { %4419 = vmax.xlane.f32.xlu0 %v12394_v42  ;;  %4421 = vmax.xlane.f32.xlu1 %v12399_v41  ;;  %v12411_v58 = vadd.f32 %v9718_v45, %v4380_v14  ;;  %v4385_v39 = vmul.f32 0.07216878, %v8809_v36 }
 0xb7f   : > { %v4344_v50 = vpop.f32.mrf.mxu1 }
 0xb80   : > { %v12418_v24 = vadd.f32 %v9719_v5, %v4385_v39  ;;  %v4383_v29 = vmul.f32 0.07216878, %v4344_v50 }
 0xb81   : > { %v8810_v10 = vpop.f32.mrf.mxu1 }
 0xb82   : > { %v4386_v63 = vmul.f32 0.07216878, %v8810_v10  ;;  %4415 = vmax.xlane.f32.xlu0 %v12406_v21  ;;  %4417 = vmax.xlane.f32.xlu1 %v12411_v58  ;;  %v12430_v3 = vadd.f32 %v9721_v59, %v4383_v29  ;;  %v9726_v10 = vld [vmem:[%s14400_s1 + $0x68] sm:$0xff] }
 0xb83   : > { %v4347_v7 = vpop.f32.mrf.mxu1 }
 0xb84   : > { %v12423_v43 = vadd.f32 %v9720_v61, %v4386_v63  ;;  %v4384_v40 = vmul.f32 0.07216878, %v4347_v7 }
 0xb85   : > { %v8813_v16 = vpop.f32.mrf.mxu1 }
 0xb86   : > { %4427 = vmax.xlane.f32.xlu0 %v12418_v24  ;;  %4429 = vmax.xlane.f32.xlu1 %v12423_v43  ;;  %v12435_v17 = vadd.f32 %v9722_v56, %v4384_v40  ;;  %v4389_v19 = vmul.f32 0.07216878, %v8813_v16 }
 0xb87   : > { %v4360_v53 = vpop.f32.mrf.mxu1 }
 0xb88   : > { %v12442_v30 = vadd.f32 %v9723_v48, %v4389_v19  ;;  %v4387_v8 = vmul.f32 0.07216878, %v4360_v53 }
 0xb89   : > { %v8814_v14 = vpop.f32.mrf.mxu1 }
 0xb8a   : > { %4423 = vmax.xlane.f32.xlu0 %v12430_v3  ;;  %4425 = vmax.xlane.f32.xlu1 %v12435_v17  ;;  %v12448_v4 = vadd.f32 %v9724_v38, %v4387_v8  ;;  %v4390_v36 = vmul.f32 0.07216878, %v8814_v14 }
 0xb8b   : > { %v4363_v50 = vpop.f32.mrf.mxu1 }
 0xb8c   : > { %v12458_v45 = vadd.f32 %v9725_v44, %v4390_v36  ;;  %v4388_v39 = vmul.f32 0.07216878, %v4363_v50 }
 0xb8e   : > { %4435 = vmax.xlane.f32.xlu0 %v12442_v30 }
 0xb92   : > { %4431 = vmax.xlane.f32.xlu0 %v12448_v4 }
 0xb9b   : > { %4571 = vrot.lane.b32.xlu1 %v14658_v0, %s9802_s13  ;;  %v12464_v0 = vadd.f32 %v9726_v10, %v4388_v39 }
 0xba8   : > { %4573 = vrot.lane.b32.xlu0 %v14657_v18, %s9802_s13 }
 0xbbf   : > { %4437 = vmax.xlane.f32.xlu1 %v12458_v45 }
 0xbc3   : > { %4433 = vmax.xlane.f32.xlu1 %v12464_v0 }
 0xbfb   : > { %v4412_v18 = vpop.xlane.xlu0 %4411 }
 0xbfc   : > { %v4441_v63 = vsub.f32 %v12370_v35, %v4412_v18 }
 0xbfe   : > { %v4459_v7 = vmul.f32 1.442695, %v4441_v63 }
 0xbff   : > { %v4408_v5 = vpop.xlane.xlu0 %4407 }
 0xc00   : > { %9599 = vpow2.f32 %v4459_v7  ;;  %v4439_v29 = vsub.f32 %v12376_v1, %v4408_v5 }
 0xc01   : > { %v4410_v61 = vpop.xlane.xlu1 %4409 }
 0xc02   : > { %v4455_v40 = vmul.f32 1.442695, %v4439_v29  ;;  %v4440_v16 = vsub.f32 %v12381_v57, %v4410_v61 }
 0xc03   : > { %v4414_v59 = vpop.xlane.xlu0 %4413 }
 0xc04   : > { %9601 = vpow2.f32 %v4455_v40  ;;  %v4442_v56 = vsub.f32 %v12387_v54, %v4414_v59  ;;  %v4457_v53 = vmul.f32 1.442695, %v4440_v16 }
 0xc06   : > { %v4461_v19 = vmul.f32 1.442695, %v4442_v56 }
 0xc07   : > { %v4420_v48 = vpop.xlane.xlu0 %4419  ;;  %v4422_v8 = vpop.xlane.xlu1 %4421 }
 0xc08   : > { %9603 = vpow2.f32 %v4461_v19  ;;  %v4445_v35 = vsub.f32 %v12394_v42, %v4420_v48  ;;  %v4446_v38 = vsub.f32 %v12399_v41, %v4422_v8 }
 0xc09   : > { %9605 = vpow2.f32 %v4457_v53 }
 0xc0a   : > { %v4467_v14 = vmul.f32 1.442695, %v4445_v35  ;;  %v4469_v1 = vmul.f32 1.442695, %v4446_v38 }
 0xc0b   : > { %v4416_v36 = vpop.xlane.xlu0 %4415  ;;  %v4418_v50 = vpop.xlane.xlu1 %4417 }
 0xc0c   : > { %9607 = vpow2.f32 %v4467_v14  ;;  %v4443_v57 = vsub.f32 %v12406_v21, %v4416_v36  ;;  %v4444_v44 = vsub.f32 %v12411_v58, %v4418_v50 }
 0xc0d   : > { %v12475_v54 = vpop.eup %9599  ;;  %9609 = vpow2.f32 %v4469_v1 }
 0xc0e   : > { %v4463_v39 = vmul.f32 1.442695, %v4443_v57  ;;  %4491 = vadd.xlane.f32.xlu1 %v12475_v54  ;;  %v4465_v42 = vmul.f32 1.442695, %v4444_v44 }
 0xc0f   : > { %v4428_v10 = vpop.xlane.xlu0 %4427  ;;  %v4430_v21 = vpop.xlane.xlu1 %4429 }
 0xc10   : > { %9611 = vpow2.f32 %v4463_v39  ;;  %v4450_v48 = vsub.f32 %v12423_v43, %v4430_v21  ;;  %v4449_v14 = vsub.f32 %v12418_v24, %v4428_v10 }
 0xc11   : > { %v12478_v41 = vpop.eup %9601  ;;  %9613 = vpow2.f32 %v4465_v42 }
 0xc12   : > { %4487 = vadd.xlane.f32.xlu1 %v12478_v41  ;;  %v4477_v38 = vmul.f32 1.442695, %v4450_v48  ;;  %v14741_v48 = vld [vmem:[#allocation57_spill] sm:$0xff] }
 0xc13   : > { %v4424_v18 = vpop.xlane.xlu0 %4423  ;;  %v4426_v29 = vpop.xlane.xlu1 %4425 }
 0xc14   : > { %v4447_v53 = vsub.f32 %v12430_v3, %v4424_v18  ;;  %v4448_v35 = vsub.f32 %v12435_v17, %v4426_v29  ;;  %v14733_v29 = vld [vmem:[#allocation13_spill] sm:$0xff] }
 0xc15   : > { %v12481_v63 = vpop.eup %9603 }
 0xc16   : > { %4493 = vadd.xlane.f32.xlu1 %v12481_v63  ;;  %v12484_v7 = vpop.eup %9605  ;;  %v4471_v8 = vmul.f32 1.442695, %v4447_v53  ;;  %v4473_v1 = vmul.f32 1.442695, %v4448_v35  ;;  %v14738_v53 = vld [vmem:[#allocation36_spill] sm:$0xff] }
 0xc17   : > { %v4436_v58 = vpop.xlane.xlu0 %4435  ;;  %v4572_v19 = vpop.permute.xlu1 %4571 }
 0xc18   : > { %9615 = vpow2.f32 %v4471_v8  ;;  %v14742_v8 = vld [vmem:[#allocation55_spill] sm:$0xff] }
 0xc19   : > { %v12486_v5 = vpop.eup %9607  ;;  %9617 = vpow2.f32 %v4477_v38  ;;  %v14744_v38 = vld [vmem:[#allocation37_spill] sm:$0xff] }
 0xc1a   : > { %4499 = vadd.xlane.f32.xlu0 %v12486_v5  ;;  %4489 = vadd.xlane.f32.xlu1 %v12484_v7  ;;  %v12490_v40 = vpop.eup %9609  ;;  %9619 = vpow2.f32 %v4473_v1 }
 0xc1b   : > { %v4432_v61 = vpop.xlane.xlu0 %4431 }
 0xc1c   : > { %v4451_v36 = vsub.f32 %v12448_v4, %v4432_v61  ;;  %v14734_v61 = vld [vmem:[#allocation61_spill] sm:$0xff] }
 0xc1d   : > { %v12492_v16 = vpop.eup %9611 }
 0xc1e   : > { %4495 = vadd.xlane.f32.xlu1 %v12492_v16  ;;  %4501 = vadd.xlane.f32.xlu0 %v12490_v40  ;;  %v12496_v56 = vpop.eup %9613  ;;  %v4479_v57 = vmul.f32 1.442695, %v4451_v36  ;;  %v14746_v36 = vld [vmem:[#allocation69_spill] sm:$0xff] }
 0xc1f   : > { %v4574_v59 = vpop.permute.xlu0 %4573 }
 0xc20   : > { %8823 = vmatprep.subr.bf16.mxu0 %v4574_v59 }
 0xc21   : > { %8824 = vmatpush3.bf16.msra.mxu0 %v4574_v59  ;;  %v14735_v59 = vld [vmem:[#allocation42_spill] sm:$0xff] }
 0xc22   : > { %4497 = vadd.xlane.f32.xlu0 %v12496_v56  ;;  %8825 = vmatprep.subr.bf16.mxu0 %v4572_v19 }
 0xc25   : > { %8826 = vmatpush3.bf16.msra.mxu0 %v4572_v19  ;;  %v12511_v10 = vpop.eup %9615  ;;  %v14737_v19 = vld [vmem:[#allocation66_spill] sm:$0xff] }
 0xc26   : > { %v12514_v4 = vpop.eup %9617 }
 0xc2f   : > { %4567 = vrot.lane.b32.xlu1 %v14661_v51, %s9802_s13  ;;  %v4475_v51 = vmul.f32 1.442695, %v4449_v14  ;;  %v14745_v14 = vld [vmem:[#allocation54_spill] sm:$0xff] }
 0xc31   : > { %9621 = vpow2.f32 %v4475_v51 }
 0xc32   : > { %9623 = vpow2.f32 %v4479_v57  ;;  %v14748_v57 = vld [vmem:[#allocation63_spill] sm:$0xff] }
 0xc38   : > { %4569 = vrot.lane.b32.xlu0 %v14659_v23, %s9802_s13  ;;  %v4453_v23 = vsub.f32 %v12442_v30, %v4436_v58  ;;  %v12516_v30 = vpop.eup %9619  ;;  %v14732_v58 = vld [vmem:[#allocation53_spill] sm:$0xff] }
 0xc3a   : > { %v4483_v39 = vmul.f32 1.442695, %v4453_v23 }
 0xc48   : > { %v4438_v50 = vpop.xlane.xlu1 %4437 }
 0xc49   : > { %v4454_v43 = vsub.f32 %v12458_v45, %v4438_v50  ;;  %v12520_v45 = vpop.eup %9621  ;;  %v14747_v50 = vld [vmem:[#allocation50_spill] sm:$0xff] }
 0xc4b   : > { %v4485_v24 = vmul.f32 1.442695, %v4454_v43  ;;  %v14750_v43 = vld [vmem:[#allocation32_spill] sm:$0xff] }
 0xc4c   : > { %v4434_v3 = vpop.xlane.xlu1 %4433 }
 0xc4d   : > { %v4452_v17 = vsub.f32 %v12464_v0, %v4434_v3  ;;  %v12523_v0 = vpop.eup %9623 }
 0xc4f   : > { %v4481_v44 = vmul.f32 1.442695, %v4452_v17 }
 0xc51   : > { %9625 = vpow2.f32 %v4481_v44 }
 0xc52   : > { %9627 = vpow2.f32 %v4483_v39 }
 0xc53   : > { %4503 = vadd.xlane.f32.xlu1 %v12511_v10  ;;  %9629 = vpow2.f32 %v4485_v24  ;;  %v14752_v24 = vld [vmem:[#allocation15_spill] sm:$0xff] }
 0xc57   : > { %4509 = vadd.xlane.f32.xlu1 %v12514_v4  ;;  %4505 = vadd.xlane.f32.xlu0 %v12516_v30 }
 0xc5b   : > { %4507 = vadd.xlane.f32.xlu0 %v12520_v45 }
 0xc5e   : > { %v12525_v42 = vpop.eup %9625 }
 0xc5f   : > { %4511 = vadd.xlane.f32.xlu0 %v12523_v0  ;;  %4513 = vadd.xlane.f32.xlu1 %v12525_v42  ;;  %v12529_v18 = vpop.eup %9627 }
 0xc60   : > { %v12531_v21 = vpop.eup %9629 }
 0xc63   : > { %4515 = vadd.xlane.f32.xlu0 %v12529_v18  ;;  %4517 = vadd.xlane.f32.xlu1 %v12531_v21 }
 0xc74   : > { %4706 = vrot.lane.b32.xlu1 %v11747_v46, %s9800_s21  ;;  %v14736_v46 = vld [vmem:[#allocation31_spill] sm:$0xff] }
 0xc78   : > { %4768 = vrot.lane.b32.xlu1 %v14732_v58, %s9801_s23 }
 0xc79   : > { %4704 = vrot.lane.b32.xlu0 %v14733_v29, %s9800_s21 }
 0xc7c   : > { %4770 = vrot.lane.b32.xlu1 %v14734_v61, %s9801_s23  ;;  %v14753_v61 = vld [vmem:[#allocation38_spill] sm:$0xff] }
 0xc7d   : > { %4832 = vrot.lane.b32.xlu0 %v12097_v33, %s9802_s13  ;;  %v14739_v33 = vld [vmem:[#allocation39_spill] sm:$0xff] }
 0xc80   : > { %4834 = vrot.lane.b32.xlu1 %v12101_v31, %s9802_s13  ;;  %v14740_v31 = vld [vmem:[#allocation60_spill] sm:$0xff] }
 0xc81   : > { %4708 = vrot.lane.b32.xlu0 %v14735_v59, %s9800_s21 }
 0xc84   : > { %4710 = vrot.lane.b32.xlu1 %v14736_v46, %s9800_s21 }
 0xc85   : > { %4772 = vrot.lane.b32.xlu0 %v14737_v19, %s9801_s23 }
 0xc88   : > { %4774 = vrot.lane.b32.xlu1 %v14738_v53, %s9801_s23 }
 0xc89   : > { %4836 = vrot.lane.b32.xlu0 %v12095_v22, %s9802_s13  ;;  %v14743_v22 = vld [vmem:[#allocation33_spill] sm:$0xff] }
 0xc8c   : > { %4838 = vrot.lane.b32.xlu1 %v12099_v37, %s9802_s13 }
 0xc8d   : > { %4712 = vrot.lane.b32.xlu0 %v14739_v33, %s9800_s21 }
 0xc90   : > { %4714 = vrot.lane.b32.xlu1 %v14740_v31, %s9800_s21  ;;  %v14754_v31 = vld [vmem:[#allocation62_spill] sm:$0xff] }
 0xc91   : > { %4776 = vrot.lane.b32.xlu0 %v14741_v48, %s9801_s23  ;;  %v14755_v48 = vld [vmem:[#allocation70_spill] sm:$0xff] }
 0xc94   : > { %4778 = vrot.lane.b32.xlu1 %v14742_v8, %s9801_s23 }
 0xc95   : > { %4840 = vrot.lane.b32.xlu0 %v12105_v49, %s9802_s13 }
 0xc97   : > { %v4492_v35 = vpop.xlane.xlu1 %4491 }
 0xc98   : > { %4842 = vrot.lane.b32.xlu1 %v12109_v28, %s9802_s13 }
 0xc99   : > { %4716 = vrot.lane.b32.xlu0 %v14743_v22, %s9800_s21 }
 0xc9b   : > { %v4488_v37 = vpop.xlane.xlu1 %4487 }
 0xc9c   : > { %4718 = vrot.lane.b32.xlu1 %v14744_v38, %s9800_s21  ;;  %v14756_v38 = vld [vmem:[#allocation34_spill] sm:$0xff] }
 0xc9d   : > { %4780 = vrot.lane.b32.xlu0 %v14745_v14, %s9801_s23 }
 0xc9f   : > { %v4494_v1 = vpop.xlane.xlu1 %4493 }
 0xca0   : > { %4782 = vrot.lane.b32.xlu1 %v14746_v36, %s9801_s23  ;;  %9631 = vrcp.f32 %v4494_v1  ;;  %v14758_v36 = vld [vmem:[#allocation46_spill] sm:$0xff] }
 0xca1   : > { %4844 = vrot.lane.b32.xlu0 %v12103_v9, %s9802_s13  ;;  %9633 = vrcp.f32 %v4488_v37  ;;  %v14749_v9 = vld [vmem:[#allocation68_spill] sm:$0xff] }
 0xca2   : > { %9635 = vrcp.f32 %v4492_v35 }
 0xca3   : > { %v4500_v49 = vpop.xlane.xlu0 %4499  ;;  %v4490_v28 = vpop.xlane.xlu1 %4489 }
 0xca4   : > { %4846 = vrot.lane.b32.xlu1 %v12107_v26, %s9802_s13  ;;  %9637 = vrcp.f32 %v4490_v28  ;;  %v14751_v26 = vld [vmem:[#allocation41_spill] sm:$0xff] }
 0xca5   : > { %4720 = vrot.lane.b32.xlu0 %v14747_v50, %s9800_s21  ;;  %v14759_v50 = vld [vmem:[#allocation51_spill] sm:$0xff] }
 0xca7   : > { %v4502_v51 = vpop.xlane.xlu0 %4501  ;;  %v4496_v23 = vpop.xlane.xlu1 %4495 }
 0xca8   : > { %4722 = vrot.lane.b32.xlu1 %v14748_v57, %s9800_s21  ;;  %9639 = vrcp.f32 %v4502_v51 }
 0xca9   : > { %4784 = vrot.lane.b32.xlu0 %v14749_v9, %s9801_s23  ;;  %9641 = vrcp.f32 %v4496_v23 }
 0xcaa   : > { %9643 = vrcp.f32 %v4500_v49 }
 0xcab   : > { %v4498_v3 = vpop.xlane.xlu0 %4497  ;;  %v4568_v29 = vpop.permute.xlu1 %4567 }
 0xcac   : > { %9645 = vrcp.f32 %v4498_v3  ;;  %4786 = vrot.lane.b32.xlu1 %v14750_v43, %s9801_s23 }
 0xcad   : > { %4848 = vrot.lane.b32.xlu0 %v14751_v26, %s9802_s13  ;;  %v9632_v17 = vpop.eup %9631 }
 0xcae   : > { %v9634_v39 = vpop.eup %9633  ;;  %v4538_v46 = vmul.f32 %v9632_v17, %v12481_v63 }
 0xcaf   : > { %v4570_v44 = vpop.permute.xlu0 %4569  ;;  %v9636_v58 = vpop.eup %9635  ;;  %v4535_v19 = vmul.f32 %v9634_v39, %v12478_v41 }
 0xcb0   : > { %8827 = vmatprep.subr.bf16.mxu0 %v4570_v44  ;;  %4850 = vrot.lane.b32.xlu1 %v14752_v24, %s9802_s13  ;;  %v4537_v33 = vmul.f32 %v9636_v58, %v12475_v54  ;;  %v14757_v54 = vld [vmem:[#allocation19_spill] sm:$0xff] }
 0xcb1   : > { %4724 = vrot.lane.b32.xlu0 %v14753_v61, %s9800_s21  ;;  %8828 = vmatpush3.bf16.msra.mxu0 %v4570_v44  ;;  %v9638_v59 = vpop.eup %9637 }
 0xcb2   : > { %8829 = vmatprep.subr.bf16.mxu0 %v4568_v29  ;;  %v4536_v53 = vmul.f32 %v9638_v59, %v12484_v7  ;;  %v4552_v22 = vpack.c.bf16 %v4538_v46, %v4537_v33 }
 0xcb4   : > { %4726 = vrot.lane.b32.xlu1 %v14754_v31, %s9800_s21  ;;  %v4551_v8 = vpack.c.bf16 %v4536_v53, %v4535_v19  ;;  %v14760_v19 = vld [vmem:[#allocation56_spill] sm:$0xff] }
 0xcb5   : > { %4788 = vrot.lane.b32.xlu0 %v14755_v48, %s9801_s23  ;;  %8830 = vmatpush3.bf16.msra.mxu0 %v4568_v29  ;;  %v9640_v35 = vpop.eup %9639 }
 0xcb6   : > { %v9642_v37 = vpop.eup %9641  ;;  %8831 = vmatprep.mubr.bf16.mxu0 %v4551_v8  ;;  %v4542_v1 = vmul.f32 %v9640_v35, %v12490_v40 }
 0xcb7   : > { %v9644_v63 = vpop.eup %9643  ;;  %v4539_v7 = vmul.f32 %v9642_v37, %v12492_v16  ;;  %v14761_v37 = vld [vmem:[#allocation47_spill] sm:$0xff] }
 0xcb8   : > { %4790 = vrot.lane.b32.xlu1 %v14756_v38, %s9801_s23  ;;  %8832 = vmatmul.mubr.bf16.vlgmr.msra.gmra.mxu0 %v4552_v22  ;;  %v4541_v28 = vmul.f32 %v9644_v63, %v12486_v5 }
 0xcb9   : > { %v9646_v41 = vpop.eup %9645  ;;  %4852 = vrot.lane.b32.xlu0 %v14757_v54, %s9802_s13 }
 0xcba   : > { %v4540_v14 = vmul.f32 %v9646_v41, %v12496_v56  ;;  %v4554_v51 = vpack.c.bf16 %v4542_v1, %v4541_v28 }
 0xcbc   : > { %4854 = vrot.lane.b32.xlu1 %v14758_v36, %s9802_s13  ;;  %v4553_v49 = vpack.c.bf16 %v4540_v14, %v4539_v7  ;;  %v14762_v36 = vld [vmem:[#allocation7_spill] sm:$0xff] }
 0xcbd   : > { %4728 = vrot.lane.b32.xlu0 %v14759_v50, %s9800_s21 }
 0xcbe   : > { %8835 = vmatprep.mubr.bf16.mxu0 %v4553_v49 }
 0xcc0   : > { %8836 = vmatmul.mubr.bf16.gmra.mxu0 %v4554_v51 }
 0xcdc   : > { %v4504_v23 = vpop.xlane.xlu1 %4503 }
 0xcdd   : > { %9647 = vrcp.f32 %v4504_v23 }
 0xce0   : > { %v4506_v57 = vpop.xlane.xlu0 %4505  ;;  %v4510_v16 = vpop.xlane.xlu1 %4509 }
 0xce1   : > { %9649 = vrcp.f32 %v4506_v57 }
 0xce2   : > { %9651 = vrcp.f32 %v4510_v16 }
 0xce4   : > { %v4508_v56 = vpop.xlane.xlu0 %4507 }
 0xce5   : > { %9653 = vrcp.f32 %v4508_v56 }
 0xce8   : > { %v4512_v40 = vpop.xlane.xlu0 %4511  ;;  %v4514_v9 = vpop.xlane.xlu1 %4513 }
 0xce9   : > { %9655 = vrcp.f32 %v4512_v40 }
 0xcea   : > { %9657 = vrcp.f32 %v4514_v9  ;;  %v9648_v3 = vpop.eup %9647 }
 0xceb   : > { %v4543_v17 = vmul.f32 %v9648_v3, %v12511_v10 }
 0xcec   : > { %v4516_v5 = vpop.xlane.xlu0 %4515  ;;  %v4518_v43 = vpop.xlane.xlu1 %4517 }
 0xced   : > { %9659 = vrcp.f32 %v4516_v5 }
 0xcee   : > { %v9650_v26 = vpop.eup %9649  ;;  %9661 = vrcp.f32 %v4518_v43 }
 0xcef   : > { %v4544_v44 = vmul.f32 %v9650_v26, %v12516_v30  ;;  %v9652_v39 = vpop.eup %9651 }
 0xcf0   : > { %v4705_v24 = vpop.permute.xlu0 %4704  ;;  %v4707_v58 = vpop.permute.xlu1 %4706  ;;  %v4546_v46 = vmul.f32 %v9652_v39, %v12514_v4 }
 0xcf1   : > { %v4555_v29 = vpack.c.bf16 %v4544_v44, %v4543_v17  ;;  %v4944_v53 = vsel %vm1875_vm2, %v14760_v19, %v4705_v24 }
 0xcf2   : > { %v9654_v61 = vpop.eup %9653 }
 0xcf3   : > { %8839 = vmatprep.mubr.bf16.mxu0 %v4555_v29  ;;  %v4545_v59 = vmul.f32 %v9654_v61, %v12520_v45  ;;  %v4945_v45 = vsel %vm1875_vm2, %v14761_v37, %v4707_v58  ;;  %v14765_v29 = vld [vmem:[#allocation48_spill] sm:$0xff] }
 0xcf4   : > { %v4833_v33 = vpop.permute.xlu0 %4832  ;;  %v4769_v31 = vpop.permute.xlu1 %4768 }
 0xcf5   : > { %v4960_v10 = vsel %vm672_vm1, %v4944_v53, %v4769_v31  ;;  %v4556_v48 = vpack.c.bf16 %v4546_v46, %v4545_v59 }
 0xcf6   : > { %v9656_v30 = vpop.eup %9655  ;;  %v12625_v8 = vsel %vm4976_vm3, %v4960_v10, %v4833_v33 }
 0xcf7   : > { %v9658_v35 = vpop.eup %9657  ;;  %8840 = vmatmul.mubr.bf16.gmra.mxu0 %v4556_v48  ;;  %v4547_v22 = vmul.f32 %v9656_v30, %v12523_v0 }
 0xcf8   : > { %v4709_v4 = vpop.permute.xlu0 %4708  ;;  %v4771_v63 = vpop.permute.xlu1 %4770  ;;  %v4548_v38 = vmul.f32 %v9658_v35, %v12525_v42  ;;  %v14766_v35 = vld [vmem:[#allocation59_spill] sm:$0xff] }
 0xcf9   : > { %v4961_v41 = vsel %vm672_vm1, %v4945_v45, %v4771_v63  ;;  %v4946_v49 = vsel %vm1875_vm2, %v14762_v36, %v4709_v4 }
 0xcfa   : > { %v9660_v54 = vpop.eup %9659  ;;  %v4557_v7 = vpack.c.bf16 %v4548_v38, %v4547_v22 }
 0xcfb   : > { %v9662_v14 = vpop.eup %9661  ;;  %v4549_v1 = vmul.f32 %v9660_v54, %v12529_v18  ;;  %v14763_v18 = vld [vmem:[#allocation11_spill] sm:$0xff]  ;;  %v14767_v54 = vld [vmem:[#allocation49_spill] sm:$0xff] }
 0xcfc   : > { %8843 = vmatprep.mubr.bf16.mxu0 %v4557_v7  ;;  %v4773_v28 = vpop.permute.xlu0 %4772  ;;  %v4835_v0 = vpop.permute.xlu1 %4834  ;;  %v4550_v50 = vmul.f32 %v9662_v14, %v12531_v21  ;;  %v14764_v21 = vld [vmem:[#allocation58_spill] sm:$0xff] }
 0xcfd   : > { %v4962_v51 = vsel %vm672_vm1, %v4946_v49, %v4773_v28  ;;  %v12638_v23 = vsel %vm4976_vm3, %v4961_v41, %v4835_v0  ;;  %v14768_v49 = vld [vmem:[#allocation45_spill] sm:$0xff] }
 0xcfe   : > { %v4558_v42 = vpack.c.bf16 %v4550_v50, %v4549_v1 }
 0xd00   : > { %8844 = vmatmul.mubr.bf16.gmra.mxu0 %v4558_v42  ;;  %v4837_v57 = vpop.permute.xlu0 %4836  ;;  %v4711_v16 = vpop.permute.xlu1 %4710 }
 0xd01   : > { %v12641_v56 = vsel %vm4976_vm3, %v4962_v51, %v4837_v57  ;;  %v4947_v40 = vsel %vm1875_vm2, %v14763_v18, %v4711_v16 }
 0xd04   : > { %v4713_v9 = vpop.permute.xlu0 %4712  ;;  %v4775_v3 = vpop.permute.xlu1 %4774 }
 0xd05   : > { %v12646_v5 = vsel %vm672_vm1, %v4947_v40, %v4775_v3  ;;  %v4948_v43 = vsel %vm1875_vm2, %v14764_v21, %v4713_v9  ;;  %v14769_v40 = vld [vmem:[#allocation40_spill] sm:$0xff] }
 0xd08   : > { %v4777_v26 = vpop.permute.xlu0 %4776  ;;  %v12650_v17 = vpop.permute.xlu1 %4838 }
 0xd09   : > { %v4964_v44 = vsel %vm672_vm1, %v4948_v43, %v4777_v26 }
 0xd0c   : > { %v4841_v39 = vpop.permute.xlu0 %4840  ;;  %v4715_v24 = vpop.permute.xlu1 %4714 }
 0xd0d   : > { %v12654_v58 = vsel %vm4976_vm3, %v4964_v44, %v4841_v39  ;;  %v4949_v61 = vsel %vm1875_vm2, %v14765_v29, %v4715_v24  ;;  %v14770_v24 = vld [vmem:[#allocation27_spill] sm:$0xff] }
 0xd10   : > { %v12658_v59 = vpop.permute.xlu0 %4716  ;;  %v4779_v46 = vpop.permute.xlu1 %4778 }
 0xd11   : > { %v12661_v19 = vsel %vm672_vm1, %v4949_v61, %v4779_v46  ;;  %v14771_v61 = vld [vmem:[#allocation44_spill] sm:$0xff] }
 0xd12   : > { %v14772_v46 = vld [vmem:[#allocation52_spill] sm:$0xff] }
 0xd14   : > { %v12663_v53 = vpop.permute.xlu0 %4780  ;;  %v12665_v33 = vpop.permute.xlu1 %4842 }
 0xd18   : > { %v12667_v31 = vpop.permute.xlu0 %4844  ;;  %v12669_v10 = vpop.permute.xlu1 %4718 }
 0xd1c   : > { %v4721_v48 = vpop.permute.xlu0 %4720  ;;  %v12671_v30 = vpop.permute.xlu1 %4782 }
 0xd1d   : > { %v4952_v22 = vsel %vm1875_vm2, %v14766_v35, %v4721_v48  ;;  %v14773_v35 = vld [vmem:[#allocation22_spill] sm:$0xff] }
 0xd20   : > { %v4785_v37 = vpop.permute.xlu0 %4784  ;;  %v12675_v45 = vpop.permute.xlu1 %4846 }
 0xd21   : > { %v4968_v4 = vsel %vm672_vm1, %v4952_v22, %v4785_v37 }
 0xd24   : > { %v4849_v63 = vpop.permute.xlu0 %4848  ;;  %v4723_v38 = vpop.permute.xlu1 %4722 }
 0xd25   : > { %v12679_v41 = vsel %vm4976_vm3, %v4968_v4, %v4849_v63  ;;  %v4953_v7 = vsel %vm1875_vm2, %v14767_v54, %v4723_v38  ;;  %v14774_v4 = vld [vmem:[#allocation64_spill] sm:$0xff]  ;;  %v14775_v63 = vld [vmem:[#allocation29_spill] sm:$0xff] }
 0xd26   : > { %v14776_v38 = vld [vmem:[#allocation12_spill] sm:$0xff]  ;;  %v14777_v54 = vld [vmem:[#allocation65_spill] sm:$0xff] }
 0xd28   : > { %v4725_v14 = vpop.permute.xlu0 %4724  ;;  %v4787_v1 = vpop.permute.xlu1 %4786 }
 0xd29   : > { %v4969_v36 = vsel %vm672_vm1, %v4953_v7, %v4787_v1  ;;  %v4954_v28 = vsel %vm1875_vm2, %v14768_v49, %v4725_v14  ;;  %v14778_v49 = vld [vmem:[#allocation43_spill] sm:$0xff] }
 0xd2c   : > { %v4789_v0 = vpop.permute.xlu0 %4788  ;;  %v4851_v50 = vpop.permute.xlu1 %4850 }
 0xd2d   : > { %v4970_v51 = vsel %vm672_vm1, %v4954_v28, %v4789_v0  ;;  %v12688_v42 = vsel %vm4976_vm3, %v4969_v36, %v4851_v50  ;;  %v14779_v0 = vld [vmem:[#allocation25_spill] sm:$0xff] }
 0xd30   : > { %v4853_v57 = vpop.permute.xlu0 %4852  ;;  %v4727_v16 = vpop.permute.xlu1 %4726 }
 0xd31   : > { %v12691_v18 = vsel %vm4976_vm3, %v4970_v51, %v4853_v57  ;;  %v4955_v9 = vsel %vm1875_vm2, %v14769_v40, %v4727_v16  ;;  %v14780_v51 = vld [vmem:[#allocation14_spill] sm:$0xff] }
 0xd34   : > { %v4791_v3 = vpop.permute.xlu1 %4790  ;;  %v4729_v40 = vpop.permute.xlu0 %4728 }
 0xd35   : > { %v12696_v21 = vsel %vm672_vm1, %v4955_v9, %v4791_v3 }
 0xd38   : > { %v12736_v9 = vpop.permute.xlu1 %4854 }
 0xd78   : > { %v8833_v43 = vpop.f32.mrf.mxu0 }
 0xd79   : > { %4900 = vrot.lane.b32.xlu0 %v8833_v43, %s9800_s21 }
 0xd7a   : > { %v4625_v26 = vpop.f32.mrf.mxu0 }
 0xd7c   : > { %v8834_v44 = vpop.f32.mrf.mxu0 }
 0xd7d   : > { %4896 = vrot.lane.b32.xlu0 %v4625_v26, %s9800_s21  ;;  %4902 = vrot.lane.b32.xlu1 %v8834_v44, %s9800_s21 }
 0xd7e   : > { %v4628_v39 = vpop.f32.mrf.mxu0 }
 0xd80   : > { %v8837_v29 = vpop.f32.mrf.mxu0 }
 0xd81   : > { %4792 = vrot.lane.b32.xlu0 %v14770_v24, %s9801_s23  ;;  %4898 = vrot.lane.b32.xlu1 %v4628_v39, %s9800_s21  ;;  %v9727_v24 = vld [vmem:[#allocation2 + $0x28] sm:$0xff] }
 0xd82   : > { %v4641_v48 = vpop.f32.mrf.mxu0 }
 0xd84   : > { %v8838_v22 = vpop.f32.mrf.mxu0 }
 0xd85   : > { %4856 = vrot.lane.b32.xlu0 %v14771_v61, %s9802_s13  ;;  %4730 = vrot.lane.b32.xlu1 %v14772_v46, %s9800_s21  ;;  %v9728_v61 = vld [vmem:[#allocation2 + $0x8] sm:$0xff] }
 0xd86   : > { %v4644_v37 = vpop.f32.mrf.mxu0 }
 0xd89   : > { %4794 = vrot.lane.b32.xlu1 %v14773_v35, %s9801_s23  ;;  %4908 = vrot.lane.b32.xlu0 %v8837_v29, %s9800_s21 }
 0xd8d   : > { %4904 = vrot.lane.b32.xlu0 %v4641_v48, %s9800_s21  ;;  %4910 = vrot.lane.b32.xlu1 %v8838_v22, %s9800_s21  ;;  %v9729_v48 = vld [vmem:[#allocation2] sm:$0xff] }
 0xd8e   : > { %v12747_v35 = vadd.f32 %v9729_v48, %v12625_v8 }
 0xd91   : > { %4732 = vrot.lane.b32.xlu0 %v14774_v4, %s9800_s21  ;;  %4906 = vrot.lane.b32.xlu1 %v4644_v37, %s9800_s21 }
 0xd95   : > { %4796 = vrot.lane.b32.xlu0 %v14775_v63, %s9801_s23  ;;  %4858 = vrot.lane.b32.xlu1 %v14776_v38, %s9802_s13  ;;  %v9730_v38 = vld [vmem:[#allocation2 + $0x38] sm:$0xff] }
 0xd99   : > { %4734 = vrot.lane.b32.xlu1 %v14777_v54, %s9800_s21 }
 0xdb7   : > { %v8841_v7 = vpop.f32.mrf.mxu0 }
 0xdb8   : > { %4916 = vrot.lane.b32.xlu0 %v8841_v7, %s9800_s21  ;;  %v9731_v7 = vld [vmem:[#allocation2 + $0x18] sm:$0xff] }
 0xdb9   : > { %v4657_v14 = vpop.f32.mrf.mxu0 }
 0xdbb   : > { %v8842_v1 = vpop.f32.mrf.mxu0 }
 0xdbc   : > { %4912 = vrot.lane.b32.xlu0 %v4657_v14, %s9800_s21  ;;  %4918 = vrot.lane.b32.xlu1 %v8842_v1, %s9800_s21 }
 0xdbd   : > { %v4660_v36 = vpop.f32.mrf.mxu0 }
 0xdc0   : > { %4860 = vrot.lane.b32.xlu0 %v14778_v49, %s9802_s13  ;;  %4914 = vrot.lane.b32.xlu1 %v4660_v36, %s9800_s21  ;;  %v8845_v28 = vpop.f32.mrf.mxu0  ;;  %v9733_v36 = vld [vmem:[#allocation2 + $0x20] sm:$0xff] }
 0xdc1   : > { %v12766_v49 = vadd.f32 %v9733_v36, %v12641_v56 }
 0xdc2   : > { %v4673_v50 = vpop.f32.mrf.mxu0 }
 0xdc4   : > { %4798 = vrot.lane.b32.xlu1 %v14779_v0, %s9801_s23  ;;  %4924 = vrot.lane.b32.xlu0 %v8845_v28, %s9800_s21  ;;  %v8846_v57 = vpop.f32.mrf.mxu0  ;;  %v4980_v0 = vsel %vm4976_vm3, %v12646_v5, %v12650_v17  ;;  %v14782_v5 = vld [vmem:[#allocation9_spill] sm:$0xff] }
 0xdc6   : > { %v4676_v16 = vpop.f32.mrf.mxu0 }
 0xdc8   : > { %4862 = vrot.lane.b32.xlu1 %v14780_v51, %s9802_s13  ;;  %4920 = vrot.lane.b32.xlu0 %v4673_v50, %s9800_s21 }
 0xdcc   : > { %4926 = vrot.lane.b32.xlu1 %v8846_v57, %s9800_s21 }
 0xdd0   : > { %4922 = vrot.lane.b32.xlu1 %v4676_v16, %s9800_s21 }
 0xdeb   : > { %v4901_v3 = vpop.permute.xlu0 %4900 }
 0xdec   : > { %v4995_v43 = vsel %vm1875_vm2, %v12335_v60, %v4901_v3 }
 0xded   : > { %v12742_v29 = vadd.f32 %v9727_v24, %v4995_v43  ;;  %v9734_v43 = vld [vmem:[#allocation2 + $0x30] sm:$0xff] }
 0xdef   : > { %v4897_v26 = vpop.permute.xlu0 %4896  ;;  %v4903_v44 = vpop.permute.xlu1 %4902  ;;  %v5051_v8 = vsel %vm672_vm1, %v12742_v29, 0.0 }
 0xdf0   : > { %v4993_v39 = vsel %vm1875_vm2, %v12337_v20, %v4897_v26  ;;  %v4996_v22 = vsel %vm1875_vm2, %v12339_v11, %v4903_v44  ;;  %v9732_v11 = vld [vmem:[#allocation2 + $0x10] sm:$0xff]  ;;  %v5052_v56 = vadd.f32 %v5051_v8, %v12766_v49  ;;  %v12783_v26 = vadd.f32 %v9734_v43, %v4980_v0 }
 0xdf1   : > { %v12744_v46 = vadd.f32 %v9728_v61, %v4993_v39  ;;  %v12756_v54 = vadd.f32 %v9730_v38, %v4996_v22  ;;  %v12763_v1 = vadd.f32 %v9732_v11, %v12638_v23  ;;  %v9737_v11 = vld [vmem:[#allocation2 + $0x40] sm:$0xff] }
 0xdf2   : > { %v12803_v36 = vadd.f32 %v9737_v11, %v12654_v58  ;;  %v9743_v11 = vld [vmem:[#allocation2 + $0xa8] sm:$0xff] }
 0xdf3   : > { %v4793_v37 = vpop.permute.xlu0 %4792  ;;  %v4899_v60 = vpop.permute.xlu1 %4898  ;;  %v5043_v4 = vsel %vm672_vm1, %v12744_v46, 0.0 }
 0xdf4   : > { %v4994_v20 = vsel %vm1875_vm2, %v12341_v32, %v4899_v60  ;;  %v5044_v63 = vadd.f32 %v5043_v4, %v12747_v35  ;;  %v14781_v32 = vld [vmem:[#allocation35_spill] sm:$0xff]  ;;  %v14783_v4 = vld [vmem:[#allocation28_spill] sm:$0xff] }
 0xdf5   : > { %v12758_v14 = vadd.f32 %v9731_v7, %v4994_v20  ;;  %v4956_v28 = vsel %vm1875_vm2, %v14781_v32, %v4729_v40  ;;  %v5055_v40 = vsel %vm672_vm1, %v12756_v54, 0.0  ;;  %v4950_v20 = vsel %vm1875_vm2, %v14783_v4, %v12658_v59  ;;  %v9736_v7 = vld [vmem:[#allocation2 + $0x48] sm:$0xff] }
 0xdf6   : > { %5045 = vadd.xlane.f32.xlu0 %v5044_v63  ;;  %v4972_v50 = vsel %vm672_vm1, %v4956_v28, %v4793_v37  ;;  %v5056_v61 = vadd.f32 %v5055_v40, %v12783_v26  ;;  %v9735_v63 = vld [vmem:[#allocation2 + $0x68] sm:$0xff]  ;;  %v4982_v59 = vsel %vm4976_vm3, %v12661_v19, %v12665_v33  ;;  %v9739_v19 = vld [vmem:[#allocation2 + $0x58] sm:$0xff] }
 0xdf7   : > { %v4857_v51 = vpop.permute.xlu0 %4856  ;;  %v4731_v57 = vpop.permute.xlu1 %4730  ;;  %v5047_v23 = vsel %vm672_vm1, %v12758_v14, 0.0 }
 0xdf8   : > { %v12777_v16 = vsel %vm4976_vm3, %v4972_v50, %v4857_v51  ;;  %v5048_v3 = vadd.f32 %v5047_v23, %v12763_v1  ;;  %v4957_v17 = vsel %vm1875_vm2, %v14782_v5, %v4731_v57  ;;  %v9738_v51 = vld [vmem:[#allocation2 + $0x78] sm:$0xff]  ;;  %v9740_v23 = vld [vmem:[#allocation2 + $0x50] sm:$0xff] }
 0xdfa   : > { %5053 = vadd.xlane.f32.xlu0 %v5052_v56  ;;  %5049 = vadd.xlane.f32.xlu1 %v5048_v3  ;;  %v12828_v56 = vadd.f32 %v9740_v23, %v4982_v59  ;;  %v9741_v3 = vld [vmem:[#allocation2 + $0x60] sm:$0xff] }
 0xdfb   : > { %v4909_v44 = vpop.permute.xlu0 %4908  ;;  %v4795_v39 = vpop.permute.xlu1 %4794 }
 0xdfc   : > { %v12788_v24 = vsel %vm672_vm1, %v4957_v17, %v4795_v39  ;;  %v4999_v48 = vsel %vm1875_vm2, %v12343_v62, %v4909_v44  ;;  %v4966_v62 = vsel %vm672_vm1, %v4950_v20, %v12663_v53  ;;  %v14785_v53 = vld [vmem:[#allocation30_spill] sm:$0xff]  ;;  %14788 = vst [vmem:[#allocation23_spill] sm:$0xff] %v12828_v56 }
 0xdfd   : > { %v12798_v38 = vadd.f32 %v9735_v63, %v4999_v48  ;;  %v4983_v32 = vsel %vm4976_vm3, %v4966_v62, %v12667_v31  ;;  %v9742_v39 = vld [vmem:[#allocation2 + $0x70] sm:$0xff] }
 0xdfe   : > { %5057 = vadd.xlane.f32.xlu0 %v5056_v61 }
 0xdff   : > { %v4905_v22 = vpop.permute.xlu0 %4904  ;;  %v4911_v37 = vpop.permute.xlu1 %4910  ;;  %14784 = vst [vmem:[#allocation10_spill] sm:$0xff] %v12798_v38  ;;  %v5067_v31 = vsel %vm672_vm1, %v12798_v38, 0.0 }
 0xe00   : > { %v4997_v60 = vsel %vm1875_vm2, %v12345_v15, %v4905_v22  ;;  %v5000_v15 = vsel %vm1875_vm2, %v12347_v2, %v4911_v37  ;;  %v4951_v2 = vsel %vm1875_vm2, %v14785_v53, %v12669_v10 }
 0xe01   : > { %v12800_v8 = vadd.f32 %v9736_v7, %v4997_v60  ;;  %v12822_v57 = vadd.f32 %v9738_v51, %v5000_v15  ;;  %v4967_v40 = vsel %vm672_vm1, %v4951_v2, %v12671_v30  ;;  %v9744_v15 = vld [vmem:[#allocation2 + $0x88] sm:$0xff]  ;;  %v9746_v2 = vld [vmem:[#allocation2 + $0xb8] sm:$0xff] }
 0xe02   : > { %v4984_v10 = vsel %vm4976_vm3, %v4967_v40, %v12675_v45 }
 0xe03   : > { %v4907_v28 = vpop.permute.xlu1 %4906  ;;  %v5059_v0 = vsel %vm672_vm1, %v12800_v8, 0.0  ;;  %14786 = vst [vmem:[#allocation26_spill] sm:$0xff] %v12822_v57  ;;  %v5071_v44 = vsel %vm672_vm1, %v12822_v57, 0.0  ;;  %v12842_v61 = vadd.f32 %v9742_v39, %v4984_v10  ;;  %v4733_v48 = vpop.permute.xlu0 %4732  ;;  %v9750_v39 = vld [vmem:[#allocation2 + $0xb0] sm:$0xff] }
 0xe04   : > { %v4998_v58 = vsel %vm1875_vm2, %v12349_v27, %v4907_v28  ;;  %v5060_v50 = vadd.f32 %v5059_v0, %v12803_v36  ;;  %v12830_v27 = vadd.f32 %v9741_v3, %v4983_v32  ;;  %v9745_v32 = vld [vmem:[#allocation2 + $0x80] sm:$0xff] }
 0xe05   : > { %v12824_v33 = vadd.f32 %v9739_v19, %v4998_v58  ;;  %14790 = vst [vmem:[#allocation20_spill] sm:$0xff] %v12842_v61  ;;  %v5072_v30 = vadd.f32 %v5071_v44, %v12842_v61  ;;  %v12858_v28 = vadd.f32 %v9745_v32, %v12679_v41  ;;  %v9747_v19 = vld [vmem:[#allocation2 + $0x98] sm:$0xff]  ;;  %v9749_v3 = vld [vmem:[#allocation2 + $0xa0] sm:$0xff] }
 0xe06   : > { %14789 = vst [vmem:[#allocation21_spill] sm:$0xff] %v12830_v27  ;;  %5061 = vadd.xlane.f32.xlu0 %v5060_v50  ;;  %v5068_v5 = vadd.f32 %v5067_v31, %v12830_v27  ;;  %v12877_v40 = vadd.f32 %v9749_v3, %v12691_v18  ;;  %v14804_v3 = vld [vmem:[#allocation67_spill] sm:$0xff] }
 0xe07   : > { %14787 = vst [vmem:[#allocation24_spill] sm:$0xff] %v12824_v33  ;;  %v5063_v43 = vsel %vm672_vm1, %v12824_v33, 0.0  ;;  %v12845_v45 = vpop.permute.xlu1 %4858  ;;  %v4797_v22 = vpop.permute.xlu0 %4796  ;;  %14793 = vst [vmem:[#allocation16_spill] sm:$0xff] %v12858_v28 }
 0xe08   : > { %v5064_v17 = vadd.f32 %v5063_v43, %v12828_v56  ;;  %14797 = vst [vmem:[#allocation42_spill] sm:$0xff] %v12877_v40 }
 0xe0a   : > { %5069 = vadd.xlane.f32.xlu0 %v5068_v5  ;;  %5065 = vadd.xlane.f32.xlu1 %v5064_v17 }
 0xe0b   : > { %v12847_v37 = vpop.permute.xlu1 %4734 }
 0xe0e   : > { %5073 = vadd.xlane.f32.xlu1 %v5072_v30 }
 0xe2a   : > { %v4917_v60 = vpop.permute.xlu0 %4916 }
 0xe2b   : > { %v5003_v4 = vsel %vm1875_vm2, %v12351_v12, %v4917_v60 }
 0xe2c   : > { %v12853_v62 = vadd.f32 %v9743_v11, %v5003_v4 }
 0xe2e   : > { %v4913_v20 = vpop.permute.xlu0 %4912  ;;  %v4919_v63 = vpop.permute.xlu1 %4918  ;;  %14791 = vst [vmem:[#allocation17_spill] sm:$0xff] %v12853_v62  ;;  %v5083_v41 = vsel %vm672_vm1, %v12853_v62, 0.0 }
 0xe2f   : > { %v5001_v7 = vsel %vm1875_vm2, %v12353_v34, %v4913_v20  ;;  %v5004_v0 = vsel %vm1875_vm2, %v12355_v47, %v4919_v63  ;;  %v9748_v47 = vld [vmem:[#allocation2 + $0x90] sm:$0xff]  ;;  %v5084_v17 = vadd.f32 %v5083_v41, %v12877_v40  ;;  %v14799_v20 = vld [vmem:[#allocation8_spill] sm:$0xff] }
 0xe30   : > { %v12855_v59 = vadd.f32 %v9744_v15, %v5001_v7  ;;  %v12867_v51 = vadd.f32 %v9746_v2, %v5004_v0  ;;  %v12874_v23 = vadd.f32 %v9748_v47, %v12688_v42  ;;  %v4958_v63 = vsel %vm1875_vm2, %v14799_v20, %v4733_v48  ;;  %v9751_v7 = vld [vmem:[#allocation2 + $0xe8] sm:$0xff]  ;;  %v9753_v0 = vld [vmem:[#allocation2 + $0xc0] sm:$0xff]  ;;  %v9000_v20 = vld [vmem:[%s9915_s19 + $0x15c] ss:$24 sps:$4 sm:$0xff]  }
 0xe31   : > { %v9752_v15 = vld [vmem:[#allocation2 + $0xc8] sm:$0xff]  ;;  %v9754_v2 = vld [vmem:[#allocation2 + $0xe0] sm:$0xff]  ;;  %6034 = vmatprep.subr.bf16.mxu1 %v9000_v20 }
 0xe32   : > { %14792 = vst [vmem:[#allocation18_spill] sm:$0xff] %v12855_v59  ;;  %v4861_v58 = vpop.permute.xlu0 %4860  ;;  %v4915_v12 = vpop.permute.xlu1 %4914  ;;  %v5075_v50 = vsel %vm672_vm1, %v12855_v59, 0.0  ;;  %14794 = vst [vmem:[#allocation53_spill] sm:$0xff] %v12867_v51  ;;  %v5087_v42 = vsel %vm672_vm1, %v12867_v51, 0.0 }
 0xe33   : > { %v5002_v34 = vsel %vm1875_vm2, %v12357_v55, %v4915_v12  ;;  %v5076_v53 = vadd.f32 %v5075_v50, %v12858_v28  ;;  %14796 = vst [vmem:[#allocation61_spill] sm:$0xff] %v12874_v23  ;;  %v4988_v55 = vsel %vm4976_vm3, %v12696_v21, %v12736_v9  ;;  %v4974_v12 = vsel %vm672_vm1, %v4958_v63, %v4797_v22  ;;  %v9003_v63 = vld [vmem:[%s9915_s19 + $0x124] ss:$24 sps:$4 sm:$0xff]  }
 0xe34   : > { %v12869_v31 = vadd.f32 %v9747_v19, %v5002_v34  ;;  %v12888_v18 = vadd.f32 %v9750_v39, %v4988_v55  ;;  %v4990_v22 = vsel %vm4976_vm3, %v12788_v24, %v12845_v45  ;;  %v4959_v55 = vsel %vm1875_vm2, %v14804_v3, %v12847_v37  ;;  %v9757_v24 = vld [vmem:[#allocation2 + $0xd0] sm:$0xff] }
 0xe35   : > { %5077 = vadd.xlane.f32.xlu0 %v5076_v53  ;;  %v12928_v45 = vadd.f32 %v9757_v24, %v4990_v22  ;;  %v9021_v22 = vld [vmem:[%s9915_s19 + $0x94] ss:$24 sps:$4 sm:$0xff]  }
 0xe36   : > { %14795 = vst [vmem:[#allocation13_spill] sm:$0xff] %v12869_v31  ;;  %v4925_v10 = vpop.permute.xlu0 %4924  ;;  %v4799_v43 = vpop.permute.xlu1 %4798  ;;  %v5079_v5 = vsel %vm672_vm1, %v12869_v31, 0.0  ;;  %14798 = vst [vmem:[#allocation31_spill] sm:$0xff] %v12888_v18  ;;  %v5088_v4 = vadd.f32 %v5087_v42, %v12888_v18 }
 0xe37   : > { %v5080_v44 = vadd.f32 %v5079_v5, %v12874_v23  ;;  %v5007_v30 = vsel %vm1875_vm2, %v12359_v6, %v4925_v10  ;;  %v12902_v6 = vadd.f32 %v9753_v0, %v12777_v16  ;;  %v9755_v10 = vld [vmem:[#allocation2 + $0xf8] sm:$0xff]  ;;  %14807 = vst [vmem:[#allocation33_spill] sm:$0xff] %v12928_v45  ;;  %v9004_v0 = vld [vmem:[%s9915_s19 + $0x128] ss:$24 sps:$4 sm:$0xff]  }
 0xe38   : > { %v12897_v11 = vadd.f32 %v9751_v7, %v5007_v30  ;;  %v9758_v30 = vld [vmem:[#allocation2 + $0xf0] sm:$0xff]  ;;  %v9006_v7 = vld [vmem:[%s9915_s19 + $0x12c] ss:$24 sps:$4 sm:$0xff]  }
 0xe39   : > { %5085 = vadd.xlane.f32.xlu0 %v5084_v17  ;;  %5081 = vadd.xlane.f32.xlu1 %v5080_v44  ;;  %14802 = vst [vmem:[#allocation39_spill] sm:$0xff] %v12902_v6 }
 0xe3a   : > { %v4921_v21 = vpop.permute.xlu0 %4920  ;;  %v4863_v9 = vpop.permute.xlu1 %4862  ;;  %14800 = vst [vmem:[#allocation66_spill] sm:$0xff] %v12897_v11  ;;  %v5099_v53 = vsel %vm672_vm1, %v12897_v11, 0.0 }
 0xe3b   : > { %v5005_v60 = vsel %vm1875_vm2, %v12361_v25, %v4921_v21  ;;  %v4991_v25 = vsel %vm4976_vm3, %v4974_v12, %v4861_v58  ;;  %v9009_v12 = vld [vmem:[%s9915_s19 + $0xf4] ss:$24 sps:$4 sm:$0xff]  }
 0xe3c   : > { %v12899_v32 = vadd.f32 %v9752_v15, %v5005_v60  ;;  %v12911_v19 = vadd.f32 %v9754_v2, %v4991_v25  ;;  %v8997_v60 = vld [vmem:[%s9915_s19 + $0x154] ss:$24 sps:$4 sm:$0xff]   ;;  %v9001_v15 = vld [vmem:[%s9915_s19 + $0x120] ss:$24 sps:$4 sm:$0xff]  }
 0xe3d   : > { %5089 = vadd.xlane.f32.xlu1 %v5088_v4  ;;  %v8998_v4 = vld [vmem:[%s9915_s19 + $0x158] ss:$24 sps:$4 sm:$0xff]   ;;  %5921 = vmatprep.subr.bf16.mxu0 %v8997_v60  ;;  %v9012_v25 = vld [vmem:[%s9915_s19 + $0xfc] ss:$24 sps:$4 sm:$0xff]  }
 0xe3e   : > { %14801 = vst [vmem:[#allocation36_spill] sm:$0xff] %v12899_v32  ;;  %v4927_v50 = vpop.permute.xlu1 %4926  ;;  %v5091_v34 = vsel %vm672_vm1, %v12899_v32, 0.0  ;;  %14803 = vst [vmem:[#allocation60_spill] sm:$0xff] %v12911_v19  ;;  %v5100_v47 = vadd.f32 %v5099_v53, %v12911_v19  ;;  %6035 = vmatpush1.bf16.msra.mxu1 %v8998_v4  ;;  %v9018_v53 = vld [vmem:[%s9915_s19 + $0xcc] ss:$24 sps:$4 sm:$0xff]  }
 0xe3f   : > { %v5092_v48 = vadd.f32 %v5091_v34, %v12902_v6  ;;  %v5008_v16 = vsel %vm1875_vm2, %v12363_v13, %v4927_v50  ;;  %v9756_v13 = vld [vmem:[#allocation2 + $0xd8] sm:$0xff]  ;;  %6036 = vmatprep.subr.bf16.mxu1 %v9006_v7  ;;  %v9007_v50 = vld [vmem:[%s9915_s19 + $0xf0] ss:$24 sps:$4 sm:$0xff]  }
 0xe40   : > { %v12924_v5 = vadd.f32 %v9755_v10, %v5008_v16  ;;  %v9010_v34 = vld [vmem:[%s9915_s19 + $0xf8] ss:$24 sps:$4 sm:$0xff]   ;;  %v9016_v16 = vld [vmem:[%s9915_s19 + $0xc8] ss:$24 sps:$4 sm:$0xff]  }
 0xe41   : > { %5093 = vadd.xlane.f32.xlu0 %v5092_v48  ;;  %v9015_v48 = vld [vmem:[%s9915_s19 + $0xc4] ss:$24 sps:$4 sm:$0xff]   ;;  %v9013_v2 = vld [vmem:[%s9915_s19 + $0xc0] ss:$24 sps:$4 sm:$0xff]  }
 0xe42   : > { %v4923_v58 = vpop.permute.xlu1 %4922  ;;  %14805 = vst [vmem:[#allocation57_spill] sm:$0xff] %v12924_v5  ;;  %v5103_v39 = vsel %vm672_vm1, %v12924_v5, 0.0  ;;  %6037 = vmatpush1.bf16.msra.mxu1 %v9004_v0 }
 0xe43   : > { %v5006_v41 = vsel %vm1875_vm2, %v12365_v52, %v4923_v58  ;;  %v4975_v52 = vsel %vm672_vm1, %v4959_v55, %v4799_v43  ;;  %6038 = vmatprep.subr.bf16.mxu1 %v9012_v25  ;;  %v9024_v58 = vld [vmem:[%s9915_s19 + $0x9c] ss:$24 sps:$4 sm:$0xff]  }
 0xe44   : > { %v12926_v17 = vadd.f32 %v9756_v13, %v5006_v41  ;;  %v4992_v37 = vsel %vm4976_vm3, %v4975_v52, %v4863_v9  ;;  %v8995_v9 = vld [vmem:[%s9915_s19 + $0x150] ss:$24 sps:$4 sm:$0xff]  }
 0xe45   : > { %5101 = vadd.xlane.f32.xlu0 %v5100_v47  ;;  %v12937_v21 = vadd.f32 %v9758_v30, %v4992_v37  ;;  %5922 = vmatpush1.bf16.msra.mxu0 %v8995_v9  ;;  %v9019_v41 = vld [vmem:[%s9915_s19 + $0x90] ss:$24 sps:$4 sm:$0xff]  }
 0xe46   : > { %14806 = vst [vmem:[#allocation55_spill] sm:$0xff] %v12926_v17  ;;  %v5095_v44 = vsel %vm672_vm1, %v12926_v17, 0.0  ;;  %5923 = vmatprep.subr.bf16.mxu0 %v9003_v63  ;;  %6039 = vmatpush1.bf16.msra.mxu1 %v9010_v34  ;;  %v9022_v47 = vld [vmem:[%s9915_s19 + $0x98] ss:$24 sps:$4 sm:$0xff]  }
 0xe47   : > { %v5096_v42 = vadd.f32 %v5095_v44, %v12928_v45  ;;  %14808 = vst [vmem:[#allocation37_spill] sm:$0xff] %v12937_v21  ;;  %v5104_v43 = vadd.f32 %v5103_v39, %v12937_v21  ;;  %6040 = vmatprep.subr.bf16.mxu1 %v9018_v53 }
 0xe49   : > { %5097 = vadd.xlane.f32.xlu1 %v5096_v42  ;;  %5924 = vmatpush1.bf16.msra.mxu0 %v9001_v15 }
 0xe4a   : > { %5925 = vmatprep.subr.bf16.mxu0 %v9009_v12  ;;  %6041 = vmatpush1.bf16.msra.mxu1 %v9016_v16 }
 0xe4b   : > { %6042 = vmatprep.subr.bf16.mxu1 %v9024_v58 }
 0xe4d   : > { %5105 = vadd.xlane.f32.xlu1 %v5104_v43  ;;  %5926 = vmatpush1.bf16.msra.mxu0 %v9007_v50 }
 0xe4e   : > { %5927 = vmatprep.subr.bf16.mxu0 %v9015_v48  ;;  %6043 = vmatpush1.bf16.msra.mxu1 %v9022_v47 }
 0xe51   : > { %5928 = vmatpush1.bf16.msra.mxu0 %v9013_v2 }
 0xe52   : > { %5929 = vmatprep.subr.bf16.mxu0 %v9021_v22 }
 0xe55   : > { %5930 = vmatpush1.bf16.msra.mxu0 %v9019_v41 }
 0xe7f   : > { %v5046_v3 = vpop.xlane.xlu0 %5045 }
 0xe80   : > { %v5107_v55 = vmul.f32 0.0052083335, %v5046_v3 }
 0xe82   : > { %v12961_v10 = vsub.f32 %v12747_v35, %v5107_v55  ;;  %v12964_v13 = vsub.f32 %v12744_v46, %v5107_v55 }
 0xe83   : > { %v5054_v24 = vpop.xlane.xlu0 %5053  ;;  %v5050_v52 = vpop.xlane.xlu1 %5049 }
 0xe84   : > { %v5156_v37 = vmul.f32 %v12964_v13, %v12964_v13  ;;  %v5109_v44 = vmul.f32 0.0052083335, %v5054_v24  ;;  %v5108_v42 = vmul.f32 0.0052083335, %v5050_v52  ;;  %v5155_v39 = vmul.f32 %v12961_v10, %v12961_v10 }
 0xe86   : > { %v12971_v30 = vsub.f32 %v12766_v49, %v5109_v44  ;;  %v12974_v43 = vsub.f32 %v12742_v29, %v5109_v44  ;;  %v12977_v9 = vsub.f32 %v12763_v1, %v5108_v42  ;;  %v12980_v60 = vsub.f32 %v12758_v14, %v5108_v42 }
 0xe87   : > { %v5058_v4 = vpop.xlane.xlu0 %5057  ;;  %v5187_v20 = vsel %vm672_vm1, %v5156_v37, 0.0 }
 0xe88   : > { %v5159_v63 = vmul.f32 %v12971_v30, %v12971_v30  ;;  %v5160_v7 = vmul.f32 %v12974_v43, %v12974_v43  ;;  %v5157_v15 = vmul.f32 %v12977_v9, %v12977_v9  ;;  %v5158_v0 = vmul.f32 %v12980_v60, %v12980_v60 }
 0xe89   : > { %v5110_v12 = vmul.f32 0.0052083335, %v5058_v4  ;;  %v5188_v25 = vadd.f32 %v5187_v20, %v5155_v39 }
 0xe8a   : > { %v5195_v50 = vsel %vm672_vm1, %v5160_v7, 0.0  ;;  %v5191_v34 = vsel %vm672_vm1, %v5158_v0, 0.0 }
 0xe8b   : > { %v12994_v48 = vsub.f32 %v12783_v26, %v5110_v12  ;;  %v12997_v53 = vsub.f32 %v12756_v54, %v5110_v12  ;;  %5189 = vadd.xlane.f32.xlu0 %v5188_v25  ;;  %v5196_v2 = vadd.f32 %v5195_v50, %v5159_v63  ;;  %v5192_v16 = vadd.f32 %v5191_v34, %v5157_v15 }
 0xe8d   : > { %v5161_v22 = vmul.f32 %v12994_v48, %v12994_v48  ;;  %v5162_v58 = vmul.f32 %v12997_v53, %v12997_v53  ;;  %5193 = vadd.xlane.f32.xlu1 %v5192_v16 }
 0xe8f   : > { %5197 = vadd.xlane.f32.xlu0 %v5196_v2  ;;  %v5062_v41 = vpop.xlane.xlu0 %5061  ;;  %v5199_v47 = vsel %vm672_vm1, %v5162_v58, 0.0 }
 0xe90   : > { %v5111_v3 = vmul.f32 0.0052083335, %v5062_v41  ;;  %v5200_v55 = vadd.f32 %v5199_v47, %v5161_v22 }
 0xe92   : > { %v13005_v24 = vsub.f32 %v12803_v36, %v5111_v3  ;;  %v13008_v52 = vsub.f32 %v12800_v8, %v5111_v3  ;;  %5201 = vadd.xlane.f32.xlu1 %v5200_v55  ;;  %v9027_v3 = vld [vmem:[%s9915_s19 + $0x64] ss:$24 sps:$4 sm:$0xff]  }
 0xe93   : > { %v5070_v37 = vpop.xlane.xlu0 %5069  ;;  %v5066_v44 = vpop.xlane.xlu1 %5065  ;;  %v9030_v55 = vld [vmem:[%s9915_s19 + $0x6c] ss:$24 sps:$4 sm:$0xff]   ;;  %5931 = vmatprep.subr.bf16.mxu0 %v9027_v3  ;;  %v9037_v3 = vld [vmem:[%s9915_s19] ss:$24 sps:$4 sm:$0xff]  }
 0xe94   : > { %v5164_v42 = vmul.f32 %v13008_v52, %v13008_v52  ;;  %v5113_v39 = vmul.f32 0.0052083335, %v5070_v37  ;;  %v5112_v4 = vmul.f32 0.0052083335, %v5066_v44  ;;  %v5163_v20 = vmul.f32 %v13005_v24, %v13005_v24  ;;  %6044 = vmatprep.subr.bf16.mxu1 %v9030_v55  ;;  %v9040_v55 = vld [vmem:[%s9915_s19 + $0x8] ss:$24 sps:$4 sm:$0xff]  }
 0xe96   : > { %v13015_v63 = vsub.f32 %v12830_v27, %v5113_v39  ;;  %v13018_v7 = vsub.f32 %v12798_v38, %v5113_v39  ;;  %v13021_v15 = vsub.f32 %v12828_v56, %v5112_v4  ;;  %v13024_v0 = vsub.f32 %v12824_v33, %v5112_v4  ;;  %v9025_v4 = vld [vmem:[%s9915_s19 + $0x60] ss:$24 sps:$4 sm:$0xff]  }
 0xe97   : > { %v5074_v12 = vpop.xlane.xlu1 %5073  ;;  %v5203_v25 = vsel %vm672_vm1, %v5164_v42, 0.0  ;;  %5932 = vmatpush1.bf16.msra.mxu0 %v9025_v4  ;;  %v9043_v4 = vld [vmem:[%s9915_s19 + $0x210] ss:$24 sps:$4 sm:$0xff]  }
 0xe98   : > { %v5167_v50 = vmul.f32 %v13015_v63, %v13015_v63  ;;  %v5168_v34 = vmul.f32 %v13018_v7, %v13018_v7  ;;  %v5165_v2 = vmul.f32 %v13021_v15, %v13021_v15  ;;  %v5166_v16 = vmul.f32 %v13024_v0, %v13024_v0 }
 0xe99   : > { %v5114_v22 = vmul.f32 0.0052083335, %v5074_v12  ;;  %v5204_v58 = vadd.f32 %v5203_v25, %v5163_v20  ;;  %v9028_v20 = vld [vmem:[%s9915_s19 + $0x68] ss:$24 sps:$4 sm:$0xff]  }
 0xe9a   : > { %v5211_v41 = vsel %vm672_vm1, %v5168_v34, 0.0  ;;  %v5207_v47 = vsel %vm672_vm1, %v5166_v16, 0.0  ;;  %6045 = vmatpush1.bf16.msra.mxu1 %v9028_v20  ;;  %v9036_v34 = vld [vmem:[%s9915_s19 + $0x3c] ss:$24 sps:$4 sm:$0xff]   ;;  %v9031_v16 = vld [vmem:[%s9915_s19 + $0x30] ss:$24 sps:$4 sm:$0xff]  }
 0xe9b   : > { %v13040_v37 = vsub.f32 %v12842_v61, %v5114_v22  ;;  %v13043_v44 = vsub.f32 %v12822_v57, %v5114_v22  ;;  %5205 = vadd.xlane.f32.xlu0 %v5204_v58  ;;  %v5212_v42 = vadd.f32 %v5211_v41, %v5167_v50  ;;  %v5208_v39 = vadd.f32 %v5207_v47, %v5165_v2  ;;  %v9033_v50 = vld [vmem:[%s9915_s19 + $0x34] ss:$24 sps:$4 sm:$0xff]   ;;  %v9034_v22 = vld [vmem:[%s9915_s19 + $0x38] ss:$24 sps:$4 sm:$0xff]   ;;  %v9039_v41 = vld [vmem:[%s9915_s19 + $0x4] ss:$24 sps:$4 sm:$0xff]  }
 0xe9c   : > { %5933 = vmatprep.subr.bf16.mxu0 %v9033_v50  ;;  %6046 = vmatprep.subr.bf16.mxu1 %v9036_v34  ;;  %v9042_v47 = vld [vmem:[%s9915_s19 + $0xc] ss:$24 sps:$4 sm:$0xff]   ;;  %v9046_v20 = vld [vmem:[%s9915_s19 + $0x218] ss:$24 sps:$4 sm:$0xff]   ;;  %v9052_v34 = vld [vmem:[%s9915_s19 + $0x1e8] ss:$24 sps:$4 sm:$0xff]  }
 0xe9d   : > { %v5169_v12 = vmul.f32 %v13040_v37, %v13040_v37  ;;  %v5170_v25 = vmul.f32 %v13043_v44, %v13043_v44  ;;  %5209 = vadd.xlane.f32.xlu1 %v5208_v39  ;;  %5934 = vmatpush1.bf16.msra.mxu0 %v9031_v16  ;;  %v9048_v39 = vld [vmem:[%s9915_s19 + $0x21c] ss:$24 sps:$4 sm:$0xff]   ;;  %v9049_v50 = vld [vmem:[%s9915_s19 + $0x1e0] ss:$24 sps:$4 sm:$0xff]  }
 0xe9e   : > { %6047 = vmatpush1.bf16.msra.mxu1 %v9034_v22  ;;  %5935 = vmatprep.subr.bf16.mxu0 %v9039_v41  ;;  %v9057_v16 = vld [vmem:[%s9915_s19 + $0x1b4] ss:$24 sps:$4 sm:$0xff]   ;;  %v9058_v22 = vld [vmem:[%s9915_s19 + $0x1b8] ss:$24 sps:$4 sm:$0xff]   ;;  %v9063_v41 = vld [vmem:[%s9915_s19 + $0x184] ss:$24 sps:$4 sm:$0xff]  }
 0xe9f   : > { %5213 = vadd.xlane.f32.xlu0 %v5212_v42  ;;  %v5215_v2 = vsel %vm672_vm1, %v5170_v25, 0.0  ;;  %6048 = vmatprep.subr.bf16.mxu1 %v9042_v47  ;;  %v9045_v42 = vld [vmem:[%s9915_s19 + $0x214] ss:$24 sps:$4 sm:$0xff]   ;;  %v9061_v47 = vld [vmem:[%s9915_s19 + $0x180] ss:$24 sps:$4 sm:$0xff]  }
 0xea0   : > { %v5216_v58 = vadd.f32 %v5215_v2, %v5169_v12  ;;  %v9051_v12 = vld [vmem:[%s9915_s19 + $0x1e4] ss:$24 sps:$4 sm:$0xff]   ;;  %v9055_v2 = vld [vmem:[%s9915_s19 + $0x1b0] ss:$24 sps:$4 sm:$0xff]  }
 0xea1   : > { %5936 = vmatpush1.bf16.msra.mxu0 %v9037_v3  ;;  %v9054_v25 = vld [vmem:[%s9915_s19 + $0x1ec] ss:$24 sps:$4 sm:$0xff]  }
 0xea2   : > { %5217 = vadd.xlane.f32.xlu1 %v5216_v58  ;;  %6049 = vmatpush1.bf16.msra.mxu1 %v9040_v55  ;;  %v9060_v58 = vld [vmem:[%s9915_s19 + $0x1bc] ss:$24 sps:$4 sm:$0xff]   ;;  %v9066_v3 = vld [vmem:[%s9915_s19 + $0x18c] ss:$24 sps:$4 sm:$0xff]   ;;  %v9064_v55 = vld [vmem:[%s9915_s19 + $0x188] ss:$24 sps:$4 sm:$0xff]  }
 0xea3   : > { %5945 = vmatprep.subr.bf16.mxu0 %v9045_v42  ;;  %6058 = vmatprep.subr.bf16.mxu1 %v9048_v39  ;;  %v9069_v61 = vld [vmem:[%s9915_s19 + $0x164] ss:$24 sps:$4 sm:$0xff]  }
 0xea5   : > { %5946 = vmatpush2.bf16.msra.mxu0 %v9043_v4 }
 0xea6   : > { %6059 = vmatpush2.bf16.msra.mxu1 %v9046_v20  ;;  %5947 = vmatprep.subr.bf16.mxu0 %v9051_v12 }
 0xea7   : > { %6060 = vmatprep.subr.bf16.mxu1 %v9054_v25 }
 0xea9   : > { %5948 = vmatpush2.bf16.msra.mxu0 %v9049_v50 }
 0xeaa   : > { %6061 = vmatpush2.bf16.msra.mxu1 %v9052_v34  ;;  %5949 = vmatprep.subr.bf16.mxu0 %v9057_v16 }
 0xeab   : > { %6062 = vmatprep.subr.bf16.mxu1 %v9060_v58 }
 0xead   : > { %5950 = vmatpush2.bf16.msra.mxu0 %v9055_v2 }
 0xeae   : > { %6063 = vmatpush2.bf16.msra.mxu1 %v9058_v22  ;;  %5951 = vmatprep.subr.bf16.mxu0 %v9063_v41 }
 0xeaf   : > { %6064 = vmatprep.subr.bf16.mxu1 %v9066_v3 }
 0xeb1   : > { %5952 = vmatpush2.bf16.msra.mxu0 %v9061_v47 }
 0xeb2   : > { %6065 = vmatpush2.bf16.msra.mxu1 %v9064_v55  ;;  %6147 = vmatprep.subr.bf16.mxu0 %v9069_v61 }
 0xebe   : > { %v5078_v42 = vpop.xlane.xlu0 %5077 }
 0xebf   : > { %v5115_v39 = vmul.f32 0.0052083335, %v5078_v42 }
 0xec1   : > { %v13077_v4 = vsub.f32 %v12858_v28, %v5115_v39  ;;  %v13080_v20 = vsub.f32 %v12855_v59, %v5115_v39 }
 0xec2   : > { %v5086_v12 = vpop.xlane.xlu0 %5085  ;;  %v5082_v25 = vpop.xlane.xlu1 %5081 }
 0xec3   : > { %v5172_v50 = vmul.f32 %v13080_v20, %v13080_v20  ;;  %v5117_v34 = vmul.f32 0.0052083335, %v5086_v12  ;;  %v5116_v2 = vmul.f32 0.0052083335, %v5082_v25  ;;  %v5171_v16 = vmul.f32 %v13077_v4, %v13077_v4 }
 0xec5   : > { %v13087_v22 = vsub.f32 %v12877_v40, %v5117_v34  ;;  %v13090_v58 = vsub.f32 %v12853_v62, %v5117_v34  ;;  %v13093_v41 = vsub.f32 %v12874_v23, %v5116_v2  ;;  %v13096_v47 = vsub.f32 %v12869_v31, %v5116_v2 }
 0xec6   : > { %v5090_v3 = vpop.xlane.xlu1 %5089  ;;  %v5219_v55 = vsel %vm672_vm1, %v5172_v50, 0.0 }
 0xec7   : > { %v5175_v42 = vmul.f32 %v13087_v22, %v13087_v22  ;;  %v5176_v39 = vmul.f32 %v13090_v58, %v13090_v58  ;;  %v5173_v12 = vmul.f32 %v13093_v41, %v13093_v41  ;;  %v5174_v25 = vmul.f32 %v13096_v47, %v13096_v47 }
 0xec8   : > { %v5118_v34 = vmul.f32 0.0052083335, %v5090_v3  ;;  %v5220_v62 = vadd.f32 %v5219_v55, %v5171_v16 }
 0xec9   : > { %v5227_v2 = vsel %vm672_vm1, %v5176_v39, 0.0  ;;  %v5223_v40 = vsel %vm672_vm1, %v5174_v25, 0.0 }
 0xeca   : > { %v13110_v50 = vsub.f32 %v12888_v18, %v5118_v34  ;;  %v13113_v31 = vsub.f32 %v12867_v51, %v5118_v34  ;;  %5221 = vadd.xlane.f32.xlu0 %v5220_v62  ;;  %v5094_v23 = vpop.xlane.xlu0 %5093  ;;  %v5228_v59 = vadd.f32 %v5227_v2, %v5175_v42  ;;  %v5224_v28 = vadd.f32 %v5223_v40, %v5173_v12 }
 0xecb   : > { %v5119_v57 = vmul.f32 0.0052083335, %v5094_v23 }
 0xecc   : > { %v5177_v3 = vmul.f32 %v13110_v50, %v13110_v50  ;;  %v5178_v16 = vmul.f32 %v13113_v31, %v13113_v31  ;;  %5225 = vadd.xlane.f32.xlu1 %v5224_v28 }
 0xecd   : > { %v13121_v55 = vsub.f32 %v12902_v6, %v5119_v57  ;;  %v13124_v39 = vsub.f32 %v12899_v32, %v5119_v57 }
 0xece   : > { %5229 = vadd.xlane.f32.xlu0 %v5228_v59  ;;  %v5102_v62 = vpop.xlane.xlu0 %5101  ;;  %v5231_v40 = vsel %vm672_vm1, %v5178_v16, 0.0 }
 0xecf   : > { %v5179_v23 = vmul.f32 %v13121_v55, %v13121_v55  ;;  %v5180_v42 = vmul.f32 %v13124_v39, %v13124_v39  ;;  %v5121_v12 = vmul.f32 0.0052083335, %v5102_v62  ;;  %v5232_v25 = vadd.f32 %v5231_v40, %v5177_v3 }
 0xed1   : > { %v13132_v28 = vsub.f32 %v12911_v19, %v5121_v12  ;;  %v13135_v34 = vsub.f32 %v12897_v11, %v5121_v12  ;;  %5233 = vadd.xlane.f32.xlu1 %v5232_v25  ;;  %v5235_v57 = vsel %vm672_vm1, %v5180_v42, 0.0 }
 0xed2   : > { %v5098_v61 = vpop.xlane.xlu1 %5097  ;;  %v5236_v59 = vadd.f32 %v5235_v57, %v5179_v23 }
 0xed3   : > { %v5183_v2 = vmul.f32 %v13132_v28, %v13132_v28  ;;  %v5184_v16 = vmul.f32 %v13135_v34, %v13135_v34  ;;  %v5120_v32 = vmul.f32 0.0052083335, %v5098_v61 }
 0xed4   : > { %5237 = vadd.xlane.f32.xlu0 %v5236_v59 }
 0xed5   : > { %v13143_v3 = vsub.f32 %v12928_v45, %v5120_v32  ;;  %v13146_v62 = vsub.f32 %v12926_v17, %v5120_v32  ;;  %v5243_v40 = vsel %vm672_vm1, %v5184_v16, 0.0 }
 0xed6   : > { %v5106_v12 = vpop.xlane.xlu1 %5105  ;;  %v5244_v42 = vadd.f32 %v5243_v40, %v5183_v2 }
 0xed7   : > { %v5181_v23 = vmul.f32 %v13143_v3, %v13143_v3  ;;  %v5182_v25 = vmul.f32 %v13146_v62, %v13146_v62  ;;  %v5122_v57 = vmul.f32 0.0052083335, %v5106_v12 }
 0xed8   : > { %5245 = vadd.xlane.f32.xlu0 %v5244_v42 }
 0xed9   : > { %v13154_v61 = vsub.f32 %v12937_v21, %v5122_v57  ;;  %v13157_v59 = vsub.f32 %v12924_v5, %v5122_v57  ;;  %v5239_v32 = vsel %vm672_vm1, %v5182_v25, 0.0 }
 0xeda   : > { %v5240_v11 = vadd.f32 %v5239_v32, %v5181_v23 }
 0xedb   : > { %v5185_v2 = vmul.f32 %v13154_v61, %v13154_v61  ;;  %v5186_v16 = vmul.f32 %v13157_v59, %v13157_v59 }
 0xedc   : > { %5241 = vadd.xlane.f32.xlu1 %v5240_v11 }
 0xedd   : > { %v5247_v40 = vsel %vm672_vm1, %v5186_v16, 0.0 }
 0xede   : > { %v5248_v12 = vadd.f32 %v5247_v40, %v5185_v2  ;;  %v5041_v2 = vld [vmem:[%s545_s24] sm:$0x3] }
 0xee0   : > { %5249 = vadd.xlane.f32.xlu1 %v5248_v12 }
 0xf14   : > { %v5190_v42 = vpop.xlane.xlu0 %5189 }
 0xf15   : > { %v5251_v21 = vmul.f32 0.0052083335, %v5190_v42 }
 0xf16   : > { %v5194_v19 = vpop.xlane.xlu1 %5193 }
 0xf17   : > { %v5267_v57 = vadd.f32 1e-05, %v5251_v21  ;;  %v5252_v5 = vmul.f32 0.0052083335, %v5194_v19  ;;  %v14809_v21 = vld [vmem:[#allocation6_spill] sm:$0xff] }
 0xf18   : > { %v5198_v25 = vpop.xlane.xlu0 %5197  ;;  %v13171_v19 = vrot.slane %v5041_v2, %v14809_v21 }
 0xf19   : > { %9663 = vrsqrt.f32 %v5267_v57  ;;  %v5253_v23 = vmul.f32 0.0052083335, %v5198_v25  ;;  %v5268_v32 = vadd.f32 1e-05, %v5252_v5  ;;  %v5042_v5 = vld [vmem:[%s549_s12] sm:$0x3] }
 0xf1b   : > { %v5269_v17 = vadd.f32 1e-05, %v5253_v23  ;;  %9665 = vrsqrt.f32 %v5268_v32  ;;  %v5202_v45 = vpop.xlane.xlu1 %5201 }
 0xf1c   : > { %v5254_v6 = vmul.f32 0.0052083335, %v5202_v45 }
 0xf1d   : > { %9667 = vrsqrt.f32 %v5269_v17  ;;  %v14810_v17 = vld [vmem:[#allocation5_spill] sm:$0xff] }
 0xf1e   : > { %v5270_v11 = vadd.f32 1e-05, %v5254_v6  ;;  %v13179_v6 = vrot.slane %v5041_v2, %v14810_v17  ;;  %v13187_v51 = vrot.slane %v5042_v5, %v14810_v17 }
 0xf20   : > { %9669 = vrsqrt.f32 %v5270_v11 }
 0xf24   : > { %v5206_v16 = vpop.xlane.xlu0 %5205 }
 0xf25   : > { %v5255_v40 = vmul.f32 0.0052083335, %v5206_v16  ;;  %v13184_v16 = vrot.slane %v5042_v5, %v14809_v21 }
 0xf26   : > { %v9664_v12 = vpop.eup %9663  ;;  %v5210_v45 = vpop.xlane.xlu1 %5209 }
 0xf27   : > { %v5299_v42 = vmul.f32 %v9664_v12, %v12961_v10  ;;  %v5271_v57 = vadd.f32 1e-05, %v5255_v40  ;;  %v5256_v25 = vmul.f32 0.0052083335, %v5210_v45  ;;  %v5300_v23 = vmul.f32 %v9664_v12, %v12964_v13 }
 0xf28   : > { %v9666_v32 = vpop.eup %9665  ;;  %v5214_v11 = vpop.xlane.xlu0 %5213 }
 0xf29   : > { %v5342_v18 = vmul.f32 %v13171_v19, %v5299_v42  ;;  %v5301_v38 = vmul.f32 %v9666_v32, %v12977_v9  ;;  %9671 = vrsqrt.f32 %v5271_v57  ;;  %v5257_v2 = vmul.f32 0.0052083335, %v5214_v11 }
 0xf2a   : > { %v9668_v27 = vpop.eup %9667  ;;  %v5272_v10 = vadd.f32 1e-05, %v5256_v25  ;;  %v5302_v40 = vmul.f32 %v9666_v32, %v12980_v60  ;;  %v5343_v13 = vmul.f32 %v13179_v6, %v5300_v23 }
 0xf2b   : > { %v5344_v12 = vmul.f32 %v13171_v19, %v5301_v38  ;;  %v5273_v45 = vadd.f32 1e-05, %v5257_v2  ;;  %v5218_v33 = vpop.xlane.xlu1 %5217  ;;  %v5304_v56 = vmul.f32 %v9668_v27, %v12974_v43  ;;  %v5385_v9 = vadd.f32 %v13184_v16, %v5342_v18 }
 0xf2c   : > { %9673 = vrsqrt.f32 %v5272_v10  ;;  %v5258_v5 = vmul.f32 0.0052083335, %v5218_v33  ;;  %v5345_v42 = vmul.f32 %v13179_v6, %v5302_v40  ;;  %v5386_v60 = vadd.f32 %v13187_v51, %v5343_v13  ;;  %v9067_v40 = vld [vmem:[%s9915_s19 + $0x160] ss:$24 sps:$4 sm:$0xff]   ;;  %v9072_v13 = vld [vmem:[%s9915_s19 + $0x134] ss:$24 sps:$4 sm:$0xff]  }
 0xf2d   : > { %v9670_v57 = vpop.eup %9669  ;;  %9675 = vrsqrt.f32 %v5273_v45  ;;  %v5387_v25 = vadd.f32 %v13184_v16, %v5344_v12  ;;  %v5347_v38 = vmul.f32 %v13179_v6, %v5304_v56  ;;  %v5303_v18 = vmul.f32 %v9668_v27, %v12971_v30  ;;  %v9070_v12 = vld [vmem:[%s9915_s19 + $0x130] ss:$24 sps:$4 sm:$0xff]  }
 0xf2e   : > { %v5274_v23 = vadd.f32 1e-05, %v5258_v5  ;;  %v5388_v32 = vadd.f32 %v13187_v51, %v5345_v42  ;;  %v5306_v43 = vmul.f32 %v9670_v57, %v12997_v53  ;;  %v5305_v33 = vmul.f32 %v9670_v57, %v12994_v48  ;;  %v9075_v5 = vld [vmem:[%s9915_s19 + $0x104] ss:$24 sps:$4 sm:$0xff]  }
 0xf2f   : > { %v13203_v11 = vpack.c.bf16 %v5387_v25, %v5385_v9  ;;  %v5390_v48 = vadd.f32 %v13187_v51, %v5347_v38  ;;  %v5346_v30 = vmul.f32 %v13171_v19, %v5303_v18  ;;  %v9073_v25 = vld [vmem:[%s9915_s19 + $0x100] ss:$24 sps:$4 sm:$0xff]  }
 0xf30   : > { %9677 = vrsqrt.f32 %v5274_v23  ;;  %v13206_v2 = vpack.c.bf16 %v5388_v32, %v5386_v60  ;;  %v5349_v10 = vmul.f32 %v13179_v6, %v5306_v43  ;;  %v5348_v56 = vmul.f32 %v13171_v19, %v5305_v33  ;;  %v9078_v33 = vld [vmem:[%s9915_s19 + $0xd4] ss:$24 sps:$4 sm:$0xff]  }
 0xf31   : > { %v5389_v9 = vadd.f32 %v13184_v16, %v5346_v30 }
 0xf32   : > { %8148 = vmatprep.mubr.msk.bf16.mxu0 %vm672_vm1, %v13206_v2  ;;  %8156 = vmatprep.mubr.msk.bf16.mxu1 %vm672_vm1, %v13206_v2  ;;  %v5392_v27 = vadd.f32 %v13187_v51, %v5349_v10  ;;  %v5391_v45 = vadd.f32 %v13184_v16, %v5348_v56 }
 0xf33   : > { %5954 = vmatmul.mubr.bf16.vlgmr.msra.gmra.mxu0 %v13203_v11  ;;  %6067 = vmatmul.mubr.bf16.vlgmr.msra.gmra.mxu1 %v13203_v11 }
 0xf34   : > { %v13221_v53 = vpack.c.bf16 %v5392_v27, %v5390_v48  ;;  %6148 = vmatpush1.bf16.msra.mxu0 %v9067_v40  ;;  %v13234_v23 = vpack.c.bf16 %v5391_v45, %v5389_v9  ;;  %v9076_v27 = vld [vmem:[%s9915_s19 + $0xd0] ss:$24 sps:$4 sm:$0xff]   ;;  %v9081_v45 = vld [vmem:[%s9915_s19 + $0xa4] ss:$24 sps:$4 sm:$0xff]  }
 0xf35   : > { %6149 = vmatprep.subr.bf16.mxu0 %v9072_v13 }
 0xf36   : > { %v9672_v42 = vpop.eup %9671  ;;  %8149 = vmatprep.mubr.msk.bf16.mxu0 %vm672_vm1, %v13221_v53  ;;  %8157 = vmatprep.mubr.msk.bf16.mxu1 %vm672_vm1, %v13221_v53 }
 0xf37   : > { %v5308_v57 = vmul.f32 %v9672_v42, %v13008_v52  ;;  %v5307_v60 = vmul.f32 %v9672_v42, %v13005_v24  ;;  %v9103_v52 = vld [vmem:[%s9925_s25 + $0x70] ss:$8 sps:$4 sm:$0xff]   ;;  %v9105_v24 = vld [vmem:[%s9925_s25 + $0x74] ss:$8 sps:$4 sm:$0xff]  }
 0xf38   : > { %6150 = vmatpush1.bf16.msra.mxu0 %v9070_v12  ;;  %6992 = vmatprep.subr.bf16.mxu1 %v9105_v24  ;;  %v9082_v24 = vld [vmem:[%s9915_s19 + $0x70] ss:$24 sps:$4 sm:$0xff]  }
 0xf39   : > { %v9674_v38 = vpop.eup %9673  ;;  %v5351_v32 = vmul.f32 %v13179_v6, %v5308_v57  ;;  %v5350_v43 = vmul.f32 %v13171_v19, %v5307_v60  ;;  %6151 = vmatprep.subr.bf16.mxu0 %v9075_v5  ;;  %6993 = vmatpush1.bf16.msra.mxu1 %v9103_v52 }
 0xf3a   : > { %v9676_v18 = vpop.eup %9675  ;;  %v5310_v10 = vmul.f32 %v9674_v38, %v13024_v0  ;;  %v5309_v40 = vmul.f32 %v9674_v38, %v13021_v15 }
 0xf3b   : > { %5964 = vmatmul.mubr.bf16.gmra.mxu0 %v13234_v23  ;;  %6077 = vmatmul.mubr.bf16.gmra.mxu1 %v13234_v23  ;;  %v5312_v56 = vmul.f32 %v9676_v18, %v13018_v7  ;;  %v5394_v15 = vadd.f32 %v13187_v51, %v5351_v32  ;;  %v5393_v0 = vadd.f32 %v13184_v16, %v5350_v43  ;;  %v9079_v32 = vld [vmem:[%s9915_s19 + $0xa0] ss:$24 sps:$4 sm:$0xff]  }
 0xf3c   : > { %v5353_v13 = vmul.f32 %v13179_v6, %v5310_v10  ;;  %v5352_v48 = vmul.f32 %v13171_v19, %v5309_v40  ;;  %6152 = vmatpush1.bf16.msra.mxu0 %v9073_v25  ;;  %v5311_v57 = vmul.f32 %v9676_v18, %v13015_v63  ;;  %v9111_v18 = vld [vmem:[%s9925_s25 + $0x64] ss:$8 sps:$4 sm:$0xff]   ;;  %v9117_v40 = vld [vmem:[%s9925_s25 + $0x54] ss:$8 sps:$4 sm:$0xff]  }
 0xf3d   : > { %v9678_v30 = vpop.eup %9677  ;;  %v5355_v12 = vmul.f32 %v13179_v6, %v5312_v56  ;;  %6153 = vmatprep.subr.bf16.mxu0 %v9078_v33  ;;  %v9084_v33 = vld [vmem:[%s9915_s19 + $0x74] ss:$24 sps:$4 sm:$0xff]   ;;  %6994 = vmatprep.subr.bf16.mxu1 %v9111_v18 }
 0xf3e   : > { %v5396_v7 = vadd.f32 %v13187_v51, %v5353_v13  ;;  %v5395_v5 = vadd.f32 %v13184_v16, %v5352_v48  ;;  %v5314_v42 = vmul.f32 %v9678_v30, %v13043_v44  ;;  %v5313_v9 = vmul.f32 %v9678_v30, %v13040_v37  ;;  %v9109_v44 = vld [vmem:[%s9925_s25 + $0x60] ss:$8 sps:$4 sm:$0xff]   ;;  %v9087_v13 = vld [vmem:[%s9915_s19 + $0x44] ss:$24 sps:$4 sm:$0xff]   ;;  %v9115_v48 = vld [vmem:[%s9925_s25 + $0x50] ss:$8 sps:$4 sm:$0xff]  }
 0xf3f   : > { %v5398_v63 = vadd.f32 %v13187_v51, %v5355_v12  ;;  %v5354_v10 = vmul.f32 %v13171_v19, %v5311_v57  ;;  %6995 = vmatpush1.bf16.msra.mxu1 %v9109_v44  ;;  %v9085_v30 = vld [vmem:[%s9915_s19 + $0x40] ss:$24 sps:$4 sm:$0xff]   ;;  %v9135_v57 = vld [vmem:[%s9925_s25 + $0x24] ss:$8 sps:$4 sm:$0xff]   ;;  %v9094_v44 = vld [vmem:[%s9915_s19 + $0x1f0] ss:$24 sps:$4 sm:$0xff]  }
 0xf40   : > { %v13258_v60 = vpack.c.bf16 %v5396_v7, %v5394_v15  ;;  %v13260_v25 = vpack.c.bf16 %v5395_v5, %v5393_v0  ;;  %v5357_v38 = vmul.f32 %v13179_v6, %v5314_v42  ;;  %6154 = vmatpush1.bf16.msra.mxu0 %v9076_v27  ;;  %v5356_v43 = vmul.f32 %v13171_v19, %v5313_v9  ;;  %v9090_v0 = vld [vmem:[%s9915_s19 + $0x14] ss:$24 sps:$4 sm:$0xff]   ;;  %v9121_v12 = vld [vmem:[%s9925_s25 + $0x40] ss:$8 sps:$4 sm:$0xff]   ;;  %v9093_v42 = vld [vmem:[%s9915_s19 + $0x224] ss:$24 sps:$4 sm:$0xff]  }
 0xf41   : > { %6155 = vmatprep.subr.bf16.mxu0 %v9081_v45  ;;  %v5397_v27 = vadd.f32 %v13184_v16, %v5354_v10  ;;  %6996 = vmatprep.subr.bf16.mxu1 %v9117_v40  ;;  %v9123_v45 = vld [vmem:[%s9925_s25 + $0x44] ss:$8 sps:$4 sm:$0xff]   ;;  %v9129_v7 = vld [vmem:[%s9925_s25 + $0x34] ss:$8 sps:$4 sm:$0xff]   ;;  %v9088_v5 = vld [vmem:[%s9915_s19 + $0x10] ss:$24 sps:$4 sm:$0xff]  }
 0xf42   : > { %8150 = vmatprep.mubr.msk.bf16.mxu0 %vm672_vm1, %v13258_v60  ;;  %8158 = vmatprep.mubr.msk.bf16.mxu1 %vm672_vm1, %v13258_v60  ;;  %v5400_v37 = vadd.f32 %v13187_v51, %v5357_v38  ;;  %v5399_v56 = vadd.f32 %v13184_v16, %v5356_v43  ;;  %v9127_v9 = vld [vmem:[%s9925_s25 + $0x30] ss:$8 sps:$4 sm:$0xff]   ;;  %v9133_v43 = vld [vmem:[%s9925_s25 + $0x20] ss:$8 sps:$4 sm:$0xff]   ;;  %v9099_v10 = vld [vmem:[%s9915_s19 + $0x1c4] ss:$24 sps:$4 sm:$0xff]  }
 0xf43   : > { %5974 = vmatmul.mubr.bf16.gmra.mxu0 %v13260_v25  ;;  %6087 = vmatmul.mubr.bf16.gmra.mxu1 %v13260_v25  ;;  %v9091_v38 = vld [vmem:[%s9915_s19 + $0x220] ss:$24 sps:$4 sm:$0xff]  }
 0xf44   : > { %v13278_v52 = vpack.c.bf16 %v5400_v37, %v5398_v63  ;;  %6156 = vmatpush1.bf16.msra.mxu0 %v9079_v32  ;;  %v13290_v15 = vpack.c.bf16 %v5399_v56, %v5397_v27  ;;  %6997 = vmatpush1.bf16.msra.mxu1 %v9115_v48  ;;  %v9096_v32 = vld [vmem:[%s9915_s19 + $0x1f4] ss:$24 sps:$4 sm:$0xff]   ;;  %v9139_v40 = vld [vmem:[%s9925_s25 + $0x10] ss:$8 sps:$4 sm:$0xff]  }
 0xf45   : > { %6157 = vmatprep.subr.bf16.mxu0 %v9084_v33  ;;  %6998 = vmatprep.subr.bf16.mxu1 %v9123_v45  ;;  %v9141_v33 = vld [vmem:[%s9925_s25 + $0x14] ss:$8 sps:$4 sm:$0xff]   ;;  %v9145_v45 = vld [vmem:[%s9925_s25] ss:$8 sps:$4 sm:$0xff]  }
 0xf46   : > { %8151 = vmatprep.mubr.msk.bf16.mxu0 %vm672_vm1, %v13278_v52  ;;  %8159 = vmatprep.mubr.msk.bf16.mxu1 %vm672_vm1, %v13278_v52 }
 0xf48   : > { %6158 = vmatpush1.bf16.msra.mxu0 %v9082_v24  ;;  %6999 = vmatpush1.bf16.msra.mxu1 %v9121_v12  ;;  %v9102_v12 = vld [vmem:[%s9915_s19 + $0x194] ss:$24 sps:$4 sm:$0xff]  }
 0xf49   : > { %6159 = vmatprep.subr.bf16.mxu0 %v9087_v13  ;;  %7000 = vmatprep.subr.bf16.mxu1 %v9129_v7  ;;  %v9147_v13 = vld [vmem:[%s9925_s25 + $0x4] ss:$8 sps:$4 sm:$0xff]  }
 0xf4b   : > { %5984 = vmatmul.mubr.bf16.gmra.mxu0 %v13290_v15  ;;  %6097 = vmatmul.mubr.bf16.gmra.mxu1 %v13290_v15 }
 0xf4c   : > { %6160 = vmatpush1.bf16.msra.mxu0 %v9085_v30  ;;  %7001 = vmatpush1.bf16.msra.mxu1 %v9127_v9 }
 0xf4d   : > { %6161 = vmatprep.subr.bf16.mxu0 %v9090_v0  ;;  %7002 = vmatprep.subr.bf16.mxu1 %v9135_v57  ;;  %v9097_v0 = vld [vmem:[%s9915_s19 + $0x1c0] ss:$24 sps:$4 sm:$0xff]   ;;  %v9100_v57 = vld [vmem:[%s9915_s19 + $0x190] ss:$24 sps:$4 sm:$0xff]  }
 0xf50   : > { %6162 = vmatpush1.bf16.msra.mxu0 %v9088_v5  ;;  %7003 = vmatpush1.bf16.msra.mxu1 %v9133_v43  ;;  %v9108_v43 = vld [vmem:[%s9925_s25 + $0x174] ss:$8 sps:$4 sm:$0xff]  }
 0xf51   : > { %6171 = vmatprep.subr.bf16.mxu0 %v9093_v42  ;;  %7004 = vmatprep.subr.bf16.mxu1 %v9141_v33  ;;  %v9153_v42 = vld [vmem:[%s9925_s25 + $0xf4] ss:$8 sps:$4 sm:$0xff]   ;;  %v9151_v33 = vld [vmem:[%s9925_s25 + $0xf0] ss:$8 sps:$4 sm:$0xff]  }
 0xf53   : > { %v5222_v63 = vpop.xlane.xlu0 %5221 }
 0xf54   : > { %v5259_v37 = vmul.f32 0.0052083335, %v5222_v63  ;;  %6172 = vmatpush2.bf16.msra.mxu0 %v9091_v38  ;;  %7005 = vmatpush1.bf16.msra.mxu1 %v9139_v40 }
 0xf55   : > { %v5226_v18 = vpop.xlane.xlu1 %5225  ;;  %6173 = vmatprep.subr.bf16.mxu0 %v9096_v32  ;;  %7006 = vmatprep.subr.bf16.mxu1 %v9147_v13 }
 0xf56   : > { %v5275_v24 = vadd.f32 1e-05, %v5259_v37  ;;  %v5260_v56 = vmul.f32 0.0052083335, %v5226_v18  ;;  %v9159_v37 = vld [vmem:[%s9925_s25 + $0xe4] ss:$8 sps:$4 sm:$0xff]  }
 0xf57   : > { %v5230_v48 = vpop.xlane.xlu0 %5229 }
 0xf58   : > { %9679 = vrsqrt.f32 %v5275_v24  ;;  %v5261_v27 = vmul.f32 0.0052083335, %v5230_v48  ;;  %v5276_v30 = vadd.f32 1e-05, %v5260_v56  ;;  %6174 = vmatpush2.bf16.msra.mxu0 %v9094_v44  ;;  %7007 = vmatpush1.bf16.msra.mxu1 %v9145_v45  ;;  %v9165_v24 = vld [vmem:[%s9925_s25 + $0xd4] ss:$8 sps:$4 sm:$0xff]  }
 0xf59   : > { %6175 = vmatprep.subr.bf16.mxu0 %v9099_v10  ;;  %7008 = vmatprep.subr.bf16.mxu1 %v9153_v42  ;;  %v9157_v10 = vld [vmem:[%s9925_s25 + $0xe0] ss:$8 sps:$4 sm:$0xff]   ;;  %v9171_v45 = vld [vmem:[%s9925_s25 + $0xc4] ss:$8 sps:$4 sm:$0xff]  }
 0xf5a   : > { %v5277_v7 = vadd.f32 1e-05, %v5261_v27  ;;  %9681 = vrsqrt.f32 %v5276_v30  ;;  %v5234_v5 = vpop.xlane.xlu1 %5233  ;;  %v9163_v27 = vld [vmem:[%s9925_s25 + $0xd0] ss:$8 sps:$4 sm:$0xff]  }
 0xf5b   : > { %v5262_v9 = vmul.f32 0.0052083335, %v5234_v5 }
 0xf5c   : > { %9683 = vrsqrt.f32 %v5277_v7  ;;  %6176 = vmatpush2.bf16.msra.mxu0 %v9097_v0  ;;  %7009 = vmatpush2.bf16.msra.mxu1 %v9151_v33 }
 0xf5d   : > { %v5278_v38 = vadd.f32 1e-05, %v5262_v9  ;;  %v5238_v32 = vpop.xlane.xlu0 %5237  ;;  %6177 = vmatprep.subr.bf16.mxu0 %v9102_v12  ;;  %7010 = vmatprep.subr.bf16.mxu1 %v9159_v37 }
 0xf5e   : > { %v5263_v63 = vmul.f32 0.0052083335, %v5238_v32 }
 0xf5f   : > { %9685 = vrsqrt.f32 %v5278_v38 }
 0xf60   : > { %v5279_v44 = vadd.f32 1e-05, %v5263_v63  ;;  %6178 = vmatpush2.bf16.msra.mxu0 %v9100_v57  ;;  %7011 = vmatpush2.bf16.msra.mxu1 %v9157_v10  ;;  %v9177_v63 = vld [vmem:[%s9925_s25 + $0xb4] ss:$8 sps:$4 sm:$0xff]  }
 0xf61   : > { %v5246_v18 = vpop.xlane.xlu0 %5245  ;;  %7105 = vmatprep.subr.bf16.mxu0 %v9108_v43  ;;  %7012 = vmatprep.subr.bf16.mxu1 %v9165_v24 }
 0xf62   : > { %v5265_v40 = vmul.f32 0.0052083335, %v5246_v18  ;;  %9687 = vrsqrt.f32 %v5279_v44 }
 0xf64   : > { %v5281_v56 = vadd.f32 1e-05, %v5265_v40  ;;  %7013 = vmatpush2.bf16.msra.mxu1 %v9163_v27 }
 0xf65   : > { %v9680_v13 = vpop.eup %9679  ;;  %v5242_v48 = vpop.xlane.xlu1 %5241  ;;  %7014 = vmatprep.subr.bf16.mxu1 %v9171_v45 }
 0xf66   : > { %v5264_v30 = vmul.f32 0.0052083335, %v5242_v48  ;;  %v5316_v0 = vmul.f32 %v9680_v13, %v13080_v20  ;;  %v5315_v12 = vmul.f32 %v9680_v13, %v13077_v4  ;;  %9689 = vrsqrt.f32 %v5281_v56  ;;  %v9169_v20 = vld [vmem:[%s9925_s25 + $0xc0] ss:$8 sps:$4 sm:$0xff]  }
 0xf67   : > { %v9682_v7 = vpop.eup %9681 }
 0xf68   : > { %v5280_v5 = vadd.f32 1e-05, %v5264_v30  ;;  %v5318_v42 = vmul.f32 %v9682_v7, %v13096_v47  ;;  %v5359_v9 = vmul.f32 %v13179_v6, %v5316_v0  ;;  %v5317_v57 = vmul.f32 %v9682_v7, %v13093_v41  ;;  %7015 = vmatpush2.bf16.msra.mxu1 %v9169_v20 }
 0xf69   : > { %v9684_v38 = vpop.eup %9683  ;;  %v5250_v32 = vpop.xlane.xlu1 %5249  ;;  %v5358_v43 = vmul.f32 %v13171_v19, %v5315_v12  ;;  %7016 = vmatprep.subr.bf16.mxu1 %v9177_v63 }
 0xf6a   : > { %9691 = vrsqrt.f32 %v5280_v5  ;;  %v5266_v4 = vmul.f32 0.0052083335, %v5250_v32  ;;  %v5361_v33 = vmul.f32 %v13179_v6, %v5318_v42  ;;  %v5402_v37 = vadd.f32 %v13187_v51, %v5359_v9 }
 0xf6b   : > { %v5360_v47 = vmul.f32 %v13171_v19, %v5317_v57  ;;  %v5320_v44 = vmul.f32 %v9684_v38, %v13090_v58  ;;  %v5401_v40 = vadd.f32 %v13184_v16, %v5358_v43  ;;  %v5319_v24 = vmul.f32 %v9684_v38, %v13087_v22  ;;  %v9175_v58 = vld [vmem:[%s9925_s25 + $0xb0] ss:$8 sps:$4 sm:$0xff]  }
 0xf6c   : > { %v9686_v41 = vpop.eup %9685  ;;  %v5282_v18 = vadd.f32 1e-05, %v5266_v4  ;;  %v5404_v10 = vadd.f32 %v13187_v51, %v5361_v33  ;;  %7017 = vmatpush2.bf16.msra.mxu1 %v9175_v58 }
 0xf6d   : > { %v5403_v56 = vadd.f32 %v13184_v16, %v5360_v47  ;;  %v5322_v13 = vmul.f32 %v9686_v41, %v13113_v31  ;;  %v5363_v48 = vmul.f32 %v13179_v6, %v5320_v44  ;;  %v5321_v27 = vmul.f32 %v9686_v41, %v13110_v50  ;;  %v9183_v47 = vld [vmem:[%s9925_s25 + $0xa4] ss:$8 sps:$4 sm:$0xff]  }
 0xf6e   : > { %9693 = vrsqrt.f32 %v5282_v18  ;;  %v13341_v30 = vpack.c.bf16 %v5404_v10, %v5402_v37  ;;  %v5362_v7 = vmul.f32 %v13171_v19, %v5319_v24  ;;  %v9181_v37 = vld [vmem:[%s9925_s25 + $0xa0] ss:$8 sps:$4 sm:$0xff]   ;;  %7018 = vmatprep.subr.bf16.mxu1 %v9183_v47  ;;  %v9174_v47 = vld [vmem:[%s9925_s25 + $0x1c4] ss:$8 sps:$4 sm:$0xff]  }
 0xf6f   : > { %v13344_v0 = vpack.c.bf16 %v5403_v56, %v5401_v40  ;;  %v5365_v12 = vmul.f32 %v13179_v6, %v5322_v13  ;;  %v5364_v22 = vmul.f32 %v13171_v19, %v5321_v27  ;;  %v9688_v45 = vpop.eup %9687  ;;  %v5406_v31 = vadd.f32 %v13187_v51, %v5363_v48  ;;  %v9189_v13 = vld [vmem:[%s9925_s25 + $0x94] ss:$8 sps:$4 sm:$0xff]   ;;  %v9187_v27 = vld [vmem:[%s9925_s25 + $0x90] ss:$8 sps:$4 sm:$0xff]  }
 0xf70   : > { %8152 = vmatprep.mubr.msk.bf16.mxu0 %vm672_vm1, %v13341_v30  ;;  %8160 = vmatprep.mubr.msk.bf16.mxu1 %vm672_vm1, %v13341_v30  ;;  %v5324_v9 = vmul.f32 %v9688_v45, %v13124_v39  ;;  %v5323_v57 = vmul.f32 %v9688_v45, %v13121_v55  ;;  %v5405_v32 = vadd.f32 %v13184_v16, %v5362_v7 }
 0xf71   : > { %5994 = vmatmul.mubr.bf16.gmra.mxu0 %v13344_v0  ;;  %6107 = vmatmul.mubr.bf16.gmra.mxu1 %v13344_v0  ;;  %v5408_v50 = vadd.f32 %v13187_v51, %v5365_v12  ;;  %v5407_v42 = vadd.f32 %v13184_v16, %v5364_v22 }
 0xf72   : > { %v5367_v4 = vmul.f32 %v13179_v6, %v5324_v9  ;;  %v5366_v33 = vmul.f32 %v13171_v19, %v5323_v57  ;;  %7019 = vmatpush2.bf16.msra.mxu1 %v9181_v37  ;;  %v9114_v9 = vld [vmem:[%s9925_s25 + $0x164] ss:$8 sps:$4 sm:$0xff]   ;;  %v9120_v57 = vld [vmem:[%s9925_s25 + $0x154] ss:$8 sps:$4 sm:$0xff]   ;;  %v9166_v37 = vld [vmem:[%s9925_s25 + $0x1d0] ss:$8 sps:$4 sm:$0xff]  }
 0xf73   : > { %v13357_v5 = vpack.c.bf16 %v5408_v50, %v5406_v31  ;;  %v9690_v38 = vpop.eup %9689  ;;  %v13367_v20 = vpack.c.bf16 %v5407_v42, %v5405_v32  ;;  %7020 = vmatprep.subr.bf16.mxu1 %v9189_v13  ;;  %v9195_v31 = vld [vmem:[%s9925_s25 + $0x84] ss:$8 sps:$4 sm:$0xff]  }
 0xf74   : > { %v5328_v39 = vmul.f32 %v9690_v38, %v13135_v34  ;;  %v5410_v34 = vadd.f32 %v13187_v51, %v5367_v4  ;;  %v5327_v48 = vmul.f32 %v9690_v38, %v13132_v28  ;;  %v9118_v38 = vld [vmem:[%s9925_s25 + $0x150] ss:$8 sps:$4 sm:$0xff]   ;;  %v9126_v32 = vld [vmem:[%s9925_s25 + $0x144] ss:$8 sps:$4 sm:$0xff]  }
 0xf75   : > { %8153 = vmatprep.mubr.msk.bf16.mxu0 %vm672_vm1, %v13357_v5  ;;  %8161 = vmatprep.mubr.msk.bf16.mxu1 %vm672_vm1, %v13357_v5  ;;  %v9138_v4 = vld [vmem:[%s9925_s25 + $0x124] ss:$8 sps:$4 sm:$0xff]  }
 0xf76   : > { %7021 = vmatpush2.bf16.msra.mxu1 %v9187_v27 }
 0xf77   : > { %v9692_v43 = vpop.eup %9691  ;;  %7022 = vmatprep.subr.bf16.mxu1 %v9195_v31 }
 0xf78   : > { %v5326_v55 = vmul.f32 %v9692_v43, %v13146_v62  ;;  %v5325_v63 = vmul.f32 %v9692_v43, %v13143_v3  ;;  %v5409_v62 = vadd.f32 %v13184_v16, %v5366_v33  ;;  %v5371_v3 = vmul.f32 %v13179_v6, %v5328_v39  ;;  %v9130_v43 = vld [vmem:[%s9925_s25 + $0x130] ss:$8 sps:$4 sm:$0xff]   ;;  %v9150_v39 = vld [vmem:[%s9925_s25 + $0x104] ss:$8 sps:$4 sm:$0xff]  }
 0xf79   : > { %6004 = vmatmul.mubr.bf16.gmra.mxu0 %v13367_v20  ;;  %6117 = vmatmul.mubr.bf16.gmra.mxu1 %v13367_v20  ;;  %v9142_v33 = vld [vmem:[%s9925_s25 + $0x110] ss:$8 sps:$4 sm:$0xff]  }
 0xf7a   : > { %v5369_v44 = vmul.f32 %v13179_v6, %v5326_v55  ;;  %v5368_v41 = vmul.f32 %v13171_v19, %v5325_v63  ;;  %v9154_v55 = vld [vmem:[%s9925_s25 + $0x1f0] ss:$8 sps:$4 sm:$0xff]   ;;  %v9162_v63 = vld [vmem:[%s9925_s25 + $0x1e4] ss:$8 sps:$4 sm:$0xff]  }
 0xf7b   : > { %v9694_v18 = vpop.eup %9693 }
 0xf7c   : > { %v5412_v10 = vadd.f32 %v13187_v51, %v5369_v44  ;;  %v5411_v40 = vadd.f32 %v13184_v16, %v5368_v41  ;;  %v5330_v24 = vmul.f32 %v9694_v18, %v13157_v59  ;;  %v5329_v56 = vmul.f32 %v9694_v18, %v13154_v61  ;;  %v9193_v59 = vld [vmem:[%s9925_s25 + $0x80] ss:$8 sps:$4 sm:$0xff]   ;;  %v9178_v44 = vld [vmem:[%s9925_s25 + $0x1b0] ss:$8 sps:$4 sm:$0xff]   ;;  %v9186_v41 = vld [vmem:[%s9925_s25 + $0x1a4] ss:$8 sps:$4 sm:$0xff]  }
 0xf7d   : > { %v5414_v61 = vadd.f32 %v13187_v51, %v5371_v3  ;;  %7023 = vmatpush2.bf16.msra.mxu1 %v9193_v59  ;;  %v9192_v18 = vld [vmem:[%s9925_s25 + $0x194] ss:$8 sps:$4 sm:$0xff]   ;;  %v9196_v3 = vld [vmem:[%s9925_s25 + $0x180] ss:$8 sps:$4 sm:$0xff]  }
 0xf7e   : > { %v13390_v58 = vpack.c.bf16 %v5412_v10, %v5410_v34  ;;  %v13392_v12 = vpack.c.bf16 %v5411_v40, %v5409_v62  ;;  %v5373_v22 = vmul.f32 %v13179_v6, %v5330_v24  ;;  %v5372_v45 = vmul.f32 %v13171_v19, %v5329_v56  ;;  %v9190_v34 = vld [vmem:[%s9925_s25 + $0x190] ss:$8 sps:$4 sm:$0xff]   ;;  %v9198_v62 = vld [vmem:[%s9925_s25 + $0x184] ss:$8 sps:$4 sm:$0xff]  }
 0xf7f   : > { %v5370_v6 = vmul.f32 %v13171_v19, %v5327_v48  ;;  %v9106_v19 = vld [vmem:[%s9925_s25 + $0x170] ss:$8 sps:$4 sm:$0xff]   ;;  %v14811_v10 = vld [vmem:[#allocation4_spill] sm:$0xff] }
 0xf80   : > { %8154 = vmatprep.mubr.msk.bf16.mxu0 %vm672_vm1, %v13390_v58  ;;  %8162 = vmatprep.mubr.msk.bf16.mxu1 %vm672_vm1, %v13390_v58  ;;  %v5416_v28 = vadd.f32 %v13187_v51, %v5373_v22  ;;  %v5415_v7 = vadd.f32 %v13184_v16, %v5372_v45  ;;  %v5521_v40 = vsub.s32 3, %v14811_v10  ;;  %v5517_v24 = vsub.s32 2, %v14811_v10  ;;  %v13478_v56 = vld [vmem:[%s9920_s22] sm:$0x3f] }
 0xf81   : > { %6014 = vmatmul.mubr.bf16.gmra.mxu0 %v13392_v12  ;;  %6127 = vmatmul.mubr.bf16.gmra.mxu1 %v13392_v12  ;;  %v5413_v51 = vadd.f32 %v13184_v16, %v5370_v6  ;;  %v9112_v16 = vld [vmem:[%s9925_s25 + $0x160] ss:$8 sps:$4 sm:$0xff]   ;;  %v13482_v27 = vrot.slane %v13478_v56, %v14810_v17 }
 0xf82   : > { %v13407_v50 = vpack.c.bf16 %v5416_v28, %v5414_v61  ;;  %v13492_v22 = vrot.slane %v13478_v56, %v5517_v24 }
 0xf83   : > { %v13415_v42 = vpack.c.bf16 %v5415_v7, %v5413_v51 }
 0xf84   : > { %8155 = vmatprep.mubr.msk.bf16.mxu0 %vm672_vm1, %v13407_v50  ;;  %8163 = vmatprep.mubr.msk.bf16.mxu1 %vm672_vm1, %v13407_v50 }
 0xf89   : > { %6024 = vmatmul.mubr.bf16.gmra.mxu0 %v13415_v42  ;;  %6137 = vmatmul.mubr.bf16.gmra.mxu1 %v13415_v42 }
 0xf8a   : > { %8164 = vmatprep.mubr.msk.bf16.mxu0 %vm672_vm1, %v13206_v2  ;;  %v9201_v2 = vld [vmem:[%s9925_s25 + $0x274] ss:$8 sps:$4 sm:$0xff]  }
 0xf8b   : > { %7218 = vmatprep.subr.bf16.mxu1 %v9201_v2 }
 0xf91   : > { %6180 = vmatmul.mubr.bf16.vlgmr.msra.gmra.mxu0 %v13203_v11  ;;  %v9124_v11 = vld [vmem:[%s9925_s25 + $0x140] ss:$8 sps:$4 sm:$0xff]  }
 0xf92   : > { %8165 = vmatprep.mubr.msk.bf16.mxu0 %vm672_vm1, %v13221_v53  ;;  %7106 = vmatpush1.bf16.msra.mxu0 %v9106_v19  ;;  %v9132_v53 = vld [vmem:[%s9925_s25 + $0x134] ss:$8 sps:$4 sm:$0xff]  }
 0xf93   : > { %7107 = vmatprep.subr.bf16.mxu0 %v9114_v9 }
 0xf96   : > { %7108 = vmatpush1.bf16.msra.mxu0 %v9112_v16 }
 0xf97   : > { %7109 = vmatprep.subr.bf16.mxu0 %v9120_v57 }
 0xf99   : > { %6190 = vmatmul.mubr.bf16.gmra.mxu0 %v13234_v23  ;;  %v9136_v23 = vld [vmem:[%s9925_s25 + $0x120] ss:$8 sps:$4 sm:$0xff]  }
 0xf9a   : > { %8166 = vmatprep.mubr.msk.bf16.mxu0 %vm672_vm1, %v13258_v60  ;;  %7110 = vmatpush1.bf16.msra.mxu0 %v9118_v38  ;;  %v9144_v60 = vld [vmem:[%s9925_s25 + $0x114] ss:$8 sps:$4 sm:$0xff]  }
 0xf9b   : > { %7111 = vmatprep.subr.bf16.mxu0 %v9126_v32 }
 0xf9e   : > { %7112 = vmatpush1.bf16.msra.mxu0 %v9124_v11 }
 0xf9f   : > { %7113 = vmatprep.subr.bf16.mxu0 %v9132_v53 }
 0xfa1   : > { %6200 = vmatmul.mubr.bf16.gmra.mxu0 %v13260_v25  ;;  %v9148_v25 = vld [vmem:[%s9925_s25 + $0x100] ss:$8 sps:$4 sm:$0xff]  }
 0xfa2   : > { %8167 = vmatprep.mubr.msk.bf16.mxu0 %vm672_vm1, %v13278_v52  ;;  %7114 = vmatpush1.bf16.msra.mxu0 %v9130_v43  ;;  %v9156_v52 = vld [vmem:[%s9925_s25 + $0x1f4] ss:$8 sps:$4 sm:$0xff]  }
 0xfa3   : > { %7115 = vmatprep.subr.bf16.mxu0 %v9138_v4 }
 0xfa6   : > { %7116 = vmatpush1.bf16.msra.mxu0 %v9136_v23 }
 0xfa7   : > { %7117 = vmatprep.subr.bf16.mxu0 %v9144_v60 }
 0xfa9   : > { %6210 = vmatmul.mubr.bf16.gmra.mxu0 %v13290_v15  ;;  %v9160_v15 = vld [vmem:[%s9925_s25 + $0x1e0] ss:$8 sps:$4 sm:$0xff]  }
 0xfaa   : > { %8168 = vmatprep.mubr.msk.bf16.mxu0 %vm672_vm1, %v13341_v30  ;;  %7118 = vmatpush1.bf16.msra.mxu0 %v9142_v33  ;;  %v9168_v30 = vld [vmem:[%s9925_s25 + $0x1d4] ss:$8 sps:$4 sm:$0xff]  }
 0xfab   : > { %7119 = vmatprep.subr.bf16.mxu0 %v9150_v39 }
 0xfae   : > { %7120 = vmatpush1.bf16.msra.mxu0 %v9148_v25 }
 0xfaf   : > { %7121 = vmatprep.subr.bf16.mxu0 %v9156_v52 }
 0xfb1   : > { %6220 = vmatmul.mubr.bf16.gmra.mxu0 %v13344_v0  ;;  %v9172_v0 = vld [vmem:[%s9925_s25 + $0x1c0] ss:$8 sps:$4 sm:$0xff]  }
 0xfb2   : > { %8169 = vmatprep.mubr.msk.bf16.mxu0 %vm672_vm1, %v13357_v5  ;;  %7122 = vmatpush2.bf16.msra.mxu0 %v9154_v55  ;;  %v9180_v5 = vld [vmem:[%s9925_s25 + $0x1b4] ss:$8 sps:$4 sm:$0xff]  }
 0xfb3   : > { %7123 = vmatprep.subr.bf16.mxu0 %v9162_v63  ;;  %v9199_v63 = vld [vmem:[%s9925_s25 + $0x270] ss:$8 sps:$4 sm:$0xff]  }
 0xfb6   : > { %7124 = vmatpush2.bf16.msra.mxu0 %v9160_v15 }
 0xfb7   : > { %7125 = vmatprep.subr.bf16.mxu0 %v9168_v30 }
 0xfb9   : > { %6230 = vmatmul.mubr.bf16.gmra.mxu0 %v13367_v20  ;;  %v9184_v20 = vld [vmem:[%s9925_s25 + $0x1a0] ss:$8 sps:$4 sm:$0xff]  }
 0xfba   : > { %8170 = vmatprep.mubr.msk.bf16.mxu0 %vm672_vm1, %v13390_v58  ;;  %7126 = vmatpush2.bf16.msra.mxu0 %v9166_v37  ;;  %v13485_v58 = vrot.slane %v13478_v56, %v5521_v40 }
 0xfbb   : > { %7127 = vmatprep.subr.bf16.mxu0 %v9174_v47 }
 0xfbe   : > { %7128 = vmatpush2.bf16.msra.mxu0 %v9172_v0 }
 0xfbf   : > { %7129 = vmatprep.subr.bf16.mxu0 %v9180_v5  ;;  %v9204_v5 = vld [vmem:[%s9925_s25 + $0x264] ss:$8 sps:$4 sm:$0xff]  }
 0xfc1   : > { %6240 = vmatmul.mubr.bf16.gmra.mxu0 %v13392_v12  ;;  %v13489_v12 = vrot.slane %v13478_v56, %v14809_v21 }
 0xfc2   : > { %8171 = vmatprep.mubr.msk.bf16.mxu0 %vm672_vm1, %v13407_v50  ;;  %7130 = vmatpush2.bf16.msra.mxu0 %v9178_v44 }
 0xfc3   : > { %7131 = vmatprep.subr.bf16.mxu0 %v9186_v41 }
 0xfc6   : > { %7132 = vmatpush2.bf16.msra.mxu0 %v9184_v20 }
 0xfc7   : > { %7133 = vmatprep.subr.bf16.mxu0 %v9192_v18 }
 0xfc9   : > { %6250 = vmatmul.mubr.bf16.gmra.mxu0 %v13415_v42 }
 0xfca   : > { %7134 = vmatpush2.bf16.msra.mxu0 %v9190_v34 }
 0xfcb   : > { %7135 = vmatprep.subr.bf16.mxu0 %v9198_v62 }
 0xfce   : > { %7136 = vmatpush2.bf16.msra.mxu0 %v9196_v3 }
 0xff3   : > { %v5955_v13 = vpop.f32.mrf.mxu0  ;;  %v6068_v48 = vpop.f32.mrf.mxu1 }
 0xff4   : > { %v5956_v51 = vadd.f32 %v5955_v13, %v13489_v12  ;;  %v6069_v42 = vadd.f32 %v6068_v48, %v13492_v22  ;;  %v9202_v13 = vld [vmem:[%s9925_s25 + $0x260] ss:$8 sps:$4 sm:$0xff]  }
 0xff5   : > { %v5957_v45 = vpop.f32.mrf.mxu0  ;;  %v6070_v61 = vpop.f32.mrf.mxu1 }
 0xff6   : > { %v5958_v31 = vadd.f32 %v5957_v45, %v13482_v27  ;;  %v6071_v6 = vadd.f32 %v6070_v61, %v13485_v58  ;;  %v6260_v60 = vmax.f32 %v5956_v51, 0.0  ;;  %v6262_v33 = vmax.f32 %v6069_v42, 0.0 }
 0xff7   : > { %v5959_v28 = vpop.f32.mrf.mxu0  ;;  %v6072_v59 = vpop.f32.mrf.mxu1 }
 0xff8   : > { %v5960_v50 = vadd.f32 %v5959_v28, %v13489_v12  ;;  %v6073_v7 = vadd.f32 %v6072_v59, %v13492_v22  ;;  %v6261_v53 = vmax.f32 %v5958_v31, 0.0  ;;  %v6263_v43 = vmax.f32 %v6071_v6, 0.0  ;;  %v9207_v59 = vld [vmem:[%s9925_s25 + $0x254] ss:$8 sps:$4 sm:$0xff]  }
 0xff9   : > { %v5961_v19 = vpop.f32.mrf.mxu0  ;;  %v6074_v9 = vpop.f32.mrf.mxu1 }
 0xffa   : > { %v5962_v16 = vadd.f32 %v5961_v19, %v13482_v27  ;;  %v6075_v57 = vadd.f32 %v6074_v9, %v13485_v58  ;;  %v6266_v38 = vmax.f32 %v5960_v50, 0.0  ;;  %v6268_v32 = vmax.f32 %v6073_v7, 0.0 }
 0xffb   : > { %v5965_v2 = vpop.f32.mrf.mxu0  ;;  %v6078_v11 = vpop.f32.mrf.mxu1 }
 0xffc   : > { %v6267_v4 = vmax.f32 %v5962_v16, 0.0  ;;  %v6269_v23 = vmax.f32 %v6075_v57, 0.0  ;;  %v6356_v15 = vpack.c.bf16 %v6266_v38, %v6260_v60  ;;  %v6358_v30 = vpack.c.bf16 %v6268_v32, %v6262_v33  ;;  %v9205_v38 = vld [vmem:[%s9925_s25 + $0x250] ss:$8 sps:$4 sm:$0xff]  }
 0xffd   : > { %v5967_v39 = vpop.f32.mrf.mxu0  ;;  %v6080_v25 = vpop.f32.mrf.mxu1  ;;  %v5966_v18 = vadd.f32 %v5965_v2, %v13489_v12  ;;  %v6079_v34 = vadd.f32 %v6078_v11, %v13492_v22 }
 0xffe   : > { %v6357_v52 = vpack.c.bf16 %v6267_v4, %v6261_v53  ;;  %v6359_v55 = vpack.c.bf16 %v6269_v23, %v6263_v43  ;;  %v5968_v37 = vadd.f32 %v5967_v39, %v13482_v27  ;;  %v6081_v44 = vadd.f32 %v6080_v25, %v13485_v58  ;;  %v9210_v4 = vld [vmem:[%s9925_s25 + $0x244] ss:$8 sps:$4 sm:$0xff]  }
 0xfff   : > { %v5969_v47 = vpop.f32.mrf.mxu0  ;;  %v6082_v0 = vpop.f32.mrf.mxu1  ;;  %v6272_v51 = vmax.f32 %v5966_v18, 0.0  ;;  %v6274_v42 = vmax.f32 %v6079_v34, 0.0 }
0x1000   : > { %v5970_v41 = vadd.f32 %v5969_v47, %v13489_v12  ;;  %v6083_v20 = vadd.f32 %v6082_v0, %v13492_v22  ;;  %7024 = vmatprep.mubr.bf16.mxu1 %v6357_v52  ;;  %7137 = vmatprep.mubr.bf16.mxu0 %v6359_v55  ;;  %v6273_v31 = vmax.f32 %v5968_v37, 0.0  ;;  %v6275_v6 = vmax.f32 %v6081_v44, 0.0  ;;  %v9213_v44 = vld [vmem:[%s9925_s25 + $0x234] ss:$8 sps:$4 sm:$0xff]  }
0x1001   : > { %v5971_v62 = vpop.f32.mrf.mxu0  ;;  %v6084_v3 = vpop.f32.mrf.mxu1  ;;  %7025 = vmatmul.mubr.bf16.vlgmr.msra.gmra.mxu1 %v6356_v15  ;;  %7138 = vmatmul.mubr.bf16.vlgmr.msra.gmra.mxu0 %v6358_v30  ;;  %v9208_v30 = vld [vmem:[%s9925_s25 + $0x240] ss:$8 sps:$4 sm:$0xff]  }
0x1002   : > { %v5972_v40 = vadd.f32 %v5971_v62, %v13482_v27  ;;  %v6085_v24 = vadd.f32 %v6084_v3, %v13485_v58  ;;  %7219 = vmatpush1.bf16.msra.mxu1 %v9199_v63  ;;  %v6278_v48 = vmax.f32 %v5970_v41, 0.0  ;;  %v6280_v45 = vmax.f32 %v6083_v20, 0.0 }
0x1003   : > { %v5975_v61 = vpop.f32.mrf.mxu0  ;;  %v6088_v28 = vpop.f32.mrf.mxu1  ;;  %7220 = vmatprep.subr.bf16.mxu1 %v9204_v5 }
0x1004   : > { %v6279_v50 = vmax.f32 %v5972_v40, 0.0  ;;  %v6281_v7 = vmax.f32 %v6085_v24, 0.0  ;;  %v6362_v32 = vpack.c.bf16 %v6278_v48, %v6272_v51  ;;  %v6364_v2 = vpack.c.bf16 %v6280_v45, %v6274_v42  ;;  %v9211_v45 = vld [vmem:[%s9925_s25 + $0x230] ss:$8 sps:$4 sm:$0xff]  }
0x1005   : > { %v5977_v19 = vpop.f32.mrf.mxu0  ;;  %v6090_v9 = vpop.f32.mrf.mxu1  ;;  %v5976_v39 = vadd.f32 %v5975_v61, %v13489_v12  ;;  %v6089_v25 = vadd.f32 %v6088_v28, %v13492_v22 }
0x1006   : > { %v6363_v16 = vpack.c.bf16 %v6279_v50, %v6273_v31  ;;  %v6365_v57 = vpack.c.bf16 %v6281_v7, %v6275_v6  ;;  %7221 = vmatpush1.bf16.msra.mxu1 %v9202_v13  ;;  %v5978_v11 = vadd.f32 %v5977_v19, %v13482_v27  ;;  %v6091_v23 = vadd.f32 %v6090_v9, %v13485_v58  ;;  %v9216_v50 = vld [vmem:[%s9925_s25 + $0x224] ss:$8 sps:$4 sm:$0xff]  }
0x1007   : > { %v5979_v53 = vpop.f32.mrf.mxu0  ;;  %v6092_v43 = vpop.f32.mrf.mxu1  ;;  %7222 = vmatprep.subr.bf16.mxu1 %v9207_v59  ;;  %v6284_v62 = vmax.f32 %v5976_v39, 0.0  ;;  %v6286_v3 = vmax.f32 %v6089_v25, 0.0 }
0x1008   : > { %v5980_v60 = vadd.f32 %v5979_v53, %v13489_v12  ;;  %v6093_v33 = vadd.f32 %v6092_v43, %v13492_v22  ;;  %7034 = vmatprep.mubr.bf16.mxu1 %v6363_v16  ;;  %7147 = vmatprep.mubr.bf16.mxu0 %v6365_v57  ;;  %v6285_v41 = vmax.f32 %v5978_v11, 0.0  ;;  %v6287_v20 = vmax.f32 %v6091_v23, 0.0  ;;  %v9219_v43 = vld [vmem:[%s9925_s25 + $0x214] ss:$8 sps:$4 sm:$0xff]  }
0x1009   : > { %v5981_v52 = vpop.f32.mrf.mxu0  ;;  %v6094_v55 = vpop.f32.mrf.mxu1  ;;  %7035 = vmatmul.mubr.bf16.gmra.mxu1 %v6362_v32  ;;  %7148 = vmatmul.mubr.bf16.gmra.mxu0 %v6364_v2  ;;  %v9214_v2 = vld [vmem:[%s9925_s25 + $0x220] ss:$8 sps:$4 sm:$0xff]  }
0x100a   : > { %v5982_v63 = vadd.f32 %v5981_v52, %v13482_v27  ;;  %v6095_v15 = vadd.f32 %v6094_v55, %v13485_v58  ;;  %7223 = vmatpush1.bf16.msra.mxu1 %v9205_v38  ;;  %v6290_v37 = vmax.f32 %v5980_v60, 0.0  ;;  %v6292_v47 = vmax.f32 %v6093_v33, 0.0 }
0x100b   : > { %v5985_v0 = vpop.f32.mrf.mxu0  ;;  %v6098_v5 = vpop.f32.mrf.mxu1  ;;  %7224 = vmatprep.subr.bf16.mxu1 %v9210_v4 }
0x100c   : > { %v6291_v18 = vmax.f32 %v5982_v63, 0.0  ;;  %v6293_v34 = vmax.f32 %v6095_v15, 0.0  ;;  %v6368_v61 = vpack.c.bf16 %v6290_v37, %v6284_v62  ;;  %v6370_v28 = vpack.c.bf16 %v6292_v47, %v6286_v3  ;;  %v9217_v63 = vld [vmem:[%s9925_s25 + $0x210] ss:$8 sps:$4 sm:$0xff]   ;;  %v9222_v37 = vld [vmem:[%s9925_s25 + $0x204] ss:$8 sps:$4 sm:$0xff]  }
0x100d   : > { %v5987_v40 = vpop.f32.mrf.mxu0  ;;  %v6100_v24 = vpop.f32.mrf.mxu1  ;;  %v5986_v19 = vadd.f32 %v5985_v0, %v13489_v12  ;;  %v6099_v9 = vadd.f32 %v6098_v5, %v13492_v22  ;;  %v9220_v47 = vld [vmem:[%s9925_s25 + $0x200] ss:$8 sps:$4 sm:$0xff]   ;;  %v9225_v0 = vld [vmem:[%s9925_s25 + $0x2f4] ss:$8 sps:$4 sm:$0xff]   ;;  %v9223_v5 = vld [vmem:[%s9925_s25 + $0x2f0] ss:$8 sps:$4 sm:$0xff]  }
0x100e   : > { %v6369_v13 = vpack.c.bf16 %v6291_v18, %v6285_v41  ;;  %v6371_v48 = vpack.c.bf16 %v6293_v34, %v6287_v20  ;;  %7225 = vmatpush1.bf16.msra.mxu1 %v9208_v30  ;;  %v5988_v59 = vadd.f32 %v5987_v40, %v13482_v27  ;;  %v6101_v7 = vadd.f32 %v6100_v24, %v13485_v58  ;;  %v9226_v41 = vld [vmem:[%s9925_s25 + $0x2e0] ss:$8 sps:$4 sm:$0xff]   ;;  %v9231_v20 = vld [vmem:[%s9925_s25 + $0x2d4] ss:$8 sps:$4 sm:$0xff]   ;;  %v9229_v18 = vld [vmem:[%s9925_s25 + $0x2d0] ss:$8 sps:$4 sm:$0xff]  }
0x100f   : > { %v5989_v31 = vpop.f32.mrf.mxu0  ;;  %v6102_v6 = vpop.f32.mrf.mxu1  ;;  %7226 = vmatprep.subr.bf16.mxu1 %v9213_v44  ;;  %v6296_v39 = vmax.f32 %v5986_v19, 0.0  ;;  %v6298_v25 = vmax.f32 %v6099_v9, 0.0  ;;  %v9228_v44 = vld [vmem:[%s9925_s25 + $0x2e4] ss:$8 sps:$4 sm:$0xff]   ;;  %v9232_v62 = vld [vmem:[%s9925_s25 + $0x2c0] ss:$8 sps:$4 sm:$0xff]  }
0x1010   : > { %v5990_v51 = vadd.f32 %v5989_v31, %v13489_v12  ;;  %v6103_v42 = vadd.f32 %v6102_v6, %v13492_v22  ;;  %7044 = vmatprep.mubr.bf16.mxu1 %v6369_v13  ;;  %7157 = vmatprep.mubr.bf16.mxu0 %v6371_v48  ;;  %v6297_v4 = vmax.f32 %v5988_v59, 0.0  ;;  %v6299_v23 = vmax.f32 %v6101_v7, 0.0  ;;  %v9234_v34 = vld [vmem:[%s9925_s25 + $0x2c4] ss:$8 sps:$4 sm:$0xff]   ;;  %v9237_v3 = vld [vmem:[%s9925_s25 + $0x2b4] ss:$8 sps:$4 sm:$0xff]  }
0x1011   : > { %v5991_v16 = vpop.f32.mrf.mxu0  ;;  %v6104_v57 = vpop.f32.mrf.mxu1  ;;  %7045 = vmatmul.mubr.bf16.gmra.mxu1 %v6368_v61  ;;  %7158 = vmatmul.mubr.bf16.gmra.mxu0 %v6370_v28  ;;  %v9235_v40 = vld [vmem:[%s9925_s25 + $0x2b0] ss:$8 sps:$4 sm:$0xff]   ;;  %v9240_v24 = vld [vmem:[%s9925_s25 + $0x2a4] ss:$8 sps:$4 sm:$0xff]   ;;  %v9243_v59 = vld [vmem:[%s9925_s25 + $0x294] ss:$8 sps:$4 sm:$0xff]  }
0x1012   : > { %v5992_v38 = vadd.f32 %v5991_v16, %v13482_v27  ;;  %v6105_v32 = vadd.f32 %v6104_v57, %v13485_v58  ;;  %7227 = vmatpush1.bf16.msra.mxu1 %v9211_v45  ;;  %v6302_v11 = vmax.f32 %v5990_v51, 0.0  ;;  %v6304_v53 = vmax.f32 %v6103_v42, 0.0  ;;  %v9238_v45 = vld [vmem:[%s9925_s25 + $0x2a0] ss:$8 sps:$4 sm:$0xff]   ;;  %v9241_v19 = vld [vmem:[%s9925_s25 + $0x290] ss:$8 sps:$4 sm:$0xff]  }
0x1013   : > { %7228 = vmatprep.subr.bf16.mxu1 %v9216_v50 }
0x1014   : > { %v6303_v60 = vmax.f32 %v5992_v38, 0.0  ;;  %v6305_v33 = vmax.f32 %v6105_v32, 0.0  ;;  %v6374_v15 = vpack.c.bf16 %v6302_v11, %v6296_v39  ;;  %v6376_v30 = vpack.c.bf16 %v6304_v53, %v6298_v25  ;;  %v9246_v32 = vld [vmem:[%s9925_s25 + $0x284] ss:$8 sps:$4 sm:$0xff]  }
0x1016   : > { %v6375_v52 = vpack.c.bf16 %v6303_v60, %v6297_v4  ;;  %v6377_v55 = vpack.c.bf16 %v6305_v33, %v6299_v23  ;;  %7229 = vmatpush1.bf16.msra.mxu1 %v9214_v2 }
0x1017   : > { %7230 = vmatprep.subr.bf16.mxu1 %v9219_v43 }
0x1018   : > { %7054 = vmatprep.mubr.bf16.mxu1 %v6375_v52  ;;  %7167 = vmatprep.mubr.bf16.mxu0 %v6377_v55 }
0x1019   : > { %7055 = vmatmul.mubr.bf16.gmra.mxu1 %v6374_v15  ;;  %7168 = vmatmul.mubr.bf16.gmra.mxu0 %v6376_v30 }
0x101a   : > { %7231 = vmatpush1.bf16.msra.mxu1 %v9217_v63 }
0x101b   : > { %7232 = vmatprep.subr.bf16.mxu1 %v9222_v37 }
0x101e   : > { %7233 = vmatpush1.bf16.msra.mxu1 %v9220_v47  ;;  %v9244_v47 = vld [vmem:[%s9925_s25 + $0x280] ss:$8 sps:$4 sm:$0xff]   ;;  %s14853_s25 = sld [smem:[#allocation73_spill]] (!%p8268_p5) }
0x101f   : > { %7234 = vmatprep.subr.bf16.mxu1 %v9225_v0 }
0x1022   : > { %7235 = vmatpush2.bf16.msra.mxu1 %v9223_v5 }
0x1023   : > { %7236 = vmatprep.subr.bf16.mxu1 %v9228_v44 }
0x1026   : > { %7237 = vmatpush2.bf16.msra.mxu1 %v9226_v41 }
0x1027   : > { %7238 = vmatprep.subr.bf16.mxu1 %v9231_v20 }
0x102a   : > { %7239 = vmatpush2.bf16.msra.mxu1 %v9229_v18 }
0x102b   : > { %7240 = vmatprep.subr.bf16.mxu1 %v9234_v34 }
0x102e   : > { %7241 = vmatpush2.bf16.msra.mxu1 %v9232_v62 }
0x102f   : > { %7242 = vmatprep.subr.bf16.mxu1 %v9237_v3 }
0x1031   : > { %v5995_v13 = vpop.f32.mrf.mxu0  ;;  %v6108_v48 = vpop.f32.mrf.mxu1 }
0x1032   : > { %7243 = vmatpush2.bf16.msra.mxu1 %v9235_v40  ;;  %v5996_v9 = vadd.f32 %v5995_v13, %v13489_v12  ;;  %v6109_v16 = vadd.f32 %v6108_v48, %v13492_v22 }
0x1033   : > { %v5997_v61 = vpop.f32.mrf.mxu0  ;;  %v6110_v28 = vpop.f32.mrf.mxu1  ;;  %7244 = vmatprep.subr.bf16.mxu1 %v9240_v24 }
0x1034   : > { %v5998_v50 = vadd.f32 %v5997_v61, %v13482_v27  ;;  %v6111_v7 = vadd.f32 %v6110_v28, %v13485_v58  ;;  %v6308_v52 = vmax.f32 %v5996_v9, 0.0  ;;  %v6310_v55 = vmax.f32 %v6109_v16, 0.0 }
0x1035   : > { %v5999_v31 = vpop.f32.mrf.mxu0  ;;  %v6112_v6 = vpop.f32.mrf.mxu1 }
0x1036   : > { %v6000_v51 = vadd.f32 %v5999_v31, %v13489_v12  ;;  %v6113_v42 = vadd.f32 %v6112_v6, %v13492_v22  ;;  %7245 = vmatpush2.bf16.msra.mxu1 %v9238_v45  ;;  %v6309_v60 = vmax.f32 %v5998_v50, 0.0  ;;  %v6311_v33 = vmax.f32 %v6111_v7, 0.0 }
0x1037   : > { %v6001_v57 = vpop.f32.mrf.mxu0  ;;  %v6114_v38 = vpop.f32.mrf.mxu1  ;;  %7246 = vmatprep.subr.bf16.mxu1 %v9243_v59 }
0x1038   : > { %v6002_v2 = vadd.f32 %v6001_v57, %v13482_v27  ;;  %v6115_v11 = vadd.f32 %v6114_v38, %v13485_v58  ;;  %v6314_v53 = vmax.f32 %v6000_v51, 0.0  ;;  %v6316_v43 = vmax.f32 %v6113_v42, 0.0 }
0x1039   : > { %v6005_v4 = vpop.f32.mrf.mxu0  ;;  %v6118_v23 = vpop.f32.mrf.mxu1 }
0x103a   : > { %v6315_v39 = vmax.f32 %v6002_v2, 0.0  ;;  %v6317_v25 = vmax.f32 %v6115_v11, 0.0  ;;  %7247 = vmatpush2.bf16.msra.mxu1 %v9241_v19  ;;  %v6380_v0 = vpack.c.bf16 %v6314_v53, %v6308_v52  ;;  %v6382_v5 = vpack.c.bf16 %v6316_v43, %v6310_v55 }
0x103b   : > { %v6007_v63 = vpop.f32.mrf.mxu0  ;;  %v6120_v15 = vpop.f32.mrf.mxu1  ;;  %7248 = vmatprep.subr.bf16.mxu1 %v9246_v32  ;;  %v6006_v3 = vadd.f32 %v6005_v4, %v13489_v12  ;;  %v6119_v40 = vadd.f32 %v6118_v23, %v13492_v22 }
0x103c   : > { %v6381_v30 = vpack.c.bf16 %v6315_v39, %v6309_v60  ;;  %v6383_v37 = vpack.c.bf16 %v6317_v25, %v6311_v33  ;;  %v6008_v44 = vadd.f32 %v6007_v63, %v13482_v27  ;;  %v6121_v18 = vadd.f32 %v6120_v15, %v13485_v58 }
0x103d   : > { %v6009_v41 = vpop.f32.mrf.mxu0  ;;  %v6122_v20 = vpop.f32.mrf.mxu1  ;;  %v6320_v42 = vmax.f32 %v6006_v3, 0.0  ;;  %v6322_v19 = vmax.f32 %v6119_v40, 0.0 }
0x103e   : > { %v6010_v34 = vadd.f32 %v6009_v41, %v13489_v12  ;;  %v6123_v62 = vadd.f32 %v6122_v20, %v13492_v22  ;;  %7064 = vmatprep.mubr.bf16.mxu1 %v6381_v30  ;;  %7177 = vmatprep.mubr.bf16.mxu0 %v6383_v37  ;;  %v6321_v6 = vmax.f32 %v6008_v44, 0.0  ;;  %v6323_v50 = vmax.f32 %v6121_v18, 0.0 }
0x103f   : > { %v6011_v24 = vpop.f32.mrf.mxu0  ;;  %v6124_v13 = vpop.f32.mrf.mxu1  ;;  %7065 = vmatmul.mubr.bf16.gmra.mxu1 %v6380_v0  ;;  %7178 = vmatmul.mubr.bf16.gmra.mxu0 %v6382_v5 }
0x1040   : > { %v6012_v48 = vadd.f32 %v6011_v24, %v13482_v27  ;;  %v6125_v45 = vadd.f32 %v6124_v13, %v13485_v58  ;;  %7249 = vmatpush2.bf16.msra.mxu1 %v9244_v47  ;;  %v6326_v61 = vmax.f32 %v6010_v34, 0.0  ;;  %v6328_v28 = vmax.f32 %v6123_v62, 0.0 }
0x1041   : > { %v6015_v59 = vpop.f32.mrf.mxu0  ;;  %v6128_v31 = vpop.f32.mrf.mxu1 }
0x1042   : > { %v6327_v7 = vmax.f32 %v6012_v48, 0.0  ;;  %v6329_v51 = vmax.f32 %v6125_v45, 0.0  ;;  %v6386_v32 = vpack.c.bf16 %v6326_v61, %v6320_v42  ;;  %v6388_v2 = vpack.c.bf16 %v6328_v28, %v6322_v19 }
0x1043   : > { %v6017_v9 = vpop.f32.mrf.mxu0  ;;  %v6130_v16 = vpop.f32.mrf.mxu1  ;;  %v6016_v33 = vadd.f32 %v6015_v59, %v13489_v12  ;;  %v6129_v39 = vadd.f32 %v6128_v31, %v13492_v22  ;;  %v5529_v28 = vsub.s32 5, %v14811_v10  ;;  %v5525_v19 = vsub.s32 4, %v14811_v10 }
0x1044   : > { %v6387_v57 = vpack.c.bf16 %v6327_v7, %v6321_v6  ;;  %v6389_v38 = vpack.c.bf16 %v6329_v51, %v6323_v50  ;;  %v6018_v11 = vadd.f32 %v6017_v9, %v13482_v27  ;;  %v6131_v4 = vadd.f32 %v6130_v16, %v13485_v58 }
0x1045   : > { %v6019_v53 = vpop.f32.mrf.mxu0  ;;  %v6132_v43 = vpop.f32.mrf.mxu1  ;;  %v6332_v20 = vmax.f32 %v6016_v33, 0.0  ;;  %v6334_v18 = vmax.f32 %v6129_v39, 0.0 }
0x1046   : > { %v6020_v23 = vadd.f32 %v6019_v53, %v13489_v12  ;;  %v6133_v60 = vadd.f32 %v6132_v43, %v13492_v22  ;;  %7074 = vmatprep.mubr.bf16.mxu1 %v6387_v57  ;;  %7187 = vmatprep.mubr.bf16.mxu0 %v6389_v38  ;;  %v6333_v0 = vmax.f32 %v6018_v11, 0.0  ;;  %v6335_v5 = vmax.f32 %v6131_v4, 0.0 }
0x1047   : > { %v6021_v25 = vpop.f32.mrf.mxu0  ;;  %v6134_v52 = vpop.f32.mrf.mxu1  ;;  %7075 = vmatmul.mubr.bf16.gmra.mxu1 %v6386_v32  ;;  %7188 = vmatmul.mubr.bf16.gmra.mxu0 %v6388_v2  ;;  %v13592_v2 = vrot.slane %v13478_v56, %v5529_v28 }
0x1048   : > { %v6022_v55 = vadd.f32 %v6021_v25, %v13482_v27  ;;  %v6135_v63 = vadd.f32 %v6134_v52, %v13485_v58  ;;  %v6338_v15 = vmax.f32 %v6020_v23, 0.0  ;;  %v6340_v30 = vmax.f32 %v6133_v60, 0.0 }
0x1049   : > { %v6025_v37 = vpop.f32.mrf.mxu0  ;;  %v6138_v47 = vpop.f32.mrf.mxu1  ;;  %v13595_v23 = vrot.slane %v13478_v56, %v5525_v19 }
0x104a   : > { %v6339_v44 = vmax.f32 %v6022_v55, 0.0  ;;  %v6341_v41 = vmax.f32 %v6135_v63, 0.0  ;;  %v6392_v24 = vpack.c.bf16 %v6338_v15, %v6332_v20  ;;  %v6394_v13 = vpack.c.bf16 %v6340_v30, %v6334_v18 }
0x104b   : > { %v6027_v34 = vpop.f32.mrf.mxu0  ;;  %v6140_v62 = vpop.f32.mrf.mxu1  ;;  %v6026_v50 = vadd.f32 %v6025_v37, %v13489_v12  ;;  %v6139_v7 = vadd.f32 %v6138_v47, %v13492_v22 }
0x104c   : > { %v6393_v3 = vpack.c.bf16 %v6339_v44, %v6333_v0  ;;  %v6395_v40 = vpack.c.bf16 %v6341_v41, %v6335_v5  ;;  %v6028_v48 = vadd.f32 %v6027_v34, %v13482_v27  ;;  %v6141_v59 = vadd.f32 %v6140_v62, %v13485_v58 }
0x104d   : > { %v6029_v45 = vpop.f32.mrf.mxu0  ;;  %v6142_v61 = vpop.f32.mrf.mxu1  ;;  %v6344_v43 = vmax.f32 %v6026_v50, 0.0  ;;  %v6346_v4 = vmax.f32 %v6139_v7, 0.0 }
0x104e   : > { %v6030_v31 = vadd.f32 %v6029_v45, %v13489_v12  ;;  %v6143_v6 = vadd.f32 %v6142_v61, %v13492_v22  ;;  %7084 = vmatprep.mubr.bf16.mxu1 %v6393_v3  ;;  %7197 = vmatprep.mubr.bf16.mxu0 %v6395_v40  ;;  %v6345_v11 = vmax.f32 %v6028_v48, 0.0  ;;  %v6347_v12 = vmax.f32 %v6141_v59, 0.0 }
0x104f   : > { %v6031_v51 = vpop.f32.mrf.mxu0  ;;  %v6144_v42 = vpop.f32.mrf.mxu1  ;;  %7085 = vmatmul.mubr.bf16.gmra.mxu1 %v6392_v24  ;;  %7198 = vmatmul.mubr.bf16.gmra.mxu0 %v6394_v13 }
0x1050   : > { %v6032_v9 = vadd.f32 %v6031_v51, %v13482_v27  ;;  %v6145_v16 = vadd.f32 %v6144_v42, %v13485_v58  ;;  %v6350_v57 = vmax.f32 %v6030_v31, 0.0  ;;  %v6352_v38 = vmax.f32 %v6143_v6, 0.0 }
0x1051   : > { %v6181_v32 = vpop.f32.mrf.mxu0 }
0x1052   : > { %v6351_v53 = vmax.f32 %v6032_v9, 0.0  ;;  %v6353_v22 = vmax.f32 %v6145_v16, 0.0  ;;  %v6398_v33 = vpack.c.bf16 %v6350_v57, %v6344_v43  ;;  %v6400_v58 = vpack.c.bf16 %v6352_v38, %v6346_v4 }
0x1053   : > { %v6183_v10 = vpop.f32.mrf.mxu0  ;;  %v6182_v55 = vadd.f32 %v6181_v32, %v13595_v23 }
0x1054   : > { %v6399_v60 = vpack.c.bf16 %v6351_v53, %v6345_v11  ;;  %v6401_v27 = vpack.c.bf16 %v6353_v22, %v6347_v12  ;;  %v6184_v25 = vadd.f32 %v6183_v10, %v13592_v2 }
0x1055   : > { %v6185_v39 = vpop.f32.mrf.mxu0  ;;  %v6264_v0 = vmax.f32 %v6182_v55, 0.0 }
0x1056   : > { %v6186_v52 = vadd.f32 %v6185_v39, %v13595_v23  ;;  %7094 = vmatprep.mubr.bf16.mxu1 %v6399_v60  ;;  %7207 = vmatprep.mubr.bf16.mxu0 %v6401_v27  ;;  %v6265_v37 = vmax.f32 %v6184_v25, 0.0 }
0x1057   : > { %v6187_v63 = vpop.f32.mrf.mxu0  ;;  %7095 = vmatmul.mubr.bf16.gmra.mxu1 %v6398_v33  ;;  %7208 = vmatmul.mubr.bf16.gmra.mxu0 %v6400_v58 }
0x1058   : > { %v6188_v56 = vadd.f32 %v6187_v63, %v13592_v2  ;;  %v6270_v15 = vmax.f32 %v6186_v52, 0.0 }
0x1059   : > { %v6191_v30 = vpop.f32.mrf.mxu0 }
0x105a   : > { %v6271_v47 = vmax.f32 %v6188_v56, 0.0  ;;  %v6360_v41 = vpack.c.bf16 %v6270_v15, %v6264_v0  ;;  %v6192_v62 = vadd.f32 %v6191_v30, %v13595_v23 }
0x105b   : > { %v6193_v5 = vpop.f32.mrf.mxu0 }
0x105c   : > { %v6361_v44 = vpack.c.bf16 %v6271_v47, %v6265_v37  ;;  %v6194_v18 = vadd.f32 %v6193_v5, %v13592_v2  ;;  %v6276_v61 = vmax.f32 %v6192_v62, 0.0 }
0x105d   : > { %v6195_v20 = vpop.f32.mrf.mxu0 }
0x105e   : > { %v6196_v34 = vadd.f32 %v6195_v20, %v13595_v23  ;;  %7250 = vmatprep.mubr.bf16.mxu1 %v6361_v44  ;;  %v6277_v48 = vmax.f32 %v6194_v18, 0.0 }
0x105f   : > { %v6197_v3 = vpop.f32.mrf.mxu0  ;;  %7251 = vmatmul.mubr.bf16.vlgmr.msra.gmra.mxu1 %v6360_v41 }
0x1060   : > { %v6198_v40 = vadd.f32 %v6197_v3, %v13592_v2  ;;  %v6282_v24 = vmax.f32 %v6196_v34, 0.0 }
0x1061   : > { %v6201_v13 = vpop.f32.mrf.mxu0 }
0x1062   : > { %v6283_v45 = vmax.f32 %v6198_v40, 0.0  ;;  %v6366_v31 = vpack.c.bf16 %v6282_v24, %v6276_v61  ;;  %v6202_v51 = vadd.f32 %v6201_v13, %v13595_v23 }
0x1063   : > { %v6203_v28 = vpop.f32.mrf.mxu0 }
0x1064   : > { %v6367_v59 = vpack.c.bf16 %v6283_v45, %v6277_v48  ;;  %v6204_v50 = vadd.f32 %v6203_v28, %v13592_v2  ;;  %v6288_v32 = vmax.f32 %v6202_v51, 0.0 }
0x1065   : > { %v6205_v6 = vpop.f32.mrf.mxu0 }
0x1066   : > { %v6206_v7 = vadd.f32 %v6205_v6, %v13595_v23  ;;  %7260 = vmatprep.mubr.bf16.mxu1 %v6367_v59  ;;  %v6289_v57 = vmax.f32 %v6204_v50, 0.0 }
0x1067   : > { %v6207_v42 = vpop.f32.mrf.mxu0  ;;  %7261 = vmatmul.mubr.bf16.gmra.mxu1 %v6366_v31 }
0x1068   : > { %v6208_v19 = vadd.f32 %v6207_v42, %v13592_v2  ;;  %v6294_v9 = vmax.f32 %v6206_v7, 0.0 }
0x1069   : > { %v6211_v16 = vpop.f32.mrf.mxu0 }
0x106a   : > { %v6295_v38 = vmax.f32 %v6208_v19, 0.0  ;;  %v6372_v53 = vpack.c.bf16 %v6294_v9, %v6288_v32  ;;  %v6212_v10 = vadd.f32 %v6211_v16, %v13595_v23 }
0x106b   : > { %v6213_v11 = vpop.f32.mrf.mxu0 }
0x106c   : > { %v6373_v12 = vpack.c.bf16 %v6295_v38, %v6289_v57  ;;  %v6214_v43 = vadd.f32 %v6213_v11, %v13592_v2  ;;  %v6300_v52 = vmax.f32 %v6212_v10, 0.0 }
0x106d   : > { %v6215_v22 = vpop.f32.mrf.mxu0 }
0x106e   : > { %v6216_v4 = vadd.f32 %v6215_v22, %v13595_v23  ;;  %7270 = vmatprep.mubr.bf16.mxu1 %v6373_v12  ;;  %v6301_v39 = vmax.f32 %v6214_v43, 0.0 }
0x106f   : > { %v6217_v60 = vpop.f32.mrf.mxu0  ;;  %7271 = vmatmul.mubr.bf16.gmra.mxu1 %v6372_v53 }
0x1070   : > { %v6218_v27 = vadd.f32 %v6217_v60, %v13592_v2  ;;  %v6306_v33 = vmax.f32 %v6216_v4, 0.0 }
0x1071   : > { %v6221_v58 = vpop.f32.mrf.mxu0 }
0x1072   : > { %v6307_v25 = vmax.f32 %v6218_v27, 0.0  ;;  %v6378_v56 = vpack.c.bf16 %v6306_v33, %v6300_v52  ;;  %v6222_v47 = vadd.f32 %v6221_v58, %v13595_v23 }
0x1073   : > { %v6223_v55 = vpop.f32.mrf.mxu0 }
0x1074   : > { %v6379_v63 = vpack.c.bf16 %v6307_v25, %v6301_v39  ;;  %v6224_v30 = vadd.f32 %v6223_v55, %v13592_v2  ;;  %v6312_v34 = vmax.f32 %v6222_v47, 0.0 }
0x1075   : > { %v6225_v15 = vpop.f32.mrf.mxu0 }
0x1076   : > { %v6226_v37 = vadd.f32 %v6225_v15, %v13595_v23  ;;  %7280 = vmatprep.mubr.bf16.mxu1 %v6379_v63  ;;  %v6313_v20 = vmax.f32 %v6224_v30, 0.0 }
0x1077   : > { %v6227_v0 = vpop.f32.mrf.mxu0  ;;  %7281 = vmatmul.mubr.bf16.gmra.mxu1 %v6378_v56 }
0x1078   : > { %v6228_v5 = vadd.f32 %v6227_v0, %v13592_v2  ;;  %v6318_v44 = vmax.f32 %v6226_v37, 0.0 }
0x1079   : > { %v6231_v41 = vpop.f32.mrf.mxu0 }
0x107a   : > { %v6319_v18 = vmax.f32 %v6228_v5, 0.0  ;;  %v6384_v40 = vpack.c.bf16 %v6318_v44, %v6312_v34  ;;  %v6232_v45 = vadd.f32 %v6231_v41, %v13595_v23 }
0x107b   : > { %v6233_v62 = vpop.f32.mrf.mxu0 }
0x107c   : > { %v6385_v3 = vpack.c.bf16 %v6319_v18, %v6313_v20  ;;  %v6234_v13 = vadd.f32 %v6233_v62, %v13592_v2  ;;  %v6324_v7 = vmax.f32 %v6232_v45, 0.0 }
0x107d   : > { %v6235_v24 = vpop.f32.mrf.mxu0 }
0x107e   : > { %v6236_v48 = vadd.f32 %v6235_v24, %v13595_v23  ;;  %7290 = vmatprep.mubr.bf16.mxu1 %v6385_v3  ;;  %v6325_v6 = vmax.f32 %v6234_v13, 0.0 }
0x107f   : > { %v6237_v61 = vpop.f32.mrf.mxu0  ;;  %7291 = vmatmul.mubr.bf16.gmra.mxu1 %v6384_v40 }
0x1080   : > { %v6238_v28 = vadd.f32 %v6237_v61, %v13592_v2  ;;  %v6330_v59 = vmax.f32 %v6236_v48, 0.0 }
0x1081   : > { %v6241_v31 = vpop.f32.mrf.mxu0 }
0x1082   : > { %v6331_v50 = vmax.f32 %v6238_v28, 0.0  ;;  %v6390_v19 = vpack.c.bf16 %v6330_v59, %v6324_v7  ;;  %v6242_v38 = vadd.f32 %v6241_v31, %v13595_v23 }
0x1083   : > { %v6243_v51 = vpop.f32.mrf.mxu0 }
0x1084   : > { %v6391_v42 = vpack.c.bf16 %v6331_v50, %v6325_v6  ;;  %v6244_v16 = vadd.f32 %v6243_v51, %v13592_v2  ;;  %v6336_v4 = vmax.f32 %v6242_v38, 0.0 }
0x1085   : > { %v6245_v9 = vpop.f32.mrf.mxu0 }
0x1086   : > { %v6246_v57 = vadd.f32 %v6245_v9, %v13595_v23  ;;  %7300 = vmatprep.mubr.bf16.mxu1 %v6391_v42  ;;  %v6337_v22 = vmax.f32 %v6244_v16, 0.0 }
0x1087   : > { %v6247_v32 = vpop.f32.mrf.mxu0  ;;  %7301 = vmatmul.mubr.bf16.gmra.mxu1 %v6390_v19 }
0x1088   : > { %v6248_v11 = vadd.f32 %v6247_v32, %v13592_v2  ;;  %v6342_v12 = vmax.f32 %v6246_v57, 0.0 }
0x1089   : > { %v6251_v53 = vpop.f32.mrf.mxu0 }
0x108a   : > { %v6343_v43 = vmax.f32 %v6248_v11, 0.0  ;;  %v6396_v27 = vpack.c.bf16 %v6342_v12, %v6336_v4  ;;  %v6252_v25 = vadd.f32 %v6251_v53, %v13595_v23 }
0x108b   : > { %v6253_v10 = vpop.f32.mrf.mxu0 }
0x108c   : > { %v6397_v60 = vpack.c.bf16 %v6343_v43, %v6337_v22  ;;  %v6254_v58 = vadd.f32 %v6253_v10, %v13592_v2  ;;  %v6348_v30 = vmax.f32 %v6252_v25, 0.0 }
0x108d   : > { %v6255_v33 = vpop.f32.mrf.mxu0 }
0x108e   : > { %v6256_v39 = vadd.f32 %v6255_v33, %v13595_v23  ;;  %7310 = vmatprep.mubr.bf16.mxu1 %v6397_v60  ;;  %v6349_v56 = vmax.f32 %v6254_v58, 0.0 }
0x108f   : > { %v6257_v52 = vpop.f32.mrf.mxu0  ;;  %7311 = vmatmul.mubr.bf16.gmra.mxu1 %v6396_v27  ;;  %v6500_v27 = vld [vmem:[%s567_s16] sm:$0x3]  ;;  %s14852_s16 = sld [smem:[#allocation72_spill]] (!%p8268_p5) }
0x1090   : > { %v6258_v55 = vadd.f32 %v6257_v52, %v13592_v2  ;;  %v6354_v63 = vmax.f32 %v6256_v39, 0.0  ;;  %v13697_v25 = vrot.slane %v6500_v27, %v14809_v21 }
0x1092   : > { %v6355_v15 = vmax.f32 %v6258_v55, 0.0  ;;  %v6402_v47 = vpack.c.bf16 %v6354_v63, %v6348_v30  ;;  %v13702_v55 = vrot.slane %v6500_v27, %v14810_v17 }
0x1094   : > { %v6403_v37 = vpack.c.bf16 %v6355_v15, %v6349_v56 }
0x1096   : > { %7320 = vmatprep.mubr.bf16.mxu1 %v6403_v37 }
0x1097   : > { %7321 = vmatmul.mubr.bf16.gmra.mxu1 %v6402_v47 }
0x10c1   : > { %v7026_v0 = vpop.f32.mrf.mxu1  ;;  %v7139_v2 = vpop.f32.mrf.mxu0 }
0x10c2   : > { %v7027_v15 = vadd.f32 %v7026_v0, %v13697_v25 }
0x10c3   : > { %v7028_v5 = vpop.f32.mrf.mxu1  ;;  %v7141_v3 = vpop.f32.mrf.mxu0 }
0x10c4   : > { %v7029_v37 = vadd.f32 %v7028_v5, %v13702_v55  ;;  %v7140_v21 = vadd.f32 %v7139_v2, %v7027_v15 }
0x10c5   : > { %v7030_v44 = vpop.f32.mrf.mxu1  ;;  %v7143_v24 = vpop.f32.mrf.mxu0 }
0x10c6   : > { %v7142_v27 = vadd.f32 %v7141_v3, %v7029_v37 }
0x10c7   : > { %v7032_v41 = vpop.f32.mrf.mxu1  ;;  %v7145_v48 = vpop.f32.mrf.mxu0 }
0x10c9   : > { %v7036_v20 = vpop.f32.mrf.mxu1  ;;  %v7149_v61 = vpop.f32.mrf.mxu0 }
0x10cb   : > { %v13629_v18 = vpop.f32.mrf.mxu1  ;;  %v7151_v59 = vpop.f32.mrf.mxu0 }
0x10cd   : > { %v13631_v23 = vpop.f32.mrf.mxu1  ;;  %v13647_v6 = vpop.f32.mrf.mxu0 }
0x10cf   : > { %v13633_v34 = vpop.f32.mrf.mxu1  ;;  %v13651_v7 = vpop.f32.mrf.mxu0 }
0x10d1   : > { %v13635_v62 = vpop.f32.mrf.mxu1  ;;  %v13657_v19 = vpop.f32.mrf.mxu0 }
0x10d3   : > { %v13637_v40 = vpop.f32.mrf.mxu1  ;;  %v13663_v57 = vpop.f32.mrf.mxu0 }
0x10d5   : > { %v13639_v13 = vpop.f32.mrf.mxu1  ;;  %v13669_v11 = vpop.f32.mrf.mxu0 }
0x10d7   : > { %v13641_v45 = vpop.f32.mrf.mxu1  ;;  %v13675_v22 = vpop.f32.mrf.mxu0 }
0x10d9   : > { %v13643_v28 = vpop.f32.mrf.mxu1  ;;  %v13681_v10 = vpop.f32.mrf.mxu0 }
0x10db   : > { %v13645_v31 = vpop.f32.mrf.mxu1  ;;  %v13692_v58 = vpop.f32.mrf.mxu0 }
0x10dd   : > { %v13649_v50 = vpop.f32.mrf.mxu1  ;;  %v13704_v63 = vpop.f32.mrf.mxu0 }
0x10df   : > { %v13653_v51 = vpop.f32.mrf.mxu1  ;;  %v13712_v47 = vpop.f32.mrf.mxu0 }
0x10ff   : > { %v13655_v42 = vpop.f32.mrf.mxu1 }
0x1101   : > { %v13659_v9 = vpop.f32.mrf.mxu1 }
0x1103   : > { %v13661_v16 = vpop.f32.mrf.mxu1 }
0x1105   : > { %v13665_v38 = vpop.f32.mrf.mxu1 }
0x1107   : > { %v13667_v32 = vpop.f32.mrf.mxu1 }
0x1109   : > { %v13671_v12 = vpop.f32.mrf.mxu1 }
0x110b   : > { %v13673_v53 = vpop.f32.mrf.mxu1 }
0x110c   : > { %14812 = vst [vmem:[#allocation54_spill] sm:$0xff] %v13673_v53 }
0x110d   : > { %v13677_v43 = vpop.f32.mrf.mxu1 }
0x110e   : > { %14813 = vst [vmem:[#allocation69_spill] sm:$0xff] %v13677_v43 }
0x110f   : > { %v13679_v4 = vpop.f32.mrf.mxu1 }
0x1110   : > { %14814 = vst [vmem:[#allocation50_spill] sm:$0xff] %v13679_v4 }
0x1111   : > { %v13683_v60 = vpop.f32.mrf.mxu1 }
0x1112   : > { %14815 = vst [vmem:[#allocation63_spill] sm:$0xff] %v13683_v60  ;;  %v7033_v60 = vadd.f32 %v7032_v41, %v13702_v55 }
0x1113   : > { %v13690_v33 = vpop.f32.mrf.mxu1 }
0x1114   : > { %14816 = vst [vmem:[#allocation68_spill] sm:$0xff] %v13690_v33  ;;  %v13717_v33 = vpop.f32.mrf.mxu0  ;;  %v7146_v15 = vadd.f32 %v7145_v48, %v7033_v60 }
0x1115   : > { %v13694_v39 = vpop.f32.mrf.mxu1 }
0x1116   : > { %14817 = vst [vmem:[#allocation32_spill] sm:$0xff] %v13694_v39  ;;  %v13724_v53 = vpop.f32.mrf.mxu0 }
0x1117   : > { %v13699_v52 = vpop.f32.mrf.mxu1 }
0x1118   : > { %14818 = vst [vmem:[#allocation41_spill] sm:$0xff] %v13699_v52  ;;  %v7031_v52 = vadd.f32 %v7030_v44, %v13697_v25  ;;  %v7039_v44 = vadd.f32 %v13629_v18, %v13702_v55 }
0x1119   : > { %v13706_v56 = vpop.f32.mrf.mxu1 }
0x111a   : > { %14819 = vst [vmem:[#allocation15_spill] sm:$0xff] %v13706_v56  ;;  %v7144_v0 = vadd.f32 %v7143_v24, %v7031_v52  ;;  %v7152_v60 = vadd.f32 %v7151_v59, %v7039_v44 }
0x111b   : > { %v13709_v30 = vpop.f32.mrf.mxu1 }
0x111c   : > { %14820 = vst [vmem:[#allocation38_spill] sm:$0xff] %v13709_v30  ;;  %v7037_v30 = vadd.f32 %v7036_v20, %v13697_v25 }
0x111d   : > { %v13714_v39 = vpop.f32.mrf.mxu1 }
0x111e   : > { %v7150_v52 = vadd.f32 %v7149_v61, %v7037_v30 }
0x111f   : > { %v7252_v17 = vpop.f32.mrf.mxu1 }
0x1120   : > { %v7253_v56 = vadd.f32 %v7252_v17, %v7140_v21  ;;  %v7049_v21 = vadd.f32 %v13637_v40, %v13702_v55 }
0x1121   : > { %v7254_v4 = vpop.f32.mrf.mxu1 }
0x1122   : > { %v13722_v5 = vadd.f32 %v7253_v56, %v12747_v35  ;;  %v7255_v43 = vadd.f32 %v7254_v4, %v7142_v27  ;;  %v7041_v35 = vadd.f32 %v13631_v23, %v13697_v25  ;;  %v13739_v4 = vpop.f32.mrf.mxu0 }
0x1123   : > { %v7256_v2 = vpop.f32.mrf.mxu1 }
0x1124   : > { %7363 = vst [vmem:[#allocation2] sm:$0xff] %v13722_v5  ;;  %v13730_v41 = vadd.f32 %v7255_v43, %v12744_v46  ;;  %v7257_v3 = vadd.f32 %v7256_v2, %v7144_v0  ;;  %v7043_v46 = vadd.f32 %v13633_v34, %v13702_v55  ;;  %v7154_v56 = vadd.f32 %v13647_v6, %v7041_v35  ;;  %v13755_v34 = vpop.f32.mrf.mxu0 }
0x1125   : > { %v7258_v24 = vpop.f32.mrf.mxu1  ;;  %v7059_v35 = vadd.f32 %v13645_v31, %v13702_v55 }
0x1126   : > { %7364 = vst.msk [vmem:[#allocation2 + $0x8] sm:$0xff] %vm672_vm1, %v13730_v41  ;;  %v13737_v20 = vadd.f32 %v7257_v3, %v12763_v1  ;;  %v7259_v48 = vadd.f32 %v7258_v24, %v7146_v15  ;;  %v7047_v1 = vadd.f32 %v13635_v62, %v13697_v25  ;;  %v13772_v40 = vpop.f32.mrf.mxu0  ;;  %v7053_v15 = vadd.f32 %v13641_v45, %v13702_v55 }
0x1127   : > { %v7262_v18 = vpop.f32.mrf.mxu1 }
0x1128   : > { %7365 = vst [vmem:[#allocation2 + $0x10] sm:$0xff] %v13737_v20  ;;  %v13745_v61 = vadd.f32 %v7259_v48, %v12758_v14  ;;  %v7263_v23 = vadd.f32 %v7262_v18, %v7150_v52  ;;  %v7156_v14 = vadd.f32 %v13651_v7, %v7043_v46  ;;  %v7160_v27 = vadd.f32 %v13657_v19, %v7047_v1  ;;  %v13789_v45 = vpop.f32.mrf.mxu0 }
0x1129   : > { %v7264_v43 = vpop.f32.mrf.mxu1 }
0x112a   : > { %7366 = vst.msk [vmem:[#allocation2 + $0x18] sm:$0xff] %vm672_vm1, %v13745_v61  ;;  %v13753_v59 = vadd.f32 %v7263_v23, %v12766_v49  ;;  %v7265_v30 = vadd.f32 %v7264_v43, %v7152_v60  ;;  %v7051_v49 = vadd.f32 %v13639_v13, %v13697_v25  ;;  %v14821_v60 = vld [vmem:[#allocation23_spill] sm:$0xff]  ;;  %v7193_v31 = vpop.f32.mrf.mxu0  ;;  %v7172_v43 = vadd.f32 %v13692_v58, %v7059_v35 }
0x112b   : > { %v7266_v37 = vpop.f32.mrf.mxu1  ;;  %v7077_v35 = vadd.f32 %v13667_v32, %v13697_v25 }
0x112c   : > { %7367 = vst [vmem:[#allocation2 + $0x20] sm:$0xff] %v13753_v59  ;;  %v13762_v6 = vadd.f32 %v7265_v30, %v12742_v29  ;;  %v7267_v62 = vadd.f32 %v7266_v37, %v7154_v56  ;;  %v7162_v29 = vadd.f32 %v13663_v57, %v7049_v21  ;;  %v7164_v3 = vadd.f32 %v13669_v11, %v7051_v49 }
0x112d   : > { %v7268_v17 = vpop.f32.mrf.mxu1  ;;  %v7067_v37 = vadd.f32 %v13655_v42, %v13697_v25 }
0x112e   : > { %7368 = vst.msk [vmem:[#allocation2 + $0x28] sm:$0xff] %vm672_vm1, %v13762_v6  ;;  %v13770_v7 = vadd.f32 %v7267_v62, %v12783_v26  ;;  %v7269_v0 = vadd.f32 %v7268_v17, %v7156_v14  ;;  %v7057_v26 = vadd.f32 %v13643_v28, %v13697_v25  ;;  %v14823_v14 = vld [vmem:[#allocation21_spill] sm:$0xff] }
0x112f   : > { %v7272_v2 = vpop.f32.mrf.mxu1 }
0x1130   : > { %7369 = vst [vmem:[#allocation2 + $0x30] sm:$0xff] %v13770_v7  ;;  %v13779_v19 = vadd.f32 %v7269_v0, %v12756_v54  ;;  %v7273_v13 = vadd.f32 %v7272_v2, %v7160_v27  ;;  %v7166_v54 = vadd.f32 %v13675_v22, %v7053_v15  ;;  %v7170_v18 = vadd.f32 %v13681_v10, %v7057_v26  ;;  %v14822_v10 = vld [vmem:[#allocation24_spill] sm:$0xff] }
0x1131   : > { %v7274_v44 = vpop.f32.mrf.mxu1  ;;  %v7069_v27 = vadd.f32 %v13659_v9, %v13702_v55  ;;  %v7180_v2 = vadd.f32 %v13717_v33, %v7067_v37  ;;  %v14825_v15 = vld [vmem:[#allocation20_spill] sm:$0xff]  ;;  %v7073_v26 = vadd.f32 %v13665_v38, %v13702_v55  ;;  %v14826_v33 = vld [vmem:[#allocation26_spill] sm:$0xff] }
0x1132   : > { %7370 = vst.msk [vmem:[#allocation2 + $0x38] sm:$0xff] %vm672_vm1, %v13779_v19  ;;  %v13787_v57 = vadd.f32 %v7273_v13, %v12803_v36  ;;  %v7275_v24 = vadd.f32 %v7274_v44, %v7162_v29  ;;  %v7061_v36 = vadd.f32 %v13649_v50, %v13697_v25  ;;  %v7071_v29 = vadd.f32 %v13661_v16, %v13697_v25 }
0x1133   : > { %v7276_v52 = vpop.f32.mrf.mxu1 }
0x1134   : > { %7371 = vst [vmem:[#allocation2 + $0x40] sm:$0xff] %v13787_v57  ;;  %v13796_v11 = vadd.f32 %v7275_v24, %v12800_v8  ;;  %v7277_v28 = vadd.f32 %v7276_v52, %v7164_v3  ;;  %v7063_v8 = vadd.f32 %v13653_v51, %v13702_v55  ;;  %v7174_v30 = vadd.f32 %v13704_v63, %v7061_v36  ;;  %v7195_v51 = vpop.f32.mrf.mxu0  ;;  %v14824_v63 = vld [vmem:[#allocation10_spill] sm:$0xff] }
0x1135   : > { %v7278_v48 = vpop.f32.mrf.mxu1  ;;  %v7182_v3 = vadd.f32 %v13724_v53, %v7069_v27  ;;  %v7186_v36 = vadd.f32 %v13755_v34, %v7073_v26 }
0x1136   : > { %7372 = vst.msk [vmem:[#allocation2 + $0x48] sm:$0xff] %vm672_vm1, %v13796_v11  ;;  %v13804_v22 = vadd.f32 %v7277_v28, %v14821_v60  ;;  %v7279_v46 = vadd.f32 %v7278_v48, %v7166_v54  ;;  %v7176_v17 = vadd.f32 %v13712_v47, %v7063_v8  ;;  %v7199_v9 = vpop.f32.mrf.mxu0  ;;  %v7184_v54 = vadd.f32 %v13739_v4, %v7071_v29  ;;  %v14827_v28 = vld [vmem:[#allocation16_spill] sm:$0xff]  ;;  %v14828_v4 = vld [vmem:[#allocation18_spill] sm:$0xff] }
0x1137   : > { %v7282_v23 = vpop.f32.mrf.mxu1  ;;  %v7079_v60 = vadd.f32 %v13671_v12, %v13702_v55  ;;  %v14829_v8 = vld [vmem:[#allocation54_spill] sm:$0xff] }
0x1138   : > { %7373 = vst [vmem:[#allocation2 + $0x50] sm:$0xff] %v13804_v22  ;;  %v13811_v56 = vadd.f32 %v7279_v46, %v14822_v10  ;;  %v7283_v50 = vadd.f32 %v7282_v23, %v7170_v18  ;;  %v7201_v38 = vpop.f32.mrf.mxu0  ;;  %v7081_v10 = vadd.f32 %v14829_v8, %v13697_v25 }
0x1139   : > { %v7284_v1 = vpop.f32.mrf.mxu1  ;;  %v7192_v37 = vadd.f32 %v13789_v45, %v7079_v60 }
0x113a   : > { %7374 = vst.msk [vmem:[#allocation2 + $0x58] sm:$0xff] %vm672_vm1, %v13811_v56  ;;  %v13819_v58 = vadd.f32 %v7283_v50, %v14823_v14  ;;  %v7285_v21 = vadd.f32 %v7284_v1, %v7172_v43  ;;  %v7190_v43 = vadd.f32 %v13772_v40, %v7077_v35  ;;  %v14830_v50 = vld [vmem:[#allocation61_spill] sm:$0xff]  ;;  %v7203_v12 = vpop.f32.mrf.mxu0  ;;  %v14837_v35 = vld [vmem:[#allocation68_spill] sm:$0xff] }
0x113b   : > { %v7286_v62 = vpop.f32.mrf.mxu1  ;;  %v14831_v14 = vld [vmem:[#allocation69_spill] sm:$0xff] }
0x113c   : > { %7375 = vst [vmem:[#allocation2 + $0x60] sm:$0xff] %v13819_v58  ;;  %v13826_v49 = vadd.f32 %v7285_v21, %v14824_v63  ;;  %v7287_v42 = vadd.f32 %v7286_v62, %v7174_v30  ;;  %v7083_v21 = vadd.f32 %v14831_v14, %v13702_v55  ;;  %v14832_v40 = vld [vmem:[#allocation13_spill] sm:$0xff]  ;;  %v7194_v63 = vadd.f32 %v7193_v31, %v7081_v10 }
0x113d   : > { %v7288_v0 = vpop.f32.mrf.mxu1 }
0x113e   : > { %7376 = vst.msk [vmem:[#allocation2 + $0x68] sm:$0xff] %vm672_vm1, %v13826_v49  ;;  %v13834_v47 = vadd.f32 %v7287_v42, %v14825_v15  ;;  %v7289_v13 = vadd.f32 %v7288_v0, %v7176_v17  ;;  %v14833_v42 = vld [vmem:[#allocation50_spill] sm:$0xff]  ;;  %v7205_v15 = vpop.f32.mrf.mxu0 }
0x113f   : > { %v7292_v44 = vpop.f32.mrf.mxu1  ;;  %v7087_v0 = vadd.f32 %v14833_v42, %v13697_v25  ;;  %v14844_v42 = vld [vmem:[#allocation36_spill] sm:$0xff] }
0x1140   : > { %7377 = vst [vmem:[#allocation2 + $0x70] sm:$0xff] %v13834_v47  ;;  %v13841_v24 = vadd.f32 %v7289_v13, %v14826_v33  ;;  %v7293_v16 = vadd.f32 %v7292_v44, %v7180_v2  ;;  %v14834_v2 = vld [vmem:[#allocation42_spill] sm:$0xff]  ;;  %v7196_v44 = vadd.f32 %v7195_v51, %v7083_v21  ;;  %v14836_v33 = vld [vmem:[#allocation17_spill] sm:$0xff] }
0x1141   : > { %v7294_v52 = vpop.f32.mrf.mxu1 }
0x1142   : > { %7378 = vst.msk [vmem:[#allocation2 + $0x78] sm:$0xff] %vm672_vm1, %v13841_v24  ;;  %v13849_v53 = vadd.f32 %v7293_v16, %v14827_v28  ;;  %v7295_v48 = vadd.f32 %v7294_v52, %v7182_v3  ;;  %v14835_v3 = vld [vmem:[#allocation63_spill] sm:$0xff]  ;;  %v7091_v28 = vadd.f32 %v14837_v35, %v13697_v25 }
0x1143   : > { %v7296_v18 = vpop.f32.mrf.mxu1  ;;  %v7089_v26 = vadd.f32 %v14835_v3, %v13702_v55  ;;  %v14846_v3 = vld [vmem:[#allocation33_spill] sm:$0xff]  ;;  %v14847_v35 = vld [vmem:[#allocation55_spill] sm:$0xff] }
0x1144   : > { %7379 = vst [vmem:[#allocation2 + $0x80] sm:$0xff] %v13849_v53  ;;  %v13856_v46 = vadd.f32 %v7295_v48, %v14828_v4  ;;  %v7297_v32 = vadd.f32 %v7296_v18, %v7184_v54  ;;  %v7200_v54 = vadd.f32 %v7199_v9, %v7087_v0  ;;  %v14838_v48 = vld [vmem:[#allocation31_spill] sm:$0xff] }
0x1145   : > { %v7298_v23 = vpop.f32.mrf.mxu1  ;;  %v7202_v4 = vadd.f32 %v7201_v38, %v7089_v26 }
0x1146   : > { %7380 = vst.msk [vmem:[#allocation2 + $0x88] sm:$0xff] %vm672_vm1, %v13856_v46  ;;  %v13864_v34 = vadd.f32 %v7297_v32, %v14830_v50  ;;  %v7299_v1 = vadd.f32 %v7298_v23, %v7186_v36  ;;  %v7209_v36 = vpop.f32.mrf.mxu0  ;;  %v14839_v32 = vld [vmem:[#allocation32_spill] sm:$0xff]  ;;  %v7204_v50 = vadd.f32 %v7203_v12, %v7091_v28 }
0x1147   : > { %v7302_v30 = vpop.f32.mrf.mxu1  ;;  %v7093_v23 = vadd.f32 %v14839_v32, %v13702_v55 }
0x1148   : > { %7381 = vst [vmem:[#allocation2 + $0x90] sm:$0xff] %v13864_v34  ;;  %v13871_v62 = vadd.f32 %v7299_v1, %v14832_v40  ;;  %v7303_v17 = vadd.f32 %v7302_v30, %v7190_v43  ;;  %v14840_v43 = vld [vmem:[#allocation53_spill] sm:$0xff]  ;;  %v7211_v21 = vpop.f32.mrf.mxu0 }
0x1149   : > { %v7304_v27 = vpop.f32.mrf.mxu1  ;;  %v14841_v1 = vld [vmem:[#allocation41_spill] sm:$0xff] }
0x114a   : > { %7382 = vst.msk [vmem:[#allocation2 + $0x98] sm:$0xff] %vm672_vm1, %v13871_v62  ;;  %v13878_v29 = vadd.f32 %v7303_v17, %v14834_v2  ;;  %v7305_v45 = vadd.f32 %v7304_v27, %v7192_v37  ;;  %v7097_v30 = vadd.f32 %v14841_v1, %v13697_v25  ;;  %v14842_v37 = vld [vmem:[#allocation39_spill] sm:$0xff]  ;;  %v7206_v17 = vadd.f32 %v7205_v15, %v7093_v23 }
0x114b   : > { %v7306_v13 = vpop.f32.mrf.mxu1  ;;  %v14843_v27 = vld [vmem:[#allocation15_spill] sm:$0xff] }
0x114c   : > { %7383 = vst [vmem:[#allocation2 + $0xa0] sm:$0xff] %v13878_v29  ;;  %v13884_v31 = vadd.f32 %v7305_v45, %v14836_v33  ;;  %v7307_v16 = vadd.f32 %v7306_v13, %v7194_v63  ;;  %v7099_v63 = vadd.f32 %v14843_v27, %v13702_v55  ;;  %v7210_v45 = vadd.f32 %v7209_v36, %v7097_v30  ;;  %v14845_v13 = vld [vmem:[#allocation38_spill] sm:$0xff]  ;;  %v7213_v33 = vpop.f32.mrf.mxu0  ;;  %v14848_v36 = vld [vmem:[#allocation60_spill] sm:$0xff] }
0x114d   : > { %v7308_v52 = vpop.f32.mrf.mxu1 }
0x114e   : > { %7384 = vst.msk [vmem:[#allocation2 + $0xa8] sm:$0xff] %vm672_vm1, %v13884_v31  ;;  %v13891_v18 = vadd.f32 %v7307_v16, %v14838_v48  ;;  %v7309_v51 = vadd.f32 %v7308_v52, %v7196_v44  ;;  %v7101_v44 = vadd.f32 %v14845_v13, %v13697_v25  ;;  %v7212_v52 = vadd.f32 %v7211_v21, %v7099_v63  ;;  %v7215_v32 = vpop.f32.mrf.mxu0 }
0x114f   : > { %v7312_v60 = vpop.f32.mrf.mxu1 }
0x1150   : > { %7385 = vst [vmem:[#allocation2 + $0xb0] sm:$0xff] %v13891_v18  ;;  %v13897_v9 = vadd.f32 %v7309_v51, %v14840_v43  ;;  %v7313_v8 = vadd.f32 %v7312_v60, %v7200_v54  ;;  %v7103_v54 = vadd.f32 %v13714_v39, %v13702_v55  ;;  %v7214_v51 = vadd.f32 %v7213_v33, %v7101_v44  ;;  %v14849_v39 = vld [vmem:[#allocation66_spill] sm:$0xff] }
0x1151   : > { %v7314_v10 = vpop.f32.mrf.mxu1 }
0x1152   : > { %7386 = vst.msk [vmem:[#allocation2 + $0xb8] sm:$0xff] %vm672_vm1, %v13897_v9  ;;  %v13904_v14 = vadd.f32 %v7313_v8, %v14842_v37  ;;  %v7315_v38 = vadd.f32 %v7314_v10, %v7202_v4  ;;  %v7216_v43 = vadd.f32 %v7215_v32, %v7103_v54  ;;  %v14851_v37 = vld [vmem:[#allocation57_spill] sm:$0xff] }
0x1153   : > { %v7316_v40 = vpop.f32.mrf.mxu1 }
0x1154   : > { %7387 = vst [vmem:[#allocation2 + $0xc0] sm:$0xff] %v13904_v14  ;;  %v13910_v12 = vadd.f32 %v7315_v38, %v14844_v42  ;;  %v7317_v0 = vadd.f32 %v7316_v40, %v7204_v50  ;;  %v14850_v50 = vld [vmem:[#allocation37_spill] sm:$0xff] }
0x1155   : > { %v7318_v2 = vpop.f32.mrf.mxu1 }
0x1156   : > { %7388 = vst.msk [vmem:[#allocation2 + $0xc8] sm:$0xff] %vm672_vm1, %v13910_v12  ;;  %v13917_v26 = vadd.f32 %v7317_v0, %v14846_v3  ;;  %v7319_v15 = vadd.f32 %v7318_v2, %v7206_v17 }
0x1157   : > { %v7322_v16 = vpop.f32.mrf.mxu1 }
0x1158   : > { %7389 = vst [vmem:[#allocation2 + $0xd0] sm:$0xff] %v13917_v26  ;;  %v13923_v28 = vadd.f32 %v7319_v15, %v14847_v35  ;;  %v7323_v48 = vadd.f32 %v7322_v16, %v7210_v45 }
0x1159   : > { %v7324_v25 = vpop.f32.mrf.mxu1 }
0x115a   : > { %7390 = vst.msk [vmem:[#allocation2 + $0xd8] sm:$0xff] %vm672_vm1, %v13923_v28  ;;  %v13928_v60 = vadd.f32 %v7323_v48, %v14848_v36  ;;  %v7325_v4 = vadd.f32 %v7324_v25, %v7212_v52 }
0x115b   : > { %v7326_v23 = vpop.f32.mrf.mxu1 }
0x115c   : > { %7391 = vst [vmem:[#allocation2 + $0xe0] sm:$0xff] %v13928_v60  ;;  %v13932_v55 = vadd.f32 %v7325_v4, %v14849_v39  ;;  %v7327_v8 = vadd.f32 %v7326_v23, %v7214_v51 }
0x115d   : > { %v7328_v10 = vpop.f32.mrf.mxu1 }
0x115e   : > { %7392 = vst.msk [vmem:[#allocation2 + $0xe8] sm:$0xff] %vm672_vm1, %v13932_v55  ;;  %v13937_v1 = vadd.f32 %v7327_v8, %v14850_v50  ;;  %v7329_v30 = vadd.f32 %v7328_v10, %v7216_v43  ;;  %7398 = sbr.rel (%p8268_p5) target bundleno = 4803 (0x12c3), region = 80 }
0x1160   : > { %7393 = vst [vmem:[#allocation2 + $0xf0] sm:$0xff] %v13937_v1  ;;  %v13941_v38 = vadd.f32 %v7329_v30, %v14851_v37 }
0x1162   : > { %7394 = vst.msk [vmem:[#allocation2 + $0xf8] sm:$0xff] %vm672_vm1, %v13941_v38 }
0x1163   : > { %v7401_v21 = vsel %vm672_vm1, %v13730_v41, 0.0  ;;  %v7409_v40 = vsel %vm672_vm1, %v13762_v6, 0.0  ;;  %v7405_v17 = vsel %vm672_vm1, %v13745_v61, 0.0  ;;  %v7413_v27 = vsel %vm672_vm1, %v13779_v19, 0.0 }
0x1164   : > { %v7402_v63 = vadd.f32 %v7401_v21, %v13722_v5  ;;  %v7410_v42 = vadd.f32 %v7409_v40, %v13753_v59  ;;  %v7406_v0 = vadd.f32 %v7405_v17, %v13737_v20  ;;  %v7414_v2 = vadd.f32 %v7413_v27, %v13770_v7 }
0x1165   : > { %v7417_v45 = vsel %vm672_vm1, %v13796_v11, 0.0  ;;  %v7421_v13 = vsel %vm672_vm1, %v13811_v56, 0.0  ;;  %v7425_v15 = vsel %vm672_vm1, %v13826_v49, 0.0  ;;  %v7429_v33 = vsel %vm672_vm1, %v13841_v24, 0.0 }
0x1166   : > { %7403 = vadd.xlane.f32.xlu0 %v7402_v63  ;;  %7411 = vadd.xlane.f32.xlu1 %v7410_v42  ;;  %v7418_v44 = vadd.f32 %v7417_v45, %v13787_v57  ;;  %v7422_v3 = vadd.f32 %v7421_v13, %v13804_v22  ;;  %v7426_v16 = vadd.f32 %v7425_v15, %v13819_v58  ;;  %v7433_v54 = vsel %vm672_vm1, %v13856_v46, 0.0 }
0x1167   : > { %v7430_v52 = vadd.f32 %v7429_v33, %v13834_v47  ;;  %v7437_v35 = vsel %vm672_vm1, %v13871_v62, 0.0  ;;  %v7434_v48 = vadd.f32 %v7433_v54, %v13849_v53  ;;  %v7441_v51 = vsel %vm672_vm1, %v13884_v31, 0.0 }
0x1168   : > { %v7438_v25 = vadd.f32 %v7437_v35, %v13864_v34  ;;  %v7445_v36 = vsel %vm672_vm1, %v13897_v9, 0.0  ;;  %v7442_v4 = vadd.f32 %v7441_v51, %v13878_v29  ;;  %v7449_v23 = vsel %vm672_vm1, %v13910_v12, 0.0 }
0x1169   : > { %v7446_v32 = vadd.f32 %v7445_v36, %v13891_v18  ;;  %v7453_v43 = vsel %vm672_vm1, %v13923_v28, 0.0  ;;  %v7450_v39 = vadd.f32 %v7449_v23, %v13904_v14  ;;  %v7457_v10 = vsel %vm672_vm1, %v13932_v55, 0.0 }
0x116a   : > { %7407 = vadd.xlane.f32.xlu0 %v7406_v0  ;;  %7415 = vadd.xlane.f32.xlu1 %v7414_v2  ;;  %v7454_v8 = vadd.f32 %v7453_v43, %v13917_v26  ;;  %v7461_v50 = vsel %vm672_vm1, %v13941_v38, 0.0  ;;  %v7458_v30 = vadd.f32 %v7457_v10, %v13928_v60 }
0x116b   : > { %v7462_v37 = vadd.f32 %v7461_v50, %v13937_v1 }
0x116e   : > { %7419 = vadd.xlane.f32.xlu0 %v7418_v44  ;;  %7423 = vadd.xlane.f32.xlu1 %v7422_v3 }
0x1172   : > { %7427 = vadd.xlane.f32.xlu0 %v7426_v16  ;;  %7431 = vadd.xlane.f32.xlu1 %v7430_v52 }
0x1176   : > { %7435 = vadd.xlane.f32.xlu0 %v7434_v48  ;;  %7439 = vadd.xlane.f32.xlu1 %v7438_v25 }
0x117a   : > { %7443 = vadd.xlane.f32.xlu0 %v7442_v4  ;;  %7447 = vadd.xlane.f32.xlu1 %v7446_v32 }
0x117e   : > { %7451 = vadd.xlane.f32.xlu0 %v7450_v39  ;;  %7455 = vadd.xlane.f32.xlu1 %v7454_v8 }
0x1182   : > { %7459 = vadd.xlane.f32.xlu0 %v7458_v30  ;;  %7463 = vadd.xlane.f32.xlu1 %v7462_v37 }
0x11ef   : > { %v7404_v21 = vpop.xlane.xlu0 %7403  ;;  %v7412_v40 = vpop.xlane.xlu1 %7411 }
0x11f0   : > { %v7465_v17 = vmul.f32 0.0052083335, %v7404_v21  ;;  %v7467_v27 = vmul.f32 0.0052083335, %v7412_v40 }
0x11f2   : > { %v13995_v63 = vsub.f32 %v13722_v5, %v7465_v17  ;;  %v13998_v42 = vsub.f32 %v13730_v41, %v7465_v17  ;;  %v14001_v0 = vsub.f32 %v13753_v59, %v7467_v27  ;;  %v14004_v2 = vsub.f32 %v13762_v6, %v7467_v27 }
0x11f3   : > { %v7408_v45 = vpop.xlane.xlu0 %7407  ;;  %v7416_v13 = vpop.xlane.xlu1 %7415 }
0x11f4   : > { %v7466_v44 = vmul.f32 0.0052083335, %v7408_v45  ;;  %v7468_v3 = vmul.f32 0.0052083335, %v7416_v13  ;;  %v7513_v15 = vmul.f32 %v13995_v63, %v13995_v63  ;;  %v7514_v5 = vmul.f32 %v13998_v42, %v13998_v42 }
0x11f5   : > { %v7517_v41 = vmul.f32 %v14001_v0, %v14001_v0  ;;  %v7518_v59 = vmul.f32 %v14004_v2, %v14004_v2 }
0x11f6   : > { %v14015_v33 = vsub.f32 %v13737_v20, %v7466_v44  ;;  %v14018_v6 = vsub.f32 %v13745_v61, %v7466_v44  ;;  %v14021_v16 = vsub.f32 %v13770_v7, %v7468_v3  ;;  %v14024_v52 = vsub.f32 %v13779_v19, %v7468_v3 }
0x11f7   : > { %v7420_v54 = vpop.xlane.xlu0 %7419  ;;  %v7545_v35 = vsel %vm672_vm1, %v7514_v5, 0.0  ;;  %v7424_v48 = vpop.xlane.xlu1 %7423  ;;  %v7553_v25 = vsel %vm672_vm1, %v7518_v59, 0.0 }
0x11f8   : > { %v7469_v51 = vmul.f32 0.0052083335, %v7420_v54  ;;  %v7546_v36 = vadd.f32 %v7545_v35, %v7513_v15  ;;  %v7470_v4 = vmul.f32 0.0052083335, %v7424_v48  ;;  %v7554_v20 = vadd.f32 %v7553_v25, %v7517_v41 }
0x11f9   : > { %v7515_v61 = vmul.f32 %v14015_v33, %v14015_v33  ;;  %v7516_v7 = vmul.f32 %v14018_v6, %v14018_v6  ;;  %v7519_v19 = vmul.f32 %v14021_v16, %v14021_v16  ;;  %v7520_v32 = vmul.f32 %v14024_v52, %v14024_v52 }
0x11fa   : > { %v14037_v23 = vsub.f32 %v13787_v57, %v7469_v51  ;;  %v14040_v43 = vsub.f32 %v13796_v11, %v7469_v51  ;;  %7547 = vadd.xlane.f32.xlu0 %v7546_v36  ;;  %v14043_v39 = vsub.f32 %v13804_v22, %v7470_v4  ;;  %v14046_v8 = vsub.f32 %v13811_v56, %v7470_v4 }
0x11fb   : > { %v7428_v10 = vpop.xlane.xlu0 %7427  ;;  %v7549_v50 = vsel %vm672_vm1, %v7516_v7, 0.0  ;;  %v7432_v30 = vpop.xlane.xlu1 %7431  ;;  %v7557_v37 = vsel %vm672_vm1, %v7520_v32, 0.0 }
0x11fc   : > { %v7471_v21 = vmul.f32 0.0052083335, %v7428_v10  ;;  %v7550_v40 = vadd.f32 %v7549_v50, %v7515_v61  ;;  %v7472_v57 = vmul.f32 0.0052083335, %v7432_v30  ;;  %v7558_v17 = vadd.f32 %v7557_v37, %v7519_v19 }
0x11fd   : > { %v7521_v11 = vmul.f32 %v14037_v23, %v14037_v23  ;;  %v7522_v22 = vmul.f32 %v14040_v43, %v14040_v43  ;;  %v7523_v56 = vmul.f32 %v14043_v39, %v14043_v39  ;;  %v7524_v27 = vmul.f32 %v14046_v8, %v14046_v8 }
0x11fe   : > { %v14059_v45 = vsub.f32 %v13819_v58, %v7471_v21  ;;  %v14062_v13 = vsub.f32 %v13826_v49, %v7471_v21  ;;  %7555 = vadd.xlane.f32.xlu0 %v7554_v20  ;;  %7551 = vadd.xlane.f32.xlu1 %v7550_v40  ;;  %v14065_v44 = vsub.f32 %v13834_v47, %v7472_v57 }
0x11ff   : > { %v14068_v3 = vsub.f32 %v13841_v24, %v7472_v57  ;;  %v7436_v15 = vpop.xlane.xlu0 %7435  ;;  %v7561_v5 = vsel %vm672_vm1, %v7522_v22, 0.0  ;;  %v7440_v41 = vpop.xlane.xlu1 %7439  ;;  %v7565_v59 = vsel %vm672_vm1, %v7524_v27, 0.0 }
0x1200   : > { %v7473_v54 = vmul.f32 0.0052083335, %v7436_v15  ;;  %v7562_v58 = vadd.f32 %v7561_v5, %v7521_v11  ;;  %v7474_v35 = vmul.f32 0.0052083335, %v7440_v41  ;;  %v7566_v48 = vadd.f32 %v7565_v59, %v7523_v56 }
0x1201   : > { %v7525_v49 = vmul.f32 %v14059_v45, %v14059_v45  ;;  %v7526_v47 = vmul.f32 %v14062_v13, %v14062_v13  ;;  %v7527_v24 = vmul.f32 %v14065_v44, %v14065_v44  ;;  %v7528_v25 = vmul.f32 %v14068_v3, %v14068_v3 }
0x1202   : > { %v14081_v51 = vsub.f32 %v13849_v53, %v7473_v54  ;;  %v14084_v36 = vsub.f32 %v13856_v46, %v7473_v54  ;;  %7559 = vadd.xlane.f32.xlu1 %v7558_v17  ;;  %7563 = vadd.xlane.f32.xlu0 %v7562_v58  ;;  %v14087_v4 = vsub.f32 %v13864_v34, %v7474_v35 }
0x1203   : > { %v14090_v20 = vsub.f32 %v13871_v62, %v7474_v35  ;;  %v7444_v61 = vpop.xlane.xlu0 %7443  ;;  %v7569_v7 = vsel %vm672_vm1, %v7526_v47, 0.0  ;;  %v7448_v19 = vpop.xlane.xlu1 %7447  ;;  %v7573_v32 = vsel %vm672_vm1, %v7528_v25, 0.0 }
0x1204   : > { %v7475_v10 = vmul.f32 0.0052083335, %v7444_v61  ;;  %v7570_v53 = vadd.f32 %v7569_v7, %v7525_v49  ;;  %v7476_v50 = vmul.f32 0.0052083335, %v7448_v19  ;;  %v7574_v30 = vadd.f32 %v7573_v32, %v7527_v24 }
0x1205   : > { %v7529_v46 = vmul.f32 %v14081_v51, %v14081_v51  ;;  %v7530_v34 = vmul.f32 %v14084_v36, %v14084_v36  ;;  %v7531_v62 = vmul.f32 %v14087_v4, %v14087_v4  ;;  %v7532_v37 = vmul.f32 %v14090_v20, %v14090_v20 }
0x1206   : > { %v14103_v21 = vsub.f32 %v13878_v29, %v7475_v10  ;;  %v14106_v40 = vsub.f32 %v13884_v31, %v7475_v10  ;;  %7567 = vadd.xlane.f32.xlu1 %v7566_v48  ;;  %7571 = vadd.xlane.f32.xlu0 %v7570_v53  ;;  %v14109_v57 = vsub.f32 %v13891_v18, %v7476_v50 }
0x1207   : > { %v14112_v17 = vsub.f32 %v13897_v9, %v7476_v50  ;;  %v7452_v11 = vpop.xlane.xlu0 %7451  ;;  %v7577_v22 = vsel %vm672_vm1, %v7530_v34, 0.0  ;;  %v7456_v56 = vpop.xlane.xlu1 %7455  ;;  %v7581_v27 = vsel %vm672_vm1, %v7532_v37, 0.0 }
0x1208   : > { %v7477_v15 = vmul.f32 0.0052083335, %v7452_v11  ;;  %v7578_v29 = vadd.f32 %v7577_v22, %v7529_v46  ;;  %v7478_v5 = vmul.f32 0.0052083335, %v7456_v56  ;;  %v7582_v41 = vadd.f32 %v7581_v27, %v7531_v62 }
0x1209   : > { %v7533_v31 = vmul.f32 %v14103_v21, %v14103_v21  ;;  %v7534_v18 = vmul.f32 %v14106_v40, %v14106_v40  ;;  %v7535_v9 = vmul.f32 %v14109_v57, %v14109_v57  ;;  %v7536_v59 = vmul.f32 %v14112_v17, %v14112_v17 }
0x120a   : > { %v14125_v54 = vsub.f32 %v13904_v14, %v7477_v15  ;;  %v14128_v58 = vsub.f32 %v13910_v12, %v7477_v15  ;;  %7575 = vadd.xlane.f32.xlu1 %v7574_v30  ;;  %7579 = vadd.xlane.f32.xlu0 %v7578_v29  ;;  %v14131_v35 = vsub.f32 %v13917_v26, %v7478_v5 }
0x120b   : > { %v14134_v48 = vsub.f32 %v13923_v28, %v7478_v5  ;;  %v7460_v49 = vpop.xlane.xlu0 %7459  ;;  %v7585_v47 = vsel %vm672_vm1, %v7534_v18, 0.0  ;;  %v7464_v24 = vpop.xlane.xlu1 %7463  ;;  %v7589_v25 = vsel %vm672_vm1, %v7536_v59, 0.0 }
0x120c   : > { %v7479_v61 = vmul.f32 0.0052083335, %v7460_v49  ;;  %v7586_v14 = vadd.f32 %v7585_v47, %v7533_v31  ;;  %v7480_v7 = vmul.f32 0.0052083335, %v7464_v24  ;;  %v7590_v19 = vadd.f32 %v7589_v25, %v7535_v9 }
0x120d   : > { %v7537_v12 = vmul.f32 %v14125_v54, %v14125_v54  ;;  %v7538_v26 = vmul.f32 %v14128_v58, %v14128_v58  ;;  %v7539_v28 = vmul.f32 %v14131_v35, %v14131_v35  ;;  %v7540_v32 = vmul.f32 %v14134_v48, %v14134_v48 }
0x120e   : > { %v14147_v10 = vsub.f32 %v13928_v60, %v7479_v61  ;;  %v14150_v53 = vsub.f32 %v13932_v55, %v7479_v61  ;;  %7583 = vadd.xlane.f32.xlu1 %v7582_v41  ;;  %7587 = vadd.xlane.f32.xlu0 %v7586_v14  ;;  %v14153_v50 = vsub.f32 %v13937_v1, %v7480_v7 }
0x120f   : > { %v14156_v30 = vsub.f32 %v13941_v38, %v7480_v7  ;;  %v7593_v46 = vsel %vm672_vm1, %v7538_v26, 0.0  ;;  %v7597_v34 = vsel %vm672_vm1, %v7540_v32, 0.0  ;;  %v7399_v26 = vld [vmem:[%s14852_s16] sm:$0x3] }
0x1210   : > { %v7594_v62 = vadd.f32 %v7593_v46, %v7537_v12  ;;  %v7541_v60 = vmul.f32 %v14147_v10, %v14147_v10  ;;  %v7542_v55 = vmul.f32 %v14150_v53, %v14150_v53  ;;  %v7598_v1 = vadd.f32 %v7597_v34, %v7539_v28  ;;  %v7400_v46 = vld [vmem:[%s14853_s25] sm:$0x3] }
0x1211   : > { %v7544_v37 = vmul.f32 %v14156_v30, %v14156_v30  ;;  %v7543_v11 = vmul.f32 %v14153_v50, %v14153_v50 }
0x1212   : > { %7591 = vadd.xlane.f32.xlu1 %v7590_v19  ;;  %7595 = vadd.xlane.f32.xlu0 %v7594_v62  ;;  %v7601_v38 = vsel %vm672_vm1, %v7542_v55, 0.0 }
0x1213   : > { %v7602_v22 = vadd.f32 %v7601_v38, %v7541_v60  ;;  %v7605_v56 = vsel %vm672_vm1, %v7544_v37, 0.0  ;;  %v14854_v60 = vld [vmem:[#allocation6_spill] sm:$0xff]  ;;  %v14855_v38 = vld [vmem:[#allocation5_spill] sm:$0xff] }
0x1214   : > { %v7606_v27 = vadd.f32 %v7605_v56, %v7543_v11  ;;  %v14177_v55 = vrot.slane %v7399_v26, %v14854_v60  ;;  %v14180_v11 = vrot.slane %v7399_v26, %v14855_v38 }
0x1216   : > { %7599 = vadd.xlane.f32.xlu1 %v7598_v1  ;;  %7603 = vadd.xlane.f32.xlu0 %v7602_v22 }
0x121a   : > { %7607 = vadd.xlane.f32.xlu1 %v7606_v27 }
0x1283   : > { %v7548_v15 = vpop.xlane.xlu0 %7547 }
0x1284   : > { %v7609_v29 = vmul.f32 0.0052083335, %v7548_v15  ;;  %v14183_v15 = vrot.slane %v7400_v46, %v14854_v60 }
0x1286   : > { %v7625_v5 = vadd.f32 1e-05, %v7609_v29  ;;  %v14186_v29 = vrot.slane %v7400_v46, %v14855_v38 }
0x1287   : > { %v7552_v41 = vpop.xlane.xlu1 %7551  ;;  %v7556_v31 = vpop.xlane.xlu0 %7555 }
0x1288   : > { %9759 = vrsqrt.f32 %v7625_v5  ;;  %v7610_v18 = vmul.f32 0.0052083335, %v7552_v41  ;;  %v7611_v9 = vmul.f32 0.0052083335, %v7556_v31 }
0x128a   : > { %v7626_v59 = vadd.f32 1e-05, %v7610_v18  ;;  %v7627_v49 = vadd.f32 1e-05, %v7611_v9 }
0x128b   : > { %v7560_v47 = vpop.xlane.xlu1 %7559  ;;  %v7564_v24 = vpop.xlane.xlu0 %7563 }
0x128c   : > { %9761 = vrsqrt.f32 %v7626_v59  ;;  %v7612_v25 = vmul.f32 0.0052083335, %v7560_v47  ;;  %v7613_v61 = vmul.f32 0.0052083335, %v7564_v24 }
0x128d   : > { %9763 = vrsqrt.f32 %v7627_v49 }
0x128e   : > { %v7628_v14 = vadd.f32 1e-05, %v7612_v25  ;;  %v7629_v7 = vadd.f32 1e-05, %v7613_v61 }
0x128f   : > { %v7568_v19 = vpop.xlane.xlu1 %7567  ;;  %v7572_v12 = vpop.xlane.xlu0 %7571 }
0x1290   : > { %9765 = vrsqrt.f32 %v7628_v14  ;;  %v7614_v28 = vmul.f32 0.0052083335, %v7568_v19  ;;  %v7615_v32 = vmul.f32 0.0052083335, %v7572_v12 }
0x1291   : > { %9767 = vrsqrt.f32 %v7629_v7 }
0x1292   : > { %v7630_v34 = vadd.f32 1e-05, %v7614_v28  ;;  %v7631_v62 = vadd.f32 1e-05, %v7615_v32 }
0x1293   : > { %v7576_v37 = vpop.xlane.xlu1 %7575  ;;  %v7580_v1 = vpop.xlane.xlu0 %7579 }
0x1294   : > { %9769 = vrsqrt.f32 %v7630_v34  ;;  %v7616_v22 = vmul.f32 0.0052083335, %v7576_v37  ;;  %v7617_v56 = vmul.f32 0.0052083335, %v7580_v1 }
0x1295   : > { %v9760_v27 = vpop.eup %9759  ;;  %9771 = vrsqrt.f32 %v7631_v62 }
0x1296   : > { %v7657_v5 = vmul.f32 %v9760_v27, %v13995_v63  ;;  %v7658_v41 = vmul.f32 %v9760_v27, %v13998_v42  ;;  %v7632_v31 = vadd.f32 1e-05, %v7616_v22  ;;  %v7633_v18 = vadd.f32 1e-05, %v7617_v56 }
0x1297   : > { %v7584_v9 = vpop.xlane.xlu1 %7583  ;;  %v7588_v59 = vpop.xlane.xlu0 %7587 }
0x1298   : > { %v7700_v49 = vmul.f32 %v14177_v55, %v7657_v5  ;;  %v7701_v47 = vmul.f32 %v14180_v11, %v7658_v41  ;;  %9773 = vrsqrt.f32 %v7632_v31  ;;  %v7618_v24 = vmul.f32 0.0052083335, %v7584_v9 }
0x1299   : > { %v9762_v25 = vpop.eup %9761  ;;  %9775 = vrsqrt.f32 %v7633_v18  ;;  %v7619_v61 = vmul.f32 0.0052083335, %v7588_v59 }
0x129a   : > { %v9764_v14 = vpop.eup %9763  ;;  %v7743_v7 = vadd.f32 %v14183_v15, %v7700_v49  ;;  %v7744_v63 = vadd.f32 %v14186_v29, %v7701_v47  ;;  %v7659_v42 = vmul.f32 %v9762_v25, %v14015_v33  ;;  %v7660_v19 = vmul.f32 %v9762_v25, %v14018_v6 }
0x129b   : > { %v7661_v12 = vmul.f32 %v9764_v14, %v14001_v0  ;;  %v7662_v26 = vmul.f32 %v9764_v14, %v14004_v2  ;;  %v7634_v28 = vadd.f32 1e-05, %v7618_v24  ;;  %v7592_v32 = vpop.xlane.xlu1 %7591  ;;  %v7596_v46 = vpop.xlane.xlu0 %7595  ;;  %v7635_v34 = vadd.f32 1e-05, %v7619_v61 }
0x129c   : > { %7775 = vst [vmem:[%s14856_s20] sm:$0xff] %v7743_v7  ;;  %7776 = vst.msk [vmem:[%s14856_s20 + $0x8] sm:$0xff] %vm672_vm1, %v7744_v63  ;;  %v7702_v33 = vmul.f32 %v14177_v55, %v7659_v42  ;;  %v7703_v6 = vmul.f32 %v14180_v11, %v7660_v19  ;;  %v7620_v0 = vmul.f32 0.0052083335, %v7592_v32  ;;  %v7621_v37 = vmul.f32 0.0052083335, %v7596_v46 }
0x129d   : > { %v9766_v62 = vpop.eup %9765  ;;  %v7704_v2 = vmul.f32 %v14177_v55, %v7661_v12  ;;  %v7705_v60 = vmul.f32 %v14180_v11, %v7662_v26  ;;  %9777 = vrsqrt.f32 %v7634_v28 }
0x129e   : > { %v9768_v1 = vpop.eup %9767  ;;  %v7745_v38 = vadd.f32 %v14183_v15, %v7702_v33  ;;  %v7746_v22 = vadd.f32 %v14186_v29, %v7703_v6  ;;  %v7663_v56 = vmul.f32 %v9766_v62, %v14021_v16  ;;  %v7664_v27 = vmul.f32 %v9766_v62, %v14024_v52 }
0x129f   : > { %v7747_v5 = vadd.f32 %v14183_v15, %v7704_v2  ;;  %v7748_v41 = vadd.f32 %v14186_v29, %v7705_v60  ;;  %v7665_v31 = vmul.f32 %v9768_v1, %v14037_v23  ;;  %v7666_v18 = vmul.f32 %v9768_v1, %v14040_v43  ;;  %v7600_v9 = vpop.xlane.xlu1 %7599  ;;  %v7604_v42 = vpop.xlane.xlu0 %7603 }
0x12a0   : > { %7777 = vst [vmem:[%s14856_s20 + $0x10] sm:$0xff] %v7745_v38  ;;  %7778 = vst.msk [vmem:[%s14856_s20 + $0x18] sm:$0xff] %vm672_vm1, %v7746_v22  ;;  %v7706_v16 = vmul.f32 %v14177_v55, %v7663_v56  ;;  %v7707_v52 = vmul.f32 %v14180_v11, %v7664_v27  ;;  %9779 = vrsqrt.f32 %v7635_v34  ;;  %v7636_v59 = vadd.f32 1e-05, %v7620_v0 }
0x12a1   : > { %v9770_v49 = vpop.eup %9769  ;;  %7779 = vst [vmem:[%s14856_s20 + $0x20] sm:$0xff] %v7747_v5  ;;  %7780 = vst.msk [vmem:[%s14856_s20 + $0x28] sm:$0xff] %vm672_vm1, %v7748_v41  ;;  %v7708_v23 = vmul.f32 %v14177_v55, %v7665_v31  ;;  %v7709_v43 = vmul.f32 %v14180_v11, %v7666_v18  ;;  %v7637_v47 = vadd.f32 1e-05, %v7621_v37  ;;  %v7622_v24 = vmul.f32 0.0052083335, %v7600_v9 }
0x12a2   : > { %v9772_v25 = vpop.eup %9771  ;;  %v7749_v61 = vadd.f32 %v14183_v15, %v7706_v16  ;;  %v7750_v14 = vadd.f32 %v14186_v29, %v7707_v52  ;;  %v7667_v7 = vmul.f32 %v9770_v49, %v14043_v39  ;;  %v7668_v63 = vmul.f32 %v9770_v49, %v14046_v8 }
0x12a3   : > { %v7751_v19 = vadd.f32 %v14183_v15, %v7708_v23  ;;  %v7752_v12 = vadd.f32 %v14186_v29, %v7709_v43  ;;  %v7669_v26 = vmul.f32 %v9772_v25, %v14059_v45  ;;  %v7670_v28 = vmul.f32 %v9772_v25, %v14062_v13  ;;  %v7608_v60 = vpop.xlane.xlu1 %7607 }
0x12a4   : > { %7781 = vst [vmem:[%s14856_s20 + $0x30] sm:$0xff] %v7749_v61  ;;  %7782 = vst.msk [vmem:[%s14856_s20 + $0x38] sm:$0xff] %vm672_vm1, %v7750_v14  ;;  %v7710_v39 = vmul.f32 %v14177_v55, %v7667_v7  ;;  %v7711_v8 = vmul.f32 %v14180_v11, %v7668_v63  ;;  %9781 = vrsqrt.f32 %v7636_v59  ;;  %v7638_v32 = vadd.f32 1e-05, %v7622_v24 }
0x12a5   : > { %v9774_v46 = vpop.eup %9773  ;;  %7783 = vst [vmem:[%s14856_s20 + $0x40] sm:$0xff] %v7751_v19  ;;  %7784 = vst.msk [vmem:[%s14856_s20 + $0x48] sm:$0xff] %vm672_vm1, %v7752_v12  ;;  %v7712_v45 = vmul.f32 %v14177_v55, %v7669_v26  ;;  %v7713_v13 = vmul.f32 %v14180_v11, %v7670_v28  ;;  %9783 = vrsqrt.f32 %v7637_v47  ;;  %v7623_v33 = vmul.f32 0.0052083335, %v7604_v42 }
0x12a6   : > { %v9776_v6 = vpop.eup %9775  ;;  %v7753_v34 = vadd.f32 %v14183_v15, %v7710_v39  ;;  %v7754_v0 = vadd.f32 %v14186_v29, %v7711_v8  ;;  %v7671_v62 = vmul.f32 %v9774_v46, %v14065_v44  ;;  %v7672_v2 = vmul.f32 %v9774_v46, %v14068_v3 }
0x12a7   : > { %v7755_v37 = vadd.f32 %v14183_v15, %v7712_v45  ;;  %v7756_v1 = vadd.f32 %v14186_v29, %v7713_v13  ;;  %v7673_v38 = vmul.f32 %v9776_v6, %v14081_v51  ;;  %v7674_v22 = vmul.f32 %v9776_v6, %v14084_v36 }
0x12a8   : > { %7785 = vst [vmem:[%s14856_s20 + $0x50] sm:$0xff] %v7753_v34  ;;  %7786 = vst.msk [vmem:[%s14856_s20 + $0x58] sm:$0xff] %vm672_vm1, %v7754_v0  ;;  %v7714_v44 = vmul.f32 %v14177_v55, %v7671_v62  ;;  %v7715_v3 = vmul.f32 %v14180_v11, %v7672_v2  ;;  %9785 = vrsqrt.f32 %v7638_v32  ;;  %v7639_v56 = vadd.f32 1e-05, %v7623_v33 }
0x12a9   : > { %7787 = vst [vmem:[%s14856_s20 + $0x60] sm:$0xff] %v7755_v37  ;;  %7788 = vst.msk [vmem:[%s14856_s20 + $0x68] sm:$0xff] %vm672_vm1, %v7756_v1  ;;  %v7716_v51 = vmul.f32 %v14177_v55, %v7673_v38  ;;  %v7717_v36 = vmul.f32 %v14180_v11, %v7674_v22  ;;  %v7624_v27 = vmul.f32 0.0052083335, %v7608_v60 }
0x12aa   : > { %v9778_v5 = vpop.eup %9777  ;;  %v7757_v41 = vadd.f32 %v14183_v15, %v7714_v44  ;;  %v7758_v31 = vadd.f32 %v14186_v29, %v7715_v3  ;;  %9787 = vrsqrt.f32 %v7639_v56 }
0x12ab   : > { %v7759_v18 = vadd.f32 %v14183_v15, %v7716_v51  ;;  %v7760_v9 = vadd.f32 %v14186_v29, %v7717_v36  ;;  %v7675_v16 = vmul.f32 %v9778_v5, %v14087_v4  ;;  %v7676_v52 = vmul.f32 %v9778_v5, %v14090_v20 }
0x12ac   : > { %7789 = vst [vmem:[%s14856_s20 + $0x70] sm:$0xff] %v7757_v41  ;;  %7790 = vst.msk [vmem:[%s14856_s20 + $0x78] sm:$0xff] %vm672_vm1, %v7758_v31  ;;  %v7640_v59 = vadd.f32 1e-05, %v7624_v27 }
0x12ad   : > { %v9780_v49 = vpop.eup %9779  ;;  %7791 = vst [vmem:[%s14856_s20 + $0x80] sm:$0xff] %v7759_v18  ;;  %7792 = vst.msk [vmem:[%s14856_s20 + $0x88] sm:$0xff] %vm672_vm1, %v7760_v9  ;;  %v7718_v4 = vmul.f32 %v14177_v55, %v7675_v16  ;;  %v7719_v20 = vmul.f32 %v14180_v11, %v7676_v52 }
0x12ae   : > { %v7677_v23 = vmul.f32 %v9780_v49, %v14103_v21  ;;  %v7678_v43 = vmul.f32 %v9780_v49, %v14106_v40  ;;  %9789 = vrsqrt.f32 %v7640_v59 }
0x12af   : > { %v7761_v47 = vadd.f32 %v14183_v15, %v7718_v4  ;;  %v7762_v24 = vadd.f32 %v14186_v29, %v7719_v20 }
0x12b0   : > { %v7720_v25 = vmul.f32 %v14177_v55, %v7677_v23  ;;  %v7721_v61 = vmul.f32 %v14180_v11, %v7678_v43 }
0x12b1   : > { %v9782_v14 = vpop.eup %9781  ;;  %7793 = vst [vmem:[%s14856_s20 + $0x90] sm:$0xff] %v7761_v47  ;;  %7794 = vst.msk [vmem:[%s14856_s20 + $0x98] sm:$0xff] %vm672_vm1, %v7762_v24 }
0x12b2   : > { %v9784_v21 = vpop.eup %9783  ;;  %v7763_v40 = vadd.f32 %v14183_v15, %v7720_v25  ;;  %v7764_v7 = vadd.f32 %v14186_v29, %v7721_v61  ;;  %v7679_v63 = vmul.f32 %v9782_v14, %v14109_v57  ;;  %v7680_v42 = vmul.f32 %v9782_v14, %v14112_v17 }
0x12b3   : > { %v7681_v19 = vmul.f32 %v9784_v21, %v14125_v54  ;;  %v7682_v12 = vmul.f32 %v9784_v21, %v14128_v58 }
0x12b4   : > { %7795 = vst [vmem:[%s14856_s20 + $0xa0] sm:$0xff] %v7763_v40  ;;  %7796 = vst.msk [vmem:[%s14856_s20 + $0xa8] sm:$0xff] %vm672_vm1, %v7764_v7  ;;  %v7722_v26 = vmul.f32 %v14177_v55, %v7679_v63  ;;  %v7723_v28 = vmul.f32 %v14180_v11, %v7680_v42 }
0x12b5   : > { %v9786_v57 = vpop.eup %9785  ;;  %v7724_v17 = vmul.f32 %v14177_v55, %v7681_v19  ;;  %v7725_v54 = vmul.f32 %v14180_v11, %v7682_v12 }
0x12b6   : > { %v7765_v58 = vadd.f32 %v14183_v15, %v7722_v26  ;;  %v7766_v39 = vadd.f32 %v14186_v29, %v7723_v28  ;;  %v7683_v8 = vmul.f32 %v9786_v57, %v14131_v35  ;;  %v7684_v32 = vmul.f32 %v9786_v57, %v14134_v48 }
0x12b7   : > { %v9788_v46 = vpop.eup %9787  ;;  %v7767_v45 = vadd.f32 %v14183_v15, %v7724_v17  ;;  %v7768_v13 = vadd.f32 %v14186_v29, %v7725_v54 }
0x12b8   : > { %7797 = vst [vmem:[%s14856_s20 + $0xb0] sm:$0xff] %v7765_v58  ;;  %7798 = vst.msk [vmem:[%s14856_s20 + $0xb8] sm:$0xff] %vm672_vm1, %v7766_v39  ;;  %v7726_v33 = vmul.f32 %v14177_v55, %v7683_v8  ;;  %v7727_v35 = vmul.f32 %v14180_v11, %v7684_v32  ;;  %v7685_v48 = vmul.f32 %v9788_v46, %v14147_v10 }
0x12b9   : > { %v7686_v6 = vmul.f32 %v9788_v46, %v14150_v53  ;;  %7799 = vst [vmem:[%s14856_s20 + $0xc0] sm:$0xff] %v7767_v45  ;;  %7800 = vst.msk [vmem:[%s14856_s20 + $0xc8] sm:$0xff] %vm672_vm1, %v7768_v13 }
0x12ba   : > { %v7769_v34 = vadd.f32 %v14183_v15, %v7726_v33  ;;  %v7770_v0 = vadd.f32 %v14186_v29, %v7727_v35  ;;  %v7728_v62 = vmul.f32 %v14177_v55, %v7685_v48 }
0x12bb   : > { %v7729_v2 = vmul.f32 %v14180_v11, %v7686_v6  ;;  %v9790_v10 = vpop.eup %9789 }
0x12bc   : > { %7801 = vst [vmem:[%s14856_s20 + $0xd0] sm:$0xff] %v7769_v34  ;;  %7802 = vst.msk [vmem:[%s14856_s20 + $0xd8] sm:$0xff] %vm672_vm1, %v7770_v0  ;;  %v7771_v53 = vadd.f32 %v14183_v15, %v7728_v62  ;;  %v7687_v37 = vmul.f32 %v9790_v10, %v14153_v50  ;;  %v7688_v1 = vmul.f32 %v9790_v10, %v14156_v30 }
0x12bd   : > { %v7772_v60 = vadd.f32 %v14186_v29, %v7729_v2 }
0x12be   : > { %7803 = vst [vmem:[%s14856_s20 + $0xe0] sm:$0xff] %v7771_v53  ;;  %v7730_v38 = vmul.f32 %v14177_v55, %v7687_v37  ;;  %v7731_v22 = vmul.f32 %v14180_v11, %v7688_v1 }
0x12bf   : > { %7804 = vst.msk [vmem:[%s14856_s20 + $0xe8] sm:$0xff] %vm672_vm1, %v7772_v60 }
0x12c0   : > { %v7773_v44 = vadd.f32 %v14183_v15, %v7730_v38  ;;  %v7774_v3 = vadd.f32 %v14186_v29, %v7731_v22 }
0x12c2   : > { %7805 = vst [vmem:[%s14856_s20 + $0xf0] sm:$0xff] %v7773_v44  ;;  %7806 = vst.msk [vmem:[%s14856_s20 + $0xf8] sm:$0xff] %vm672_vm1, %v7774_v3 }
0x12c3 PF: > { %s14857_s11 = sld [smem:[#allocation3_spill]] }
0x12c9   : > { %s23_s25 = sadd.s32 1, %s14857_s11  }
0x12ca   : > { %p20_p6 = scmp.ge.s32.totalorder %s23_s25, 8  }
0x12cc   :  { %22 = sbr.rel (!%p20_p6) target bundleno = 5 (0x5), region = 130 }

</bundles_post_ra>
